<compile_context>
chip_gen: v7x
topology: tpu7x:2x2x1
jax: 0.10.0
libtpu: 0.0.40
codegen_flags: <defaults>
</compile_context>

<pallas_src>
import math

import jax
import jax.numpy as jnp
from jax import lax
from jax.experimental import pallas as pl
from jax.experimental.pallas import tpu as pltpu

VMEM = pltpu.MemorySpace.VMEM


# ---------------------------------------------------------------------------
# Fused DegradationModel forward kernel
# ---------------------------------------------------------------------------
def _make_fused_kernel(T, B, C, H, num_layers):
    f32 = jnp.float32
    eps = 1e-5
    n_lstm = 6 * num_layers

    def kernel(*refs):
        xpad_ref = refs[0]                    # (B, T+2, C) zero-padded along T
        wconv_ref = refs[1]                   # (3, Cin, Cout): tap k -> (Cin, Cout)
        bconv_ref = refs[2]                   # (1, C)
        lstm_refs = refs[3:3 + n_lstm]        # per layer: Wx_f, Wh_f, b_f, Wx_b, Wh_b, b_b
        w1_ref, b1_ref, w2_ref, b2_ref, w3_ref, b3_ref = refs[3 + n_lstm:9 + n_lstm]
        o_ref = refs[9 + n_lstm]              # (B, 1)
        xpf_ref, xpb_ref, seq_f_ref, seq_b_ref = refs[10 + n_lstm:]

        # ---- Stage 1: ResConv1dBlock + hoisted layer-0 input projection ----
        wc0 = wconv_ref[0]                    # (C, C) tap for x[t-1]
        wc1 = wconv_ref[1]                    # (C, C) tap for x[t]
        wc2 = wconv_ref[2]                    # (C, C) tap for x[t+1]
        bconv = bconv_ref[...]
        wx0f = lstm_refs[0][...]              # (C, 4H)
        b0f = lstm_refs[2][...]               # (1, 4H)
        wx0b = lstm_refs[3][...]
        b0b = lstm_refs[5][...]
        for b in range(B):
            xprev = xpad_ref[b, 0:T, :]       # x[t-1]   (T, C)
            xcur = xpad_ref[b, 1:T + 1, :]    # x[t]
            xnext = xpad_ref[b, 2:T + 2, :]   # x[t+1]
            # Conv1d(C, C, k=3, pad=1) as three small matmuls
            y = (jnp.dot(xprev, wc0, preferred_element_type=f32)
                 + jnp.dot(xcur, wc1, preferred_element_type=f32)
                 + jnp.dot(xnext, wc2, preferred_element_type=f32)
                 + bconv)                     # (T, C)
            # InstanceNorm1d (affine=False): normalize over T per (batch, channel)
            mean = jnp.mean(y, axis=0, keepdims=True)
            cent = y - mean
            var = jnp.mean(cent * cent, axis=0, keepdims=True)
            h0b = jnp.maximum(cent * lax.rsqrt(var + eps) + xcur, 0.0)   # (T, C)
            # Hoisted layer-0 input projection: all T timesteps in one
            # lane-dense (T, C) @ (C, 4H=128) matmul per direction.
            xpf_ref[:, b, :] = jnp.dot(h0b, wx0f, preferred_element_type=f32) + b0f
            xpb_ref[:, b, :] = jnp.dot(h0b, wx0b, preferred_element_type=f32) + b0b

        # ---- Stage 2: stacked bidirectional LSTM ----------------------------
        def cell(p, c):
            # fused preactivation columns ordered (i, f, o, g):
            # one contiguous sigmoid on [0:3H], tanh on [3H:4H]
            sig = jax.nn.sigmoid(p[:, 0:3 * H])
            i_g = sig[:, 0:H]
            f_g = sig[:, H:2 * H]
            o_g = sig[:, 2 * H:3 * H]
            g_g = jnp.tanh(p[:, 3 * H:4 * H])
            c_new = f_g * c + i_g * g_g
            return o_g * jnp.tanh(c_new), c_new

        for l in range(num_layers):
            base = 6 * l
            whf = lstm_refs[base + 1][...]    # (H, 4H), loaded once (hoisted)
            whb = lstm_refs[base + 4][...]

            if l > 0:
                # Hoisted input projection for layer l from the previous
                # layer's fwd/bwd trajectories; concat(fwd, bwd) @ Wx is folded
                # into two matmuls on the row-split weight (no concat needed).
                wxf = lstm_refs[base + 0][...]    # (2H, 4H)
                bf = lstm_refs[base + 2][...]
                wxb = lstm_refs[base + 3][...]
                bb = lstm_refs[base + 5][...]
                for b in range(B):
                    sfb = seq_f_ref[:, b, :]      # (T, H)
                    sbb = seq_b_ref[:, b, :]      # (T, H)
                    xpf_ref[:, b, :] = (
                        jnp.dot(sfb, wxf[0:H, :], preferred_element_type=f32)
                        + jnp.dot(sbb, wxf[H:2 * H, :], preferred_element_type=f32)
                        + bf)
                    xpb_ref[:, b, :] = (
                        jnp.dot(sfb, wxb[0:H, :], preferred_element_type=f32)
                        + jnp.dot(sbb, wxb[H:2 * H, :], preferred_element_type=f32)
                        + bb)

            # NOTE: on v7x the two directions could additionally be split across
            # the two TensorCores; here they are interleaved on one core so the
            # two independent h @ Wh chains hide each other's MXU latency.
            def step(s, carry, whf=whf, whb=whb):
                hf, cf, hb, cb = carry
                tb = T - 1 - s
                pf = xpf_ref[s] + jnp.dot(hf, whf, preferred_element_type=f32)
                pb = xpb_ref[tb] + jnp.dot(hb, whb, preferred_element_type=f32)
                hf, cf = cell(pf, cf)
                hb, cb = cell(pb, cb)
                seq_f_ref[s] = hf
                seq_b_ref[tb] = hb
                return (hf, cf, hb, cb)

            z0 = jnp.zeros((B, H), f32)
            lax.fori_loop(0, T, step, (z0, z0, z0, z0), unroll=True)

        # ---- Stage 3: trailing ReLU + Regressor on the last timestep --------
        # (only the last timestep feeds the regressor, so applying the BiLSTM's
        #  ReLU to that slice is exactly equivalent to relu-ing the full output)
        zf = jnp.maximum(seq_f_ref[T - 1], 0.0)   # (B, H)  forward half
        zb = jnp.maximum(seq_b_ref[T - 1], 0.0)   # (B, H)  backward half
        w1 = w1_ref[...]                          # (2H, 64)
        h1 = jnp.maximum(
            jnp.dot(zf, w1[0:H, :], preferred_element_type=f32)
            + jnp.dot(zb, w1[H:2 * H, :], preferred_element_type=f32)
            + b1_ref[...], 0.0)
        h2 = jnp.maximum(
            jnp.dot(h1, w2_ref[...], preferred_element_type=f32) + b2_ref[...],
            0.0)
        o_ref[...] = (jnp.dot(h2, w3_ref[...], preferred_element_type=f32)
                      + b3_ref[...])

    return kernel


def degradation_forward(x_btc, params, hidden, num_layers):
    """x_btc: (B, T, C) float32 -> (B, 1) float32 (PyTorch DegradationModel)."""
    B, T, C = x_btc.shape
    H = hidden
    xpad = jnp.pad(x_btc, ((0, 0), (1, 1), (0, 0)))     # zero pad along T (k=3, p=1)
    inputs = [xpad, params['conv_w3'], params['conv_b']]
    for l in range(num_layers):
        for d in ('fwd', 'bwd'):
            inputs.extend(params['lstm'][l][d])
    inputs.extend([params['fc1_w'], params['fc1_b'],
                   params['fc2_w'], params['fc2_b'],
                   params['fc3_w'], params['fc3_b']])
    kernel = _make_fused_kernel(T, B, C, H, num_layers)
    return pl.pallas_call(
        kernel,
        out_shape=jax.ShapeDtypeStruct((B, 1), jnp.float32),
        in_specs=[pl.BlockSpec(memory_space=VMEM)] * len(inputs),
        out_specs=pl.BlockSpec(memory_space=VMEM),
        scratch_shapes=[
            pltpu.VMEM((T, B, 4 * H), jnp.float32),   # fwd hoisted preactivations
            pltpu.VMEM((T, B, 4 * H), jnp.float32),   # bwd hoisted preactivations
            pltpu.VMEM((T, B, H), jnp.float32),       # fwd hidden trajectory
            pltpu.VMEM((T, B, H), jnp.float32),       # bwd hidden trajectory
        ],
    )(*inputs)


# ---------------------------------------------------------------------------
# Parameter init (PyTorch-shaped) + one-time fusion into kernel layout
# ---------------------------------------------------------------------------
def init_params(key, c_in, hidden, num_layers):
    """PyTorch-shaped parameters with PyTorch-like uniform(-1/sqrt(fan)) init."""
    def u(k, shape, fan):
        s = 1.0 / math.sqrt(fan)
        return jax.random.uniform(k, shape, jnp.float32, -s, s)

    keys = iter(jax.random.split(key, 16 + 8 * num_layers))
    raw = {}
    raw['conv_w'] = u(next(keys), (c_in, c_in, 3), c_in * 3)        # (Cout, Cin, K)
    raw['conv_b'] = u(next(keys), (c_in,), c_in * 3)
    lstm = []
    for l in range(num_layers):
        in_sz = c_in if l == 0 else 2 * hidden
        layer = {}
        for d in ('fwd', 'bwd'):
            layer[d] = (u(next(keys), (4 * hidden, in_sz), hidden),   # w_ih
                        u(next(keys), (4 * hidden, hidden), hidden),  # w_hh
                        u(next(keys), (4 * hidden,), hidden),         # b_ih
                        u(next(keys), (4 * hidden,), hidden))         # b_hh
        lstm.append(layer)
    raw['lstm'] = lstm
    raw['fc1_w'] = u(next(keys), (64, 2 * hidden), 2 * hidden)
    raw['fc1_b'] = u(next(keys), (64,), 2 * hidden)
    raw['fc2_w'] = u(next(keys), (16, 64), 64)
    raw['fc2_b'] = u(next(keys), (16,), 64)
    raw['fc3_w'] = u(next(keys), (1, 16), 16)
    raw['fc3_b'] = u(next(keys), (1,), 16)
    return raw


def prepare_params(raw, hidden, num_layers):
    """One-time fusion/transpose of PyTorch-shaped weights into kernel layout."""
    H = hidden

    def reorder_gates(m):
        # PyTorch gate order (i, f, g, o) -> kernel order (i, f, o, g): sigmoid
        # then applies to one contiguous [0:3H] slice and tanh to [3H:4H].
        return jnp.concatenate(
            [m[0:H], m[H:2 * H], m[3 * H:4 * H], m[2 * H:3 * H]], axis=0)

    p = {}
    # Conv1d weight (Cout, Cin, K) -> (K, Cin, Cout): tap k is a (Cin, Cout) matmul
    p['conv_w3'] = jnp.transpose(raw['conv_w'], (2, 1, 0))
    p['conv_b'] = raw['conv_b'].reshape(1, -1)
    lstm = []
    for l in range(num_layers):
        layer = {}
        for d in ('fwd', 'bwd'):
            w_ih, w_hh, b_ih, b_hh = raw['lstm'][l][d]
            layer[d] = (reorder_gates(w_ih).T,                        # (In, 4H)
                        reorder_gates(w_hh).T,                        # (H, 4H)
                        reorder_gates(b_ih + b_hh).reshape(1, 4 * H)) # (1, 4H)
        lstm.append(layer)
    p['lstm'] = lstm
    p['fc1_w'] = raw['fc1_w'].T
    p['fc1_b'] = raw['fc1_b'].reshape(1, -1)
    p['fc2_w'] = raw['fc2_w'].T
    p['fc2_b'] = raw['fc2_b'].reshape(1, -1)
    p['fc3_w'] = raw['fc3_w'].T
    p['fc3_b'] = raw['fc3_b'].reshape(1, -1)
    return p


if __name__ == "__main__":
    B, T, C_IN = 2, 16, 2          # small shapes consistent with the module
    HIDDEN, NUM_LAYERS = 32, 2

    key = jax.random.PRNGKey(0)
    k_params, k_x = jax.random.split(key)
    raw = init_params(k_params, C_IN, HIDDEN, NUM_LAYERS)
    params = prepare_params(raw, HIDDEN, NUM_LAYERS)
    x = jax.random.normal(k_x, (B, T, C_IN), jnp.float32)

    out = degradation_forward(x, params, HIDDEN, NUM_LAYERS)
    out = jax.block_until_ready(out)
    assert out.shape == (B, 1) and out.dtype == jnp.float32
    assert bool(jnp.all(jnp.isfinite(out)))
    print("KERNEL_OK")
</pallas_src>

<mosaic_0001>
module attributes {stable_mosaic.version = 11 : i64} {
  func.func @kernel(%arg0: memref<2x18x2xf32, #tpu.memory_space<vmem>>, %arg1: memref<3x2x2xf32, #tpu.memory_space<vmem>>, %arg2: memref<1x2xf32, #tpu.memory_space<vmem>>, %arg3: memref<2x128xf32, #tpu.memory_space<vmem>>, %arg4: memref<32x128xf32, #tpu.memory_space<vmem>>, %arg5: memref<1x128xf32, #tpu.memory_space<vmem>>, %arg6: memref<2x128xf32, #tpu.memory_space<vmem>>, %arg7: memref<32x128xf32, #tpu.memory_space<vmem>>, %arg8: memref<1x128xf32, #tpu.memory_space<vmem>>, %arg9: memref<64x128xf32, #tpu.memory_space<vmem>>, %arg10: memref<32x128xf32, #tpu.memory_space<vmem>>, %arg11: memref<1x128xf32, #tpu.memory_space<vmem>>, %arg12: memref<64x128xf32, #tpu.memory_space<vmem>>, %arg13: memref<32x128xf32, #tpu.memory_space<vmem>>, %arg14: memref<1x128xf32, #tpu.memory_space<vmem>>, %arg15: memref<64x64xf32, #tpu.memory_space<vmem>>, %arg16: memref<1x64xf32, #tpu.memory_space<vmem>>, %arg17: memref<64x16xf32, #tpu.memory_space<vmem>>, %arg18: memref<1x16xf32, #tpu.memory_space<vmem>>, %arg19: memref<16x1xf32, #tpu.memory_space<vmem>>, %arg20: memref<1x1xf32, #tpu.memory_space<vmem>>, %arg21: memref<2x1xf32, #tpu.memory_space<vmem>>, %arg22: memref<16x2x128xf32, #tpu.memory_space<vmem>>, %arg23: memref<16x2x128xf32, #tpu.memory_space<vmem>>, %arg24: memref<16x2x32xf32, #tpu.memory_space<vmem>>, %arg25: memref<16x2x32xf32, #tpu.memory_space<vmem>>) attributes {dimension_semantics = [], scalar_prefetch = 0 : i64, scratch_operands = 4 : i64, tpu.core_type = #tpu.core_type<tc>} {
    %c0 = arith.constant 0 : index
    %c0_0 = arith.constant 0 : index
    %c0_1 = arith.constant 0 : index
    %0 = vector.load %arg1[%c0, %c0_0, %c0_1] : memref<3x2x2xf32, #tpu.memory_space<vmem>>, vector<1x2x2xf32>
    %1 = vector.shape_cast %0 : vector<1x2x2xf32> to vector<2x2xf32>
    %c1 = arith.constant 1 : index
    %c0_2 = arith.constant 0 : index
    %c0_3 = arith.constant 0 : index
    %2 = vector.load %arg1[%c1, %c0_2, %c0_3] : memref<3x2x2xf32, #tpu.memory_space<vmem>>, vector<1x2x2xf32>
    %3 = vector.shape_cast %2 : vector<1x2x2xf32> to vector<2x2xf32>
    %c2 = arith.constant 2 : index
    %c0_4 = arith.constant 0 : index
    %c0_5 = arith.constant 0 : index
    %4 = vector.load %arg1[%c2, %c0_4, %c0_5] : memref<3x2x2xf32, #tpu.memory_space<vmem>>, vector<1x2x2xf32>
    %5 = vector.shape_cast %4 : vector<1x2x2xf32> to vector<2x2xf32>
    %c0_6 = arith.constant 0 : index
    %c0_7 = arith.constant 0 : index
    %6 = vector.load %arg2[%c0_6, %c0_7] : memref<1x2xf32, #tpu.memory_space<vmem>>, vector<1x2xf32>
    %c0_8 = arith.constant 0 : index
    %c0_9 = arith.constant 0 : index
    %7 = vector.load %arg3[%c0_8, %c0_9] : memref<2x128xf32, #tpu.memory_space<vmem>>, vector<2x128xf32>
    %c0_10 = arith.constant 0 : index
    %c0_11 = arith.constant 0 : index
    %8 = vector.load %arg5[%c0_10, %c0_11] : memref<1x128xf32, #tpu.memory_space<vmem>>, vector<1x128xf32>
    %c0_12 = arith.constant 0 : index
    %c0_13 = arith.constant 0 : index
    %9 = vector.load %arg6[%c0_12, %c0_13] : memref<2x128xf32, #tpu.memory_space<vmem>>, vector<2x128xf32>
    %c0_14 = arith.constant 0 : index
    %c0_15 = arith.constant 0 : index
    %10 = vector.load %arg8[%c0_14, %c0_15] : memref<1x128xf32, #tpu.memory_space<vmem>>, vector<1x128xf32>
    %c0_16 = arith.constant 0 : index
    %c0_17 = arith.constant 0 : index
    %c0_18 = arith.constant 0 : index
    %11 = vector.load %arg0[%c0_16, %c0_17, %c0_18] : memref<2x18x2xf32, #tpu.memory_space<vmem>>, vector<1x16x2xf32>
    %12 = vector.shape_cast %11 : vector<1x16x2xf32> to vector<16x2xf32>
    %c0_19 = arith.constant 0 : index
    %c1_20 = arith.constant 1 : index
    %c0_21 = arith.constant 0 : index
    %13 = vector.load %arg0[%c0_19, %c1_20, %c0_21] : memref<2x18x2xf32, #tpu.memory_space<vmem>>, vector<1x16x2xf32>
    %14 = vector.shape_cast %13 : vector<1x16x2xf32> to vector<16x2xf32>
    %c0_22 = arith.constant 0 : index
    %c2_23 = arith.constant 2 : index
    %c0_24 = arith.constant 0 : index
    %15 = vector.load %arg0[%c0_22, %c2_23, %c0_24] : memref<2x18x2xf32, #tpu.memory_space<vmem>>, vector<1x16x2xf32>
    %16 = vector.shape_cast %15 : vector<1x16x2xf32> to vector<16x2xf32>
    %cst = arith.constant dense<0.000000e+00> : vector<16x2xf32>
    %17 = tpu.matmul %12, %1, %cst {dimension_numbers = #tpu.dot_dimension_numbers<[1], [0], [0], [1], [0, 0, 1, 1], [], []>} : vector<16x2xf32>, vector<2x2xf32>, vector<16x2xf32> -> vector<16x2xf32>
    %cst_25 = arith.constant dense<0.000000e+00> : vector<16x2xf32>
    %18 = tpu.matmul %14, %3, %cst_25 {dimension_numbers = #tpu.dot_dimension_numbers<[1], [0], [0], [1], [0, 0, 1, 1], [], []>} : vector<16x2xf32>, vector<2x2xf32>, vector<16x2xf32> -> vector<16x2xf32>
    %19 = arith.addf %17, %18 : vector<16x2xf32>
    %cst_26 = arith.constant dense<0.000000e+00> : vector<16x2xf32>
    %20 = tpu.matmul %16, %5, %cst_26 {dimension_numbers = #tpu.dot_dimension_numbers<[1], [0], [0], [1], [0, 0, 1, 1], [], []>} : vector<16x2xf32>, vector<2x2xf32>, vector<16x2xf32> -> vector<16x2xf32>
    %21 = arith.addf %19, %20 : vector<16x2xf32>
    %22 = vector.broadcast %6 : vector<1x2xf32> to vector<16x2xf32>
    %23 = arith.addf %21, %22 : vector<16x2xf32>
    %cst_27 = arith.constant dense<0.000000e+00> : vector<2xf32>
    %24 = vector.multi_reduction <add>, %23, %cst_27 [0] : vector<16x2xf32> to vector<2xf32>
    %25 = vector.shape_cast %24 : vector<2xf32> to vector<1x2xf32>
    %cst_28 = arith.constant 1.600000e+01 : f32
    %26 = vector.broadcast %cst_28 : f32 to vector<1x2xf32>
    %27 = arith.divf %25, %26 : vector<1x2xf32>
    %28 = vector.broadcast %27 : vector<1x2xf32> to vector<16x2xf32>
    %29 = arith.subf %23, %28 : vector<16x2xf32>
    %30 = arith.mulf %29, %29 : vector<16x2xf32>
    %cst_29 = arith.constant dense<0.000000e+00> : vector<2xf32>
    %31 = vector.multi_reduction <add>, %30, %cst_29 [0] : vector<16x2xf32> to vector<2xf32>
    %32 = vector.shape_cast %31 : vector<2xf32> to vector<1x2xf32>
    %cst_30 = arith.constant 1.600000e+01 : f32
    %33 = vector.broadcast %cst_30 : f32 to vector<1x2xf32>
    %34 = arith.divf %32, %33 : vector<1x2xf32>
    %cst_31 = arith.constant 9.99999974E-6 : f32
    %35 = vector.broadcast %cst_31 : f32 to vector<1x2xf32>
    %36 = arith.addf %34, %35 : vector<1x2xf32>
    %37 = math.rsqrt %36 : vector<1x2xf32>
    %38 = vector.broadcast %37 : vector<1x2xf32> to vector<16x2xf32>
    %39 = arith.mulf %29, %38 : vector<16x2xf32>
    %40 = arith.addf %39, %14 : vector<16x2xf32>
    %cst_32 = arith.constant 0.000000e+00 : f32
    %41 = vector.broadcast %cst_32 : f32 to vector<16x2xf32>
    %42 = arith.maximumf %40, %41 : vector<16x2xf32>
    %cst_33 = arith.constant dense<0.000000e+00> : vector<16x128xf32>
    %43 = tpu.matmul %42, %7, %cst_33 {dimension_numbers = #tpu.dot_dimension_numbers<[1], [0], [0], [1], [0, 0, 1, 1], [], []>} : vector<16x2xf32>, vector<2x128xf32>, vector<16x128xf32> -> vector<16x128xf32>
    %44 = vector.broadcast %8 : vector<1x128xf32> to vector<16x128xf32>
    %45 = arith.addf %43, %44 : vector<16x128xf32>
    %c0_34 = arith.constant 0 : index
    %c0_35 = arith.constant 0 : index
    %c0_36 = arith.constant 0 : index
    %46 = vector.load %arg22[%c0_34, %c0_35, %c0_36] : memref<16x2x128xf32, #tpu.memory_space<vmem>>, vector<16x1x128xf32>
    %47 = vector.shape_cast %46 : vector<16x1x128xf32> to vector<16x128xf32>
    %48 = vector.shape_cast %45 : vector<16x128xf32> to vector<16x1x128xf32>
    tpu.vector_store %arg22[%c0_34, %c0_35, %c0_36], %48 {strides = array<i32>} : memref<16x2x128xf32, #tpu.memory_space<vmem>>, vector<16x1x128xf32>,
    %cst_37 = arith.constant dense<0.000000e+00> : vector<16x128xf32>
    %49 = tpu.matmul %42, %9, %cst_37 {dimension_numbers = #tpu.dot_dimension_numbers<[1], [0], [0], [1], [0, 0, 1, 1], [], []>} : vector<16x2xf32>, vector<2x128xf32>, vector<16x128xf32> -> vector<16x128xf32>
    %50 = vector.broadcast %10 : vector<1x128xf32> to vector<16x128xf32>
    %51 = arith.addf %49, %50 : vector<16x128xf32>
    %c0_38 = arith.constant 0 : index
    %c0_39 = arith.constant 0 : index
    %c0_40 = arith.constant 0 : index
    %52 = vector.load %arg23[%c0_38, %c0_39, %c0_40] : memref<16x2x128xf32, #tpu.memory_space<vmem>>, vector<16x1x128xf32>
    %53 = vector.shape_cast %52 : vector<16x1x128xf32> to vector<16x128xf32>
    %54 = vector.shape_cast %51 : vector<16x128xf32> to vector<16x1x128xf32>
    tpu.vector_store %arg23[%c0_38, %c0_39, %c0_40], %54 {strides = array<i32>} : memref<16x2x128xf32, #tpu.memory_space<vmem>>, vector<16x1x128xf32>,
    %c1_41 = arith.constant 1 : index
    %c0_42 = arith.constant 0 : index
    %c0_43 = arith.constant 0 : index
    %55 = vector.load %arg0[%c1_41, %c0_42, %c0_43] : memref<2x18x2xf32, #tpu.memory_space<vmem>>, vector<1x16x2xf32>
    %56 = vector.shape_cast %55 : vector<1x16x2xf32> to vector<16x2xf32>
    %c1_44 = arith.constant 1 : index
    %c1_45 = arith.constant 1 : index
    %c0_46 = arith.constant 0 : index
    %57 = vector.load %arg0[%c1_44, %c1_45, %c0_46] : memref<2x18x2xf32, #tpu.memory_space<vmem>>, vector<1x16x2xf32>
    %58 = vector.shape_cast %57 : vector<1x16x2xf32> to vector<16x2xf32>
    %c1_47 = arith.constant 1 : index
    %c2_48 = arith.constant 2 : index
    %c0_49 = arith.constant 0 : index
    %59 = vector.load %arg0[%c1_47, %c2_48, %c0_49] : memref<2x18x2xf32, #tpu.memory_space<vmem>>, vector<1x16x2xf32>
    %60 = vector.shape_cast %59 : vector<1x16x2xf32> to vector<16x2xf32>
    %cst_50 = arith.constant dense<0.000000e+00> : vector<16x2xf32>
    %61 = tpu.matmul %56, %1, %cst_50 {dimension_numbers = #tpu.dot_dimension_numbers<[1], [0], [0], [1], [0, 0, 1, 1], [], []>} : vector<16x2xf32>, vector<2x2xf32>, vector<16x2xf32> -> vector<16x2xf32>
    %cst_51 = arith.constant dense<0.000000e+00> : vector<16x2xf32>
    %62 = tpu.matmul %58, %3, %cst_51 {dimension_numbers = #tpu.dot_dimension_numbers<[1], [0], [0], [1], [0, 0, 1, 1], [], []>} : vector<16x2xf32>, vector<2x2xf32>, vector<16x2xf32> -> vector<16x2xf32>
    %63 = arith.addf %61, %62 : vector<16x2xf32>
    %cst_52 = arith.constant dense<0.000000e+00> : vector<16x2xf32>
    %64 = tpu.matmul %60, %5, %cst_52 {dimension_numbers = #tpu.dot_dimension_numbers<[1], [0], [0], [1], [0, 0, 1, 1], [], []>} : vector<16x2xf32>, vector<2x2xf32>, vector<16x2xf32> -> vector<16x2xf32>
    %65 = arith.addf %63, %64 : vector<16x2xf32>
    %66 = vector.broadcast %6 : vector<1x2xf32> to vector<16x2xf32>
    %67 = arith.addf %65, %66 : vector<16x2xf32>
    %cst_53 = arith.constant dense<0.000000e+00> : vector<2xf32>
    %68 = vector.multi_reduction <add>, %67, %cst_53 [0] : vector<16x2xf32> to vector<2xf32>
    %69 = vector.shape_cast %68 : vector<2xf32> to vector<1x2xf32>
    %cst_54 = arith.constant 1.600000e+01 : f32
    %70 = vector.broadcast %cst_54 : f32 to vector<1x2xf32>
    %71 = arith.divf %69, %70 : vector<1x2xf32>
    %72 = vector.broadcast %71 : vector<1x2xf32> to vector<16x2xf32>
    %73 = arith.subf %67, %72 : vector<16x2xf32>
    %74 = arith.mulf %73, %73 : vector<16x2xf32>
    %cst_55 = arith.constant dense<0.000000e+00> : vector<2xf32>
    %75 = vector.multi_reduction <add>, %74, %cst_55 [0] : vector<16x2xf32> to vector<2xf32>
    %76 = vector.shape_cast %75 : vector<2xf32> to vector<1x2xf32>
    %cst_56 = arith.constant 1.600000e+01 : f32
    %77 = vector.broadcast %cst_56 : f32 to vector<1x2xf32>
    %78 = arith.divf %76, %77 : vector<1x2xf32>
    %cst_57 = arith.constant 9.99999974E-6 : f32
    %79 = vector.broadcast %cst_57 : f32 to vector<1x2xf32>
    %80 = arith.addf %78, %79 : vector<1x2xf32>
    %81 = math.rsqrt %80 : vector<1x2xf32>
    %82 = vector.broadcast %81 : vector<1x2xf32> to vector<16x2xf32>
    %83 = arith.mulf %73, %82 : vector<16x2xf32>
    %84 = arith.addf %83, %58 : vector<16x2xf32>
    %cst_58 = arith.constant 0.000000e+00 : f32
    %85 = vector.broadcast %cst_58 : f32 to vector<16x2xf32>
    %86 = arith.maximumf %84, %85 : vector<16x2xf32>
    %cst_59 = arith.constant dense<0.000000e+00> : vector<16x128xf32>
    %87 = tpu.matmul %86, %7, %cst_59 {dimension_numbers = #tpu.dot_dimension_numbers<[1], [0], [0], [1], [0, 0, 1, 1], [], []>} : vector<16x2xf32>, vector<2x128xf32>, vector<16x128xf32> -> vector<16x128xf32>
    %88 = vector.broadcast %8 : vector<1x128xf32> to vector<16x128xf32>
    %89 = arith.addf %87, %88 : vector<16x128xf32>
    %c0_60 = arith.constant 0 : index
    %c1_61 = arith.constant 1 : index
    %c0_62 = arith.constant 0 : index
    %90 = vector.load %arg22[%c0_60, %c1_61, %c0_62] : memref<16x2x128xf32, #tpu.memory_space<vmem>>, vector<16x1x128xf32>
    %91 = vector.shape_cast %90 : vector<16x1x128xf32> to vector<16x128xf32>
    %92 = vector.shape_cast %89 : vector<16x128xf32> to vector<16x1x128xf32>
    tpu.vector_store %arg22[%c0_60, %c1_61, %c0_62], %92 {strides = array<i32>} : memref<16x2x128xf32, #tpu.memory_space<vmem>>, vector<16x1x128xf32>,
    %cst_63 = arith.constant dense<0.000000e+00> : vector<16x128xf32>
    %93 = tpu.matmul %86, %9, %cst_63 {dimension_numbers = #tpu.dot_dimension_numbers<[1], [0], [0], [1], [0, 0, 1, 1], [], []>} : vector<16x2xf32>, vector<2x128xf32>, vector<16x128xf32> -> vector<16x128xf32>
    %94 = vector.broadcast %10 : vector<1x128xf32> to vector<16x128xf32>
    %95 = arith.addf %93, %94 : vector<16x128xf32>
    %c0_64 = arith.constant 0 : index
    %c1_65 = arith.constant 1 : index
    %c0_66 = arith.constant 0 : index
    %96 = vector.load %arg23[%c0_64, %c1_65, %c0_66] : memref<16x2x128xf32, #tpu.memory_space<vmem>>, vector<16x1x128xf32>
    %97 = vector.shape_cast %96 : vector<16x1x128xf32> to vector<16x128xf32>
    %98 = vector.shape_cast %95 : vector<16x128xf32> to vector<16x1x128xf32>
    tpu.vector_store %arg23[%c0_64, %c1_65, %c0_66], %98 {strides = array<i32>} : memref<16x2x128xf32, #tpu.memory_space<vmem>>, vector<16x1x128xf32>,
    %c0_67 = arith.constant 0 : index
    %c0_68 = arith.constant 0 : index
    %99 = vector.load %arg4[%c0_67, %c0_68] : memref<32x128xf32, #tpu.memory_space<vmem>>, vector<32x128xf32>
    %c0_69 = arith.constant 0 : index
    %c0_70 = arith.constant 0 : index
    %100 = vector.load %arg7[%c0_69, %c0_70] : memref<32x128xf32, #tpu.memory_space<vmem>>, vector<32x128xf32>
    %cst_71 = arith.constant 0.000000e+00 : f32
    %101 = vector.broadcast %cst_71 : f32 to vector<2x32xf32>
    %c0_i32 = arith.constant 0 : i32
    %c15_i32 = arith.constant 15 : i32
    %102 = arith.subi %c15_i32, %c0_i32 : i32
    %103 = arith.index_cast %c0_i32 : i32 to index
    %c0_72 = arith.constant 0 : index
    %c0_73 = arith.constant 0 : index
    %104 = vector.load %arg22[%103, %c0_72, %c0_73] : memref<16x2x128xf32, #tpu.memory_space<vmem>>, vector<1x2x128xf32>
    %105 = vector.shape_cast %104 : vector<1x2x128xf32> to vector<2x128xf32>
    %cst_74 = arith.constant dense<0.000000e+00> : vector<2x128xf32>
    %106 = tpu.matmul %101, %99, %cst_74 {dimension_numbers = #tpu.dot_dimension_numbers<[1], [0], [0], [1], [0, 0, 1, 1], [], []>} : vector<2x32xf32>, vector<32x128xf32>, vector<2x128xf32> -> vector<2x128xf32>
    %107 = arith.addf %105, %106 : vector<2x128xf32>
    %108 = arith.index_cast %102 : i32 to index
    %c0_75 = arith.constant 0 : index
    %c0_76 = arith.constant 0 : index
    %109 = vector.load %arg23[%108, %c0_75, %c0_76] : memref<16x2x128xf32, #tpu.memory_space<vmem>>, vector<1x2x128xf32>
    %110 = vector.shape_cast %109 : vector<1x2x128xf32> to vector<2x128xf32>
    %cst_77 = arith.constant dense<0.000000e+00> : vector<2x128xf32>
    %111 = tpu.matmul %101, %100, %cst_77 {dimension_numbers = #tpu.dot_dimension_numbers<[1], [0], [0], [1], [0, 0, 1, 1], [], []>} : vector<2x32xf32>, vector<32x128xf32>, vector<2x128xf32> -> vector<2x128xf32>
    %112 = arith.addf %110, %111 : vector<2x128xf32>
    %113 = vector.extract_strided_slice %107 {offsets = [0, 0], sizes = [2, 96], strides = [1, 1]} : vector<2x128xf32> to vector<2x96xf32>
    %114 = arith.negf %113 : vector<2x96xf32>
    %115 = math.exp %114 : vector<2x96xf32>
    %cst_78 = arith.constant 1.000000e+00 : f32
    %116 = vector.broadcast %cst_78 : f32 to vector<2x96xf32>
    %117 = arith.addf %116, %115 : vector<2x96xf32>
    %118 = arith.divf %116, %117 : vector<2x96xf32>
    %119 = vector.extract_strided_slice %118 {offsets = [0, 0], sizes = [2, 32], strides = [1, 1]} : vector<2x96xf32> to vector<2x32xf32>
    %120 = vector.extract_strided_slice %118 {offsets = [0, 32], sizes = [2, 32], strides = [1, 1]} : vector<2x96xf32> to vector<2x32xf32>
    %121 = vector.extract_strided_slice %118 {offsets = [0, 64], sizes = [2, 32], strides = [1, 1]} : vector<2x96xf32> to vector<2x32xf32>
    %122 = vector.extract_strided_slice %107 {offsets = [0, 96], sizes = [2, 32], strides = [1, 1]} : vector<2x128xf32> to vector<2x32xf32>
    %123 = math.tanh %122 : vector<2x32xf32>
    %124 = arith.mulf %120, %101 : vector<2x32xf32>
    %125 = arith.mulf %119, %123 : vector<2x32xf32>
    %126 = arith.addf %124, %125 : vector<2x32xf32>
    %127 = math.tanh %126 : vector<2x32xf32>
    %128 = arith.mulf %121, %127 : vector<2x32xf32>
    %129 = vector.extract_strided_slice %112 {offsets = [0, 0], sizes = [2, 96], strides = [1, 1]} : vector<2x128xf32> to vector<2x96xf32>
    %130 = arith.negf %129 : vector<2x96xf32>
    %131 = math.exp %130 : vector<2x96xf32>
    %cst_79 = arith.constant 1.000000e+00 : f32
    %132 = vector.broadcast %cst_79 : f32 to vector<2x96xf32>
    %133 = arith.addf %132, %131 : vector<2x96xf32>
    %134 = arith.divf %132, %133 : vector<2x96xf32>
    %135 = vector.extract_strided_slice %134 {offsets = [0, 0], sizes = [2, 32], strides = [1, 1]} : vector<2x96xf32> to vector<2x32xf32>
    %136 = vector.extract_strided_slice %134 {offsets = [0, 32], sizes = [2, 32], strides = [1, 1]} : vector<2x96xf32> to vector<2x32xf32>
    %137 = vector.extract_strided_slice %134 {offsets = [0, 64], sizes = [2, 32], strides = [1, 1]} : vector<2x96xf32> to vector<2x32xf32>
    %138 = vector.extract_strided_slice %112 {offsets = [0, 96], sizes = [2, 32], strides = [1, 1]} : vector<2x128xf32> to vector<2x32xf32>
    %139 = math.tanh %138 : vector<2x32xf32>
    %140 = arith.mulf %136, %101 : vector<2x32xf32>
    %141 = arith.mulf %135, %139 : vector<2x32xf32>
    %142 = arith.addf %140, %141 : vector<2x32xf32>
    %143 = math.tanh %142 : vector<2x32xf32>
    %144 = arith.mulf %137, %143 : vector<2x32xf32>
    %145 = arith.index_cast %c0_i32 : i32 to index
    %c0_80 = arith.constant 0 : index
    %c0_81 = arith.constant 0 : index
    %146 = vector.load %arg24[%145, %c0_80, %c0_81] : memref<16x2x32xf32, #tpu.memory_space<vmem>>, vector<1x2x32xf32>
    %147 = vector.shape_cast %146 : vector<1x2x32xf32> to vector<2x32xf32>
    %148 = vector.shape_cast %128 : vector<2x32xf32> to vector<1x2x32xf32>
    tpu.vector_store %arg24[%145, %c0_80, %c0_81], %148 {strides = array<i32>} : memref<16x2x32xf32, #tpu.memory_space<vmem>>, vector<1x2x32xf32>,
    %149 = arith.index_cast %102 : i32 to index
    %c0_82 = arith.constant 0 : index
    %c0_83 = arith.constant 0 : index
    %150 = vector.load %arg25[%149, %c0_82, %c0_83] : memref<16x2x32xf32, #tpu.memory_space<vmem>>, vector<1x2x32xf32>
    %151 = vector.shape_cast %150 : vector<1x2x32xf32> to vector<2x32xf32>
    %152 = vector.shape_cast %144 : vector<2x32xf32> to vector<1x2x32xf32>
    tpu.vector_store %arg25[%149, %c0_82, %c0_83], %152 {strides = array<i32>} : memref<16x2x32xf32, #tpu.memory_space<vmem>>, vector<1x2x32xf32>,
    %c1_i32 = arith.constant 1 : i32
    %c15_i32_84 = arith.constant 15 : i32
    %153 = arith.subi %c15_i32_84, %c1_i32 : i32
    %154 = arith.index_cast %c1_i32 : i32 to index
    %c0_85 = arith.constant 0 : index
    %c0_86 = arith.constant 0 : index
    %155 = vector.load %arg22[%154, %c0_85, %c0_86] : memref<16x2x128xf32, #tpu.memory_space<vmem>>, vector<1x2x128xf32>
    %156 = vector.shape_cast %155 : vector<1x2x128xf32> to vector<2x128xf32>
    %cst_87 = arith.constant dense<0.000000e+00> : vector<2x128xf32>
    %157 = tpu.matmul %128, %99, %cst_87 {dimension_numbers = #tpu.dot_dimension_numbers<[1], [0], [0], [1], [0, 0, 1, 1], [], []>} : vector<2x32xf32>, vector<32x128xf32>, vector<2x128xf32> -> vector<2x128xf32>
    %158 = arith.addf %156, %157 : vector<2x128xf32>
    %159 = arith.index_cast %153 : i32 to index
    %c0_88 = arith.constant 0 : index
    %c0_89 = arith.constant 0 : index
    %160 = vector.load %arg23[%159, %c0_88, %c0_89] : memref<16x2x128xf32, #tpu.memory_space<vmem>>, vector<1x2x128xf32>
    %161 = vector.shape_cast %160 : vector<1x2x128xf32> to vector<2x128xf32>
    %cst_90 = arith.constant dense<0.000000e+00> : vector<2x128xf32>
    %162 = tpu.matmul %144, %100, %cst_90 {dimension_numbers = #tpu.dot_dimension_numbers<[1], [0], [0], [1], [0, 0, 1, 1], [], []>} : vector<2x32xf32>, vector<32x128xf32>, vector<2x128xf32> -> vector<2x128xf32>
    %163 = arith.addf %161, %162 : vector<2x128xf32>
    %164 = vector.extract_strided_slice %158 {offsets = [0, 0], sizes = [2, 96], strides = [1, 1]} : vector<2x128xf32> to vector<2x96xf32>
    %165 = arith.negf %164 : vector<2x96xf32>
    %166 = math.exp %165 : vector<2x96xf32>
    %cst_91 = arith.constant 1.000000e+00 : f32
    %167 = vector.broadcast %cst_91 : f32 to vector<2x96xf32>
    %168 = arith.addf %167, %166 : vector<2x96xf32>
    %169 = arith.divf %167, %168 : vector<2x96xf32>
    %170 = vector.extract_strided_slice %169 {offsets = [0, 0], sizes = [2, 32], strides = [1, 1]} : vector<2x96xf32> to vector<2x32xf32>
    %171 = vector.extract_strided_slice %169 {offsets = [0, 32], sizes = [2, 32], strides = [1, 1]} : vector<2x96xf32> to vector<2x32xf32>
    %172 = vector.extract_strided_slice %169 {offsets = [0, 64], sizes = [2, 32], strides = [1, 1]} : vector<2x96xf32> to vector<2x32xf32>
    %173 = vector.extract_strided_slice %158 {offsets = [0, 96], sizes = [2, 32], strides = [1, 1]} : vector<2x128xf32> to vector<2x32xf32>
    %174 = math.tanh %173 : vector<2x32xf32>
    %175 = arith.mulf %171, %126 : vector<2x32xf32>
    %176 = arith.mulf %170, %174 : vector<2x32xf32>
    %177 = arith.addf %175, %176 : vector<2x32xf32>
    %178 = math.tanh %177 : vector<2x32xf32>
    %179 = arith.mulf %172, %178 : vector<2x32xf32>
    %180 = vector.extract_strided_slice %163 {offsets = [0, 0], sizes = [2, 96], strides = [1, 1]} : vector<2x128xf32> to vector<2x96xf32>
    %181 = arith.negf %180 : vector<2x96xf32>
    %182 = math.exp %181 : vector<2x96xf32>
    %cst_92 = arith.constant 1.000000e+00 : f32
    %183 = vector.broadcast %cst_92 : f32 to vector<2x96xf32>
    %184 = arith.addf %183, %182 : vector<2x96xf32>
    %185 = arith.divf %183, %184 : vector<2x96xf32>
    %186 = vector.extract_strided_slice %185 {offsets = [0, 0], sizes = [2, 32], strides = [1, 1]} : vector<2x96xf32> to vector<2x32xf32>
    %187 = vector.extract_strided_slice %185 {offsets = [0, 32], sizes = [2, 32], strides = [1, 1]} : vector<2x96xf32> to vector<2x32xf32>
    %188 = vector.extract_strided_slice %185 {offsets = [0, 64], sizes = [2, 32], strides = [1, 1]} : vector<2x96xf32> to vector<2x32xf32>
    %189 = vector.extract_strided_slice %163 {offsets = [0, 96], sizes = [2, 32], strides = [1, 1]} : vector<2x128xf32> to vector<2x32xf32>
    %190 = math.tanh %189 : vector<2x32xf32>
    %191 = arith.mulf %187, %142 : vector<2x32xf32>
    %192 = arith.mulf %186, %190 : vector<2x32xf32>
    %193 = arith.addf %191, %192 : vector<2x32xf32>
    %194 = math.tanh %193 : vector<2x32xf32>
    %195 = arith.mulf %188, %194 : vector<2x32xf32>
    %196 = arith.index_cast %c1_i32 : i32 to index
    %c0_93 = arith.constant 0 : index
    %c0_94 = arith.constant 0 : index
    %197 = vector.load %arg24[%196, %c0_93, %c0_94] : memref<16x2x32xf32, #tpu.memory_space<vmem>>, vector<1x2x32xf32>
    %198 = vector.shape_cast %197 : vector<1x2x32xf32> to vector<2x32xf32>
    %199 = vector.shape_cast %179 : vector<2x32xf32> to vector<1x2x32xf32>
    tpu.vector_store %arg24[%196, %c0_93, %c0_94], %199 {strides = array<i32>} : memref<16x2x32xf32, #tpu.memory_space<vmem>>, vector<1x2x32xf32>,
    %200 = arith.index_cast %153 : i32 to index
    %c0_95 = arith.constant 0 : index
    %c0_96 = arith.constant 0 : index
    %201 = vector.load %arg25[%200, %c0_95, %c0_96] : memref<16x2x32xf32, #tpu.memory_space<vmem>>, vector<1x2x32xf32>
    %202 = vector.shape_cast %201 : vector<1x2x32xf32> to vector<2x32xf32>
    %203 = vector.shape_cast %195 : vector<2x32xf32> to vector<1x2x32xf32>
    tpu.vector_store %arg25[%200, %c0_95, %c0_96], %203 {strides = array<i32>} : memref<16x2x32xf32, #tpu.memory_space<vmem>>, vector<1x2x32xf32>,
    %c2_i32 = arith.constant 2 : i32
    %c15_i32_97 = arith.constant 15 : i32
    %204 = arith.subi %c15_i32_97, %c2_i32 : i32
    %205 = arith.index_cast %c2_i32 : i32 to index
    %c0_98 = arith.constant 0 : index
    %c0_99 = arith.constant 0 : index
    %206 = vector.load %arg22[%205, %c0_98, %c0_99] : memref<16x2x128xf32, #tpu.memory_space<vmem>>, vector<1x2x128xf32>
    %207 = vector.shape_cast %206 : vector<1x2x128xf32> to vector<2x128xf32>
    %cst_100 = arith.constant dense<0.000000e+00> : vector<2x128xf32>
    %208 = tpu.matmul %179, %99, %cst_100 {dimension_numbers = #tpu.dot_dimension_numbers<[1], [0], [0], [1], [0, 0, 1, 1], [], []>} : vector<2x32xf32>, vector<32x128xf32>, vector<2x128xf32> -> vector<2x128xf32>
    %209 = arith.addf %207, %208 : vector<2x128xf32>
    %210 = arith.index_cast %204 : i32 to index
    %c0_101 = arith.constant 0 : index
    %c0_102 = arith.constant 0 : index
    %211 = vector.load %arg23[%210, %c0_101, %c0_102] : memref<16x2x128xf32, #tpu.memory_space<vmem>>, vector<1x2x128xf32>
    %212 = vector.shape_cast %211 : vector<1x2x128xf32> to vector<2x128xf32>
    %cst_103 = arith.constant dense<0.000000e+00> : vector<2x128xf32>
    %213 = tpu.matmul %195, %100, %cst_103 {dimension_numbers = #tpu.dot_dimension_numbers<[1], [0], [0], [1], [0, 0, 1, 1], [], []>} : vector<2x32xf32>, vector<32x128xf32>, vector<2x128xf32> -> vector<2x128xf32>
    %214 = arith.addf %212, %213 : vector<2x128xf32>
    %215 = vector.extract_strided_slice %209 {offsets = [0, 0], sizes = [2, 96], strides = [1, 1]} : vector<2x128xf32> to vector<2x96xf32>
    %216 = arith.negf %215 : vector<2x96xf32>
    %217 = math.exp %216 : vector<2x96xf32>
    %cst_104 = arith.constant 1.000000e+00 : f32
    %218 = vector.broadcast %cst_104 : f32 to vector<2x96xf32>
    %219 = arith.addf %218, %217 : vector<2x96xf32>
    %220 = arith.divf %218, %219 : vector<2x96xf32>
    %221 = vector.extract_strided_slice %220 {offsets = [0, 0], sizes = [2, 32], strides = [1, 1]} : vector<2x96xf32> to vector<2x32xf32>
    %222 = vector.extract_strided_slice %220 {offsets = [0, 32], sizes = [2, 32], strides = [1, 1]} : vector<2x96xf32> to vector<2x32xf32>
    %223 = vector.extract_strided_slice %220 {offsets = [0, 64], sizes = [2, 32], strides = [1, 1]} : vector<2x96xf32> to vector<2x32xf32>
    %224 = vector.extract_strided_slice %209 {offsets = [0, 96], sizes = [2, 32], strides = [1, 1]} : vector<2x128xf32> to vector<2x32xf32>
    %225 = math.tanh %224 : vector<2x32xf32>
    %226 = arith.mulf %222, %177 : vector<2x32xf32>
    %227 = arith.mulf %221, %225 : vector<2x32xf32>
    %228 = arith.addf %226, %227 : vector<2x32xf32>
    %229 = math.tanh %228 : vector<2x32xf32>
    %230 = arith.mulf %223, %229 : vector<2x32xf32>
    %231 = vector.extract_strided_slice %214 {offsets = [0, 0], sizes = [2, 96], strides = [1, 1]} : vector<2x128xf32> to vector<2x96xf32>
    %232 = arith.negf %231 : vector<2x96xf32>
    %233 = math.exp %232 : vector<2x96xf32>
    %cst_105 = arith.constant 1.000000e+00 : f32
    %234 = vector.broadcast %cst_105 : f32 to vector<2x96xf32>
    %235 = arith.addf %234, %233 : vector<2x96xf32>
    %236 = arith.divf %234, %235 : vector<2x96xf32>
    %237 = vector.extract_strided_slice %236 {offsets = [0, 0], sizes = [2, 32], strides = [1, 1]} : vector<2x96xf32> to vector<2x32xf32>
    %238 = vector.extract_strided_slice %236 {offsets = [0, 32], sizes = [2, 32], strides = [1, 1]} : vector<2x96xf32> to vector<2x32xf32>
    %239 = vector.extract_strided_slice %236 {offsets = [0, 64], sizes = [2, 32], strides = [1, 1]} : vector<2x96xf32> to vector<2x32xf32>
    %240 = vector.extract_strided_slice %214 {offsets = [0, 96], sizes = [2, 32], strides = [1, 1]} : vector<2x128xf32> to vector<2x32xf32>
    %241 = math.tanh %240 : vector<2x32xf32>
    %242 = arith.mulf %238, %193 : vector<2x32xf32>
    %243 = arith.mulf %237, %241 : vector<2x32xf32>
    %244 = arith.addf %242, %243 : vector<2x32xf32>
    %245 = math.tanh %244 : vector<2x32xf32>
    %246 = arith.mulf %239, %245 : vector<2x32xf32>
    %247 = arith.index_cast %c2_i32 : i32 to index
    %c0_106 = arith.constant 0 : index
    %c0_107 = arith.constant 0 : index
    %248 = vector.load %arg24[%247, %c0_106, %c0_107] : memref<16x2x32xf32, #tpu.memory_space<vmem>>, vector<1x2x32xf32>
    %249 = vector.shape_cast %248 : vector<1x2x32xf32> to vector<2x32xf32>
    %250 = vector.shape_cast %230 : vector<2x32xf32> to vector<1x2x32xf32>
    tpu.vector_store %arg24[%247, %c0_106, %c0_107], %250 {strides = array<i32>} : memref<16x2x32xf32, #tpu.memory_space<vmem>>, vector<1x2x32xf32>,
    %251 = arith.index_cast %204 : i32 to index
    %c0_108 = arith.constant 0 : index
    %c0_109 = arith.constant 0 : index
    %252 = vector.load %arg25[%251, %c0_108, %c0_109] : memref<16x2x32xf32, #tpu.memory_space<vmem>>, vector<1x2x32xf32>
    %253 = vector.shape_cast %252 : vector<1x2x32xf32> to vector<2x32xf32>
    %254 = vector.shape_cast %246 : vector<2x32xf32> to vector<1x2x32xf32>
    tpu.vector_store %arg25[%251, %c0_108, %c0_109], %254 {strides = array<i32>} : memref<16x2x32xf32, #tpu.memory_space<vmem>>, vector<1x2x32xf32>,
    %c3_i32 = arith.constant 3 : i32
    %c15_i32_110 = arith.constant 15 : i32
    %255 = arith.subi %c15_i32_110, %c3_i32 : i32
    %256 = arith.index_cast %c3_i32 : i32 to index
    %c0_111 = arith.constant 0 : index
    %c0_112 = arith.constant 0 : index
    %257 = vector.load %arg22[%256, %c0_111, %c0_112] : memref<16x2x128xf32, #tpu.memory_space<vmem>>, vector<1x2x128xf32>
    %258 = vector.shape_cast %257 : vector<1x2x128xf32> to vector<2x128xf32>
    %cst_113 = arith.constant dense<0.000000e+00> : vector<2x128xf32>
    %259 = tpu.matmul %230, %99, %cst_113 {dimension_numbers = #tpu.dot_dimension_numbers<[1], [0], [0], [1], [0, 0, 1, 1], [], []>} : vector<2x32xf32>, vector<32x128xf32>, vector<2x128xf32> -> vector<2x128xf32>
    %260 = arith.addf %258, %259 : vector<2x128xf32>
    %261 = arith.index_cast %255 : i32 to index
    %c0_114 = arith.constant 0 : index
    %c0_115 = arith.constant 0 : index
    %262 = vector.load %arg23[%261, %c0_114, %c0_115] : memref<16x2x128xf32, #tpu.memory_space<vmem>>, vector<1x2x128xf32>
    %263 = vector.shape_cast %262 : vector<1x2x128xf32> to vector<2x128xf32>
    %cst_116 = arith.constant dense<0.000000e+00> : vector<2x128xf32>
    %264 = tpu.matmul %246, %100, %cst_116 {dimension_numbers = #tpu.dot_dimension_numbers<[1], [0], [0], [1], [0, 0, 1, 1], [], []>} : vector<2x32xf32>, vector<32x128xf32>, vector<2x128xf32> -> vector<2x128xf32>
    %265 = arith.addf %263, %264 : vector<2x128xf32>
    %266 = vector.extract_strided_slice %260 {offsets = [0, 0], sizes = [2, 96], strides = [1, 1]} : vector<2x128xf32> to vector<2x96xf32>
    %267 = arith.negf %266 : vector<2x96xf32>
    %268 = math.exp %267 : vector<2x96xf32>
    %cst_117 = arith.constant 1.000000e+00 : f32
    %269 = vector.broadcast %cst_117 : f32 to vector<2x96xf32>
    %270 = arith.addf %269, %268 : vector<2x96xf32>
    %271 = arith.divf %269, %270 : vector<2x96xf32>
    %272 = vector.extract_strided_slice %271 {offsets = [0, 0], sizes = [2, 32], strides = [1, 1]} : vector<2x96xf32> to vector<2x32xf32>
    %273 = vector.extract_strided_slice %271 {offsets = [0, 32], sizes = [2, 32], strides = [1, 1]} : vector<2x96xf32> to vector<2x32xf32>
    %274 = vector.extract_strided_slice %271 {offsets = [0, 64], sizes = [2, 32], strides = [1, 1]} : vector<2x96xf32> to vector<2x32xf32>
    %275 = vector.extract_strided_slice %260 {offsets = [0, 96], sizes = [2, 32], strides = [1, 1]} : vector<2x128xf32> to vector<2x32xf32>
    %276 = math.tanh %275 : vector<2x32xf32>
    %277 = arith.mulf %273, %228 : vector<2x32xf32>
    %278 = arith.mulf %272, %276 : vector<2x32xf32>
    %279 = arith.addf %277, %278 : vector<2x32xf32>
    %280 = math.tanh %279 : vector<2x32xf32>
    %281 = arith.mulf %274, %280 : vector<2x32xf32>
    %282 = vector.extract_strided_slice %265 {offsets = [0, 0], sizes = [2, 96], strides = [1, 1]} : vector<2x128xf32> to vector<2x96xf32>
    %283 = arith.negf %282 : vector<2x96xf32>
    %284 = math.exp %283 : vector<2x96xf32>
    %cst_118 = arith.constant 1.000000e+00 : f32
    %285 = vector.broadcast %cst_118 : f32 to vector<2x96xf32>
    %286 = arith.addf %285, %284 : vector<2x96xf32>
    %287 = arith.divf %285, %286 : vector<2x96xf32>
    %288 = vector.extract_strided_slice %287 {offsets = [0, 0], sizes = [2, 32], strides = [1, 1]} : vector<2x96xf32> to vector<2x32xf32>
    %289 = vector.extract_strided_slice %287 {offsets = [0, 32], sizes = [2, 32], strides = [1, 1]} : vector<2x96xf32> to vector<2x32xf32>
    %290 = vector.extract_strided_slice %287 {offsets = [0, 64], sizes = [2, 32], strides = [1, 1]} : vector<2x96xf32> to vector<2x32xf32>
    %291 = vector.extract_strided_slice %265 {offsets = [0, 96], sizes = [2, 32], strides = [1, 1]} : vector<2x128xf32> to vector<2x32xf32>
    %292 = math.tanh %291 : vector<2x32xf32>
    %293 = arith.mulf %289, %244 : vector<2x32xf32>
    %294 = arith.mulf %288, %292 : vector<2x32xf32>
    %295 = arith.addf %293, %294 : vector<2x32xf32>
    %296 = math.tanh %295 : vector<2x32xf32>
    %297 = arith.mulf %290, %296 : vector<2x32xf32>
    %298 = arith.index_cast %c3_i32 : i32 to index
    %c0_119 = arith.constant 0 : index
    %c0_120 = arith.constant 0 : index
    %299 = vector.load %arg24[%298, %c0_119, %c0_120] : memref<16x2x32xf32, #tpu.memory_space<vmem>>, vector<1x2x32xf32>
    %300 = vector.shape_cast %299 : vector<1x2x32xf32> to vector<2x32xf32>
    %301 = vector.shape_cast %281 : vector<2x32xf32> to vector<1x2x32xf32>
    tpu.vector_store %arg24[%298, %c0_119, %c0_120], %301 {strides = array<i32>} : memref<16x2x32xf32, #tpu.memory_space<vmem>>, vector<1x2x32xf32>,
    %302 = arith.index_cast %255 : i32 to index
    %c0_121 = arith.constant 0 : index
    %c0_122 = arith.constant 0 : index
    %303 = vector.load %arg25[%302, %c0_121, %c0_122] : memref<16x2x32xf32, #tpu.memory_space<vmem>>, vector<1x2x32xf32>
    %304 = vector.shape_cast %303 : vector<1x2x32xf32> to vector<2x32xf32>
    %305 = vector.shape_cast %297 : vector<2x32xf32> to vector<1x2x32xf32>
    tpu.vector_store %arg25[%302, %c0_121, %c0_122], %305 {strides = array<i32>} : memref<16x2x32xf32, #tpu.memory_space<vmem>>, vector<1x2x32xf32>,
    %c4_i32 = arith.constant 4 : i32
    %c15_i32_123 = arith.constant 15 : i32
    %306 = arith.subi %c15_i32_123, %c4_i32 : i32
    %307 = arith.index_cast %c4_i32 : i32 to index
    %c0_124 = arith.constant 0 : index
    %c0_125 = arith.constant 0 : index
    %308 = vector.load %arg22[%307, %c0_124, %c0_125] : memref<16x2x128xf32, #tpu.memory_space<vmem>>, vector<1x2x128xf32>
    %309 = vector.shape_cast %308 : vector<1x2x128xf32> to vector<2x128xf32>
    %cst_126 = arith.constant dense<0.000000e+00> : vector<2x128xf32>
    %310 = tpu.matmul %281, %99, %cst_126 {dimension_numbers = #tpu.dot_dimension_numbers<[1], [0], [0], [1], [0, 0, 1, 1], [], []>} : vector<2x32xf32>, vector<32x128xf32>, vector<2x128xf32> -> vector<2x128xf32>
    %311 = arith.addf %309, %310 : vector<2x128xf32>
    %312 = arith.index_cast %306 : i32 to index
    %c0_127 = arith.constant 0 : index
    %c0_128 = arith.constant 0 : index
    %313 = vector.load %arg23[%312, %c0_127, %c0_128] : memref<16x2x128xf32, #tpu.memory_space<vmem>>, vector<1x2x128xf32>
    %314 = vector.shape_cast %313 : vector<1x2x128xf32> to vector<2x128xf32>
    %cst_129 = arith.constant dense<0.000000e+00> : vector<2x128xf32>
    %315 = tpu.matmul %297, %100, %cst_129 {dimension_numbers = #tpu.dot_dimension_numbers<[1], [0], [0], [1], [0, 0, 1, 1], [], []>} : vector<2x32xf32>, vector<32x128xf32>, vector<2x128xf32> -> vector<2x128xf32>
    %316 = arith.addf %314, %315 : vector<2x128xf32>
    %317 = vector.extract_strided_slice %311 {offsets = [0, 0], sizes = [2, 96], strides = [1, 1]} : vector<2x128xf32> to vector<2x96xf32>
    %318 = arith.negf %317 : vector<2x96xf32>
    %319 = math.exp %318 : vector<2x96xf32>
    %cst_130 = arith.constant 1.000000e+00 : f32
    %320 = vector.broadcast %cst_130 : f32 to vector<2x96xf32>
    %321 = arith.addf %320, %319 : vector<2x96xf32>
    %322 = arith.divf %320, %321 : vector<2x96xf32>
    %323 = vector.extract_strided_slice %322 {offsets = [0, 0], sizes = [2, 32], strides = [1, 1]} : vector<2x96xf32> to vector<2x32xf32>
    %324 = vector.extract_strided_slice %322 {offsets = [0, 32], sizes = [2, 32], strides = [1, 1]} : vector<2x96xf32> to vector<2x32xf32>
    %325 = vector.extract_strided_slice %322 {offsets = [0, 64], sizes = [2, 32], strides = [1, 1]} : vector<2x96xf32> to vector<2x32xf32>
    %326 = vector.extract_strided_slice %311 {offsets = [0, 96], sizes = [2, 32], strides = [1, 1]} : vector<2x128xf32> to vector<2x32xf32>
    %327 = math.tanh %326 : vector<2x32xf32>
    %328 = arith.mulf %324, %279 : vector<2x32xf32>
    %329 = arith.mulf %323, %327 : vector<2x32xf32>
    %330 = arith.addf %328, %329 : vector<2x32xf32>
    %331 = math.tanh %330 : vector<2x32xf32>
    %332 = arith.mulf %325, %331 : vector<2x32xf32>
    %333 = vector.extract_strided_slice %316 {offsets = [0, 0], sizes = [2, 96], strides = [1, 1]} : vector<2x128xf32> to vector<2x96xf32>
    %334 = arith.negf %333 : vector<2x96xf32>
    %335 = math.exp %334 : vector<2x96xf32>
    %cst_131 = arith.constant 1.000000e+00 : f32
    %336 = vector.broadcast %cst_131 : f32 to vector<2x96xf32>
    %337 = arith.addf %336, %335 : vector<2x96xf32>
    %338 = arith.divf %336, %337 : vector<2x96xf32>
    %339 = vector.extract_strided_slice %338 {offsets = [0, 0], sizes = [2, 32], strides = [1, 1]} : vector<2x96xf32> to vector<2x32xf32>
    %340 = vector.extract_strided_slice %338 {offsets = [0, 32], sizes = [2, 32], strides = [1, 1]} : vector<2x96xf32> to vector<2x32xf32>
    %341 = vector.extract_strided_slice %338 {offsets = [0, 64], sizes = [2, 32], strides = [1, 1]} : vector<2x96xf32> to vector<2x32xf32>
    %342 = vector.extract_strided_slice %316 {offsets = [0, 96], sizes = [2, 32], strides = [1, 1]} : vector<2x128xf32> to vector<2x32xf32>
    %343 = math.tanh %342 : vector<2x32xf32>
    %344 = arith.mulf %340, %295 : vector<2x32xf32>
    %345 = arith.mulf %339, %343 : vector<2x32xf32>
    %346 = arith.addf %344, %345 : vector<2x32xf32>
    %347 = math.tanh %346 : vector<2x32xf32>
    %348 = arith.mulf %341, %347 : vector<2x32xf32>
    %349 = arith.index_cast %c4_i32 : i32 to index
    %c0_132 = arith.constant 0 : index
    %c0_133 = arith.constant 0 : index
    %350 = vector.load %arg24[%349, %c0_132, %c0_133] : memref<16x2x32xf32, #tpu.memory_space<vmem>>, vector<1x2x32xf32>
    %351 = vector.shape_cast %350 : vector<1x2x32xf32> to vector<2x32xf32>
    %352 = vector.shape_cast %332 : vector<2x32xf32> to vector<1x2x32xf32>
    tpu.vector_store %arg24[%349, %c0_132, %c0_133], %352 {strides = array<i32>} : memref<16x2x32xf32, #tpu.memory_space<vmem>>, vector<1x2x32xf32>,
    %353 = arith.index_cast %306 : i32 to index
    %c0_134 = arith.constant 0 : index
    %c0_135 = arith.constant 0 : index
    %354 = vector.load %arg25[%353, %c0_134, %c0_135] : memref<16x2x32xf32, #tpu.memory_space<vmem>>, vector<1x2x32xf32>
    %355 = vector.shape_cast %354 : vector<1x2x32xf32> to vector<2x32xf32>
    %356 = vector.shape_cast %348 : vector<2x32xf32> to vector<1x2x32xf32>
    tpu.vector_store %arg25[%353, %c0_134, %c0_135], %356 {strides = array<i32>} : memref<16x2x32xf32, #tpu.memory_space<vmem>>, vector<1x2x32xf32>,
    %c5_i32 = arith.constant 5 : i32
    %c15_i32_136 = arith.constant 15 : i32
    %357 = arith.subi %c15_i32_136, %c5_i32 : i32
    %358 = arith.index_cast %c5_i32 : i32 to index
    %c0_137 = arith.constant 0 : index
    %c0_138 = arith.constant 0 : index
    %359 = vector.load %arg22[%358, %c0_137, %c0_138] : memref<16x2x128xf32, #tpu.memory_space<vmem>>, vector<1x2x128xf32>
    %360 = vector.shape_cast %359 : vector<1x2x128xf32> to vector<2x128xf32>
    %cst_139 = arith.constant dense<0.000000e+00> : vector<2x128xf32>
    %361 = tpu.matmul %332, %99, %cst_139 {dimension_numbers = #tpu.dot_dimension_numbers<[1], [0], [0], [1], [0, 0, 1, 1], [], []>} : vector<2x32xf32>, vector<32x128xf32>, vector<2x128xf32> -> vector<2x128xf32>
    %362 = arith.addf %360, %361 : vector<2x128xf32>
    %363 = arith.index_cast %357 : i32 to index
    %c0_140 = arith.constant 0 : index
    %c0_141 = arith.constant 0 : index
    %364 = vector.load %arg23[%363, %c0_140, %c0_141] : memref<16x2x128xf32, #tpu.memory_space<vmem>>, vector<1x2x128xf32>
    %365 = vector.shape_cast %364 : vector<1x2x128xf32> to vector<2x128xf32>
    %cst_142 = arith.constant dense<0.000000e+00> : vector<2x128xf32>
    %366 = tpu.matmul %348, %100, %cst_142 {dimension_numbers = #tpu.dot_dimension_numbers<[1], [0], [0], [1], [0, 0, 1, 1], [], []>} : vector<2x32xf32>, vector<32x128xf32>, vector<2x128xf32> -> vector<2x128xf32>
    %367 = arith.addf %365, %366 : vector<2x128xf32>
    %368 = vector.extract_strided_slice %362 {offsets = [0, 0], sizes = [2, 96], strides = [1, 1]} : vector<2x128xf32> to vector<2x96xf32>
    %369 = arith.negf %368 : vector<2x96xf32>
    %370 = math.exp %369 : vector<2x96xf32>
    %cst_143 = arith.constant 1.000000e+00 : f32
    %371 = vector.broadcast %cst_143 : f32 to vector<2x96xf32>
    %372 = arith.addf %371, %370 : vector<2x96xf32>
    %373 = arith.divf %371, %372 : vector<2x96xf32>
    %374 = vector.extract_strided_slice %373 {offsets = [0, 0], sizes = [2, 32], strides = [1, 1]} : vector<2x96xf32> to vector<2x32xf32>
    %375 = vector.extract_strided_slice %373 {offsets = [0, 32], sizes = [2, 32], strides = [1, 1]} : vector<2x96xf32> to vector<2x32xf32>
    %376 = vector.extract_strided_slice %373 {offsets = [0, 64], sizes = [2, 32], strides = [1, 1]} : vector<2x96xf32> to vector<2x32xf32>
    %377 = vector.extract_strided_slice %362 {offsets = [0, 96], sizes = [2, 32], strides = [1, 1]} : vector<2x128xf32> to vector<2x32xf32>
    %378 = math.tanh %377 : vector<2x32xf32>
    %379 = arith.mulf %375, %330 : vector<2x32xf32>
    %380 = arith.mulf %374, %378 : vector<2x32xf32>
    %381 = arith.addf %379, %380 : vector<2x32xf32>
    %382 = math.tanh %381 : vector<2x32xf32>
    %383 = arith.mulf %376, %382 : vector<2x32xf32>
    %384 = vector.extract_strided_slice %367 {offsets = [0, 0], sizes = [2, 96], strides = [1, 1]} : vector<2x128xf32> to vector<2x96xf32>
    %385 = arith.negf %384 : vector<2x96xf32>
    %386 = math.exp %385 : vector<2x96xf32>
    %cst_144 = arith.constant 1.000000e+00 : f32
    %387 = vector.broadcast %cst_144 : f32 to vector<2x96xf32>
    %388 = arith.addf %387, %386 : vector<2x96xf32>
    %389 = arith.divf %387, %388 : vector<2x96xf32>
    %390 = vector.extract_strided_slice %389 {offsets = [0, 0], sizes = [2, 32], strides = [1, 1]} : vector<2x96xf32> to vector<2x32xf32>
    %391 = vector.extract_strided_slice %389 {offsets = [0, 32], sizes = [2, 32], strides = [1, 1]} : vector<2x96xf32> to vector<2x32xf32>
    %392 = vector.extract_strided_slice %389 {offsets = [0, 64], sizes = [2, 32], strides = [1, 1]} : vector<2x96xf32> to vector<2x32xf32>
    %393 = vector.extract_strided_slice %367 {offsets = [0, 96], sizes = [2, 32], strides = [1, 1]} : vector<2x128xf32> to vector<2x32xf32>
    %394 = math.tanh %393 : vector<2x32xf32>
    %395 = arith.mulf %391, %346 : vector<2x32xf32>
    %396 = arith.mulf %390, %394 : vector<2x32xf32>
    %397 = arith.addf %395, %396 : vector<2x32xf32>
    %398 = math.tanh %397 : vector<2x32xf32>
    %399 = arith.mulf %392, %398 : vector<2x32xf32>
    %400 = arith.index_cast %c5_i32 : i32 to index
    %c0_145 = arith.constant 0 : index
    %c0_146 = arith.constant 0 : index
    %401 = vector.load %arg24[%400, %c0_145, %c0_146] : memref<16x2x32xf32, #tpu.memory_space<vmem>>, vector<1x2x32xf32>
    %402 = vector.shape_cast %401 : vector<1x2x32xf32> to vector<2x32xf32>
    %403 = vector.shape_cast %383 : vector<2x32xf32> to vector<1x2x32xf32>
    tpu.vector_store %arg24[%400, %c0_145, %c0_146], %403 {strides = array<i32>} : memref<16x2x32xf32, #tpu.memory_space<vmem>>, vector<1x2x32xf32>,
    %404 = arith.index_cast %357 : i32 to index
    %c0_147 = arith.constant 0 : index
    %c0_148 = arith.constant 0 : index
    %405 = vector.load %arg25[%404, %c0_147, %c0_148] : memref<16x2x32xf32, #tpu.memory_space<vmem>>, vector<1x2x32xf32>
    %406 = vector.shape_cast %405 : vector<1x2x32xf32> to vector<2x32xf32>
    %407 = vector.shape_cast %399 : vector<2x32xf32> to vector<1x2x32xf32>
    tpu.vector_store %arg25[%404, %c0_147, %c0_148], %407 {strides = array<i32>} : memref<16x2x32xf32, #tpu.memory_space<vmem>>, vector<1x2x32xf32>,
    %c6_i32 = arith.constant 6 : i32
    %c15_i32_149 = arith.constant 15 : i32
    %408 = arith.subi %c15_i32_149, %c6_i32 : i32
    %409 = arith.index_cast %c6_i32 : i32 to index
    %c0_150 = arith.constant 0 : index
    %c0_151 = arith.constant 0 : index
    %410 = vector.load %arg22[%409, %c0_150, %c0_151] : memref<16x2x128xf32, #tpu.memory_space<vmem>>, vector<1x2x128xf32>
    %411 = vector.shape_cast %410 : vector<1x2x128xf32> to vector<2x128xf32>
    %cst_152 = arith.constant dense<0.000000e+00> : vector<2x128xf32>
    %412 = tpu.matmul %383, %99, %cst_152 {dimension_numbers = #tpu.dot_dimension_numbers<[1], [0], [0], [1], [0, 0, 1, 1], [], []>} : vector<2x32xf32>, vector<32x128xf32>, vector<2x128xf32> -> vector<2x128xf32>
    %413 = arith.addf %411, %412 : vector<2x128xf32>
    %414 = arith.index_cast %408 : i32 to index
    %c0_153 = arith.constant 0 : index
    %c0_154 = arith.constant 0 : index
    %415 = vector.load %arg23[%414, %c0_153, %c0_154] : memref<16x2x128xf32, #tpu.memory_space<vmem>>, vector<1x2x128xf32>
    %416 = vector.shape_cast %415 : vector<1x2x128xf32> to vector<2x128xf32>
    %cst_155 = arith.constant dense<0.000000e+00> : vector<2x128xf32>
    %417 = tpu.matmul %399, %100, %cst_155 {dimension_numbers = #tpu.dot_dimension_numbers<[1], [0], [0], [1], [0, 0, 1, 1], [], []>} : vector<2x32xf32>, vector<32x128xf32>, vector<2x128xf32> -> vector<2x128xf32>
    %418 = arith.addf %416, %417 : vector<2x128xf32>
    %419 = vector.extract_strided_slice %413 {offsets = [0, 0], sizes = [2, 96], strides = [1, 1]} : vector<2x128xf32> to vector<2x96xf32>
    %420 = arith.negf %419 : vector<2x96xf32>
    %421 = math.exp %420 : vector<2x96xf32>
    %cst_156 = arith.constant 1.000000e+00 : f32
    %422 = vector.broadcast %cst_156 : f32 to vector<2x96xf32>
    %423 = arith.addf %422, %421 : vector<2x96xf32>
    %424 = arith.divf %422, %423 : vector<2x96xf32>
    %425 = vector.extract_strided_slice %424 {offsets = [0, 0], sizes = [2, 32], strides = [1, 1]} : vector<2x96xf32> to vector<2x32xf32>
    %426 = vector.extract_strided_slice %424 {offsets = [0, 32], sizes = [2, 32], strides = [1, 1]} : vector<2x96xf32> to vector<2x32xf32>
    %427 = vector.extract_strided_slice %424 {offsets = [0, 64], sizes = [2, 32], strides = [1, 1]} : vector<2x96xf32> to vector<2x32xf32>
    %428 = vector.extract_strided_slice %413 {offsets = [0, 96], sizes = [2, 32], strides = [1, 1]} : vector<2x128xf32> to vector<2x32xf32>
    %429 = math.tanh %428 : vector<2x32xf32>
    %430 = arith.mulf %426, %381 : vector<2x32xf32>
    %431 = arith.mulf %425, %429 : vector<2x32xf32>
    %432 = arith.addf %430, %431 : vector<2x32xf32>
    %433 = math.tanh %432 : vector<2x32xf32>
    %434 = arith.mulf %427, %433 : vector<2x32xf32>
    %435 = vector.extract_strided_slice %418 {offsets = [0, 0], sizes = [2, 96], strides = [1, 1]} : vector<2x128xf32> to vector<2x96xf32>
    %436 = arith.negf %435 : vector<2x96xf32>
    %437 = math.exp %436 : vector<2x96xf32>
    %cst_157 = arith.constant 1.000000e+00 : f32
    %438 = vector.broadcast %cst_157 : f32 to vector<2x96xf32>
    %439 = arith.addf %438, %437 : vector<2x96xf32>
    %440 = arith.divf %438, %439 : vector<2x96xf32>
    %441 = vector.extract_strided_slice %440 {offsets = [0, 0], sizes = [2, 32], strides = [1, 1]} : vector<2x96xf32> to vector<2x32xf32>
    %442 = vector.extract_strided_slice %440 {offsets = [0, 32], sizes = [2, 32], strides = [1, 1]} : vector<2x96xf32> to vector<2x32xf32>
    %443 = vector.extract_strided_slice %440 {offsets = [0, 64], sizes = [2, 32], strides = [1, 1]} : vector<2x96xf32> to vector<2x32xf32>
    %444 = vector.extract_strided_slice %418 {offsets = [0, 96], sizes = [2, 32], strides = [1, 1]} : vector<2x128xf32> to vector<2x32xf32>
    %445 = math.tanh %444 : vector<2x32xf32>
    %446 = arith.mulf %442, %397 : vector<2x32xf32>
    %447 = arith.mulf %441, %445 : vector<2x32xf32>
    %448 = arith.addf %446, %447 : vector<2x32xf32>
    %449 = math.tanh %448 : vector<2x32xf32>
    %450 = arith.mulf %443, %449 : vector<2x32xf32>
    %451 = arith.index_cast %c6_i32 : i32 to index
    %c0_158 = arith.constant 0 : index
    %c0_159 = arith.constant 0 : index
    %452 = vector.load %arg24[%451, %c0_158, %c0_159] : memref<16x2x32xf32, #tpu.memory_space<vmem>>, vector<1x2x32xf32>
    %453 = vector.shape_cast %452 : vector<1x2x32xf32> to vector<2x32xf32>
    %454 = vector.shape_cast %434 : vector<2x32xf32> to vector<1x2x32xf32>
    tpu.vector_store %arg24[%451, %c0_158, %c0_159], %454 {strides = array<i32>} : memref<16x2x32xf32, #tpu.memory_space<vmem>>, vector<1x2x32xf32>,
    %455 = arith.index_cast %408 : i32 to index
    %c0_160 = arith.constant 0 : index
    %c0_161 = arith.constant 0 : index
    %456 = vector.load %arg25[%455, %c0_160, %c0_161] : memref<16x2x32xf32, #tpu.memory_space<vmem>>, vector<1x2x32xf32>
    %457 = vector.shape_cast %456 : vector<1x2x32xf32> to vector<2x32xf32>
    %458 = vector.shape_cast %450 : vector<2x32xf32> to vector<1x2x32xf32>
    tpu.vector_store %arg25[%455, %c0_160, %c0_161], %458 {strides = array<i32>} : memref<16x2x32xf32, #tpu.memory_space<vmem>>, vector<1x2x32xf32>,
    %c7_i32 = arith.constant 7 : i32
    %c15_i32_162 = arith.constant 15 : i32
    %459 = arith.subi %c15_i32_162, %c7_i32 : i32
    %460 = arith.index_cast %c7_i32 : i32 to index
    %c0_163 = arith.constant 0 : index
    %c0_164 = arith.constant 0 : index
    %461 = vector.load %arg22[%460, %c0_163, %c0_164] : memref<16x2x128xf32, #tpu.memory_space<vmem>>, vector<1x2x128xf32>
    %462 = vector.shape_cast %461 : vector<1x2x128xf32> to vector<2x128xf32>
    %cst_165 = arith.constant dense<0.000000e+00> : vector<2x128xf32>
    %463 = tpu.matmul %434, %99, %cst_165 {dimension_numbers = #tpu.dot_dimension_numbers<[1], [0], [0], [1], [0, 0, 1, 1], [], []>} : vector<2x32xf32>, vector<32x128xf32>, vector<2x128xf32> -> vector<2x128xf32>
    %464 = arith.addf %462, %463 : vector<2x128xf32>
    %465 = arith.index_cast %459 : i32 to index
    %c0_166 = arith.constant 0 : index
    %c0_167 = arith.constant 0 : index
    %466 = vector.load %arg23[%465, %c0_166, %c0_167] : memref<16x2x128xf32, #tpu.memory_space<vmem>>, vector<1x2x128xf32>
    %467 = vector.shape_cast %466 : vector<1x2x128xf32> to vector<2x128xf32>
    %cst_168 = arith.constant dense<0.000000e+00> : vector<2x128xf32>
    %468 = tpu.matmul %450, %100, %cst_168 {dimension_numbers = #tpu.dot_dimension_numbers<[1], [0], [0], [1], [0, 0, 1, 1], [], []>} : vector<2x32xf32>, vector<32x128xf32>, vector<2x128xf32> -> vector<2x128xf32>
    %469 = arith.addf %467, %468 : vector<2x128xf32>
    %470 = vector.extract_strided_slice %464 {offsets = [0, 0], sizes = [2, 96], strides = [1, 1]} : vector<2x128xf32> to vector<2x96xf32>
    %471 = arith.negf %470 : vector<2x96xf32>
    %472 = math.exp %471 : vector<2x96xf32>
    %cst_169 = arith.constant 1.000000e+00 : f32
    %473 = vector.broadcast %cst_169 : f32 to vector<2x96xf32>
    %474 = arith.addf %473, %472 : vector<2x96xf32>
    %475 = arith.divf %473, %474 : vector<2x96xf32>
    %476 = vector.extract_strided_slice %475 {offsets = [0, 0], sizes = [2, 32], strides = [1, 1]} : vector<2x96xf32> to vector<2x32xf32>
    %477 = vector.extract_strided_slice %475 {offsets = [0, 32], sizes = [2, 32], strides = [1, 1]} : vector<2x96xf32> to vector<2x32xf32>
    %478 = vector.extract_strided_slice %475 {offsets = [0, 64], sizes = [2, 32], strides = [1, 1]} : vector<2x96xf32> to vector<2x32xf32>
    %479 = vector.extract_strided_slice %464 {offsets = [0, 96], sizes = [2, 32], strides = [1, 1]} : vector<2x128xf32> to vector<2x32xf32>
    %480 = math.tanh %479 : vector<2x32xf32>
    %481 = arith.mulf %477, %432 : vector<2x32xf32>
    %482 = arith.mulf %476, %480 : vector<2x32xf32>
    %483 = arith.addf %481, %482 : vector<2x32xf32>
    %484 = math.tanh %483 : vector<2x32xf32>
    %485 = arith.mulf %478, %484 : vector<2x32xf32>
    %486 = vector.extract_strided_slice %469 {offsets = [0, 0], sizes = [2, 96], strides = [1, 1]} : vector<2x128xf32> to vector<2x96xf32>
    %487 = arith.negf %486 : vector<2x96xf32>
    %488 = math.exp %487 : vector<2x96xf32>
    %cst_170 = arith.constant 1.000000e+00 : f32
    %489 = vector.broadcast %cst_170 : f32 to vector<2x96xf32>
    %490 = arith.addf %489, %488 : vector<2x96xf32>
    %491 = arith.divf %489, %490 : vector<2x96xf32>
    %492 = vector.extract_strided_slice %491 {offsets = [0, 0], sizes = [2, 32], strides = [1, 1]} : vector<2x96xf32> to vector<2x32xf32>
    %493 = vector.extract_strided_slice %491 {offsets = [0, 32], sizes = [2, 32], strides = [1, 1]} : vector<2x96xf32> to vector<2x32xf32>
    %494 = vector.extract_strided_slice %491 {offsets = [0, 64], sizes = [2, 32], strides = [1, 1]} : vector<2x96xf32> to vector<2x32xf32>
    %495 = vector.extract_strided_slice %469 {offsets = [0, 96], sizes = [2, 32], strides = [1, 1]} : vector<2x128xf32> to vector<2x32xf32>
    %496 = math.tanh %495 : vector<2x32xf32>
    %497 = arith.mulf %493, %448 : vector<2x32xf32>
    %498 = arith.mulf %492, %496 : vector<2x32xf32>
    %499 = arith.addf %497, %498 : vector<2x32xf32>
    %500 = math.tanh %499 : vector<2x32xf32>
    %501 = arith.mulf %494, %500 : vector<2x32xf32>
    %502 = arith.index_cast %c7_i32 : i32 to index
    %c0_171 = arith.constant 0 : index
    %c0_172 = arith.constant 0 : index
    %503 = vector.load %arg24[%502, %c0_171, %c0_172] : memref<16x2x32xf32, #tpu.memory_space<vmem>>, vector<1x2x32xf32>
    %504 = vector.shape_cast %503 : vector<1x2x32xf32> to vector<2x32xf32>
    %505 = vector.shape_cast %485 : vector<2x32xf32> to vector<1x2x32xf32>
    tpu.vector_store %arg24[%502, %c0_171, %c0_172], %505 {strides = array<i32>} : memref<16x2x32xf32, #tpu.memory_space<vmem>>, vector<1x2x32xf32>,
    %506 = arith.index_cast %459 : i32 to index
    %c0_173 = arith.constant 0 : index
    %c0_174 = arith.constant 0 : index
    %507 = vector.load %arg25[%506, %c0_173, %c0_174] : memref<16x2x32xf32, #tpu.memory_space<vmem>>, vector<1x2x32xf32>
    %508 = vector.shape_cast %507 : vector<1x2x32xf32> to vector<2x32xf32>
    %509 = vector.shape_cast %501 : vector<2x32xf32> to vector<1x2x32xf32>
    tpu.vector_store %arg25[%506, %c0_173, %c0_174], %509 {strides = array<i32>} : memref<16x2x32xf32, #tpu.memory_space<vmem>>, vector<1x2x32xf32>,
    %c8_i32 = arith.constant 8 : i32
    %c15_i32_175 = arith.constant 15 : i32
    %510 = arith.subi %c15_i32_175, %c8_i32 : i32
    %511 = arith.index_cast %c8_i32 : i32 to index
    %c0_176 = arith.constant 0 : index
    %c0_177 = arith.constant 0 : index
    %512 = vector.load %arg22[%511, %c0_176, %c0_177] : memref<16x2x128xf32, #tpu.memory_space<vmem>>, vector<1x2x128xf32>
    %513 = vector.shape_cast %512 : vector<1x2x128xf32> to vector<2x128xf32>
    %cst_178 = arith.constant dense<0.000000e+00> : vector<2x128xf32>
    %514 = tpu.matmul %485, %99, %cst_178 {dimension_numbers = #tpu.dot_dimension_numbers<[1], [0], [0], [1], [0, 0, 1, 1], [], []>} : vector<2x32xf32>, vector<32x128xf32>, vector<2x128xf32> -> vector<2x128xf32>
    %515 = arith.addf %513, %514 : vector<2x128xf32>
    %516 = arith.index_cast %510 : i32 to index
    %c0_179 = arith.constant 0 : index
    %c0_180 = arith.constant 0 : index
    %517 = vector.load %arg23[%516, %c0_179, %c0_180] : memref<16x2x128xf32, #tpu.memory_space<vmem>>, vector<1x2x128xf32>
    %518 = vector.shape_cast %517 : vector<1x2x128xf32> to vector<2x128xf32>
    %cst_181 = arith.constant dense<0.000000e+00> : vector<2x128xf32>
    %519 = tpu.matmul %501, %100, %cst_181 {dimension_numbers = #tpu.dot_dimension_numbers<[1], [0], [0], [1], [0, 0, 1, 1], [], []>} : vector<2x32xf32>, vector<32x128xf32>, vector<2x128xf32> -> vector<2x128xf32>
    %520 = arith.addf %518, %519 : vector<2x128xf32>
    %521 = vector.extract_strided_slice %515 {offsets = [0, 0], sizes = [2, 96], strides = [1, 1]} : vector<2x128xf32> to vector<2x96xf32>
    %522 = arith.negf %521 : vector<2x96xf32>
    %523 = math.exp %522 : vector<2x96xf32>
    %cst_182 = arith.constant 1.000000e+00 : f32
    %524 = vector.broadcast %cst_182 : f32 to vector<2x96xf32>
    %525 = arith.addf %524, %523 : vector<2x96xf32>
    %526 = arith.divf %524, %525 : vector<2x96xf32>
    %527 = vector.extract_strided_slice %526 {offsets = [0, 0], sizes = [2, 32], strides = [1, 1]} : vector<2x96xf32> to vector<2x32xf32>
    %528 = vector.extract_strided_slice %526 {offsets = [0, 32], sizes = [2, 32], strides = [1, 1]} : vector<2x96xf32> to vector<2x32xf32>
    %529 = vector.extract_strided_slice %526 {offsets = [0, 64], sizes = [2, 32], strides = [1, 1]} : vector<2x96xf32> to vector<2x32xf32>
    %530 = vector.extract_strided_slice %515 {offsets = [0, 96], sizes = [2, 32], strides = [1, 1]} : vector<2x128xf32> to vector<2x32xf32>
    %531 = math.tanh %530 : vector<2x32xf32>
    %532 = arith.mulf %528, %483 : vector<2x32xf32>
    %533 = arith.mulf %527, %531 : vector<2x32xf32>
    %534 = arith.addf %532, %533 : vector<2x32xf32>
    %535 = math.tanh %534 : vector<2x32xf32>
    %536 = arith.mulf %529, %535 : vector<2x32xf32>
    %537 = vector.extract_strided_slice %520 {offsets = [0, 0], sizes = [2, 96], strides = [1, 1]} : vector<2x128xf32> to vector<2x96xf32>
    %538 = arith.negf %537 : vector<2x96xf32>
    %539 = math.exp %538 : vector<2x96xf32>
    %cst_183 = arith.constant 1.000000e+00 : f32
    %540 = vector.broadcast %cst_183 : f32 to vector<2x96xf32>
    %541 = arith.addf %540, %539 : vector<2x96xf32>
    %542 = arith.divf %540, %541 : vector<2x96xf32>
    %543 = vector.extract_strided_slice %542 {offsets = [0, 0], sizes = [2, 32], strides = [1, 1]} : vector<2x96xf32> to vector<2x32xf32>
    %544 = vector.extract_strided_slice %542 {offsets = [0, 32], sizes = [2, 32], strides = [1, 1]} : vector<2x96xf32> to vector<2x32xf32>
    %545 = vector.extract_strided_slice %542 {offsets = [0, 64], sizes = [2, 32], strides = [1, 1]} : vector<2x96xf32> to vector<2x32xf32>
    %546 = vector.extract_strided_slice %520 {offsets = [0, 96], sizes = [2, 32], strides = [1, 1]} : vector<2x128xf32> to vector<2x32xf32>
    %547 = math.tanh %546 : vector<2x32xf32>
    %548 = arith.mulf %544, %499 : vector<2x32xf32>
    %549 = arith.mulf %543, %547 : vector<2x32xf32>
    %550 = arith.addf %548, %549 : vector<2x32xf32>
    %551 = math.tanh %550 : vector<2x32xf32>
    %552 = arith.mulf %545, %551 : vector<2x32xf32>
    %553 = arith.index_cast %c8_i32 : i32 to index
    %c0_184 = arith.constant 0 : index
    %c0_185 = arith.constant 0 : index
    %554 = vector.load %arg24[%553, %c0_184, %c0_185] : memref<16x2x32xf32, #tpu.memory_space<vmem>>, vector<1x2x32xf32>
    %555 = vector.shape_cast %554 : vector<1x2x32xf32> to vector<2x32xf32>
    %556 = vector.shape_cast %536 : vector<2x32xf32> to vector<1x2x32xf32>
    tpu.vector_store %arg24[%553, %c0_184, %c0_185], %556 {strides = array<i32>} : memref<16x2x32xf32, #tpu.memory_space<vmem>>, vector<1x2x32xf32>,
    %557 = arith.index_cast %510 : i32 to index
    %c0_186 = arith.constant 0 : index
    %c0_187 = arith.constant 0 : index
    %558 = vector.load %arg25[%557, %c0_186, %c0_187] : memref<16x2x32xf32, #tpu.memory_space<vmem>>, vector<1x2x32xf32>
    %559 = vector.shape_cast %558 : vector<1x2x32xf32> to vector<2x32xf32>
    %560 = vector.shape_cast %552 : vector<2x32xf32> to vector<1x2x32xf32>
    tpu.vector_store %arg25[%557, %c0_186, %c0_187], %560 {strides = array<i32>} : memref<16x2x32xf32, #tpu.memory_space<vmem>>, vector<1x2x32xf32>,
    %c9_i32 = arith.constant 9 : i32
    %c15_i32_188 = arith.constant 15 : i32
    %561 = arith.subi %c15_i32_188, %c9_i32 : i32
    %562 = arith.index_cast %c9_i32 : i32 to index
    %c0_189 = arith.constant 0 : index
    %c0_190 = arith.constant 0 : index
    %563 = vector.load %arg22[%562, %c0_189, %c0_190] : memref<16x2x128xf32, #tpu.memory_space<vmem>>, vector<1x2x128xf32>
    %564 = vector.shape_cast %563 : vector<1x2x128xf32> to vector<2x128xf32>
    %cst_191 = arith.constant dense<0.000000e+00> : vector<2x128xf32>
    %565 = tpu.matmul %536, %99, %cst_191 {dimension_numbers = #tpu.dot_dimension_numbers<[1], [0], [0], [1], [0, 0, 1, 1], [], []>} : vector<2x32xf32>, vector<32x128xf32>, vector<2x128xf32> -> vector<2x128xf32>
    %566 = arith.addf %564, %565 : vector<2x128xf32>
    %567 = arith.index_cast %561 : i32 to index
    %c0_192 = arith.constant 0 : index
    %c0_193 = arith.constant 0 : index
    %568 = vector.load %arg23[%567, %c0_192, %c0_193] : memref<16x2x128xf32, #tpu.memory_space<vmem>>, vector<1x2x128xf32>
    %569 = vector.shape_cast %568 : vector<1x2x128xf32> to vector<2x128xf32>
    %cst_194 = arith.constant dense<0.000000e+00> : vector<2x128xf32>
    %570 = tpu.matmul %552, %100, %cst_194 {dimension_numbers = #tpu.dot_dimension_numbers<[1], [0], [0], [1], [0, 0, 1, 1], [], []>} : vector<2x32xf32>, vector<32x128xf32>, vector<2x128xf32> -> vector<2x128xf32>
    %571 = arith.addf %569, %570 : vector<2x128xf32>
    %572 = vector.extract_strided_slice %566 {offsets = [0, 0], sizes = [2, 96], strides = [1, 1]} : vector<2x128xf32> to vector<2x96xf32>
    %573 = arith.negf %572 : vector<2x96xf32>
    %574 = math.exp %573 : vector<2x96xf32>
    %cst_195 = arith.constant 1.000000e+00 : f32
    %575 = vector.broadcast %cst_195 : f32 to vector<2x96xf32>
    %576 = arith.addf %575, %574 : vector<2x96xf32>
    %577 = arith.divf %575, %576 : vector<2x96xf32>
    %578 = vector.extract_strided_slice %577 {offsets = [0, 0], sizes = [2, 32], strides = [1, 1]} : vector<2x96xf32> to vector<2x32xf32>
    %579 = vector.extract_strided_slice %577 {offsets = [0, 32], sizes = [2, 32], strides = [1, 1]} : vector<2x96xf32> to vector<2x32xf32>
    %580 = vector.extract_strided_slice %577 {offsets = [0, 64], sizes = [2, 32], strides = [1, 1]} : vector<2x96xf32> to vector<2x32xf32>
    %581 = vector.extract_strided_slice %566 {offsets = [0, 96], sizes = [2, 32], strides = [1, 1]} : vector<2x128xf32> to vector<2x32xf32>
    %582 = math.tanh %581 : vector<2x32xf32>
    %583 = arith.mulf %579, %534 : vector<2x32xf32>
    %584 = arith.mulf %578, %582 : vector<2x32xf32>
    %585 = arith.addf %583, %584 : vector<2x32xf32>
    %586 = math.tanh %585 : vector<2x32xf32>
    %587 = arith.mulf %580, %586 : vector<2x32xf32>
    %588 = vector.extract_strided_slice %571 {offsets = [0, 0], sizes = [2, 96], strides = [1, 1]} : vector<2x128xf32> to vector<2x96xf32>
    %589 = arith.negf %588 : vector<2x96xf32>
    %590 = math.exp %589 : vector<2x96xf32>
    %cst_196 = arith.constant 1.000000e+00 : f32
    %591 = vector.broadcast %cst_196 : f32 to vector<2x96xf32>
    %592 = arith.addf %591, %590 : vector<2x96xf32>
    %593 = arith.divf %591, %592 : vector<2x96xf32>
    %594 = vector.extract_strided_slice %593 {offsets = [0, 0], sizes = [2, 32], strides = [1, 1]} : vector<2x96xf32> to vector<2x32xf32>
    %595 = vector.extract_strided_slice %593 {offsets = [0, 32], sizes = [2, 32], strides = [1, 1]} : vector<2x96xf32> to vector<2x32xf32>
    %596 = vector.extract_strided_slice %593 {offsets = [0, 64], sizes = [2, 32], strides = [1, 1]} : vector<2x96xf32> to vector<2x32xf32>
    %597 = vector.extract_strided_slice %571 {offsets = [0, 96], sizes = [2, 32], strides = [1, 1]} : vector<2x128xf32> to vector<2x32xf32>
    %598 = math.tanh %597 : vector<2x32xf32>
    %599 = arith.mulf %595, %550 : vector<2x32xf32>
    %600 = arith.mulf %594, %598 : vector<2x32xf32>
    %601 = arith.addf %599, %600 : vector<2x32xf32>
    %602 = math.tanh %601 : vector<2x32xf32>
    %603 = arith.mulf %596, %602 : vector<2x32xf32>
    %604 = arith.index_cast %c9_i32 : i32 to index
    %c0_197 = arith.constant 0 : index
    %c0_198 = arith.constant 0 : index
    %605 = vector.load %arg24[%604, %c0_197, %c0_198] : memref<16x2x32xf32, #tpu.memory_space<vmem>>, vector<1x2x32xf32>
    %606 = vector.shape_cast %605 : vector<1x2x32xf32> to vector<2x32xf32>
    %607 = vector.shape_cast %587 : vector<2x32xf32> to vector<1x2x32xf32>
    tpu.vector_store %arg24[%604, %c0_197, %c0_198], %607 {strides = array<i32>} : memref<16x2x32xf32, #tpu.memory_space<vmem>>, vector<1x2x32xf32>,
    %608 = arith.index_cast %561 : i32 to index
    %c0_199 = arith.constant 0 : index
    %c0_200 = arith.constant 0 : index
    %609 = vector.load %arg25[%608, %c0_199, %c0_200] : memref<16x2x32xf32, #tpu.memory_space<vmem>>, vector<1x2x32xf32>
    %610 = vector.shape_cast %609 : vector<1x2x32xf32> to vector<2x32xf32>
    %611 = vector.shape_cast %603 : vector<2x32xf32> to vector<1x2x32xf32>
    tpu.vector_store %arg25[%608, %c0_199, %c0_200], %611 {strides = array<i32>} : memref<16x2x32xf32, #tpu.memory_space<vmem>>, vector<1x2x32xf32>,
    %c10_i32 = arith.constant 10 : i32
    %c15_i32_201 = arith.constant 15 : i32
    %612 = arith.subi %c15_i32_201, %c10_i32 : i32
    %613 = arith.index_cast %c10_i32 : i32 to index
    %c0_202 = arith.constant 0 : index
    %c0_203 = arith.constant 0 : index
    %614 = vector.load %arg22[%613, %c0_202, %c0_203] : memref<16x2x128xf32, #tpu.memory_space<vmem>>, vector<1x2x128xf32>
    %615 = vector.shape_cast %614 : vector<1x2x128xf32> to vector<2x128xf32>
    %cst_204 = arith.constant dense<0.000000e+00> : vector<2x128xf32>
    %616 = tpu.matmul %587, %99, %cst_204 {dimension_numbers = #tpu.dot_dimension_numbers<[1], [0], [0], [1], [0, 0, 1, 1], [], []>} : vector<2x32xf32>, vector<32x128xf32>, vector<2x128xf32> -> vector<2x128xf32>
    %617 = arith.addf %615, %616 : vector<2x128xf32>
    %618 = arith.index_cast %612 : i32 to index
    %c0_205 = arith.constant 0 : index
    %c0_206 = arith.constant 0 : index
    %619 = vector.load %arg23[%618, %c0_205, %c0_206] : memref<16x2x128xf32, #tpu.memory_space<vmem>>, vector<1x2x128xf32>
    %620 = vector.shape_cast %619 : vector<1x2x128xf32> to vector<2x128xf32>
    %cst_207 = arith.constant dense<0.000000e+00> : vector<2x128xf32>
    %621 = tpu.matmul %603, %100, %cst_207 {dimension_numbers = #tpu.dot_dimension_numbers<[1], [0], [0], [1], [0, 0, 1, 1], [], []>} : vector<2x32xf32>, vector<32x128xf32>, vector<2x128xf32> -> vector<2x128xf32>
    %622 = arith.addf %620, %621 : vector<2x128xf32>
    %623 = vector.extract_strided_slice %617 {offsets = [0, 0], sizes = [2, 96], strides = [1, 1]} : vector<2x128xf32> to vector<2x96xf32>
    %624 = arith.negf %623 : vector<2x96xf32>
    %625 = math.exp %624 : vector<2x96xf32>
    %cst_208 = arith.constant 1.000000e+00 : f32
    %626 = vector.broadcast %cst_208 : f32 to vector<2x96xf32>
    %627 = arith.addf %626, %625 : vector<2x96xf32>
    %628 = arith.divf %626, %627 : vector<2x96xf32>
    %629 = vector.extract_strided_slice %628 {offsets = [0, 0], sizes = [2, 32], strides = [1, 1]} : vector<2x96xf32> to vector<2x32xf32>
    %630 = vector.extract_strided_slice %628 {offsets = [0, 32], sizes = [2, 32], strides = [1, 1]} : vector<2x96xf32> to vector<2x32xf32>
    %631 = vector.extract_strided_slice %628 {offsets = [0, 64], sizes = [2, 32], strides = [1, 1]} : vector<2x96xf32> to vector<2x32xf32>
    %632 = vector.extract_strided_slice %617 {offsets = [0, 96], sizes = [2, 32], strides = [1, 1]} : vector<2x128xf32> to vector<2x32xf32>
    %633 = math.tanh %632 : vector<2x32xf32>
    %634 = arith.mulf %630, %585 : vector<2x32xf32>
    %635 = arith.mulf %629, %633 : vector<2x32xf32>
    %636 = arith.addf %634, %635 : vector<2x32xf32>
    %637 = math.tanh %636 : vector<2x32xf32>
    %638 = arith.mulf %631, %637 : vector<2x32xf32>
    %639 = vector.extract_strided_slice %622 {offsets = [0, 0], sizes = [2, 96], strides = [1, 1]} : vector<2x128xf32> to vector<2x96xf32>
    %640 = arith.negf %639 : vector<2x96xf32>
    %641 = math.exp %640 : vector<2x96xf32>
    %cst_209 = arith.constant 1.000000e+00 : f32
    %642 = vector.broadcast %cst_209 : f32 to vector<2x96xf32>
    %643 = arith.addf %642, %641 : vector<2x96xf32>
    %644 = arith.divf %642, %643 : vector<2x96xf32>
    %645 = vector.extract_strided_slice %644 {offsets = [0, 0], sizes = [2, 32], strides = [1, 1]} : vector<2x96xf32> to vector<2x32xf32>
    %646 = vector.extract_strided_slice %644 {offsets = [0, 32], sizes = [2, 32], strides = [1, 1]} : vector<2x96xf32> to vector<2x32xf32>
    %647 = vector.extract_strided_slice %644 {offsets = [0, 64], sizes = [2, 32], strides = [1, 1]} : vector<2x96xf32> to vector<2x32xf32>
    %648 = vector.extract_strided_slice %622 {offsets = [0, 96], sizes = [2, 32], strides = [1, 1]} : vector<2x128xf32> to vector<2x32xf32>
    %649 = math.tanh %648 : vector<2x32xf32>
    %650 = arith.mulf %646, %601 : vector<2x32xf32>
    %651 = arith.mulf %645, %649 : vector<2x32xf32>
    %652 = arith.addf %650, %651 : vector<2x32xf32>
    %653 = math.tanh %652 : vector<2x32xf32>
    %654 = arith.mulf %647, %653 : vector<2x32xf32>
    %655 = arith.index_cast %c10_i32 : i32 to index
    %c0_210 = arith.constant 0 : index
    %c0_211 = arith.constant 0 : index
    %656 = vector.load %arg24[%655, %c0_210, %c0_211] : memref<16x2x32xf32, #tpu.memory_space<vmem>>, vector<1x2x32xf32>
    %657 = vector.shape_cast %656 : vector<1x2x32xf32> to vector<2x32xf32>
    %658 = vector.shape_cast %638 : vector<2x32xf32> to vector<1x2x32xf32>
    tpu.vector_store %arg24[%655, %c0_210, %c0_211], %658 {strides = array<i32>} : memref<16x2x32xf32, #tpu.memory_space<vmem>>, vector<1x2x32xf32>,
    %659 = arith.index_cast %612 : i32 to index
    %c0_212 = arith.constant 0 : index
    %c0_213 = arith.constant 0 : index
    %660 = vector.load %arg25[%659, %c0_212, %c0_213] : memref<16x2x32xf32, #tpu.memory_space<vmem>>, vector<1x2x32xf32>
    %661 = vector.shape_cast %660 : vector<1x2x32xf32> to vector<2x32xf32>
    %662 = vector.shape_cast %654 : vector<2x32xf32> to vector<1x2x32xf32>
    tpu.vector_store %arg25[%659, %c0_212, %c0_213], %662 {strides = array<i32>} : memref<16x2x32xf32, #tpu.memory_space<vmem>>, vector<1x2x32xf32>,
    %c11_i32 = arith.constant 11 : i32
    %c15_i32_214 = arith.constant 15 : i32
    %663 = arith.subi %c15_i32_214, %c11_i32 : i32
    %664 = arith.index_cast %c11_i32 : i32 to index
    %c0_215 = arith.constant 0 : index
    %c0_216 = arith.constant 0 : index
    %665 = vector.load %arg22[%664, %c0_215, %c0_216] : memref<16x2x128xf32, #tpu.memory_space<vmem>>, vector<1x2x128xf32>
    %666 = vector.shape_cast %665 : vector<1x2x128xf32> to vector<2x128xf32>
    %cst_217 = arith.constant dense<0.000000e+00> : vector<2x128xf32>
    %667 = tpu.matmul %638, %99, %cst_217 {dimension_numbers = #tpu.dot_dimension_numbers<[1], [0], [0], [1], [0, 0, 1, 1], [], []>} : vector<2x32xf32>, vector<32x128xf32>, vector<2x128xf32> -> vector<2x128xf32>
    %668 = arith.addf %666, %667 : vector<2x128xf32>
    %669 = arith.index_cast %663 : i32 to index
    %c0_218 = arith.constant 0 : index
    %c0_219 = arith.constant 0 : index
    %670 = vector.load %arg23[%669, %c0_218, %c0_219] : memref<16x2x128xf32, #tpu.memory_space<vmem>>, vector<1x2x128xf32>
    %671 = vector.shape_cast %670 : vector<1x2x128xf32> to vector<2x128xf32>
    %cst_220 = arith.constant dense<0.000000e+00> : vector<2x128xf32>
    %672 = tpu.matmul %654, %100, %cst_220 {dimension_numbers = #tpu.dot_dimension_numbers<[1], [0], [0], [1], [0, 0, 1, 1], [], []>} : vector<2x32xf32>, vector<32x128xf32>, vector<2x128xf32> -> vector<2x128xf32>
    %673 = arith.addf %671, %672 : vector<2x128xf32>
    %674 = vector.extract_strided_slice %668 {offsets = [0, 0], sizes = [2, 96], strides = [1, 1]} : vector<2x128xf32> to vector<2x96xf32>
    %675 = arith.negf %674 : vector<2x96xf32>
    %676 = math.exp %675 : vector<2x96xf32>
    %cst_221 = arith.constant 1.000000e+00 : f32
    %677 = vector.broadcast %cst_221 : f32 to vector<2x96xf32>
    %678 = arith.addf %677, %676 : vector<2x96xf32>
    %679 = arith.divf %677, %678 : vector<2x96xf32>
    %680 = vector.extract_strided_slice %679 {offsets = [0, 0], sizes = [2, 32], strides = [1, 1]} : vector<2x96xf32> to vector<2x32xf32>
    %681 = vector.extract_strided_slice %679 {offsets = [0, 32], sizes = [2, 32], strides = [1, 1]} : vector<2x96xf32> to vector<2x32xf32>
    %682 = vector.extract_strided_slice %679 {offsets = [0, 64], sizes = [2, 32], strides = [1, 1]} : vector<2x96xf32> to vector<2x32xf32>
    %683 = vector.extract_strided_slice %668 {offsets = [0, 96], sizes = [2, 32], strides = [1, 1]} : vector<2x128xf32> to vector<2x32xf32>
    %684 = math.tanh %683 : vector<2x32xf32>
    %685 = arith.mulf %681, %636 : vector<2x32xf32>
    %686 = arith.mulf %680, %684 : vector<2x32xf32>
    %687 = arith.addf %685, %686 : vector<2x32xf32>
    %688 = math.tanh %687 : vector<2x32xf32>
    %689 = arith.mulf %682, %688 : vector<2x32xf32>
    %690 = vector.extract_strided_slice %673 {offsets = [0, 0], sizes = [2, 96], strides = [1, 1]} : vector<2x128xf32> to vector<2x96xf32>
    %691 = arith.negf %690 : vector<2x96xf32>
    %692 = math.exp %691 : vector<2x96xf32>
    %cst_222 = arith.constant 1.000000e+00 : f32
    %693 = vector.broadcast %cst_222 : f32 to vector<2x96xf32>
    %694 = arith.addf %693, %692 : vector<2x96xf32>
    %695 = arith.divf %693, %694 : vector<2x96xf32>
    %696 = vector.extract_strided_slice %695 {offsets = [0, 0], sizes = [2, 32], strides = [1, 1]} : vector<2x96xf32> to vector<2x32xf32>
    %697 = vector.extract_strided_slice %695 {offsets = [0, 32], sizes = [2, 32], strides = [1, 1]} : vector<2x96xf32> to vector<2x32xf32>
    %698 = vector.extract_strided_slice %695 {offsets = [0, 64], sizes = [2, 32], strides = [1, 1]} : vector<2x96xf32> to vector<2x32xf32>
    %699 = vector.extract_strided_slice %673 {offsets = [0, 96], sizes = [2, 32], strides = [1, 1]} : vector<2x128xf32> to vector<2x32xf32>
    %700 = math.tanh %699 : vector<2x32xf32>
    %701 = arith.mulf %697, %652 : vector<2x32xf32>
    %702 = arith.mulf %696, %700 : vector<2x32xf32>
    %703 = arith.addf %701, %702 : vector<2x32xf32>
    %704 = math.tanh %703 : vector<2x32xf32>
    %705 = arith.mulf %698, %704 : vector<2x32xf32>
    %706 = arith.index_cast %c11_i32 : i32 to index
    %c0_223 = arith.constant 0 : index
    %c0_224 = arith.constant 0 : index
    %707 = vector.load %arg24[%706, %c0_223, %c0_224] : memref<16x2x32xf32, #tpu.memory_space<vmem>>, vector<1x2x32xf32>
    %708 = vector.shape_cast %707 : vector<1x2x32xf32> to vector<2x32xf32>
    %709 = vector.shape_cast %689 : vector<2x32xf32> to vector<1x2x32xf32>
    tpu.vector_store %arg24[%706, %c0_223, %c0_224], %709 {strides = array<i32>} : memref<16x2x32xf32, #tpu.memory_space<vmem>>, vector<1x2x32xf32>,
    %710 = arith.index_cast %663 : i32 to index
    %c0_225 = arith.constant 0 : index
    %c0_226 = arith.constant 0 : index
    %711 = vector.load %arg25[%710, %c0_225, %c0_226] : memref<16x2x32xf32, #tpu.memory_space<vmem>>, vector<1x2x32xf32>
    %712 = vector.shape_cast %711 : vector<1x2x32xf32> to vector<2x32xf32>
    %713 = vector.shape_cast %705 : vector<2x32xf32> to vector<1x2x32xf32>
    tpu.vector_store %arg25[%710, %c0_225, %c0_226], %713 {strides = array<i32>} : memref<16x2x32xf32, #tpu.memory_space<vmem>>, vector<1x2x32xf32>,
    %c12_i32 = arith.constant 12 : i32
    %c15_i32_227 = arith.constant 15 : i32
    %714 = arith.subi %c15_i32_227, %c12_i32 : i32
    %715 = arith.index_cast %c12_i32 : i32 to index
    %c0_228 = arith.constant 0 : index
    %c0_229 = arith.constant 0 : index
    %716 = vector.load %arg22[%715, %c0_228, %c0_229] : memref<16x2x128xf32, #tpu.memory_space<vmem>>, vector<1x2x128xf32>
    %717 = vector.shape_cast %716 : vector<1x2x128xf32> to vector<2x128xf32>
    %cst_230 = arith.constant dense<0.000000e+00> : vector<2x128xf32>
    %718 = tpu.matmul %689, %99, %cst_230 {dimension_numbers = #tpu.dot_dimension_numbers<[1], [0], [0], [1], [0, 0, 1, 1], [], []>} : vector<2x32xf32>, vector<32x128xf32>, vector<2x128xf32> -> vector<2x128xf32>
    %719 = arith.addf %717, %718 : vector<2x128xf32>
    %720 = arith.index_cast %714 : i32 to index
    %c0_231 = arith.constant 0 : index
    %c0_232 = arith.constant 0 : index
    %721 = vector.load %arg23[%720, %c0_231, %c0_232] : memref<16x2x128xf32, #tpu.memory_space<vmem>>, vector<1x2x128xf32>
    %722 = vector.shape_cast %721 : vector<1x2x128xf32> to vector<2x128xf32>
    %cst_233 = arith.constant dense<0.000000e+00> : vector<2x128xf32>
    %723 = tpu.matmul %705, %100, %cst_233 {dimension_numbers = #tpu.dot_dimension_numbers<[1], [0], [0], [1], [0, 0, 1, 1], [], []>} : vector<2x32xf32>, vector<32x128xf32>, vector<2x128xf32> -> vector<2x128xf32>
    %724 = arith.addf %722, %723 : vector<2x128xf32>
    %725 = vector.extract_strided_slice %719 {offsets = [0, 0], sizes = [2, 96], strides = [1, 1]} : vector<2x128xf32> to vector<2x96xf32>
    %726 = arith.negf %725 : vector<2x96xf32>
    %727 = math.exp %726 : vector<2x96xf32>
    %cst_234 = arith.constant 1.000000e+00 : f32
    %728 = vector.broadcast %cst_234 : f32 to vector<2x96xf32>
    %729 = arith.addf %728, %727 : vector<2x96xf32>
    %730 = arith.divf %728, %729 : vector<2x96xf32>
    %731 = vector.extract_strided_slice %730 {offsets = [0, 0], sizes = [2, 32], strides = [1, 1]} : vector<2x96xf32> to vector<2x32xf32>
    %732 = vector.extract_strided_slice %730 {offsets = [0, 32], sizes = [2, 32], strides = [1, 1]} : vector<2x96xf32> to vector<2x32xf32>
    %733 = vector.extract_strided_slice %730 {offsets = [0, 64], sizes = [2, 32], strides = [1, 1]} : vector<2x96xf32> to vector<2x32xf32>
    %734 = vector.extract_strided_slice %719 {offsets = [0, 96], sizes = [2, 32], strides = [1, 1]} : vector<2x128xf32> to vector<2x32xf32>
    %735 = math.tanh %734 : vector<2x32xf32>
    %736 = arith.mulf %732, %687 : vector<2x32xf32>
    %737 = arith.mulf %731, %735 : vector<2x32xf32>
    %738 = arith.addf %736, %737 : vector<2x32xf32>
    %739 = math.tanh %738 : vector<2x32xf32>
    %740 = arith.mulf %733, %739 : vector<2x32xf32>
    %741 = vector.extract_strided_slice %724 {offsets = [0, 0], sizes = [2, 96], strides = [1, 1]} : vector<2x128xf32> to vector<2x96xf32>
    %742 = arith.negf %741 : vector<2x96xf32>
    %743 = math.exp %742 : vector<2x96xf32>
    %cst_235 = arith.constant 1.000000e+00 : f32
    %744 = vector.broadcast %cst_235 : f32 to vector<2x96xf32>
    %745 = arith.addf %744, %743 : vector<2x96xf32>
    %746 = arith.divf %744, %745 : vector<2x96xf32>
    %747 = vector.extract_strided_slice %746 {offsets = [0, 0], sizes = [2, 32], strides = [1, 1]} : vector<2x96xf32> to vector<2x32xf32>
    %748 = vector.extract_strided_slice %746 {offsets = [0, 32], sizes = [2, 32], strides = [1, 1]} : vector<2x96xf32> to vector<2x32xf32>
    %749 = vector.extract_strided_slice %746 {offsets = [0, 64], sizes = [2, 32], strides = [1, 1]} : vector<2x96xf32> to vector<2x32xf32>
    %750 = vector.extract_strided_slice %724 {offsets = [0, 96], sizes = [2, 32], strides = [1, 1]} : vector<2x128xf32> to vector<2x32xf32>
    %751 = math.tanh %750 : vector<2x32xf32>
    %752 = arith.mulf %748, %703 : vector<2x32xf32>
    %753 = arith.mulf %747, %751 : vector<2x32xf32>
    %754 = arith.addf %752, %753 : vector<2x32xf32>
    %755 = math.tanh %754 : vector<2x32xf32>
    %756 = arith.mulf %749, %755 : vector<2x32xf32>
    %757 = arith.index_cast %c12_i32 : i32 to index
    %c0_236 = arith.constant 0 : index
    %c0_237 = arith.constant 0 : index
    %758 = vector.load %arg24[%757, %c0_236, %c0_237] : memref<16x2x32xf32, #tpu.memory_space<vmem>>, vector<1x2x32xf32>
    %759 = vector.shape_cast %758 : vector<1x2x32xf32> to vector<2x32xf32>
    %760 = vector.shape_cast %740 : vector<2x32xf32> to vector<1x2x32xf32>
    tpu.vector_store %arg24[%757, %c0_236, %c0_237], %760 {strides = array<i32>} : memref<16x2x32xf32, #tpu.memory_space<vmem>>, vector<1x2x32xf32>,
    %761 = arith.index_cast %714 : i32 to index
    %c0_238 = arith.constant 0 : index
    %c0_239 = arith.constant 0 : index
    %762 = vector.load %arg25[%761, %c0_238, %c0_239] : memref<16x2x32xf32, #tpu.memory_space<vmem>>, vector<1x2x32xf32>
    %763 = vector.shape_cast %762 : vector<1x2x32xf32> to vector<2x32xf32>
    %764 = vector.shape_cast %756 : vector<2x32xf32> to vector<1x2x32xf32>
    tpu.vector_store %arg25[%761, %c0_238, %c0_239], %764 {strides = array<i32>} : memref<16x2x32xf32, #tpu.memory_space<vmem>>, vector<1x2x32xf32>,
    %c13_i32 = arith.constant 13 : i32
    %c15_i32_240 = arith.constant 15 : i32
    %765 = arith.subi %c15_i32_240, %c13_i32 : i32
    %766 = arith.index_cast %c13_i32 : i32 to index
    %c0_241 = arith.constant 0 : index
    %c0_242 = arith.constant 0 : index
    %767 = vector.load %arg22[%766, %c0_241, %c0_242] : memref<16x2x128xf32, #tpu.memory_space<vmem>>, vector<1x2x128xf32>
    %768 = vector.shape_cast %767 : vector<1x2x128xf32> to vector<2x128xf32>
    %cst_243 = arith.constant dense<0.000000e+00> : vector<2x128xf32>
    %769 = tpu.matmul %740, %99, %cst_243 {dimension_numbers = #tpu.dot_dimension_numbers<[1], [0], [0], [1], [0, 0, 1, 1], [], []>} : vector<2x32xf32>, vector<32x128xf32>, vector<2x128xf32> -> vector<2x128xf32>
    %770 = arith.addf %768, %769 : vector<2x128xf32>
    %771 = arith.index_cast %765 : i32 to index
    %c0_244 = arith.constant 0 : index
    %c0_245 = arith.constant 0 : index
    %772 = vector.load %arg23[%771, %c0_244, %c0_245] : memref<16x2x128xf32, #tpu.memory_space<vmem>>, vector<1x2x128xf32>
    %773 = vector.shape_cast %772 : vector<1x2x128xf32> to vector<2x128xf32>
    %cst_246 = arith.constant dense<0.000000e+00> : vector<2x128xf32>
    %774 = tpu.matmul %756, %100, %cst_246 {dimension_numbers = #tpu.dot_dimension_numbers<[1], [0], [0], [1], [0, 0, 1, 1], [], []>} : vector<2x32xf32>, vector<32x128xf32>, vector<2x128xf32> -> vector<2x128xf32>
    %775 = arith.addf %773, %774 : vector<2x128xf32>
    %776 = vector.extract_strided_slice %770 {offsets = [0, 0], sizes = [2, 96], strides = [1, 1]} : vector<2x128xf32> to vector<2x96xf32>
    %777 = arith.negf %776 : vector<2x96xf32>
    %778 = math.exp %777 : vector<2x96xf32>
    %cst_247 = arith.constant 1.000000e+00 : f32
    %779 = vector.broadcast %cst_247 : f32 to vector<2x96xf32>
    %780 = arith.addf %779, %778 : vector<2x96xf32>
    %781 = arith.divf %779, %780 : vector<2x96xf32>
    %782 = vector.extract_strided_slice %781 {offsets = [0, 0], sizes = [2, 32], strides = [1, 1]} : vector<2x96xf32> to vector<2x32xf32>
    %783 = vector.extract_strided_slice %781 {offsets = [0, 32], sizes = [2, 32], strides = [1, 1]} : vector<2x96xf32> to vector<2x32xf32>
    %784 = vector.extract_strided_slice %781 {offsets = [0, 64], sizes = [2, 32], strides = [1, 1]} : vector<2x96xf32> to vector<2x32xf32>
    %785 = vector.extract_strided_slice %770 {offsets = [0, 96], sizes = [2, 32], strides = [1, 1]} : vector<2x128xf32> to vector<2x32xf32>
    %786 = math.tanh %785 : vector<2x32xf32>
    %787 = arith.mulf %783, %738 : vector<2x32xf32>
    %788 = arith.mulf %782, %786 : vector<2x32xf32>
    %789 = arith.addf %787, %788 : vector<2x32xf32>
    %790 = math.tanh %789 : vector<2x32xf32>
    %791 = arith.mulf %784, %790 : vector<2x32xf32>
    %792 = vector.extract_strided_slice %775 {offsets = [0, 0], sizes = [2, 96], strides = [1, 1]} : vector<2x128xf32> to vector<2x96xf32>
    %793 = arith.negf %792 : vector<2x96xf32>
    %794 = math.exp %793 : vector<2x96xf32>
    %cst_248 = arith.constant 1.000000e+00 : f32
    %795 = vector.broadcast %cst_248 : f32 to vector<2x96xf32>
    %796 = arith.addf %795, %794 : vector<2x96xf32>
    %797 = arith.divf %795, %796 : vector<2x96xf32>
    %798 = vector.extract_strided_slice %797 {offsets = [0, 0], sizes = [2, 32], strides = [1, 1]} : vector<2x96xf32> to vector<2x32xf32>
    %799 = vector.extract_strided_slice %797 {offsets = [0, 32], sizes = [2, 32], strides = [1, 1]} : vector<2x96xf32> to vector<2x32xf32>
    %800 = vector.extract_strided_slice %797 {offsets = [0, 64], sizes = [2, 32], strides = [1, 1]} : vector<2x96xf32> to vector<2x32xf32>
    %801 = vector.extract_strided_slice %775 {offsets = [0, 96], sizes = [2, 32], strides = [1, 1]} : vector<2x128xf32> to vector<2x32xf32>
    %802 = math.tanh %801 : vector<2x32xf32>
    %803 = arith.mulf %799, %754 : vector<2x32xf32>
    %804 = arith.mulf %798, %802 : vector<2x32xf32>
    %805 = arith.addf %803, %804 : vector<2x32xf32>
    %806 = math.tanh %805 : vector<2x32xf32>
    %807 = arith.mulf %800, %806 : vector<2x32xf32>
    %808 = arith.index_cast %c13_i32 : i32 to index
    %c0_249 = arith.constant 0 : index
    %c0_250 = arith.constant 0 : index
    %809 = vector.load %arg24[%808, %c0_249, %c0_250] : memref<16x2x32xf32, #tpu.memory_space<vmem>>, vector<1x2x32xf32>
    %810 = vector.shape_cast %809 : vector<1x2x32xf32> to vector<2x32xf32>
    %811 = vector.shape_cast %791 : vector<2x32xf32> to vector<1x2x32xf32>
    tpu.vector_store %arg24[%808, %c0_249, %c0_250], %811 {strides = array<i32>} : memref<16x2x32xf32, #tpu.memory_space<vmem>>, vector<1x2x32xf32>,
    %812 = arith.index_cast %765 : i32 to index
    %c0_251 = arith.constant 0 : index
    %c0_252 = arith.constant 0 : index
    %813 = vector.load %arg25[%812, %c0_251, %c0_252] : memref<16x2x32xf32, #tpu.memory_space<vmem>>, vector<1x2x32xf32>
    %814 = vector.shape_cast %813 : vector<1x2x32xf32> to vector<2x32xf32>
    %815 = vector.shape_cast %807 : vector<2x32xf32> to vector<1x2x32xf32>
    tpu.vector_store %arg25[%812, %c0_251, %c0_252], %815 {strides = array<i32>} : memref<16x2x32xf32, #tpu.memory_space<vmem>>, vector<1x2x32xf32>,
    %c14_i32 = arith.constant 14 : i32
    %c15_i32_253 = arith.constant 15 : i32
    %816 = arith.subi %c15_i32_253, %c14_i32 : i32
    %817 = arith.index_cast %c14_i32 : i32 to index
    %c0_254 = arith.constant 0 : index
    %c0_255 = arith.constant 0 : index
    %818 = vector.load %arg22[%817, %c0_254, %c0_255] : memref<16x2x128xf32, #tpu.memory_space<vmem>>, vector<1x2x128xf32>
    %819 = vector.shape_cast %818 : vector<1x2x128xf32> to vector<2x128xf32>
    %cst_256 = arith.constant dense<0.000000e+00> : vector<2x128xf32>
    %820 = tpu.matmul %791, %99, %cst_256 {dimension_numbers = #tpu.dot_dimension_numbers<[1], [0], [0], [1], [0, 0, 1, 1], [], []>} : vector<2x32xf32>, vector<32x128xf32>, vector<2x128xf32> -> vector<2x128xf32>
    %821 = arith.addf %819, %820 : vector<2x128xf32>
    %822 = arith.index_cast %816 : i32 to index
    %c0_257 = arith.constant 0 : index
    %c0_258 = arith.constant 0 : index
    %823 = vector.load %arg23[%822, %c0_257, %c0_258] : memref<16x2x128xf32, #tpu.memory_space<vmem>>, vector<1x2x128xf32>
    %824 = vector.shape_cast %823 : vector<1x2x128xf32> to vector<2x128xf32>
    %cst_259 = arith.constant dense<0.000000e+00> : vector<2x128xf32>
    %825 = tpu.matmul %807, %100, %cst_259 {dimension_numbers = #tpu.dot_dimension_numbers<[1], [0], [0], [1], [0, 0, 1, 1], [], []>} : vector<2x32xf32>, vector<32x128xf32>, vector<2x128xf32> -> vector<2x128xf32>
    %826 = arith.addf %824, %825 : vector<2x128xf32>
    %827 = vector.extract_strided_slice %821 {offsets = [0, 0], sizes = [2, 96], strides = [1, 1]} : vector<2x128xf32> to vector<2x96xf32>
    %828 = arith.negf %827 : vector<2x96xf32>
    %829 = math.exp %828 : vector<2x96xf32>
    %cst_260 = arith.constant 1.000000e+00 : f32
    %830 = vector.broadcast %cst_260 : f32 to vector<2x96xf32>
    %831 = arith.addf %830, %829 : vector<2x96xf32>
    %832 = arith.divf %830, %831 : vector<2x96xf32>
    %833 = vector.extract_strided_slice %832 {offsets = [0, 0], sizes = [2, 32], strides = [1, 1]} : vector<2x96xf32> to vector<2x32xf32>
    %834 = vector.extract_strided_slice %832 {offsets = [0, 32], sizes = [2, 32], strides = [1, 1]} : vector<2x96xf32> to vector<2x32xf32>
    %835 = vector.extract_strided_slice %832 {offsets = [0, 64], sizes = [2, 32], strides = [1, 1]} : vector<2x96xf32> to vector<2x32xf32>
    %836 = vector.extract_strided_slice %821 {offsets = [0, 96], sizes = [2, 32], strides = [1, 1]} : vector<2x128xf32> to vector<2x32xf32>
    %837 = math.tanh %836 : vector<2x32xf32>
    %838 = arith.mulf %834, %789 : vector<2x32xf32>
    %839 = arith.mulf %833, %837 : vector<2x32xf32>
    %840 = arith.addf %838, %839 : vector<2x32xf32>
    %841 = math.tanh %840 : vector<2x32xf32>
    %842 = arith.mulf %835, %841 : vector<2x32xf32>
    %843 = vector.extract_strided_slice %826 {offsets = [0, 0], sizes = [2, 96], strides = [1, 1]} : vector<2x128xf32> to vector<2x96xf32>
    %844 = arith.negf %843 : vector<2x96xf32>
    %845 = math.exp %844 : vector<2x96xf32>
    %cst_261 = arith.constant 1.000000e+00 : f32
    %846 = vector.broadcast %cst_261 : f32 to vector<2x96xf32>
    %847 = arith.addf %846, %845 : vector<2x96xf32>
    %848 = arith.divf %846, %847 : vector<2x96xf32>
    %849 = vector.extract_strided_slice %848 {offsets = [0, 0], sizes = [2, 32], strides = [1, 1]} : vector<2x96xf32> to vector<2x32xf32>
    %850 = vector.extract_strided_slice %848 {offsets = [0, 32], sizes = [2, 32], strides = [1, 1]} : vector<2x96xf32> to vector<2x32xf32>
    %851 = vector.extract_strided_slice %848 {offsets = [0, 64], sizes = [2, 32], strides = [1, 1]} : vector<2x96xf32> to vector<2x32xf32>
    %852 = vector.extract_strided_slice %826 {offsets = [0, 96], sizes = [2, 32], strides = [1, 1]} : vector<2x128xf32> to vector<2x32xf32>
    %853 = math.tanh %852 : vector<2x32xf32>
    %854 = arith.mulf %850, %805 : vector<2x32xf32>
    %855 = arith.mulf %849, %853 : vector<2x32xf32>
    %856 = arith.addf %854, %855 : vector<2x32xf32>
    %857 = math.tanh %856 : vector<2x32xf32>
    %858 = arith.mulf %851, %857 : vector<2x32xf32>
    %859 = arith.index_cast %c14_i32 : i32 to index
    %c0_262 = arith.constant 0 : index
    %c0_263 = arith.constant 0 : index
    %860 = vector.load %arg24[%859, %c0_262, %c0_263] : memref<16x2x32xf32, #tpu.memory_space<vmem>>, vector<1x2x32xf32>
    %861 = vector.shape_cast %860 : vector<1x2x32xf32> to vector<2x32xf32>
    %862 = vector.shape_cast %842 : vector<2x32xf32> to vector<1x2x32xf32>
    tpu.vector_store %arg24[%859, %c0_262, %c0_263], %862 {strides = array<i32>} : memref<16x2x32xf32, #tpu.memory_space<vmem>>, vector<1x2x32xf32>,
    %863 = arith.index_cast %816 : i32 to index
    %c0_264 = arith.constant 0 : index
    %c0_265 = arith.constant 0 : index
    %864 = vector.load %arg25[%863, %c0_264, %c0_265] : memref<16x2x32xf32, #tpu.memory_space<vmem>>, vector<1x2x32xf32>
    %865 = vector.shape_cast %864 : vector<1x2x32xf32> to vector<2x32xf32>
    %866 = vector.shape_cast %858 : vector<2x32xf32> to vector<1x2x32xf32>
    tpu.vector_store %arg25[%863, %c0_264, %c0_265], %866 {strides = array<i32>} : memref<16x2x32xf32, #tpu.memory_space<vmem>>, vector<1x2x32xf32>,
    %c15_i32_266 = arith.constant 15 : i32
    %c15_i32_267 = arith.constant 15 : i32
    %867 = arith.subi %c15_i32_267, %c15_i32_266 : i32
    %868 = arith.index_cast %c15_i32_266 : i32 to index
    %c0_268 = arith.constant 0 : index
    %c0_269 = arith.constant 0 : index
    %869 = vector.load %arg22[%868, %c0_268, %c0_269] : memref<16x2x128xf32, #tpu.memory_space<vmem>>, vector<1x2x128xf32>
    %870 = vector.shape_cast %869 : vector<1x2x128xf32> to vector<2x128xf32>
    %cst_270 = arith.constant dense<0.000000e+00> : vector<2x128xf32>
    %871 = tpu.matmul %842, %99, %cst_270 {dimension_numbers = #tpu.dot_dimension_numbers<[1], [0], [0], [1], [0, 0, 1, 1], [], []>} : vector<2x32xf32>, vector<32x128xf32>, vector<2x128xf32> -> vector<2x128xf32>
    %872 = arith.addf %870, %871 : vector<2x128xf32>
    %873 = arith.index_cast %867 : i32 to index
    %c0_271 = arith.constant 0 : index
    %c0_272 = arith.constant 0 : index
    %874 = vector.load %arg23[%873, %c0_271, %c0_272] : memref<16x2x128xf32, #tpu.memory_space<vmem>>, vector<1x2x128xf32>
    %875 = vector.shape_cast %874 : vector<1x2x128xf32> to vector<2x128xf32>
    %cst_273 = arith.constant dense<0.000000e+00> : vector<2x128xf32>
    %876 = tpu.matmul %858, %100, %cst_273 {dimension_numbers = #tpu.dot_dimension_numbers<[1], [0], [0], [1], [0, 0, 1, 1], [], []>} : vector<2x32xf32>, vector<32x128xf32>, vector<2x128xf32> -> vector<2x128xf32>
    %877 = arith.addf %875, %876 : vector<2x128xf32>
    %878 = vector.extract_strided_slice %872 {offsets = [0, 0], sizes = [2, 96], strides = [1, 1]} : vector<2x128xf32> to vector<2x96xf32>
    %879 = arith.negf %878 : vector<2x96xf32>
    %880 = math.exp %879 : vector<2x96xf32>
    %cst_274 = arith.constant 1.000000e+00 : f32
    %881 = vector.broadcast %cst_274 : f32 to vector<2x96xf32>
    %882 = arith.addf %881, %880 : vector<2x96xf32>
    %883 = arith.divf %881, %882 : vector<2x96xf32>
    %884 = vector.extract_strided_slice %883 {offsets = [0, 0], sizes = [2, 32], strides = [1, 1]} : vector<2x96xf32> to vector<2x32xf32>
    %885 = vector.extract_strided_slice %883 {offsets = [0, 32], sizes = [2, 32], strides = [1, 1]} : vector<2x96xf32> to vector<2x32xf32>
    %886 = vector.extract_strided_slice %883 {offsets = [0, 64], sizes = [2, 32], strides = [1, 1]} : vector<2x96xf32> to vector<2x32xf32>
    %887 = vector.extract_strided_slice %872 {offsets = [0, 96], sizes = [2, 32], strides = [1, 1]} : vector<2x128xf32> to vector<2x32xf32>
    %888 = math.tanh %887 : vector<2x32xf32>
    %889 = arith.mulf %885, %840 : vector<2x32xf32>
    %890 = arith.mulf %884, %888 : vector<2x32xf32>
    %891 = arith.addf %889, %890 : vector<2x32xf32>
    %892 = math.tanh %891 : vector<2x32xf32>
    %893 = arith.mulf %886, %892 : vector<2x32xf32>
    %894 = vector.extract_strided_slice %877 {offsets = [0, 0], sizes = [2, 96], strides = [1, 1]} : vector<2x128xf32> to vector<2x96xf32>
    %895 = arith.negf %894 : vector<2x96xf32>
    %896 = math.exp %895 : vector<2x96xf32>
    %cst_275 = arith.constant 1.000000e+00 : f32
    %897 = vector.broadcast %cst_275 : f32 to vector<2x96xf32>
    %898 = arith.addf %897, %896 : vector<2x96xf32>
    %899 = arith.divf %897, %898 : vector<2x96xf32>
    %900 = vector.extract_strided_slice %899 {offsets = [0, 0], sizes = [2, 32], strides = [1, 1]} : vector<2x96xf32> to vector<2x32xf32>
    %901 = vector.extract_strided_slice %899 {offsets = [0, 32], sizes = [2, 32], strides = [1, 1]} : vector<2x96xf32> to vector<2x32xf32>
    %902 = vector.extract_strided_slice %899 {offsets = [0, 64], sizes = [2, 32], strides = [1, 1]} : vector<2x96xf32> to vector<2x32xf32>
    %903 = vector.extract_strided_slice %877 {offsets = [0, 96], sizes = [2, 32], strides = [1, 1]} : vector<2x128xf32> to vector<2x32xf32>
    %904 = math.tanh %903 : vector<2x32xf32>
    %905 = arith.mulf %901, %856 : vector<2x32xf32>
    %906 = arith.mulf %900, %904 : vector<2x32xf32>
    %907 = arith.addf %905, %906 : vector<2x32xf32>
    %908 = math.tanh %907 : vector<2x32xf32>
    %909 = arith.mulf %902, %908 : vector<2x32xf32>
    %910 = arith.index_cast %c15_i32_266 : i32 to index
    %c0_276 = arith.constant 0 : index
    %c0_277 = arith.constant 0 : index
    %911 = vector.load %arg24[%910, %c0_276, %c0_277] : memref<16x2x32xf32, #tpu.memory_space<vmem>>, vector<1x2x32xf32>
    %912 = vector.shape_cast %911 : vector<1x2x32xf32> to vector<2x32xf32>
    %913 = vector.shape_cast %893 : vector<2x32xf32> to vector<1x2x32xf32>
    tpu.vector_store %arg24[%910, %c0_276, %c0_277], %913 {strides = array<i32>} : memref<16x2x32xf32, #tpu.memory_space<vmem>>, vector<1x2x32xf32>,
    %914 = arith.index_cast %867 : i32 to index
    %c0_278 = arith.constant 0 : index
    %c0_279 = arith.constant 0 : index
    %915 = vector.load %arg25[%914, %c0_278, %c0_279] : memref<16x2x32xf32, #tpu.memory_space<vmem>>, vector<1x2x32xf32>
    %916 = vector.shape_cast %915 : vector<1x2x32xf32> to vector<2x32xf32>
    %917 = vector.shape_cast %909 : vector<2x32xf32> to vector<1x2x32xf32>
    tpu.vector_store %arg25[%914, %c0_278, %c0_279], %917 {strides = array<i32>} : memref<16x2x32xf32, #tpu.memory_space<vmem>>, vector<1x2x32xf32>,
    %c16_i32 = arith.constant 16 : i32
    %c0_280 = arith.constant 0 : index
    %c0_281 = arith.constant 0 : index
    %918 = vector.load %arg10[%c0_280, %c0_281] : memref<32x128xf32, #tpu.memory_space<vmem>>, vector<32x128xf32>
    %c0_282 = arith.constant 0 : index
    %c0_283 = arith.constant 0 : index
    %919 = vector.load %arg13[%c0_282, %c0_283] : memref<32x128xf32, #tpu.memory_space<vmem>>, vector<32x128xf32>
    %c0_284 = arith.constant 0 : index
    %c0_285 = arith.constant 0 : index
    %920 = vector.load %arg9[%c0_284, %c0_285] : memref<64x128xf32, #tpu.memory_space<vmem>>, vector<64x128xf32>
    %c0_286 = arith.constant 0 : index
    %c0_287 = arith.constant 0 : index
    %921 = vector.load %arg11[%c0_286, %c0_287] : memref<1x128xf32, #tpu.memory_space<vmem>>, vector<1x128xf32>
    %c0_288 = arith.constant 0 : index
    %c0_289 = arith.constant 0 : index
    %922 = vector.load %arg12[%c0_288, %c0_289] : memref<64x128xf32, #tpu.memory_space<vmem>>, vector<64x128xf32>
    %c0_290 = arith.constant 0 : index
    %c0_291 = arith.constant 0 : index
    %923 = vector.load %arg14[%c0_290, %c0_291] : memref<1x128xf32, #tpu.memory_space<vmem>>, vector<1x128xf32>
    %c0_292 = arith.constant 0 : index
    %c0_293 = arith.constant 0 : index
    %c0_294 = arith.constant 0 : index
    %924 = vector.load %arg24[%c0_292, %c0_293, %c0_294] : memref<16x2x32xf32, #tpu.memory_space<vmem>>, vector<16x1x32xf32>
    %925 = vector.shape_cast %924 : vector<16x1x32xf32> to vector<16x32xf32>
    %c0_295 = arith.constant 0 : index
    %c0_296 = arith.constant 0 : index
    %c0_297 = arith.constant 0 : index
    %926 = vector.load %arg25[%c0_295, %c0_296, %c0_297] : memref<16x2x32xf32, #tpu.memory_space<vmem>>, vector<16x1x32xf32>
    %927 = vector.shape_cast %926 : vector<16x1x32xf32> to vector<16x32xf32>
    %928 = vector.extract_strided_slice %920 {offsets = [0, 0], sizes = [32, 128], strides = [1, 1]} : vector<64x128xf32> to vector<32x128xf32>
    %cst_298 = arith.constant dense<0.000000e+00> : vector<16x128xf32>
    %929 = tpu.matmul %925, %928, %cst_298 {dimension_numbers = #tpu.dot_dimension_numbers<[1], [0], [0], [1], [0, 0, 1, 1], [], []>} : vector<16x32xf32>, vector<32x128xf32>, vector<16x128xf32> -> vector<16x128xf32>
    %930 = vector.extract_strided_slice %920 {offsets = [32, 0], sizes = [32, 128], strides = [1, 1]} : vector<64x128xf32> to vector<32x128xf32>
    %cst_299 = arith.constant dense<0.000000e+00> : vector<16x128xf32>
    %931 = tpu.matmul %927, %930, %cst_299 {dimension_numbers = #tpu.dot_dimension_numbers<[1], [0], [0], [1], [0, 0, 1, 1], [], []>} : vector<16x32xf32>, vector<32x128xf32>, vector<16x128xf32> -> vector<16x128xf32>
    %932 = arith.addf %929, %931 : vector<16x128xf32>
    %933 = vector.broadcast %921 : vector<1x128xf32> to vector<16x128xf32>
    %934 = arith.addf %932, %933 : vector<16x128xf32>
    %c0_300 = arith.constant 0 : index
    %c0_301 = arith.constant 0 : index
    %c0_302 = arith.constant 0 : index
    %935 = vector.load %arg22[%c0_300, %c0_301, %c0_302] : memref<16x2x128xf32, #tpu.memory_space<vmem>>, vector<16x1x128xf32>
    %936 = vector.shape_cast %935 : vector<16x1x128xf32> to vector<16x128xf32>
    %937 = vector.shape_cast %934 : vector<16x128xf32> to vector<16x1x128xf32>
    tpu.vector_store %arg22[%c0_300, %c0_301, %c0_302], %937 {strides = array<i32>} : memref<16x2x128xf32, #tpu.memory_space<vmem>>, vector<16x1x128xf32>,
    %938 = vector.extract_strided_slice %922 {offsets = [0, 0], sizes = [32, 128], strides = [1, 1]} : vector<64x128xf32> to vector<32x128xf32>
    %cst_303 = arith.constant dense<0.000000e+00> : vector<16x128xf32>
    %939 = tpu.matmul %925, %938, %cst_303 {dimension_numbers = #tpu.dot_dimension_numbers<[1], [0], [0], [1], [0, 0, 1, 1], [], []>} : vector<16x32xf32>, vector<32x128xf32>, vector<16x128xf32> -> vector<16x128xf32>
    %940 = vector.extract_strided_slice %922 {offsets = [32, 0], sizes = [32, 128], strides = [1, 1]} : vector<64x128xf32> to vector<32x128xf32>
    %cst_304 = arith.constant dense<0.000000e+00> : vector<16x128xf32>
    %941 = tpu.matmul %927, %940, %cst_304 {dimension_numbers = #tpu.dot_dimension_numbers<[1], [0], [0], [1], [0, 0, 1, 1], [], []>} : vector<16x32xf32>, vector<32x128xf32>, vector<16x128xf32> -> vector<16x128xf32>
    %942 = arith.addf %939, %941 : vector<16x128xf32>
    %943 = vector.broadcast %923 : vector<1x128xf32> to vector<16x128xf32>
    %944 = arith.addf %942, %943 : vector<16x128xf32>
    %c0_305 = arith.constant 0 : index
    %c0_306 = arith.constant 0 : index
    %c0_307 = arith.constant 0 : index
    %945 = vector.load %arg23[%c0_305, %c0_306, %c0_307] : memref<16x2x128xf32, #tpu.memory_space<vmem>>, vector<16x1x128xf32>
    %946 = vector.shape_cast %945 : vector<16x1x128xf32> to vector<16x128xf32>
    %947 = vector.shape_cast %944 : vector<16x128xf32> to vector<16x1x128xf32>
    tpu.vector_store %arg23[%c0_305, %c0_306, %c0_307], %947 {strides = array<i32>} : memref<16x2x128xf32, #tpu.memory_space<vmem>>, vector<16x1x128xf32>,
    %c0_308 = arith.constant 0 : index
    %c1_309 = arith.constant 1 : index
    %c0_310 = arith.constant 0 : index
    %948 = vector.load %arg24[%c0_308, %c1_309, %c0_310] : memref<16x2x32xf32, #tpu.memory_space<vmem>>, vector<16x1x32xf32>
    %949 = vector.shape_cast %948 : vector<16x1x32xf32> to vector<16x32xf32>
    %c0_311 = arith.constant 0 : index
    %c1_312 = arith.constant 1 : index
    %c0_313 = arith.constant 0 : index
    %950 = vector.load %arg25[%c0_311, %c1_312, %c0_313] : memref<16x2x32xf32, #tpu.memory_space<vmem>>, vector<16x1x32xf32>
    %951 = vector.shape_cast %950 : vector<16x1x32xf32> to vector<16x32xf32>
    %952 = vector.extract_strided_slice %920 {offsets = [0, 0], sizes = [32, 128], strides = [1, 1]} : vector<64x128xf32> to vector<32x128xf32>
    %cst_314 = arith.constant dense<0.000000e+00> : vector<16x128xf32>
    %953 = tpu.matmul %949, %952, %cst_314 {dimension_numbers = #tpu.dot_dimension_numbers<[1], [0], [0], [1], [0, 0, 1, 1], [], []>} : vector<16x32xf32>, vector<32x128xf32>, vector<16x128xf32> -> vector<16x128xf32>
    %954 = vector.extract_strided_slice %920 {offsets = [32, 0], sizes = [32, 128], strides = [1, 1]} : vector<64x128xf32> to vector<32x128xf32>
    %cst_315 = arith.constant dense<0.000000e+00> : vector<16x128xf32>
    %955 = tpu.matmul %951, %954, %cst_315 {dimension_numbers = #tpu.dot_dimension_numbers<[1], [0], [0], [1], [0, 0, 1, 1], [], []>} : vector<16x32xf32>, vector<32x128xf32>, vector<16x128xf32> -> vector<16x128xf32>
    %956 = arith.addf %953, %955 : vector<16x128xf32>
    %957 = vector.broadcast %921 : vector<1x128xf32> to vector<16x128xf32>
    %958 = arith.addf %956, %957 : vector<16x128xf32>
    %c0_316 = arith.constant 0 : index
    %c1_317 = arith.constant 1 : index
    %c0_318 = arith.constant 0 : index
    %959 = vector.load %arg22[%c0_316, %c1_317, %c0_318] : memref<16x2x128xf32, #tpu.memory_space<vmem>>, vector<16x1x128xf32>
    %960 = vector.shape_cast %959 : vector<16x1x128xf32> to vector<16x128xf32>
    %961 = vector.shape_cast %958 : vector<16x128xf32> to vector<16x1x128xf32>
    tpu.vector_store %arg22[%c0_316, %c1_317, %c0_318], %961 {strides = array<i32>} : memref<16x2x128xf32, #tpu.memory_space<vmem>>, vector<16x1x128xf32>,
    %962 = vector.extract_strided_slice %922 {offsets = [0, 0], sizes = [32, 128], strides = [1, 1]} : vector<64x128xf32> to vector<32x128xf32>
    %cst_319 = arith.constant dense<0.000000e+00> : vector<16x128xf32>
    %963 = tpu.matmul %949, %962, %cst_319 {dimension_numbers = #tpu.dot_dimension_numbers<[1], [0], [0], [1], [0, 0, 1, 1], [], []>} : vector<16x32xf32>, vector<32x128xf32>, vector<16x128xf32> -> vector<16x128xf32>
    %964 = vector.extract_strided_slice %922 {offsets = [32, 0], sizes = [32, 128], strides = [1, 1]} : vector<64x128xf32> to vector<32x128xf32>
    %cst_320 = arith.constant dense<0.000000e+00> : vector<16x128xf32>
    %965 = tpu.matmul %951, %964, %cst_320 {dimension_numbers = #tpu.dot_dimension_numbers<[1], [0], [0], [1], [0, 0, 1, 1], [], []>} : vector<16x32xf32>, vector<32x128xf32>, vector<16x128xf32> -> vector<16x128xf32>
    %966 = arith.addf %963, %965 : vector<16x128xf32>
    %967 = vector.broadcast %923 : vector<1x128xf32> to vector<16x128xf32>
    %968 = arith.addf %966, %967 : vector<16x128xf32>
    %c0_321 = arith.constant 0 : index
    %c1_322 = arith.constant 1 : index
    %c0_323 = arith.constant 0 : index
    %969 = vector.load %arg23[%c0_321, %c1_322, %c0_323] : memref<16x2x128xf32, #tpu.memory_space<vmem>>, vector<16x1x128xf32>
    %970 = vector.shape_cast %969 : vector<16x1x128xf32> to vector<16x128xf32>
    %971 = vector.shape_cast %968 : vector<16x128xf32> to vector<16x1x128xf32>
    tpu.vector_store %arg23[%c0_321, %c1_322, %c0_323], %971 {strides = array<i32>} : memref<16x2x128xf32, #tpu.memory_space<vmem>>, vector<16x1x128xf32>,
    %cst_324 = arith.constant 0.000000e+00 : f32
    %972 = vector.broadcast %cst_324 : f32 to vector<2x32xf32>
    %c0_i32_325 = arith.constant 0 : i32
    %c15_i32_326 = arith.constant 15 : i32
    %973 = arith.subi %c15_i32_326, %c0_i32_325 : i32
    %974 = arith.index_cast %c0_i32_325 : i32 to index
    %c0_327 = arith.constant 0 : index
    %c0_328 = arith.constant 0 : index
    %975 = vector.load %arg22[%974, %c0_327, %c0_328] : memref<16x2x128xf32, #tpu.memory_space<vmem>>, vector<1x2x128xf32>
    %976 = vector.shape_cast %975 : vector<1x2x128xf32> to vector<2x128xf32>
    %cst_329 = arith.constant dense<0.000000e+00> : vector<2x128xf32>
    %977 = tpu.matmul %972, %918, %cst_329 {dimension_numbers = #tpu.dot_dimension_numbers<[1], [0], [0], [1], [0, 0, 1, 1], [], []>} : vector<2x32xf32>, vector<32x128xf32>, vector<2x128xf32> -> vector<2x128xf32>
    %978 = arith.addf %976, %977 : vector<2x128xf32>
    %979 = arith.index_cast %973 : i32 to index
    %c0_330 = arith.constant 0 : index
    %c0_331 = arith.constant 0 : index
    %980 = vector.load %arg23[%979, %c0_330, %c0_331] : memref<16x2x128xf32, #tpu.memory_space<vmem>>, vector<1x2x128xf32>
    %981 = vector.shape_cast %980 : vector<1x2x128xf32> to vector<2x128xf32>
    %cst_332 = arith.constant dense<0.000000e+00> : vector<2x128xf32>
    %982 = tpu.matmul %972, %919, %cst_332 {dimension_numbers = #tpu.dot_dimension_numbers<[1], [0], [0], [1], [0, 0, 1, 1], [], []>} : vector<2x32xf32>, vector<32x128xf32>, vector<2x128xf32> -> vector<2x128xf32>
    %983 = arith.addf %981, %982 : vector<2x128xf32>
    %984 = vector.extract_strided_slice %978 {offsets = [0, 0], sizes = [2, 96], strides = [1, 1]} : vector<2x128xf32> to vector<2x96xf32>
    %985 = arith.negf %984 : vector<2x96xf32>
    %986 = math.exp %985 : vector<2x96xf32>
    %cst_333 = arith.constant 1.000000e+00 : f32
    %987 = vector.broadcast %cst_333 : f32 to vector<2x96xf32>
    %988 = arith.addf %987, %986 : vector<2x96xf32>
    %989 = arith.divf %987, %988 : vector<2x96xf32>
    %990 = vector.extract_strided_slice %989 {offsets = [0, 0], sizes = [2, 32], strides = [1, 1]} : vector<2x96xf32> to vector<2x32xf32>
    %991 = vector.extract_strided_slice %989 {offsets = [0, 32], sizes = [2, 32], strides = [1, 1]} : vector<2x96xf32> to vector<2x32xf32>
    %992 = vector.extract_strided_slice %989 {offsets = [0, 64], sizes = [2, 32], strides = [1, 1]} : vector<2x96xf32> to vector<2x32xf32>
    %993 = vector.extract_strided_slice %978 {offsets = [0, 96], sizes = [2, 32], strides = [1, 1]} : vector<2x128xf32> to vector<2x32xf32>
    %994 = math.tanh %993 : vector<2x32xf32>
    %995 = arith.mulf %991, %972 : vector<2x32xf32>
    %996 = arith.mulf %990, %994 : vector<2x32xf32>
    %997 = arith.addf %995, %996 : vector<2x32xf32>
    %998 = math.tanh %997 : vector<2x32xf32>
    %999 = arith.mulf %992, %998 : vector<2x32xf32>
    %1000 = vector.extract_strided_slice %983 {offsets = [0, 0], sizes = [2, 96], strides = [1, 1]} : vector<2x128xf32> to vector<2x96xf32>
    %1001 = arith.negf %1000 : vector<2x96xf32>
    %1002 = math.exp %1001 : vector<2x96xf32>
    %cst_334 = arith.constant 1.000000e+00 : f32
    %1003 = vector.broadcast %cst_334 : f32 to vector<2x96xf32>
    %1004 = arith.addf %1003, %1002 : vector<2x96xf32>
    %1005 = arith.divf %1003, %1004 : vector<2x96xf32>
    %1006 = vector.extract_strided_slice %1005 {offsets = [0, 0], sizes = [2, 32], strides = [1, 1]} : vector<2x96xf32> to vector<2x32xf32>
    %1007 = vector.extract_strided_slice %1005 {offsets = [0, 32], sizes = [2, 32], strides = [1, 1]} : vector<2x96xf32> to vector<2x32xf32>
    %1008 = vector.extract_strided_slice %1005 {offsets = [0, 64], sizes = [2, 32], strides = [1, 1]} : vector<2x96xf32> to vector<2x32xf32>
    %1009 = vector.extract_strided_slice %983 {offsets = [0, 96], sizes = [2, 32], strides = [1, 1]} : vector<2x128xf32> to vector<2x32xf32>
    %1010 = math.tanh %1009 : vector<2x32xf32>
    %1011 = arith.mulf %1007, %972 : vector<2x32xf32>
    %1012 = arith.mulf %1006, %1010 : vector<2x32xf32>
    %1013 = arith.addf %1011, %1012 : vector<2x32xf32>
    %1014 = math.tanh %1013 : vector<2x32xf32>
    %1015 = arith.mulf %1008, %1014 : vector<2x32xf32>
    %1016 = arith.index_cast %c0_i32_325 : i32 to index
    %c0_335 = arith.constant 0 : index
    %c0_336 = arith.constant 0 : index
    %1017 = vector.load %arg24[%1016, %c0_335, %c0_336] : memref<16x2x32xf32, #tpu.memory_space<vmem>>, vector<1x2x32xf32>
    %1018 = vector.shape_cast %1017 : vector<1x2x32xf32> to vector<2x32xf32>
    %1019 = vector.shape_cast %999 : vector<2x32xf32> to vector<1x2x32xf32>
    tpu.vector_store %arg24[%1016, %c0_335, %c0_336], %1019 {strides = array<i32>} : memref<16x2x32xf32, #tpu.memory_space<vmem>>, vector<1x2x32xf32>,
    %1020 = arith.index_cast %973 : i32 to index
    %c0_337 = arith.constant 0 : index
    %c0_338 = arith.constant 0 : index
    %1021 = vector.load %arg25[%1020, %c0_337, %c0_338] : memref<16x2x32xf32, #tpu.memory_space<vmem>>, vector<1x2x32xf32>
    %1022 = vector.shape_cast %1021 : vector<1x2x32xf32> to vector<2x32xf32>
    %1023 = vector.shape_cast %1015 : vector<2x32xf32> to vector<1x2x32xf32>
    tpu.vector_store %arg25[%1020, %c0_337, %c0_338], %1023 {strides = array<i32>} : memref<16x2x32xf32, #tpu.memory_space<vmem>>, vector<1x2x32xf32>,
    %c1_i32_339 = arith.constant 1 : i32
    %c15_i32_340 = arith.constant 15 : i32
    %1024 = arith.subi %c15_i32_340, %c1_i32_339 : i32
    %1025 = arith.index_cast %c1_i32_339 : i32 to index
    %c0_341 = arith.constant 0 : index
    %c0_342 = arith.constant 0 : index
    %1026 = vector.load %arg22[%1025, %c0_341, %c0_342] : memref<16x2x128xf32, #tpu.memory_space<vmem>>, vector<1x2x128xf32>
    %1027 = vector.shape_cast %1026 : vector<1x2x128xf32> to vector<2x128xf32>
    %cst_343 = arith.constant dense<0.000000e+00> : vector<2x128xf32>
    %1028 = tpu.matmul %999, %918, %cst_343 {dimension_numbers = #tpu.dot_dimension_numbers<[1], [0], [0], [1], [0, 0, 1, 1], [], []>} : vector<2x32xf32>, vector<32x128xf32>, vector<2x128xf32> -> vector<2x128xf32>
    %1029 = arith.addf %1027, %1028 : vector<2x128xf32>
    %1030 = arith.index_cast %1024 : i32 to index
    %c0_344 = arith.constant 0 : index
    %c0_345 = arith.constant 0 : index
    %1031 = vector.load %arg23[%1030, %c0_344, %c0_345] : memref<16x2x128xf32, #tpu.memory_space<vmem>>, vector<1x2x128xf32>
    %1032 = vector.shape_cast %1031 : vector<1x2x128xf32> to vector<2x128xf32>
    %cst_346 = arith.constant dense<0.000000e+00> : vector<2x128xf32>
    %1033 = tpu.matmul %1015, %919, %cst_346 {dimension_numbers = #tpu.dot_dimension_numbers<[1], [0], [0], [1], [0, 0, 1, 1], [], []>} : vector<2x32xf32>, vector<32x128xf32>, vector<2x128xf32> -> vector<2x128xf32>
    %1034 = arith.addf %1032, %1033 : vector<2x128xf32>
    %1035 = vector.extract_strided_slice %1029 {offsets = [0, 0], sizes = [2, 96], strides = [1, 1]} : vector<2x128xf32> to vector<2x96xf32>
    %1036 = arith.negf %1035 : vector<2x96xf32>
    %1037 = math.exp %1036 : vector<2x96xf32>
    %cst_347 = arith.constant 1.000000e+00 : f32
    %1038 = vector.broadcast %cst_347 : f32 to vector<2x96xf32>
    %1039 = arith.addf %1038, %1037 : vector<2x96xf32>
    %1040 = arith.divf %1038, %1039 : vector<2x96xf32>
    %1041 = vector.extract_strided_slice %1040 {offsets = [0, 0], sizes = [2, 32], strides = [1, 1]} : vector<2x96xf32> to vector<2x32xf32>
    %1042 = vector.extract_strided_slice %1040 {offsets = [0, 32], sizes = [2, 32], strides = [1, 1]} : vector<2x96xf32> to vector<2x32xf32>
    %1043 = vector.extract_strided_slice %1040 {offsets = [0, 64], sizes = [2, 32], strides = [1, 1]} : vector<2x96xf32> to vector<2x32xf32>
    %1044 = vector.extract_strided_slice %1029 {offsets = [0, 96], sizes = [2, 32], strides = [1, 1]} : vector<2x128xf32> to vector<2x32xf32>
    %1045 = math.tanh %1044 : vector<2x32xf32>
    %1046 = arith.mulf %1042, %997 : vector<2x32xf32>
    %1047 = arith.mulf %1041, %1045 : vector<2x32xf32>
    %1048 = arith.addf %1046, %1047 : vector<2x32xf32>
    %1049 = math.tanh %1048 : vector<2x32xf32>
    %1050 = arith.mulf %1043, %1049 : vector<2x32xf32>
    %1051 = vector.extract_strided_slice %1034 {offsets = [0, 0], sizes = [2, 96], strides = [1, 1]} : vector<2x128xf32> to vector<2x96xf32>
    %1052 = arith.negf %1051 : vector<2x96xf32>
    %1053 = math.exp %1052 : vector<2x96xf32>
    %cst_348 = arith.constant 1.000000e+00 : f32
    %1054 = vector.broadcast %cst_348 : f32 to vector<2x96xf32>
    %1055 = arith.addf %1054, %1053 : vector<2x96xf32>
    %1056 = arith.divf %1054, %1055 : vector<2x96xf32>
    %1057 = vector.extract_strided_slice %1056 {offsets = [0, 0], sizes = [2, 32], strides = [1, 1]} : vector<2x96xf32> to vector<2x32xf32>
    %1058 = vector.extract_strided_slice %1056 {offsets = [0, 32], sizes = [2, 32], strides = [1, 1]} : vector<2x96xf32> to vector<2x32xf32>
    %1059 = vector.extract_strided_slice %1056 {offsets = [0, 64], sizes = [2, 32], strides = [1, 1]} : vector<2x96xf32> to vector<2x32xf32>
    %1060 = vector.extract_strided_slice %1034 {offsets = [0, 96], sizes = [2, 32], strides = [1, 1]} : vector<2x128xf32> to vector<2x32xf32>
    %1061 = math.tanh %1060 : vector<2x32xf32>
    %1062 = arith.mulf %1058, %1013 : vector<2x32xf32>
    %1063 = arith.mulf %1057, %1061 : vector<2x32xf32>
    %1064 = arith.addf %1062, %1063 : vector<2x32xf32>
    %1065 = math.tanh %1064 : vector<2x32xf32>
    %1066 = arith.mulf %1059, %1065 : vector<2x32xf32>
    %1067 = arith.index_cast %c1_i32_339 : i32 to index
    %c0_349 = arith.constant 0 : index
    %c0_350 = arith.constant 0 : index
    %1068 = vector.load %arg24[%1067, %c0_349, %c0_350] : memref<16x2x32xf32, #tpu.memory_space<vmem>>, vector<1x2x32xf32>
    %1069 = vector.shape_cast %1068 : vector<1x2x32xf32> to vector<2x32xf32>
    %1070 = vector.shape_cast %1050 : vector<2x32xf32> to vector<1x2x32xf32>
    tpu.vector_store %arg24[%1067, %c0_349, %c0_350], %1070 {strides = array<i32>} : memref<16x2x32xf32, #tpu.memory_space<vmem>>, vector<1x2x32xf32>,
    %1071 = arith.index_cast %1024 : i32 to index
    %c0_351 = arith.constant 0 : index
    %c0_352 = arith.constant 0 : index
    %1072 = vector.load %arg25[%1071, %c0_351, %c0_352] : memref<16x2x32xf32, #tpu.memory_space<vmem>>, vector<1x2x32xf32>
    %1073 = vector.shape_cast %1072 : vector<1x2x32xf32> to vector<2x32xf32>
    %1074 = vector.shape_cast %1066 : vector<2x32xf32> to vector<1x2x32xf32>
    tpu.vector_store %arg25[%1071, %c0_351, %c0_352], %1074 {strides = array<i32>} : memref<16x2x32xf32, #tpu.memory_space<vmem>>, vector<1x2x32xf32>,
    %c2_i32_353 = arith.constant 2 : i32
    %c15_i32_354 = arith.constant 15 : i32
    %1075 = arith.subi %c15_i32_354, %c2_i32_353 : i32
    %1076 = arith.index_cast %c2_i32_353 : i32 to index
    %c0_355 = arith.constant 0 : index
    %c0_356 = arith.constant 0 : index
    %1077 = vector.load %arg22[%1076, %c0_355, %c0_356] : memref<16x2x128xf32, #tpu.memory_space<vmem>>, vector<1x2x128xf32>
    %1078 = vector.shape_cast %1077 : vector<1x2x128xf32> to vector<2x128xf32>
    %cst_357 = arith.constant dense<0.000000e+00> : vector<2x128xf32>
    %1079 = tpu.matmul %1050, %918, %cst_357 {dimension_numbers = #tpu.dot_dimension_numbers<[1], [0], [0], [1], [0, 0, 1, 1], [], []>} : vector<2x32xf32>, vector<32x128xf32>, vector<2x128xf32> -> vector<2x128xf32>
    %1080 = arith.addf %1078, %1079 : vector<2x128xf32>
    %1081 = arith.index_cast %1075 : i32 to index
    %c0_358 = arith.constant 0 : index
    %c0_359 = arith.constant 0 : index
    %1082 = vector.load %arg23[%1081, %c0_358, %c0_359] : memref<16x2x128xf32, #tpu.memory_space<vmem>>, vector<1x2x128xf32>
    %1083 = vector.shape_cast %1082 : vector<1x2x128xf32> to vector<2x128xf32>
    %cst_360 = arith.constant dense<0.000000e+00> : vector<2x128xf32>
    %1084 = tpu.matmul %1066, %919, %cst_360 {dimension_numbers = #tpu.dot_dimension_numbers<[1], [0], [0], [1], [0, 0, 1, 1], [], []>} : vector<2x32xf32>, vector<32x128xf32>, vector<2x128xf32> -> vector<2x128xf32>
    %1085 = arith.addf %1083, %1084 : vector<2x128xf32>
    %1086 = vector.extract_strided_slice %1080 {offsets = [0, 0], sizes = [2, 96], strides = [1, 1]} : vector<2x128xf32> to vector<2x96xf32>
    %1087 = arith.negf %1086 : vector<2x96xf32>
    %1088 = math.exp %1087 : vector<2x96xf32>
    %cst_361 = arith.constant 1.000000e+00 : f32
    %1089 = vector.broadcast %cst_361 : f32 to vector<2x96xf32>
    %1090 = arith.addf %1089, %1088 : vector<2x96xf32>
    %1091 = arith.divf %1089, %1090 : vector<2x96xf32>
    %1092 = vector.extract_strided_slice %1091 {offsets = [0, 0], sizes = [2, 32], strides = [1, 1]} : vector<2x96xf32> to vector<2x32xf32>
    %1093 = vector.extract_strided_slice %1091 {offsets = [0, 32], sizes = [2, 32], strides = [1, 1]} : vector<2x96xf32> to vector<2x32xf32>
    %1094 = vector.extract_strided_slice %1091 {offsets = [0, 64], sizes = [2, 32], strides = [1, 1]} : vector<2x96xf32> to vector<2x32xf32>
    %1095 = vector.extract_strided_slice %1080 {offsets = [0, 96], sizes = [2, 32], strides = [1, 1]} : vector<2x128xf32> to vector<2x32xf32>
    %1096 = math.tanh %1095 : vector<2x32xf32>
    %1097 = arith.mulf %1093, %1048 : vector<2x32xf32>
    %1098 = arith.mulf %1092, %1096 : vector<2x32xf32>
    %1099 = arith.addf %1097, %1098 : vector<2x32xf32>
    %1100 = math.tanh %1099 : vector<2x32xf32>
    %1101 = arith.mulf %1094, %1100 : vector<2x32xf32>
    %1102 = vector.extract_strided_slice %1085 {offsets = [0, 0], sizes = [2, 96], strides = [1, 1]} : vector<2x128xf32> to vector<2x96xf32>
    %1103 = arith.negf %1102 : vector<2x96xf32>
    %1104 = math.exp %1103 : vector<2x96xf32>
    %cst_362 = arith.constant 1.000000e+00 : f32
    %1105 = vector.broadcast %cst_362 : f32 to vector<2x96xf32>
    %1106 = arith.addf %1105, %1104 : vector<2x96xf32>
    %1107 = arith.divf %1105, %1106 : vector<2x96xf32>
    %1108 = vector.extract_strided_slice %1107 {offsets = [0, 0], sizes = [2, 32], strides = [1, 1]} : vector<2x96xf32> to vector<2x32xf32>
    %1109 = vector.extract_strided_slice %1107 {offsets = [0, 32], sizes = [2, 32], strides = [1, 1]} : vector<2x96xf32> to vector<2x32xf32>
    %1110 = vector.extract_strided_slice %1107 {offsets = [0, 64], sizes = [2, 32], strides = [1, 1]} : vector<2x96xf32> to vector<2x32xf32>
    %1111 = vector.extract_strided_slice %1085 {offsets = [0, 96], sizes = [2, 32], strides = [1, 1]} : vector<2x128xf32> to vector<2x32xf32>
    %1112 = math.tanh %1111 : vector<2x32xf32>
    %1113 = arith.mulf %1109, %1064 : vector<2x32xf32>
    %1114 = arith.mulf %1108, %1112 : vector<2x32xf32>
    %1115 = arith.addf %1113, %1114 : vector<2x32xf32>
    %1116 = math.tanh %1115 : vector<2x32xf32>
    %1117 = arith.mulf %1110, %1116 : vector<2x32xf32>
    %1118 = arith.index_cast %c2_i32_353 : i32 to index
    %c0_363 = arith.constant 0 : index
    %c0_364 = arith.constant 0 : index
    %1119 = vector.load %arg24[%1118, %c0_363, %c0_364] : memref<16x2x32xf32, #tpu.memory_space<vmem>>, vector<1x2x32xf32>
    %1120 = vector.shape_cast %1119 : vector<1x2x32xf32> to vector<2x32xf32>
    %1121 = vector.shape_cast %1101 : vector<2x32xf32> to vector<1x2x32xf32>
    tpu.vector_store %arg24[%1118, %c0_363, %c0_364], %1121 {strides = array<i32>} : memref<16x2x32xf32, #tpu.memory_space<vmem>>, vector<1x2x32xf32>,
    %1122 = arith.index_cast %1075 : i32 to index
    %c0_365 = arith.constant 0 : index
    %c0_366 = arith.constant 0 : index
    %1123 = vector.load %arg25[%1122, %c0_365, %c0_366] : memref<16x2x32xf32, #tpu.memory_space<vmem>>, vector<1x2x32xf32>
    %1124 = vector.shape_cast %1123 : vector<1x2x32xf32> to vector<2x32xf32>
    %1125 = vector.shape_cast %1117 : vector<2x32xf32> to vector<1x2x32xf32>
    tpu.vector_store %arg25[%1122, %c0_365, %c0_366], %1125 {strides = array<i32>} : memref<16x2x32xf32, #tpu.memory_space<vmem>>, vector<1x2x32xf32>,
    %c3_i32_367 = arith.constant 3 : i32
    %c15_i32_368 = arith.constant 15 : i32
    %1126 = arith.subi %c15_i32_368, %c3_i32_367 : i32
    %1127 = arith.index_cast %c3_i32_367 : i32 to index
    %c0_369 = arith.constant 0 : index
    %c0_370 = arith.constant 0 : index
    %1128 = vector.load %arg22[%1127, %c0_369, %c0_370] : memref<16x2x128xf32, #tpu.memory_space<vmem>>, vector<1x2x128xf32>
    %1129 = vector.shape_cast %1128 : vector<1x2x128xf32> to vector<2x128xf32>
    %cst_371 = arith.constant dense<0.000000e+00> : vector<2x128xf32>
    %1130 = tpu.matmul %1101, %918, %cst_371 {dimension_numbers = #tpu.dot_dimension_numbers<[1], [0], [0], [1], [0, 0, 1, 1], [], []>} : vector<2x32xf32>, vector<32x128xf32>, vector<2x128xf32> -> vector<2x128xf32>
    %1131 = arith.addf %1129, %1130 : vector<2x128xf32>
    %1132 = arith.index_cast %1126 : i32 to index
    %c0_372 = arith.constant 0 : index
    %c0_373 = arith.constant 0 : index
    %1133 = vector.load %arg23[%1132, %c0_372, %c0_373] : memref<16x2x128xf32, #tpu.memory_space<vmem>>, vector<1x2x128xf32>
    %1134 = vector.shape_cast %1133 : vector<1x2x128xf32> to vector<2x128xf32>
    %cst_374 = arith.constant dense<0.000000e+00> : vector<2x128xf32>
    %1135 = tpu.matmul %1117, %919, %cst_374 {dimension_numbers = #tpu.dot_dimension_numbers<[1], [0], [0], [1], [0, 0, 1, 1], [], []>} : vector<2x32xf32>, vector<32x128xf32>, vector<2x128xf32> -> vector<2x128xf32>
    %1136 = arith.addf %1134, %1135 : vector<2x128xf32>
    %1137 = vector.extract_strided_slice %1131 {offsets = [0, 0], sizes = [2, 96], strides = [1, 1]} : vector<2x128xf32> to vector<2x96xf32>
    %1138 = arith.negf %1137 : vector<2x96xf32>
    %1139 = math.exp %1138 : vector<2x96xf32>
    %cst_375 = arith.constant 1.000000e+00 : f32
    %1140 = vector.broadcast %cst_375 : f32 to vector<2x96xf32>
    %1141 = arith.addf %1140, %1139 : vector<2x96xf32>
    %1142 = arith.divf %1140, %1141 : vector<2x96xf32>
    %1143 = vector.extract_strided_slice %1142 {offsets = [0, 0], sizes = [2, 32], strides = [1, 1]} : vector<2x96xf32> to vector<2x32xf32>
    %1144 = vector.extract_strided_slice %1142 {offsets = [0, 32], sizes = [2, 32], strides = [1, 1]} : vector<2x96xf32> to vector<2x32xf32>
    %1145 = vector.extract_strided_slice %1142 {offsets = [0, 64], sizes = [2, 32], strides = [1, 1]} : vector<2x96xf32> to vector<2x32xf32>
    %1146 = vector.extract_strided_slice %1131 {offsets = [0, 96], sizes = [2, 32], strides = [1, 1]} : vector<2x128xf32> to vector<2x32xf32>
    %1147 = math.tanh %1146 : vector<2x32xf32>
    %1148 = arith.mulf %1144, %1099 : vector<2x32xf32>
    %1149 = arith.mulf %1143, %1147 : vector<2x32xf32>
    %1150 = arith.addf %1148, %1149 : vector<2x32xf32>
    %1151 = math.tanh %1150 : vector<2x32xf32>
    %1152 = arith.mulf %1145, %1151 : vector<2x32xf32>
    %1153 = vector.extract_strided_slice %1136 {offsets = [0, 0], sizes = [2, 96], strides = [1, 1]} : vector<2x128xf32> to vector<2x96xf32>
    %1154 = arith.negf %1153 : vector<2x96xf32>
    %1155 = math.exp %1154 : vector<2x96xf32>
    %cst_376 = arith.constant 1.000000e+00 : f32
    %1156 = vector.broadcast %cst_376 : f32 to vector<2x96xf32>
    %1157 = arith.addf %1156, %1155 : vector<2x96xf32>
    %1158 = arith.divf %1156, %1157 : vector<2x96xf32>
    %1159 = vector.extract_strided_slice %1158 {offsets = [0, 0], sizes = [2, 32], strides = [1, 1]} : vector<2x96xf32> to vector<2x32xf32>
    %1160 = vector.extract_strided_slice %1158 {offsets = [0, 32], sizes = [2, 32], strides = [1, 1]} : vector<2x96xf32> to vector<2x32xf32>
    %1161 = vector.extract_strided_slice %1158 {offsets = [0, 64], sizes = [2, 32], strides = [1, 1]} : vector<2x96xf32> to vector<2x32xf32>
    %1162 = vector.extract_strided_slice %1136 {offsets = [0, 96], sizes = [2, 32], strides = [1, 1]} : vector<2x128xf32> to vector<2x32xf32>
    %1163 = math.tanh %1162 : vector<2x32xf32>
    %1164 = arith.mulf %1160, %1115 : vector<2x32xf32>
    %1165 = arith.mulf %1159, %1163 : vector<2x32xf32>
    %1166 = arith.addf %1164, %1165 : vector<2x32xf32>
    %1167 = math.tanh %1166 : vector<2x32xf32>
    %1168 = arith.mulf %1161, %1167 : vector<2x32xf32>
    %1169 = arith.index_cast %c3_i32_367 : i32 to index
    %c0_377 = arith.constant 0 : index
    %c0_378 = arith.constant 0 : index
    %1170 = vector.load %arg24[%1169, %c0_377, %c0_378] : memref<16x2x32xf32, #tpu.memory_space<vmem>>, vector<1x2x32xf32>
    %1171 = vector.shape_cast %1170 : vector<1x2x32xf32> to vector<2x32xf32>
    %1172 = vector.shape_cast %1152 : vector<2x32xf32> to vector<1x2x32xf32>
    tpu.vector_store %arg24[%1169, %c0_377, %c0_378], %1172 {strides = array<i32>} : memref<16x2x32xf32, #tpu.memory_space<vmem>>, vector<1x2x32xf32>,
    %1173 = arith.index_cast %1126 : i32 to index
    %c0_379 = arith.constant 0 : index
    %c0_380 = arith.constant 0 : index
    %1174 = vector.load %arg25[%1173, %c0_379, %c0_380] : memref<16x2x32xf32, #tpu.memory_space<vmem>>, vector<1x2x32xf32>
    %1175 = vector.shape_cast %1174 : vector<1x2x32xf32> to vector<2x32xf32>
    %1176 = vector.shape_cast %1168 : vector<2x32xf32> to vector<1x2x32xf32>
    tpu.vector_store %arg25[%1173, %c0_379, %c0_380], %1176 {strides = array<i32>} : memref<16x2x32xf32, #tpu.memory_space<vmem>>, vector<1x2x32xf32>,
    %c4_i32_381 = arith.constant 4 : i32
    %c15_i32_382 = arith.constant 15 : i32
    %1177 = arith.subi %c15_i32_382, %c4_i32_381 : i32
    %1178 = arith.index_cast %c4_i32_381 : i32 to index
    %c0_383 = arith.constant 0 : index
    %c0_384 = arith.constant 0 : index
    %1179 = vector.load %arg22[%1178, %c0_383, %c0_384] : memref<16x2x128xf32, #tpu.memory_space<vmem>>, vector<1x2x128xf32>
    %1180 = vector.shape_cast %1179 : vector<1x2x128xf32> to vector<2x128xf32>
    %cst_385 = arith.constant dense<0.000000e+00> : vector<2x128xf32>
    %1181 = tpu.matmul %1152, %918, %cst_385 {dimension_numbers = #tpu.dot_dimension_numbers<[1], [0], [0], [1], [0, 0, 1, 1], [], []>} : vector<2x32xf32>, vector<32x128xf32>, vector<2x128xf32> -> vector<2x128xf32>
    %1182 = arith.addf %1180, %1181 : vector<2x128xf32>
    %1183 = arith.index_cast %1177 : i32 to index
    %c0_386 = arith.constant 0 : index
    %c0_387 = arith.constant 0 : index
    %1184 = vector.load %arg23[%1183, %c0_386, %c0_387] : memref<16x2x128xf32, #tpu.memory_space<vmem>>, vector<1x2x128xf32>
    %1185 = vector.shape_cast %1184 : vector<1x2x128xf32> to vector<2x128xf32>
    %cst_388 = arith.constant dense<0.000000e+00> : vector<2x128xf32>
    %1186 = tpu.matmul %1168, %919, %cst_388 {dimension_numbers = #tpu.dot_dimension_numbers<[1], [0], [0], [1], [0, 0, 1, 1], [], []>} : vector<2x32xf32>, vector<32x128xf32>, vector<2x128xf32> -> vector<2x128xf32>
    %1187 = arith.addf %1185, %1186 : vector<2x128xf32>
    %1188 = vector.extract_strided_slice %1182 {offsets = [0, 0], sizes = [2, 96], strides = [1, 1]} : vector<2x128xf32> to vector<2x96xf32>
    %1189 = arith.negf %1188 : vector<2x96xf32>
    %1190 = math.exp %1189 : vector<2x96xf32>
    %cst_389 = arith.constant 1.000000e+00 : f32
    %1191 = vector.broadcast %cst_389 : f32 to vector<2x96xf32>
    %1192 = arith.addf %1191, %1190 : vector<2x96xf32>
    %1193 = arith.divf %1191, %1192 : vector<2x96xf32>
    %1194 = vector.extract_strided_slice %1193 {offsets = [0, 0], sizes = [2, 32], strides = [1, 1]} : vector<2x96xf32> to vector<2x32xf32>
    %1195 = vector.extract_strided_slice %1193 {offsets = [0, 32], sizes = [2, 32], strides = [1, 1]} : vector<2x96xf32> to vector<2x32xf32>
    %1196 = vector.extract_strided_slice %1193 {offsets = [0, 64], sizes = [2, 32], strides = [1, 1]} : vector<2x96xf32> to vector<2x32xf32>
    %1197 = vector.extract_strided_slice %1182 {offsets = [0, 96], sizes = [2, 32], strides = [1, 1]} : vector<2x128xf32> to vector<2x32xf32>
    %1198 = math.tanh %1197 : vector<2x32xf32>
    %1199 = arith.mulf %1195, %1150 : vector<2x32xf32>
    %1200 = arith.mulf %1194, %1198 : vector<2x32xf32>
    %1201 = arith.addf %1199, %1200 : vector<2x32xf32>
    %1202 = math.tanh %1201 : vector<2x32xf32>
    %1203 = arith.mulf %1196, %1202 : vector<2x32xf32>
    %1204 = vector.extract_strided_slice %1187 {offsets = [0, 0], sizes = [2, 96], strides = [1, 1]} : vector<2x128xf32> to vector<2x96xf32>
    %1205 = arith.negf %1204 : vector<2x96xf32>
    %1206 = math.exp %1205 : vector<2x96xf32>
    %cst_390 = arith.constant 1.000000e+00 : f32
    %1207 = vector.broadcast %cst_390 : f32 to vector<2x96xf32>
    %1208 = arith.addf %1207, %1206 : vector<2x96xf32>
    %1209 = arith.divf %1207, %1208 : vector<2x96xf32>
    %1210 = vector.extract_strided_slice %1209 {offsets = [0, 0], sizes = [2, 32], strides = [1, 1]} : vector<2x96xf32> to vector<2x32xf32>
    %1211 = vector.extract_strided_slice %1209 {offsets = [0, 32], sizes = [2, 32], strides = [1, 1]} : vector<2x96xf32> to vector<2x32xf32>
    %1212 = vector.extract_strided_slice %1209 {offsets = [0, 64], sizes = [2, 32], strides = [1, 1]} : vector<2x96xf32> to vector<2x32xf32>
    %1213 = vector.extract_strided_slice %1187 {offsets = [0, 96], sizes = [2, 32], strides = [1, 1]} : vector<2x128xf32> to vector<2x32xf32>
    %1214 = math.tanh %1213 : vector<2x32xf32>
    %1215 = arith.mulf %1211, %1166 : vector<2x32xf32>
    %1216 = arith.mulf %1210, %1214 : vector<2x32xf32>
    %1217 = arith.addf %1215, %1216 : vector<2x32xf32>
    %1218 = math.tanh %1217 : vector<2x32xf32>
    %1219 = arith.mulf %1212, %1218 : vector<2x32xf32>
    %1220 = arith.index_cast %c4_i32_381 : i32 to index
    %c0_391 = arith.constant 0 : index
    %c0_392 = arith.constant 0 : index
    %1221 = vector.load %arg24[%1220, %c0_391, %c0_392] : memref<16x2x32xf32, #tpu.memory_space<vmem>>, vector<1x2x32xf32>
    %1222 = vector.shape_cast %1221 : vector<1x2x32xf32> to vector<2x32xf32>
    %1223 = vector.shape_cast %1203 : vector<2x32xf32> to vector<1x2x32xf32>
    tpu.vector_store %arg24[%1220, %c0_391, %c0_392], %1223 {strides = array<i32>} : memref<16x2x32xf32, #tpu.memory_space<vmem>>, vector<1x2x32xf32>,
    %1224 = arith.index_cast %1177 : i32 to index
    %c0_393 = arith.constant 0 : index
    %c0_394 = arith.constant 0 : index
    %1225 = vector.load %arg25[%1224, %c0_393, %c0_394] : memref<16x2x32xf32, #tpu.memory_space<vmem>>, vector<1x2x32xf32>
    %1226 = vector.shape_cast %1225 : vector<1x2x32xf32> to vector<2x32xf32>
    %1227 = vector.shape_cast %1219 : vector<2x32xf32> to vector<1x2x32xf32>
    tpu.vector_store %arg25[%1224, %c0_393, %c0_394], %1227 {strides = array<i32>} : memref<16x2x32xf32, #tpu.memory_space<vmem>>, vector<1x2x32xf32>,
    %c5_i32_395 = arith.constant 5 : i32
    %c15_i32_396 = arith.constant 15 : i32
    %1228 = arith.subi %c15_i32_396, %c5_i32_395 : i32
    %1229 = arith.index_cast %c5_i32_395 : i32 to index
    %c0_397 = arith.constant 0 : index
    %c0_398 = arith.constant 0 : index
    %1230 = vector.load %arg22[%1229, %c0_397, %c0_398] : memref<16x2x128xf32, #tpu.memory_space<vmem>>, vector<1x2x128xf32>
    %1231 = vector.shape_cast %1230 : vector<1x2x128xf32> to vector<2x128xf32>
    %cst_399 = arith.constant dense<0.000000e+00> : vector<2x128xf32>
    %1232 = tpu.matmul %1203, %918, %cst_399 {dimension_numbers = #tpu.dot_dimension_numbers<[1], [0], [0], [1], [0, 0, 1, 1], [], []>} : vector<2x32xf32>, vector<32x128xf32>, vector<2x128xf32> -> vector<2x128xf32>
    %1233 = arith.addf %1231, %1232 : vector<2x128xf32>
    %1234 = arith.index_cast %1228 : i32 to index
    %c0_400 = arith.constant 0 : index
    %c0_401 = arith.constant 0 : index
    %1235 = vector.load %arg23[%1234, %c0_400, %c0_401] : memref<16x2x128xf32, #tpu.memory_space<vmem>>, vector<1x2x128xf32>
    %1236 = vector.shape_cast %1235 : vector<1x2x128xf32> to vector<2x128xf32>
    %cst_402 = arith.constant dense<0.000000e+00> : vector<2x128xf32>
    %1237 = tpu.matmul %1219, %919, %cst_402 {dimension_numbers = #tpu.dot_dimension_numbers<[1], [0], [0], [1], [0, 0, 1, 1], [], []>} : vector<2x32xf32>, vector<32x128xf32>, vector<2x128xf32> -> vector<2x128xf32>
    %1238 = arith.addf %1236, %1237 : vector<2x128xf32>
    %1239 = vector.extract_strided_slice %1233 {offsets = [0, 0], sizes = [2, 96], strides = [1, 1]} : vector<2x128xf32> to vector<2x96xf32>
    %1240 = arith.negf %1239 : vector<2x96xf32>
    %1241 = math.exp %1240 : vector<2x96xf32>
    %cst_403 = arith.constant 1.000000e+00 : f32
    %1242 = vector.broadcast %cst_403 : f32 to vector<2x96xf32>
    %1243 = arith.addf %1242, %1241 : vector<2x96xf32>
    %1244 = arith.divf %1242, %1243 : vector<2x96xf32>
    %1245 = vector.extract_strided_slice %1244 {offsets = [0, 0], sizes = [2, 32], strides = [1, 1]} : vector<2x96xf32> to vector<2x32xf32>
    %1246 = vector.extract_strided_slice %1244 {offsets = [0, 32], sizes = [2, 32], strides = [1, 1]} : vector<2x96xf32> to vector<2x32xf32>
    %1247 = vector.extract_strided_slice %1244 {offsets = [0, 64], sizes = [2, 32], strides = [1, 1]} : vector<2x96xf32> to vector<2x32xf32>
    %1248 = vector.extract_strided_slice %1233 {offsets = [0, 96], sizes = [2, 32], strides = [1, 1]} : vector<2x128xf32> to vector<2x32xf32>
    %1249 = math.tanh %1248 : vector<2x32xf32>
    %1250 = arith.mulf %1246, %1201 : vector<2x32xf32>
    %1251 = arith.mulf %1245, %1249 : vector<2x32xf32>
    %1252 = arith.addf %1250, %1251 : vector<2x32xf32>
    %1253 = math.tanh %1252 : vector<2x32xf32>
    %1254 = arith.mulf %1247, %1253 : vector<2x32xf32>
    %1255 = vector.extract_strided_slice %1238 {offsets = [0, 0], sizes = [2, 96], strides = [1, 1]} : vector<2x128xf32> to vector<2x96xf32>
    %1256 = arith.negf %1255 : vector<2x96xf32>
    %1257 = math.exp %1256 : vector<2x96xf32>
    %cst_404 = arith.constant 1.000000e+00 : f32
    %1258 = vector.broadcast %cst_404 : f32 to vector<2x96xf32>
    %1259 = arith.addf %1258, %1257 : vector<2x96xf32>
    %1260 = arith.divf %1258, %1259 : vector<2x96xf32>
    %1261 = vector.extract_strided_slice %1260 {offsets = [0, 0], sizes = [2, 32], strides = [1, 1]} : vector<2x96xf32> to vector<2x32xf32>
    %1262 = vector.extract_strided_slice %1260 {offsets = [0, 32], sizes = [2, 32], strides = [1, 1]} : vector<2x96xf32> to vector<2x32xf32>
    %1263 = vector.extract_strided_slice %1260 {offsets = [0, 64], sizes = [2, 32], strides = [1, 1]} : vector<2x96xf32> to vector<2x32xf32>
    %1264 = vector.extract_strided_slice %1238 {offsets = [0, 96], sizes = [2, 32], strides = [1, 1]} : vector<2x128xf32> to vector<2x32xf32>
    %1265 = math.tanh %1264 : vector<2x32xf32>
    %1266 = arith.mulf %1262, %1217 : vector<2x32xf32>
    %1267 = arith.mulf %1261, %1265 : vector<2x32xf32>
    %1268 = arith.addf %1266, %1267 : vector<2x32xf32>
    %1269 = math.tanh %1268 : vector<2x32xf32>
    %1270 = arith.mulf %1263, %1269 : vector<2x32xf32>
    %1271 = arith.index_cast %c5_i32_395 : i32 to index
    %c0_405 = arith.constant 0 : index
    %c0_406 = arith.constant 0 : index
    %1272 = vector.load %arg24[%1271, %c0_405, %c0_406] : memref<16x2x32xf32, #tpu.memory_space<vmem>>, vector<1x2x32xf32>
    %1273 = vector.shape_cast %1272 : vector<1x2x32xf32> to vector<2x32xf32>
    %1274 = vector.shape_cast %1254 : vector<2x32xf32> to vector<1x2x32xf32>
    tpu.vector_store %arg24[%1271, %c0_405, %c0_406], %1274 {strides = array<i32>} : memref<16x2x32xf32, #tpu.memory_space<vmem>>, vector<1x2x32xf32>,
    %1275 = arith.index_cast %1228 : i32 to index
    %c0_407 = arith.constant 0 : index
    %c0_408 = arith.constant 0 : index
    %1276 = vector.load %arg25[%1275, %c0_407, %c0_408] : memref<16x2x32xf32, #tpu.memory_space<vmem>>, vector<1x2x32xf32>
    %1277 = vector.shape_cast %1276 : vector<1x2x32xf32> to vector<2x32xf32>
    %1278 = vector.shape_cast %1270 : vector<2x32xf32> to vector<1x2x32xf32>
    tpu.vector_store %arg25[%1275, %c0_407, %c0_408], %1278 {strides = array<i32>} : memref<16x2x32xf32, #tpu.memory_space<vmem>>, vector<1x2x32xf32>,
    %c6_i32_409 = arith.constant 6 : i32
    %c15_i32_410 = arith.constant 15 : i32
    %1279 = arith.subi %c15_i32_410, %c6_i32_409 : i32
    %1280 = arith.index_cast %c6_i32_409 : i32 to index
    %c0_411 = arith.constant 0 : index
    %c0_412 = arith.constant 0 : index
    %1281 = vector.load %arg22[%1280, %c0_411, %c0_412] : memref<16x2x128xf32, #tpu.memory_space<vmem>>, vector<1x2x128xf32>
    %1282 = vector.shape_cast %1281 : vector<1x2x128xf32> to vector<2x128xf32>
    %cst_413 = arith.constant dense<0.000000e+00> : vector<2x128xf32>
    %1283 = tpu.matmul %1254, %918, %cst_413 {dimension_numbers = #tpu.dot_dimension_numbers<[1], [0], [0], [1], [0, 0, 1, 1], [], []>} : vector<2x32xf32>, vector<32x128xf32>, vector<2x128xf32> -> vector<2x128xf32>
    %1284 = arith.addf %1282, %1283 : vector<2x128xf32>
    %1285 = arith.index_cast %1279 : i32 to index
    %c0_414 = arith.constant 0 : index
    %c0_415 = arith.constant 0 : index
    %1286 = vector.load %arg23[%1285, %c0_414, %c0_415] : memref<16x2x128xf32, #tpu.memory_space<vmem>>, vector<1x2x128xf32>
    %1287 = vector.shape_cast %1286 : vector<1x2x128xf32> to vector<2x128xf32>
    %cst_416 = arith.constant dense<0.000000e+00> : vector<2x128xf32>
    %1288 = tpu.matmul %1270, %919, %cst_416 {dimension_numbers = #tpu.dot_dimension_numbers<[1], [0], [0], [1], [0, 0, 1, 1], [], []>} : vector<2x32xf32>, vector<32x128xf32>, vector<2x128xf32> -> vector<2x128xf32>
    %1289 = arith.addf %1287, %1288 : vector<2x128xf32>
    %1290 = vector.extract_strided_slice %1284 {offsets = [0, 0], sizes = [2, 96], strides = [1, 1]} : vector<2x128xf32> to vector<2x96xf32>
    %1291 = arith.negf %1290 : vector<2x96xf32>
    %1292 = math.exp %1291 : vector<2x96xf32>
    %cst_417 = arith.constant 1.000000e+00 : f32
    %1293 = vector.broadcast %cst_417 : f32 to vector<2x96xf32>
    %1294 = arith.addf %1293, %1292 : vector<2x96xf32>
    %1295 = arith.divf %1293, %1294 : vector<2x96xf32>
    %1296 = vector.extract_strided_slice %1295 {offsets = [0, 0], sizes = [2, 32], strides = [1, 1]} : vector<2x96xf32> to vector<2x32xf32>
    %1297 = vector.extract_strided_slice %1295 {offsets = [0, 32], sizes = [2, 32], strides = [1, 1]} : vector<2x96xf32> to vector<2x32xf32>
    %1298 = vector.extract_strided_slice %1295 {offsets = [0, 64], sizes = [2, 32], strides = [1, 1]} : vector<2x96xf32> to vector<2x32xf32>
    %1299 = vector.extract_strided_slice %1284 {offsets = [0, 96], sizes = [2, 32], strides = [1, 1]} : vector<2x128xf32> to vector<2x32xf32>
    %1300 = math.tanh %1299 : vector<2x32xf32>
    %1301 = arith.mulf %1297, %1252 : vector<2x32xf32>
    %1302 = arith.mulf %1296, %1300 : vector<2x32xf32>
    %1303 = arith.addf %1301, %1302 : vector<2x32xf32>
    %1304 = math.tanh %1303 : vector<2x32xf32>
    %1305 = arith.mulf %1298, %1304 : vector<2x32xf32>
    %1306 = vector.extract_strided_slice %1289 {offsets = [0, 0], sizes = [2, 96], strides = [1, 1]} : vector<2x128xf32> to vector<2x96xf32>
    %1307 = arith.negf %1306 : vector<2x96xf32>
    %1308 = math.exp %1307 : vector<2x96xf32>
    %cst_418 = arith.constant 1.000000e+00 : f32
    %1309 = vector.broadcast %cst_418 : f32 to vector<2x96xf32>
    %1310 = arith.addf %1309, %1308 : vector<2x96xf32>
    %1311 = arith.divf %1309, %1310 : vector<2x96xf32>
    %1312 = vector.extract_strided_slice %1311 {offsets = [0, 0], sizes = [2, 32], strides = [1, 1]} : vector<2x96xf32> to vector<2x32xf32>
    %1313 = vector.extract_strided_slice %1311 {offsets = [0, 32], sizes = [2, 32], strides = [1, 1]} : vector<2x96xf32> to vector<2x32xf32>
    %1314 = vector.extract_strided_slice %1311 {offsets = [0, 64], sizes = [2, 32], strides = [1, 1]} : vector<2x96xf32> to vector<2x32xf32>
    %1315 = vector.extract_strided_slice %1289 {offsets = [0, 96], sizes = [2, 32], strides = [1, 1]} : vector<2x128xf32> to vector<2x32xf32>
    %1316 = math.tanh %1315 : vector<2x32xf32>
    %1317 = arith.mulf %1313, %1268 : vector<2x32xf32>
    %1318 = arith.mulf %1312, %1316 : vector<2x32xf32>
    %1319 = arith.addf %1317, %1318 : vector<2x32xf32>
    %1320 = math.tanh %1319 : vector<2x32xf32>
    %1321 = arith.mulf %1314, %1320 : vector<2x32xf32>
    %1322 = arith.index_cast %c6_i32_409 : i32 to index
    %c0_419 = arith.constant 0 : index
    %c0_420 = arith.constant 0 : index
    %1323 = vector.load %arg24[%1322, %c0_419, %c0_420] : memref<16x2x32xf32, #tpu.memory_space<vmem>>, vector<1x2x32xf32>
    %1324 = vector.shape_cast %1323 : vector<1x2x32xf32> to vector<2x32xf32>
    %1325 = vector.shape_cast %1305 : vector<2x32xf32> to vector<1x2x32xf32>
    tpu.vector_store %arg24[%1322, %c0_419, %c0_420], %1325 {strides = array<i32>} : memref<16x2x32xf32, #tpu.memory_space<vmem>>, vector<1x2x32xf32>,
    %1326 = arith.index_cast %1279 : i32 to index
    %c0_421 = arith.constant 0 : index
    %c0_422 = arith.constant 0 : index
    %1327 = vector.load %arg25[%1326, %c0_421, %c0_422] : memref<16x2x32xf32, #tpu.memory_space<vmem>>, vector<1x2x32xf32>
    %1328 = vector.shape_cast %1327 : vector<1x2x32xf32> to vector<2x32xf32>
    %1329 = vector.shape_cast %1321 : vector<2x32xf32> to vector<1x2x32xf32>
    tpu.vector_store %arg25[%1326, %c0_421, %c0_422], %1329 {strides = array<i32>} : memref<16x2x32xf32, #tpu.memory_space<vmem>>, vector<1x2x32xf32>,
    %c7_i32_423 = arith.constant 7 : i32
    %c15_i32_424 = arith.constant 15 : i32
    %1330 = arith.subi %c15_i32_424, %c7_i32_423 : i32
    %1331 = arith.index_cast %c7_i32_423 : i32 to index
    %c0_425 = arith.constant 0 : index
    %c0_426 = arith.constant 0 : index
    %1332 = vector.load %arg22[%1331, %c0_425, %c0_426] : memref<16x2x128xf32, #tpu.memory_space<vmem>>, vector<1x2x128xf32>
    %1333 = vector.shape_cast %1332 : vector<1x2x128xf32> to vector<2x128xf32>
    %cst_427 = arith.constant dense<0.000000e+00> : vector<2x128xf32>
    %1334 = tpu.matmul %1305, %918, %cst_427 {dimension_numbers = #tpu.dot_dimension_numbers<[1], [0], [0], [1], [0, 0, 1, 1], [], []>} : vector<2x32xf32>, vector<32x128xf32>, vector<2x128xf32> -> vector<2x128xf32>
    %1335 = arith.addf %1333, %1334 : vector<2x128xf32>
    %1336 = arith.index_cast %1330 : i32 to index
    %c0_428 = arith.constant 0 : index
    %c0_429 = arith.constant 0 : index
    %1337 = vector.load %arg23[%1336, %c0_428, %c0_429] : memref<16x2x128xf32, #tpu.memory_space<vmem>>, vector<1x2x128xf32>
    %1338 = vector.shape_cast %1337 : vector<1x2x128xf32> to vector<2x128xf32>
    %cst_430 = arith.constant dense<0.000000e+00> : vector<2x128xf32>
    %1339 = tpu.matmul %1321, %919, %cst_430 {dimension_numbers = #tpu.dot_dimension_numbers<[1], [0], [0], [1], [0, 0, 1, 1], [], []>} : vector<2x32xf32>, vector<32x128xf32>, vector<2x128xf32> -> vector<2x128xf32>
    %1340 = arith.addf %1338, %1339 : vector<2x128xf32>
    %1341 = vector.extract_strided_slice %1335 {offsets = [0, 0], sizes = [2, 96], strides = [1, 1]} : vector<2x128xf32> to vector<2x96xf32>
    %1342 = arith.negf %1341 : vector<2x96xf32>
    %1343 = math.exp %1342 : vector<2x96xf32>
    %cst_431 = arith.constant 1.000000e+00 : f32
    %1344 = vector.broadcast %cst_431 : f32 to vector<2x96xf32>
    %1345 = arith.addf %1344, %1343 : vector<2x96xf32>
    %1346 = arith.divf %1344, %1345 : vector<2x96xf32>
    %1347 = vector.extract_strided_slice %1346 {offsets = [0, 0], sizes = [2, 32], strides = [1, 1]} : vector<2x96xf32> to vector<2x32xf32>
    %1348 = vector.extract_strided_slice %1346 {offsets = [0, 32], sizes = [2, 32], strides = [1, 1]} : vector<2x96xf32> to vector<2x32xf32>
    %1349 = vector.extract_strided_slice %1346 {offsets = [0, 64], sizes = [2, 32], strides = [1, 1]} : vector<2x96xf32> to vector<2x32xf32>
    %1350 = vector.extract_strided_slice %1335 {offsets = [0, 96], sizes = [2, 32], strides = [1, 1]} : vector<2x128xf32> to vector<2x32xf32>
    %1351 = math.tanh %1350 : vector<2x32xf32>
    %1352 = arith.mulf %1348, %1303 : vector<2x32xf32>
    %1353 = arith.mulf %1347, %1351 : vector<2x32xf32>
    %1354 = arith.addf %1352, %1353 : vector<2x32xf32>
    %1355 = math.tanh %1354 : vector<2x32xf32>
    %1356 = arith.mulf %1349, %1355 : vector<2x32xf32>
    %1357 = vector.extract_strided_slice %1340 {offsets = [0, 0], sizes = [2, 96], strides = [1, 1]} : vector<2x128xf32> to vector<2x96xf32>
    %1358 = arith.negf %1357 : vector<2x96xf32>
    %1359 = math.exp %1358 : vector<2x96xf32>
    %cst_432 = arith.constant 1.000000e+00 : f32
    %1360 = vector.broadcast %cst_432 : f32 to vector<2x96xf32>
    %1361 = arith.addf %1360, %1359 : vector<2x96xf32>
    %1362 = arith.divf %1360, %1361 : vector<2x96xf32>
    %1363 = vector.extract_strided_slice %1362 {offsets = [0, 0], sizes = [2, 32], strides = [1, 1]} : vector<2x96xf32> to vector<2x32xf32>
    %1364 = vector.extract_strided_slice %1362 {offsets = [0, 32], sizes = [2, 32], strides = [1, 1]} : vector<2x96xf32> to vector<2x32xf32>
    %1365 = vector.extract_strided_slice %1362 {offsets = [0, 64], sizes = [2, 32], strides = [1, 1]} : vector<2x96xf32> to vector<2x32xf32>
    %1366 = vector.extract_strided_slice %1340 {offsets = [0, 96], sizes = [2, 32], strides = [1, 1]} : vector<2x128xf32> to vector<2x32xf32>
    %1367 = math.tanh %1366 : vector<2x32xf32>
    %1368 = arith.mulf %1364, %1319 : vector<2x32xf32>
    %1369 = arith.mulf %1363, %1367 : vector<2x32xf32>
    %1370 = arith.addf %1368, %1369 : vector<2x32xf32>
    %1371 = math.tanh %1370 : vector<2x32xf32>
    %1372 = arith.mulf %1365, %1371 : vector<2x32xf32>
    %1373 = arith.index_cast %c7_i32_423 : i32 to index
    %c0_433 = arith.constant 0 : index
    %c0_434 = arith.constant 0 : index
    %1374 = vector.load %arg24[%1373, %c0_433, %c0_434] : memref<16x2x32xf32, #tpu.memory_space<vmem>>, vector<1x2x32xf32>
    %1375 = vector.shape_cast %1374 : vector<1x2x32xf32> to vector<2x32xf32>
    %1376 = vector.shape_cast %1356 : vector<2x32xf32> to vector<1x2x32xf32>
    tpu.vector_store %arg24[%1373, %c0_433, %c0_434], %1376 {strides = array<i32>} : memref<16x2x32xf32, #tpu.memory_space<vmem>>, vector<1x2x32xf32>,
    %1377 = arith.index_cast %1330 : i32 to index
    %c0_435 = arith.constant 0 : index
    %c0_436 = arith.constant 0 : index
    %1378 = vector.load %arg25[%1377, %c0_435, %c0_436] : memref<16x2x32xf32, #tpu.memory_space<vmem>>, vector<1x2x32xf32>
    %1379 = vector.shape_cast %1378 : vector<1x2x32xf32> to vector<2x32xf32>
    %1380 = vector.shape_cast %1372 : vector<2x32xf32> to vector<1x2x32xf32>
    tpu.vector_store %arg25[%1377, %c0_435, %c0_436], %1380 {strides = array<i32>} : memref<16x2x32xf32, #tpu.memory_space<vmem>>, vector<1x2x32xf32>,
    %c8_i32_437 = arith.constant 8 : i32
    %c15_i32_438 = arith.constant 15 : i32
    %1381 = arith.subi %c15_i32_438, %c8_i32_437 : i32
    %1382 = arith.index_cast %c8_i32_437 : i32 to index
    %c0_439 = arith.constant 0 : index
    %c0_440 = arith.constant 0 : index
    %1383 = vector.load %arg22[%1382, %c0_439, %c0_440] : memref<16x2x128xf32, #tpu.memory_space<vmem>>, vector<1x2x128xf32>
    %1384 = vector.shape_cast %1383 : vector<1x2x128xf32> to vector<2x128xf32>
    %cst_441 = arith.constant dense<0.000000e+00> : vector<2x128xf32>
    %1385 = tpu.matmul %1356, %918, %cst_441 {dimension_numbers = #tpu.dot_dimension_numbers<[1], [0], [0], [1], [0, 0, 1, 1], [], []>} : vector<2x32xf32>, vector<32x128xf32>, vector<2x128xf32> -> vector<2x128xf32>
    %1386 = arith.addf %1384, %1385 : vector<2x128xf32>
    %1387 = arith.index_cast %1381 : i32 to index
    %c0_442 = arith.constant 0 : index
    %c0_443 = arith.constant 0 : index
    %1388 = vector.load %arg23[%1387, %c0_442, %c0_443] : memref<16x2x128xf32, #tpu.memory_space<vmem>>, vector<1x2x128xf32>
    %1389 = vector.shape_cast %1388 : vector<1x2x128xf32> to vector<2x128xf32>
    %cst_444 = arith.constant dense<0.000000e+00> : vector<2x128xf32>
    %1390 = tpu.matmul %1372, %919, %cst_444 {dimension_numbers = #tpu.dot_dimension_numbers<[1], [0], [0], [1], [0, 0, 1, 1], [], []>} : vector<2x32xf32>, vector<32x128xf32>, vector<2x128xf32> -> vector<2x128xf32>
    %1391 = arith.addf %1389, %1390 : vector<2x128xf32>
    %1392 = vector.extract_strided_slice %1386 {offsets = [0, 0], sizes = [2, 96], strides = [1, 1]} : vector<2x128xf32> to vector<2x96xf32>
    %1393 = arith.negf %1392 : vector<2x96xf32>
    %1394 = math.exp %1393 : vector<2x96xf32>
    %cst_445 = arith.constant 1.000000e+00 : f32
    %1395 = vector.broadcast %cst_445 : f32 to vector<2x96xf32>
    %1396 = arith.addf %1395, %1394 : vector<2x96xf32>
    %1397 = arith.divf %1395, %1396 : vector<2x96xf32>
    %1398 = vector.extract_strided_slice %1397 {offsets = [0, 0], sizes = [2, 32], strides = [1, 1]} : vector<2x96xf32> to vector<2x32xf32>
    %1399 = vector.extract_strided_slice %1397 {offsets = [0, 32], sizes = [2, 32], strides = [1, 1]} : vector<2x96xf32> to vector<2x32xf32>
    %1400 = vector.extract_strided_slice %1397 {offsets = [0, 64], sizes = [2, 32], strides = [1, 1]} : vector<2x96xf32> to vector<2x32xf32>
    %1401 = vector.extract_strided_slice %1386 {offsets = [0, 96], sizes = [2, 32], strides = [1, 1]} : vector<2x128xf32> to vector<2x32xf32>
    %1402 = math.tanh %1401 : vector<2x32xf32>
    %1403 = arith.mulf %1399, %1354 : vector<2x32xf32>
    %1404 = arith.mulf %1398, %1402 : vector<2x32xf32>
    %1405 = arith.addf %1403, %1404 : vector<2x32xf32>
    %1406 = math.tanh %1405 : vector<2x32xf32>
    %1407 = arith.mulf %1400, %1406 : vector<2x32xf32>
    %1408 = vector.extract_strided_slice %1391 {offsets = [0, 0], sizes = [2, 96], strides = [1, 1]} : vector<2x128xf32> to vector<2x96xf32>
    %1409 = arith.negf %1408 : vector<2x96xf32>
    %1410 = math.exp %1409 : vector<2x96xf32>
    %cst_446 = arith.constant 1.000000e+00 : f32
    %1411 = vector.broadcast %cst_446 : f32 to vector<2x96xf32>
    %1412 = arith.addf %1411, %1410 : vector<2x96xf32>
    %1413 = arith.divf %1411, %1412 : vector<2x96xf32>
    %1414 = vector.extract_strided_slice %1413 {offsets = [0, 0], sizes = [2, 32], strides = [1, 1]} : vector<2x96xf32> to vector<2x32xf32>
    %1415 = vector.extract_strided_slice %1413 {offsets = [0, 32], sizes = [2, 32], strides = [1, 1]} : vector<2x96xf32> to vector<2x32xf32>
    %1416 = vector.extract_strided_slice %1413 {offsets = [0, 64], sizes = [2, 32], strides = [1, 1]} : vector<2x96xf32> to vector<2x32xf32>
    %1417 = vector.extract_strided_slice %1391 {offsets = [0, 96], sizes = [2, 32], strides = [1, 1]} : vector<2x128xf32> to vector<2x32xf32>
    %1418 = math.tanh %1417 : vector<2x32xf32>
    %1419 = arith.mulf %1415, %1370 : vector<2x32xf32>
    %1420 = arith.mulf %1414, %1418 : vector<2x32xf32>
    %1421 = arith.addf %1419, %1420 : vector<2x32xf32>
    %1422 = math.tanh %1421 : vector<2x32xf32>
    %1423 = arith.mulf %1416, %1422 : vector<2x32xf32>
    %1424 = arith.index_cast %c8_i32_437 : i32 to index
    %c0_447 = arith.constant 0 : index
    %c0_448 = arith.constant 0 : index
    %1425 = vector.load %arg24[%1424, %c0_447, %c0_448] : memref<16x2x32xf32, #tpu.memory_space<vmem>>, vector<1x2x32xf32>
    %1426 = vector.shape_cast %1425 : vector<1x2x32xf32> to vector<2x32xf32>
    %1427 = vector.shape_cast %1407 : vector<2x32xf32> to vector<1x2x32xf32>
    tpu.vector_store %arg24[%1424, %c0_447, %c0_448], %1427 {strides = array<i32>} : memref<16x2x32xf32, #tpu.memory_space<vmem>>, vector<1x2x32xf32>,
    %1428 = arith.index_cast %1381 : i32 to index
    %c0_449 = arith.constant 0 : index
    %c0_450 = arith.constant 0 : index
    %1429 = vector.load %arg25[%1428, %c0_449, %c0_450] : memref<16x2x32xf32, #tpu.memory_space<vmem>>, vector<1x2x32xf32>
    %1430 = vector.shape_cast %1429 : vector<1x2x32xf32> to vector<2x32xf32>
    %1431 = vector.shape_cast %1423 : vector<2x32xf32> to vector<1x2x32xf32>
    tpu.vector_store %arg25[%1428, %c0_449, %c0_450], %1431 {strides = array<i32>} : memref<16x2x32xf32, #tpu.memory_space<vmem>>, vector<1x2x32xf32>,
    %c9_i32_451 = arith.constant 9 : i32
    %c15_i32_452 = arith.constant 15 : i32
    %1432 = arith.subi %c15_i32_452, %c9_i32_451 : i32
    %1433 = arith.index_cast %c9_i32_451 : i32 to index
    %c0_453 = arith.constant 0 : index
    %c0_454 = arith.constant 0 : index
    %1434 = vector.load %arg22[%1433, %c0_453, %c0_454] : memref<16x2x128xf32, #tpu.memory_space<vmem>>, vector<1x2x128xf32>
    %1435 = vector.shape_cast %1434 : vector<1x2x128xf32> to vector<2x128xf32>
    %cst_455 = arith.constant dense<0.000000e+00> : vector<2x128xf32>
    %1436 = tpu.matmul %1407, %918, %cst_455 {dimension_numbers = #tpu.dot_dimension_numbers<[1], [0], [0], [1], [0, 0, 1, 1], [], []>} : vector<2x32xf32>, vector<32x128xf32>, vector<2x128xf32> -> vector<2x128xf32>
    %1437 = arith.addf %1435, %1436 : vector<2x128xf32>
    %1438 = arith.index_cast %1432 : i32 to index
    %c0_456 = arith.constant 0 : index
    %c0_457 = arith.constant 0 : index
    %1439 = vector.load %arg23[%1438, %c0_456, %c0_457] : memref<16x2x128xf32, #tpu.memory_space<vmem>>, vector<1x2x128xf32>
    %1440 = vector.shape_cast %1439 : vector<1x2x128xf32> to vector<2x128xf32>
    %cst_458 = arith.constant dense<0.000000e+00> : vector<2x128xf32>
    %1441 = tpu.matmul %1423, %919, %cst_458 {dimension_numbers = #tpu.dot_dimension_numbers<[1], [0], [0], [1], [0, 0, 1, 1], [], []>} : vector<2x32xf32>, vector<32x128xf32>, vector<2x128xf32> -> vector<2x128xf32>
    %1442 = arith.addf %1440, %1441 : vector<2x128xf32>
    %1443 = vector.extract_strided_slice %1437 {offsets = [0, 0], sizes = [2, 96], strides = [1, 1]} : vector<2x128xf32> to vector<2x96xf32>
    %1444 = arith.negf %1443 : vector<2x96xf32>
    %1445 = math.exp %1444 : vector<2x96xf32>
    %cst_459 = arith.constant 1.000000e+00 : f32
    %1446 = vector.broadcast %cst_459 : f32 to vector<2x96xf32>
    %1447 = arith.addf %1446, %1445 : vector<2x96xf32>
    %1448 = arith.divf %1446, %1447 : vector<2x96xf32>
    %1449 = vector.extract_strided_slice %1448 {offsets = [0, 0], sizes = [2, 32], strides = [1, 1]} : vector<2x96xf32> to vector<2x32xf32>
    %1450 = vector.extract_strided_slice %1448 {offsets = [0, 32], sizes = [2, 32], strides = [1, 1]} : vector<2x96xf32> to vector<2x32xf32>
    %1451 = vector.extract_strided_slice %1448 {offsets = [0, 64], sizes = [2, 32], strides = [1, 1]} : vector<2x96xf32> to vector<2x32xf32>
    %1452 = vector.extract_strided_slice %1437 {offsets = [0, 96], sizes = [2, 32], strides = [1, 1]} : vector<2x128xf32> to vector<2x32xf32>
    %1453 = math.tanh %1452 : vector<2x32xf32>
    %1454 = arith.mulf %1450, %1405 : vector<2x32xf32>
    %1455 = arith.mulf %1449, %1453 : vector<2x32xf32>
    %1456 = arith.addf %1454, %1455 : vector<2x32xf32>
    %1457 = math.tanh %1456 : vector<2x32xf32>
    %1458 = arith.mulf %1451, %1457 : vector<2x32xf32>
    %1459 = vector.extract_strided_slice %1442 {offsets = [0, 0], sizes = [2, 96], strides = [1, 1]} : vector<2x128xf32> to vector<2x96xf32>
    %1460 = arith.negf %1459 : vector<2x96xf32>
    %1461 = math.exp %1460 : vector<2x96xf32>
    %cst_460 = arith.constant 1.000000e+00 : f32
    %1462 = vector.broadcast %cst_460 : f32 to vector<2x96xf32>
    %1463 = arith.addf %1462, %1461 : vector<2x96xf32>
    %1464 = arith.divf %1462, %1463 : vector<2x96xf32>
    %1465 = vector.extract_strided_slice %1464 {offsets = [0, 0], sizes = [2, 32], strides = [1, 1]} : vector<2x96xf32> to vector<2x32xf32>
    %1466 = vector.extract_strided_slice %1464 {offsets = [0, 32], sizes = [2, 32], strides = [1, 1]} : vector<2x96xf32> to vector<2x32xf32>
    %1467 = vector.extract_strided_slice %1464 {offsets = [0, 64], sizes = [2, 32], strides = [1, 1]} : vector<2x96xf32> to vector<2x32xf32>
    %1468 = vector.extract_strided_slice %1442 {offsets = [0, 96], sizes = [2, 32], strides = [1, 1]} : vector<2x128xf32> to vector<2x32xf32>
    %1469 = math.tanh %1468 : vector<2x32xf32>
    %1470 = arith.mulf %1466, %1421 : vector<2x32xf32>
    %1471 = arith.mulf %1465, %1469 : vector<2x32xf32>
    %1472 = arith.addf %1470, %1471 : vector<2x32xf32>
    %1473 = math.tanh %1472 : vector<2x32xf32>
    %1474 = arith.mulf %1467, %1473 : vector<2x32xf32>
    %1475 = arith.index_cast %c9_i32_451 : i32 to index
    %c0_461 = arith.constant 0 : index
    %c0_462 = arith.constant 0 : index
    %1476 = vector.load %arg24[%1475, %c0_461, %c0_462] : memref<16x2x32xf32, #tpu.memory_space<vmem>>, vector<1x2x32xf32>
    %1477 = vector.shape_cast %1476 : vector<1x2x32xf32> to vector<2x32xf32>
    %1478 = vector.shape_cast %1458 : vector<2x32xf32> to vector<1x2x32xf32>
    tpu.vector_store %arg24[%1475, %c0_461, %c0_462], %1478 {strides = array<i32>} : memref<16x2x32xf32, #tpu.memory_space<vmem>>, vector<1x2x32xf32>,
    %1479 = arith.index_cast %1432 : i32 to index
    %c0_463 = arith.constant 0 : index
    %c0_464 = arith.constant 0 : index
    %1480 = vector.load %arg25[%1479, %c0_463, %c0_464] : memref<16x2x32xf32, #tpu.memory_space<vmem>>, vector<1x2x32xf32>
    %1481 = vector.shape_cast %1480 : vector<1x2x32xf32> to vector<2x32xf32>
    %1482 = vector.shape_cast %1474 : vector<2x32xf32> to vector<1x2x32xf32>
    tpu.vector_store %arg25[%1479, %c0_463, %c0_464], %1482 {strides = array<i32>} : memref<16x2x32xf32, #tpu.memory_space<vmem>>, vector<1x2x32xf32>,
    %c10_i32_465 = arith.constant 10 : i32
    %c15_i32_466 = arith.constant 15 : i32
    %1483 = arith.subi %c15_i32_466, %c10_i32_465 : i32
    %1484 = arith.index_cast %c10_i32_465 : i32 to index
    %c0_467 = arith.constant 0 : index
    %c0_468 = arith.constant 0 : index
    %1485 = vector.load %arg22[%1484, %c0_467, %c0_468] : memref<16x2x128xf32, #tpu.memory_space<vmem>>, vector<1x2x128xf32>
    %1486 = vector.shape_cast %1485 : vector<1x2x128xf32> to vector<2x128xf32>
    %cst_469 = arith.constant dense<0.000000e+00> : vector<2x128xf32>
    %1487 = tpu.matmul %1458, %918, %cst_469 {dimension_numbers = #tpu.dot_dimension_numbers<[1], [0], [0], [1], [0, 0, 1, 1], [], []>} : vector<2x32xf32>, vector<32x128xf32>, vector<2x128xf32> -> vector<2x128xf32>
    %1488 = arith.addf %1486, %1487 : vector<2x128xf32>
    %1489 = arith.index_cast %1483 : i32 to index
    %c0_470 = arith.constant 0 : index
    %c0_471 = arith.constant 0 : index
    %1490 = vector.load %arg23[%1489, %c0_470, %c0_471] : memref<16x2x128xf32, #tpu.memory_space<vmem>>, vector<1x2x128xf32>
    %1491 = vector.shape_cast %1490 : vector<1x2x128xf32> to vector<2x128xf32>
    %cst_472 = arith.constant dense<0.000000e+00> : vector<2x128xf32>
    %1492 = tpu.matmul %1474, %919, %cst_472 {dimension_numbers = #tpu.dot_dimension_numbers<[1], [0], [0], [1], [0, 0, 1, 1], [], []>} : vector<2x32xf32>, vector<32x128xf32>, vector<2x128xf32> -> vector<2x128xf32>
    %1493 = arith.addf %1491, %1492 : vector<2x128xf32>
    %1494 = vector.extract_strided_slice %1488 {offsets = [0, 0], sizes = [2, 96], strides = [1, 1]} : vector<2x128xf32> to vector<2x96xf32>
    %1495 = arith.negf %1494 : vector<2x96xf32>
    %1496 = math.exp %1495 : vector<2x96xf32>
    %cst_473 = arith.constant 1.000000e+00 : f32
    %1497 = vector.broadcast %cst_473 : f32 to vector<2x96xf32>
    %1498 = arith.addf %1497, %1496 : vector<2x96xf32>
    %1499 = arith.divf %1497, %1498 : vector<2x96xf32>
    %1500 = vector.extract_strided_slice %1499 {offsets = [0, 0], sizes = [2, 32], strides = [1, 1]} : vector<2x96xf32> to vector<2x32xf32>
    %1501 = vector.extract_strided_slice %1499 {offsets = [0, 32], sizes = [2, 32], strides = [1, 1]} : vector<2x96xf32> to vector<2x32xf32>
    %1502 = vector.extract_strided_slice %1499 {offsets = [0, 64], sizes = [2, 32], strides = [1, 1]} : vector<2x96xf32> to vector<2x32xf32>
    %1503 = vector.extract_strided_slice %1488 {offsets = [0, 96], sizes = [2, 32], strides = [1, 1]} : vector<2x128xf32> to vector<2x32xf32>
    %1504 = math.tanh %1503 : vector<2x32xf32>
    %1505 = arith.mulf %1501, %1456 : vector<2x32xf32>
    %1506 = arith.mulf %1500, %1504 : vector<2x32xf32>
    %1507 = arith.addf %1505, %1506 : vector<2x32xf32>
    %1508 = math.tanh %1507 : vector<2x32xf32>
    %1509 = arith.mulf %1502, %1508 : vector<2x32xf32>
    %1510 = vector.extract_strided_slice %1493 {offsets = [0, 0], sizes = [2, 96], strides = [1, 1]} : vector<2x128xf32> to vector<2x96xf32>
    %1511 = arith.negf %1510 : vector<2x96xf32>
    %1512 = math.exp %1511 : vector<2x96xf32>
    %cst_474 = arith.constant 1.000000e+00 : f32
    %1513 = vector.broadcast %cst_474 : f32 to vector<2x96xf32>
    %1514 = arith.addf %1513, %1512 : vector<2x96xf32>
    %1515 = arith.divf %1513, %1514 : vector<2x96xf32>
    %1516 = vector.extract_strided_slice %1515 {offsets = [0, 0], sizes = [2, 32], strides = [1, 1]} : vector<2x96xf32> to vector<2x32xf32>
    %1517 = vector.extract_strided_slice %1515 {offsets = [0, 32], sizes = [2, 32], strides = [1, 1]} : vector<2x96xf32> to vector<2x32xf32>
    %1518 = vector.extract_strided_slice %1515 {offsets = [0, 64], sizes = [2, 32], strides = [1, 1]} : vector<2x96xf32> to vector<2x32xf32>
    %1519 = vector.extract_strided_slice %1493 {offsets = [0, 96], sizes = [2, 32], strides = [1, 1]} : vector<2x128xf32> to vector<2x32xf32>
    %1520 = math.tanh %1519 : vector<2x32xf32>
    %1521 = arith.mulf %1517, %1472 : vector<2x32xf32>
    %1522 = arith.mulf %1516, %1520 : vector<2x32xf32>
    %1523 = arith.addf %1521, %1522 : vector<2x32xf32>
    %1524 = math.tanh %1523 : vector<2x32xf32>
    %1525 = arith.mulf %1518, %1524 : vector<2x32xf32>
    %1526 = arith.index_cast %c10_i32_465 : i32 to index
    %c0_475 = arith.constant 0 : index
    %c0_476 = arith.constant 0 : index
    %1527 = vector.load %arg24[%1526, %c0_475, %c0_476] : memref<16x2x32xf32, #tpu.memory_space<vmem>>, vector<1x2x32xf32>
    %1528 = vector.shape_cast %1527 : vector<1x2x32xf32> to vector<2x32xf32>
    %1529 = vector.shape_cast %1509 : vector<2x32xf32> to vector<1x2x32xf32>
    tpu.vector_store %arg24[%1526, %c0_475, %c0_476], %1529 {strides = array<i32>} : memref<16x2x32xf32, #tpu.memory_space<vmem>>, vector<1x2x32xf32>,
    %1530 = arith.index_cast %1483 : i32 to index
    %c0_477 = arith.constant 0 : index
    %c0_478 = arith.constant 0 : index
    %1531 = vector.load %arg25[%1530, %c0_477, %c0_478] : memref<16x2x32xf32, #tpu.memory_space<vmem>>, vector<1x2x32xf32>
    %1532 = vector.shape_cast %1531 : vector<1x2x32xf32> to vector<2x32xf32>
    %1533 = vector.shape_cast %1525 : vector<2x32xf32> to vector<1x2x32xf32>
    tpu.vector_store %arg25[%1530, %c0_477, %c0_478], %1533 {strides = array<i32>} : memref<16x2x32xf32, #tpu.memory_space<vmem>>, vector<1x2x32xf32>,
    %c11_i32_479 = arith.constant 11 : i32
    %c15_i32_480 = arith.constant 15 : i32
    %1534 = arith.subi %c15_i32_480, %c11_i32_479 : i32
    %1535 = arith.index_cast %c11_i32_479 : i32 to index
    %c0_481 = arith.constant 0 : index
    %c0_482 = arith.constant 0 : index
    %1536 = vector.load %arg22[%1535, %c0_481, %c0_482] : memref<16x2x128xf32, #tpu.memory_space<vmem>>, vector<1x2x128xf32>
    %1537 = vector.shape_cast %1536 : vector<1x2x128xf32> to vector<2x128xf32>
    %cst_483 = arith.constant dense<0.000000e+00> : vector<2x128xf32>
    %1538 = tpu.matmul %1509, %918, %cst_483 {dimension_numbers = #tpu.dot_dimension_numbers<[1], [0], [0], [1], [0, 0, 1, 1], [], []>} : vector<2x32xf32>, vector<32x128xf32>, vector<2x128xf32> -> vector<2x128xf32>
    %1539 = arith.addf %1537, %1538 : vector<2x128xf32>
    %1540 = arith.index_cast %1534 : i32 to index
    %c0_484 = arith.constant 0 : index
    %c0_485 = arith.constant 0 : index
    %1541 = vector.load %arg23[%1540, %c0_484, %c0_485] : memref<16x2x128xf32, #tpu.memory_space<vmem>>, vector<1x2x128xf32>
    %1542 = vector.shape_cast %1541 : vector<1x2x128xf32> to vector<2x128xf32>
    %cst_486 = arith.constant dense<0.000000e+00> : vector<2x128xf32>
    %1543 = tpu.matmul %1525, %919, %cst_486 {dimension_numbers = #tpu.dot_dimension_numbers<[1], [0], [0], [1], [0, 0, 1, 1], [], []>} : vector<2x32xf32>, vector<32x128xf32>, vector<2x128xf32> -> vector<2x128xf32>
    %1544 = arith.addf %1542, %1543 : vector<2x128xf32>
    %1545 = vector.extract_strided_slice %1539 {offsets = [0, 0], sizes = [2, 96], strides = [1, 1]} : vector<2x128xf32> to vector<2x96xf32>
    %1546 = arith.negf %1545 : vector<2x96xf32>
    %1547 = math.exp %1546 : vector<2x96xf32>
    %cst_487 = arith.constant 1.000000e+00 : f32
    %1548 = vector.broadcast %cst_487 : f32 to vector<2x96xf32>
    %1549 = arith.addf %1548, %1547 : vector<2x96xf32>
    %1550 = arith.divf %1548, %1549 : vector<2x96xf32>
    %1551 = vector.extract_strided_slice %1550 {offsets = [0, 0], sizes = [2, 32], strides = [1, 1]} : vector<2x96xf32> to vector<2x32xf32>
    %1552 = vector.extract_strided_slice %1550 {offsets = [0, 32], sizes = [2, 32], strides = [1, 1]} : vector<2x96xf32> to vector<2x32xf32>
    %1553 = vector.extract_strided_slice %1550 {offsets = [0, 64], sizes = [2, 32], strides = [1, 1]} : vector<2x96xf32> to vector<2x32xf32>
    %1554 = vector.extract_strided_slice %1539 {offsets = [0, 96], sizes = [2, 32], strides = [1, 1]} : vector<2x128xf32> to vector<2x32xf32>
    %1555 = math.tanh %1554 : vector<2x32xf32>
    %1556 = arith.mulf %1552, %1507 : vector<2x32xf32>
    %1557 = arith.mulf %1551, %1555 : vector<2x32xf32>
    %1558 = arith.addf %1556, %1557 : vector<2x32xf32>
    %1559 = math.tanh %1558 : vector<2x32xf32>
    %1560 = arith.mulf %1553, %1559 : vector<2x32xf32>
    %1561 = vector.extract_strided_slice %1544 {offsets = [0, 0], sizes = [2, 96], strides = [1, 1]} : vector<2x128xf32> to vector<2x96xf32>
    %1562 = arith.negf %1561 : vector<2x96xf32>
    %1563 = math.exp %1562 : vector<2x96xf32>
    %cst_488 = arith.constant 1.000000e+00 : f32
    %1564 = vector.broadcast %cst_488 : f32 to vector<2x96xf32>
    %1565 = arith.addf %1564, %1563 : vector<2x96xf32>
    %1566 = arith.divf %1564, %1565 : vector<2x96xf32>
    %1567 = vector.extract_strided_slice %1566 {offsets = [0, 0], sizes = [2, 32], strides = [1, 1]} : vector<2x96xf32> to vector<2x32xf32>
    %1568 = vector.extract_strided_slice %1566 {offsets = [0, 32], sizes = [2, 32], strides = [1, 1]} : vector<2x96xf32> to vector<2x32xf32>
    %1569 = vector.extract_strided_slice %1566 {offsets = [0, 64], sizes = [2, 32], strides = [1, 1]} : vector<2x96xf32> to vector<2x32xf32>
    %1570 = vector.extract_strided_slice %1544 {offsets = [0, 96], sizes = [2, 32], strides = [1, 1]} : vector<2x128xf32> to vector<2x32xf32>
    %1571 = math.tanh %1570 : vector<2x32xf32>
    %1572 = arith.mulf %1568, %1523 : vector<2x32xf32>
    %1573 = arith.mulf %1567, %1571 : vector<2x32xf32>
    %1574 = arith.addf %1572, %1573 : vector<2x32xf32>
    %1575 = math.tanh %1574 : vector<2x32xf32>
    %1576 = arith.mulf %1569, %1575 : vector<2x32xf32>
    %1577 = arith.index_cast %c11_i32_479 : i32 to index
    %c0_489 = arith.constant 0 : index
    %c0_490 = arith.constant 0 : index
    %1578 = vector.load %arg24[%1577, %c0_489, %c0_490] : memref<16x2x32xf32, #tpu.memory_space<vmem>>, vector<1x2x32xf32>
    %1579 = vector.shape_cast %1578 : vector<1x2x32xf32> to vector<2x32xf32>
    %1580 = vector.shape_cast %1560 : vector<2x32xf32> to vector<1x2x32xf32>
    tpu.vector_store %arg24[%1577, %c0_489, %c0_490], %1580 {strides = array<i32>} : memref<16x2x32xf32, #tpu.memory_space<vmem>>, vector<1x2x32xf32>,
    %1581 = arith.index_cast %1534 : i32 to index
    %c0_491 = arith.constant 0 : index
    %c0_492 = arith.constant 0 : index
    %1582 = vector.load %arg25[%1581, %c0_491, %c0_492] : memref<16x2x32xf32, #tpu.memory_space<vmem>>, vector<1x2x32xf32>
    %1583 = vector.shape_cast %1582 : vector<1x2x32xf32> to vector<2x32xf32>
    %1584 = vector.shape_cast %1576 : vector<2x32xf32> to vector<1x2x32xf32>
    tpu.vector_store %arg25[%1581, %c0_491, %c0_492], %1584 {strides = array<i32>} : memref<16x2x32xf32, #tpu.memory_space<vmem>>, vector<1x2x32xf32>,
    %c12_i32_493 = arith.constant 12 : i32
    %c15_i32_494 = arith.constant 15 : i32
    %1585 = arith.subi %c15_i32_494, %c12_i32_493 : i32
    %1586 = arith.index_cast %c12_i32_493 : i32 to index
    %c0_495 = arith.constant 0 : index
    %c0_496 = arith.constant 0 : index
    %1587 = vector.load %arg22[%1586, %c0_495, %c0_496] : memref<16x2x128xf32, #tpu.memory_space<vmem>>, vector<1x2x128xf32>
    %1588 = vector.shape_cast %1587 : vector<1x2x128xf32> to vector<2x128xf32>
    %cst_497 = arith.constant dense<0.000000e+00> : vector<2x128xf32>
    %1589 = tpu.matmul %1560, %918, %cst_497 {dimension_numbers = #tpu.dot_dimension_numbers<[1], [0], [0], [1], [0, 0, 1, 1], [], []>} : vector<2x32xf32>, vector<32x128xf32>, vector<2x128xf32> -> vector<2x128xf32>
    %1590 = arith.addf %1588, %1589 : vector<2x128xf32>
    %1591 = arith.index_cast %1585 : i32 to index
    %c0_498 = arith.constant 0 : index
    %c0_499 = arith.constant 0 : index
    %1592 = vector.load %arg23[%1591, %c0_498, %c0_499] : memref<16x2x128xf32, #tpu.memory_space<vmem>>, vector<1x2x128xf32>
    %1593 = vector.shape_cast %1592 : vector<1x2x128xf32> to vector<2x128xf32>
    %cst_500 = arith.constant dense<0.000000e+00> : vector<2x128xf32>
    %1594 = tpu.matmul %1576, %919, %cst_500 {dimension_numbers = #tpu.dot_dimension_numbers<[1], [0], [0], [1], [0, 0, 1, 1], [], []>} : vector<2x32xf32>, vector<32x128xf32>, vector<2x128xf32> -> vector<2x128xf32>
    %1595 = arith.addf %1593, %1594 : vector<2x128xf32>
    %1596 = vector.extract_strided_slice %1590 {offsets = [0, 0], sizes = [2, 96], strides = [1, 1]} : vector<2x128xf32> to vector<2x96xf32>
    %1597 = arith.negf %1596 : vector<2x96xf32>
    %1598 = math.exp %1597 : vector<2x96xf32>
    %cst_501 = arith.constant 1.000000e+00 : f32
    %1599 = vector.broadcast %cst_501 : f32 to vector<2x96xf32>
    %1600 = arith.addf %1599, %1598 : vector<2x96xf32>
    %1601 = arith.divf %1599, %1600 : vector<2x96xf32>
    %1602 = vector.extract_strided_slice %1601 {offsets = [0, 0], sizes = [2, 32], strides = [1, 1]} : vector<2x96xf32> to vector<2x32xf32>
    %1603 = vector.extract_strided_slice %1601 {offsets = [0, 32], sizes = [2, 32], strides = [1, 1]} : vector<2x96xf32> to vector<2x32xf32>
    %1604 = vector.extract_strided_slice %1601 {offsets = [0, 64], sizes = [2, 32], strides = [1, 1]} : vector<2x96xf32> to vector<2x32xf32>
    %1605 = vector.extract_strided_slice %1590 {offsets = [0, 96], sizes = [2, 32], strides = [1, 1]} : vector<2x128xf32> to vector<2x32xf32>
    %1606 = math.tanh %1605 : vector<2x32xf32>
    %1607 = arith.mulf %1603, %1558 : vector<2x32xf32>
    %1608 = arith.mulf %1602, %1606 : vector<2x32xf32>
    %1609 = arith.addf %1607, %1608 : vector<2x32xf32>
    %1610 = math.tanh %1609 : vector<2x32xf32>
    %1611 = arith.mulf %1604, %1610 : vector<2x32xf32>
    %1612 = vector.extract_strided_slice %1595 {offsets = [0, 0], sizes = [2, 96], strides = [1, 1]} : vector<2x128xf32> to vector<2x96xf32>
    %1613 = arith.negf %1612 : vector<2x96xf32>
    %1614 = math.exp %1613 : vector<2x96xf32>
    %cst_502 = arith.constant 1.000000e+00 : f32
    %1615 = vector.broadcast %cst_502 : f32 to vector<2x96xf32>
    %1616 = arith.addf %1615, %1614 : vector<2x96xf32>
    %1617 = arith.divf %1615, %1616 : vector<2x96xf32>
    %1618 = vector.extract_strided_slice %1617 {offsets = [0, 0], sizes = [2, 32], strides = [1, 1]} : vector<2x96xf32> to vector<2x32xf32>
    %1619 = vector.extract_strided_slice %1617 {offsets = [0, 32], sizes = [2, 32], strides = [1, 1]} : vector<2x96xf32> to vector<2x32xf32>
    %1620 = vector.extract_strided_slice %1617 {offsets = [0, 64], sizes = [2, 32], strides = [1, 1]} : vector<2x96xf32> to vector<2x32xf32>
    %1621 = vector.extract_strided_slice %1595 {offsets = [0, 96], sizes = [2, 32], strides = [1, 1]} : vector<2x128xf32> to vector<2x32xf32>
    %1622 = math.tanh %1621 : vector<2x32xf32>
    %1623 = arith.mulf %1619, %1574 : vector<2x32xf32>
    %1624 = arith.mulf %1618, %1622 : vector<2x32xf32>
    %1625 = arith.addf %1623, %1624 : vector<2x32xf32>
    %1626 = math.tanh %1625 : vector<2x32xf32>
    %1627 = arith.mulf %1620, %1626 : vector<2x32xf32>
    %1628 = arith.index_cast %c12_i32_493 : i32 to index
    %c0_503 = arith.constant 0 : index
    %c0_504 = arith.constant 0 : index
    %1629 = vector.load %arg24[%1628, %c0_503, %c0_504] : memref<16x2x32xf32, #tpu.memory_space<vmem>>, vector<1x2x32xf32>
    %1630 = vector.shape_cast %1629 : vector<1x2x32xf32> to vector<2x32xf32>
    %1631 = vector.shape_cast %1611 : vector<2x32xf32> to vector<1x2x32xf32>
    tpu.vector_store %arg24[%1628, %c0_503, %c0_504], %1631 {strides = array<i32>} : memref<16x2x32xf32, #tpu.memory_space<vmem>>, vector<1x2x32xf32>,
    %1632 = arith.index_cast %1585 : i32 to index
    %c0_505 = arith.constant 0 : index
    %c0_506 = arith.constant 0 : index
    %1633 = vector.load %arg25[%1632, %c0_505, %c0_506] : memref<16x2x32xf32, #tpu.memory_space<vmem>>, vector<1x2x32xf32>
    %1634 = vector.shape_cast %1633 : vector<1x2x32xf32> to vector<2x32xf32>
    %1635 = vector.shape_cast %1627 : vector<2x32xf32> to vector<1x2x32xf32>
    tpu.vector_store %arg25[%1632, %c0_505, %c0_506], %1635 {strides = array<i32>} : memref<16x2x32xf32, #tpu.memory_space<vmem>>, vector<1x2x32xf32>,
    %c13_i32_507 = arith.constant 13 : i32
    %c15_i32_508 = arith.constant 15 : i32
    %1636 = arith.subi %c15_i32_508, %c13_i32_507 : i32
    %1637 = arith.index_cast %c13_i32_507 : i32 to index
    %c0_509 = arith.constant 0 : index
    %c0_510 = arith.constant 0 : index
    %1638 = vector.load %arg22[%1637, %c0_509, %c0_510] : memref<16x2x128xf32, #tpu.memory_space<vmem>>, vector<1x2x128xf32>
    %1639 = vector.shape_cast %1638 : vector<1x2x128xf32> to vector<2x128xf32>
    %cst_511 = arith.constant dense<0.000000e+00> : vector<2x128xf32>
    %1640 = tpu.matmul %1611, %918, %cst_511 {dimension_numbers = #tpu.dot_dimension_numbers<[1], [0], [0], [1], [0, 0, 1, 1], [], []>} : vector<2x32xf32>, vector<32x128xf32>, vector<2x128xf32> -> vector<2x128xf32>
    %1641 = arith.addf %1639, %1640 : vector<2x128xf32>
    %1642 = arith.index_cast %1636 : i32 to index
    %c0_512 = arith.constant 0 : index
    %c0_513 = arith.constant 0 : index
    %1643 = vector.load %arg23[%1642, %c0_512, %c0_513] : memref<16x2x128xf32, #tpu.memory_space<vmem>>, vector<1x2x128xf32>
    %1644 = vector.shape_cast %1643 : vector<1x2x128xf32> to vector<2x128xf32>
    %cst_514 = arith.constant dense<0.000000e+00> : vector<2x128xf32>
    %1645 = tpu.matmul %1627, %919, %cst_514 {dimension_numbers = #tpu.dot_dimension_numbers<[1], [0], [0], [1], [0, 0, 1, 1], [], []>} : vector<2x32xf32>, vector<32x128xf32>, vector<2x128xf32> -> vector<2x128xf32>
    %1646 = arith.addf %1644, %1645 : vector<2x128xf32>
    %1647 = vector.extract_strided_slice %1641 {offsets = [0, 0], sizes = [2, 96], strides = [1, 1]} : vector<2x128xf32> to vector<2x96xf32>
    %1648 = arith.negf %1647 : vector<2x96xf32>
    %1649 = math.exp %1648 : vector<2x96xf32>
    %cst_515 = arith.constant 1.000000e+00 : f32
    %1650 = vector.broadcast %cst_515 : f32 to vector<2x96xf32>
    %1651 = arith.addf %1650, %1649 : vector<2x96xf32>
    %1652 = arith.divf %1650, %1651 : vector<2x96xf32>
    %1653 = vector.extract_strided_slice %1652 {offsets = [0, 0], sizes = [2, 32], strides = [1, 1]} : vector<2x96xf32> to vector<2x32xf32>
    %1654 = vector.extract_strided_slice %1652 {offsets = [0, 32], sizes = [2, 32], strides = [1, 1]} : vector<2x96xf32> to vector<2x32xf32>
    %1655 = vector.extract_strided_slice %1652 {offsets = [0, 64], sizes = [2, 32], strides = [1, 1]} : vector<2x96xf32> to vector<2x32xf32>
    %1656 = vector.extract_strided_slice %1641 {offsets = [0, 96], sizes = [2, 32], strides = [1, 1]} : vector<2x128xf32> to vector<2x32xf32>
    %1657 = math.tanh %1656 : vector<2x32xf32>
    %1658 = arith.mulf %1654, %1609 : vector<2x32xf32>
    %1659 = arith.mulf %1653, %1657 : vector<2x32xf32>
    %1660 = arith.addf %1658, %1659 : vector<2x32xf32>
    %1661 = math.tanh %1660 : vector<2x32xf32>
    %1662 = arith.mulf %1655, %1661 : vector<2x32xf32>
    %1663 = vector.extract_strided_slice %1646 {offsets = [0, 0], sizes = [2, 96], strides = [1, 1]} : vector<2x128xf32> to vector<2x96xf32>
    %1664 = arith.negf %1663 : vector<2x96xf32>
    %1665 = math.exp %1664 : vector<2x96xf32>
    %cst_516 = arith.constant 1.000000e+00 : f32
    %1666 = vector.broadcast %cst_516 : f32 to vector<2x96xf32>
    %1667 = arith.addf %1666, %1665 : vector<2x96xf32>
    %1668 = arith.divf %1666, %1667 : vector<2x96xf32>
    %1669 = vector.extract_strided_slice %1668 {offsets = [0, 0], sizes = [2, 32], strides = [1, 1]} : vector<2x96xf32> to vector<2x32xf32>
    %1670 = vector.extract_strided_slice %1668 {offsets = [0, 32], sizes = [2, 32], strides = [1, 1]} : vector<2x96xf32> to vector<2x32xf32>
    %1671 = vector.extract_strided_slice %1668 {offsets = [0, 64], sizes = [2, 32], strides = [1, 1]} : vector<2x96xf32> to vector<2x32xf32>
    %1672 = vector.extract_strided_slice %1646 {offsets = [0, 96], sizes = [2, 32], strides = [1, 1]} : vector<2x128xf32> to vector<2x32xf32>
    %1673 = math.tanh %1672 : vector<2x32xf32>
    %1674 = arith.mulf %1670, %1625 : vector<2x32xf32>
    %1675 = arith.mulf %1669, %1673 : vector<2x32xf32>
    %1676 = arith.addf %1674, %1675 : vector<2x32xf32>
    %1677 = math.tanh %1676 : vector<2x32xf32>
    %1678 = arith.mulf %1671, %1677 : vector<2x32xf32>
    %1679 = arith.index_cast %c13_i32_507 : i32 to index
    %c0_517 = arith.constant 0 : index
    %c0_518 = arith.constant 0 : index
    %1680 = vector.load %arg24[%1679, %c0_517, %c0_518] : memref<16x2x32xf32, #tpu.memory_space<vmem>>, vector<1x2x32xf32>
    %1681 = vector.shape_cast %1680 : vector<1x2x32xf32> to vector<2x32xf32>
    %1682 = vector.shape_cast %1662 : vector<2x32xf32> to vector<1x2x32xf32>
    tpu.vector_store %arg24[%1679, %c0_517, %c0_518], %1682 {strides = array<i32>} : memref<16x2x32xf32, #tpu.memory_space<vmem>>, vector<1x2x32xf32>,
    %1683 = arith.index_cast %1636 : i32 to index
    %c0_519 = arith.constant 0 : index
    %c0_520 = arith.constant 0 : index
    %1684 = vector.load %arg25[%1683, %c0_519, %c0_520] : memref<16x2x32xf32, #tpu.memory_space<vmem>>, vector<1x2x32xf32>
    %1685 = vector.shape_cast %1684 : vector<1x2x32xf32> to vector<2x32xf32>
    %1686 = vector.shape_cast %1678 : vector<2x32xf32> to vector<1x2x32xf32>
    tpu.vector_store %arg25[%1683, %c0_519, %c0_520], %1686 {strides = array<i32>} : memref<16x2x32xf32, #tpu.memory_space<vmem>>, vector<1x2x32xf32>,
    %c14_i32_521 = arith.constant 14 : i32
    %c15_i32_522 = arith.constant 15 : i32
    %1687 = arith.subi %c15_i32_522, %c14_i32_521 : i32
    %1688 = arith.index_cast %c14_i32_521 : i32 to index
    %c0_523 = arith.constant 0 : index
    %c0_524 = arith.constant 0 : index
    %1689 = vector.load %arg22[%1688, %c0_523, %c0_524] : memref<16x2x128xf32, #tpu.memory_space<vmem>>, vector<1x2x128xf32>
    %1690 = vector.shape_cast %1689 : vector<1x2x128xf32> to vector<2x128xf32>
    %cst_525 = arith.constant dense<0.000000e+00> : vector<2x128xf32>
    %1691 = tpu.matmul %1662, %918, %cst_525 {dimension_numbers = #tpu.dot_dimension_numbers<[1], [0], [0], [1], [0, 0, 1, 1], [], []>} : vector<2x32xf32>, vector<32x128xf32>, vector<2x128xf32> -> vector<2x128xf32>
    %1692 = arith.addf %1690, %1691 : vector<2x128xf32>
    %1693 = arith.index_cast %1687 : i32 to index
    %c0_526 = arith.constant 0 : index
    %c0_527 = arith.constant 0 : index
    %1694 = vector.load %arg23[%1693, %c0_526, %c0_527] : memref<16x2x128xf32, #tpu.memory_space<vmem>>, vector<1x2x128xf32>
    %1695 = vector.shape_cast %1694 : vector<1x2x128xf32> to vector<2x128xf32>
    %cst_528 = arith.constant dense<0.000000e+00> : vector<2x128xf32>
    %1696 = tpu.matmul %1678, %919, %cst_528 {dimension_numbers = #tpu.dot_dimension_numbers<[1], [0], [0], [1], [0, 0, 1, 1], [], []>} : vector<2x32xf32>, vector<32x128xf32>, vector<2x128xf32> -> vector<2x128xf32>
    %1697 = arith.addf %1695, %1696 : vector<2x128xf32>
    %1698 = vector.extract_strided_slice %1692 {offsets = [0, 0], sizes = [2, 96], strides = [1, 1]} : vector<2x128xf32> to vector<2x96xf32>
    %1699 = arith.negf %1698 : vector<2x96xf32>
    %1700 = math.exp %1699 : vector<2x96xf32>
    %cst_529 = arith.constant 1.000000e+00 : f32
    %1701 = vector.broadcast %cst_529 : f32 to vector<2x96xf32>
    %1702 = arith.addf %1701, %1700 : vector<2x96xf32>
    %1703 = arith.divf %1701, %1702 : vector<2x96xf32>
    %1704 = vector.extract_strided_slice %1703 {offsets = [0, 0], sizes = [2, 32], strides = [1, 1]} : vector<2x96xf32> to vector<2x32xf32>
    %1705 = vector.extract_strided_slice %1703 {offsets = [0, 32], sizes = [2, 32], strides = [1, 1]} : vector<2x96xf32> to vector<2x32xf32>
    %1706 = vector.extract_strided_slice %1703 {offsets = [0, 64], sizes = [2, 32], strides = [1, 1]} : vector<2x96xf32> to vector<2x32xf32>
    %1707 = vector.extract_strided_slice %1692 {offsets = [0, 96], sizes = [2, 32], strides = [1, 1]} : vector<2x128xf32> to vector<2x32xf32>
    %1708 = math.tanh %1707 : vector<2x32xf32>
    %1709 = arith.mulf %1705, %1660 : vector<2x32xf32>
    %1710 = arith.mulf %1704, %1708 : vector<2x32xf32>
    %1711 = arith.addf %1709, %1710 : vector<2x32xf32>
    %1712 = math.tanh %1711 : vector<2x32xf32>
    %1713 = arith.mulf %1706, %1712 : vector<2x32xf32>
    %1714 = vector.extract_strided_slice %1697 {offsets = [0, 0], sizes = [2, 96], strides = [1, 1]} : vector<2x128xf32> to vector<2x96xf32>
    %1715 = arith.negf %1714 : vector<2x96xf32>
    %1716 = math.exp %1715 : vector<2x96xf32>
    %cst_530 = arith.constant 1.000000e+00 : f32
    %1717 = vector.broadcast %cst_530 : f32 to vector<2x96xf32>
    %1718 = arith.addf %1717, %1716 : vector<2x96xf32>
    %1719 = arith.divf %1717, %1718 : vector<2x96xf32>
    %1720 = vector.extract_strided_slice %1719 {offsets = [0, 0], sizes = [2, 32], strides = [1, 1]} : vector<2x96xf32> to vector<2x32xf32>
    %1721 = vector.extract_strided_slice %1719 {offsets = [0, 32], sizes = [2, 32], strides = [1, 1]} : vector<2x96xf32> to vector<2x32xf32>
    %1722 = vector.extract_strided_slice %1719 {offsets = [0, 64], sizes = [2, 32], strides = [1, 1]} : vector<2x96xf32> to vector<2x32xf32>
    %1723 = vector.extract_strided_slice %1697 {offsets = [0, 96], sizes = [2, 32], strides = [1, 1]} : vector<2x128xf32> to vector<2x32xf32>
    %1724 = math.tanh %1723 : vector<2x32xf32>
    %1725 = arith.mulf %1721, %1676 : vector<2x32xf32>
    %1726 = arith.mulf %1720, %1724 : vector<2x32xf32>
    %1727 = arith.addf %1725, %1726 : vector<2x32xf32>
    %1728 = math.tanh %1727 : vector<2x32xf32>
    %1729 = arith.mulf %1722, %1728 : vector<2x32xf32>
    %1730 = arith.index_cast %c14_i32_521 : i32 to index
    %c0_531 = arith.constant 0 : index
    %c0_532 = arith.constant 0 : index
    %1731 = vector.load %arg24[%1730, %c0_531, %c0_532] : memref<16x2x32xf32, #tpu.memory_space<vmem>>, vector<1x2x32xf32>
    %1732 = vector.shape_cast %1731 : vector<1x2x32xf32> to vector<2x32xf32>
    %1733 = vector.shape_cast %1713 : vector<2x32xf32> to vector<1x2x32xf32>
    tpu.vector_store %arg24[%1730, %c0_531, %c0_532], %1733 {strides = array<i32>} : memref<16x2x32xf32, #tpu.memory_space<vmem>>, vector<1x2x32xf32>,
    %1734 = arith.index_cast %1687 : i32 to index
    %c0_533 = arith.constant 0 : index
    %c0_534 = arith.constant 0 : index
    %1735 = vector.load %arg25[%1734, %c0_533, %c0_534] : memref<16x2x32xf32, #tpu.memory_space<vmem>>, vector<1x2x32xf32>
    %1736 = vector.shape_cast %1735 : vector<1x2x32xf32> to vector<2x32xf32>
    %1737 = vector.shape_cast %1729 : vector<2x32xf32> to vector<1x2x32xf32>
    tpu.vector_store %arg25[%1734, %c0_533, %c0_534], %1737 {strides = array<i32>} : memref<16x2x32xf32, #tpu.memory_space<vmem>>, vector<1x2x32xf32>,
    %c15_i32_535 = arith.constant 15 : i32
    %c15_i32_536 = arith.constant 15 : i32
    %1738 = arith.subi %c15_i32_536, %c15_i32_535 : i32
    %1739 = arith.index_cast %c15_i32_535 : i32 to index
    %c0_537 = arith.constant 0 : index
    %c0_538 = arith.constant 0 : index
    %1740 = vector.load %arg22[%1739, %c0_537, %c0_538] : memref<16x2x128xf32, #tpu.memory_space<vmem>>, vector<1x2x128xf32>
    %1741 = vector.shape_cast %1740 : vector<1x2x128xf32> to vector<2x128xf32>
    %cst_539 = arith.constant dense<0.000000e+00> : vector<2x128xf32>
    %1742 = tpu.matmul %1713, %918, %cst_539 {dimension_numbers = #tpu.dot_dimension_numbers<[1], [0], [0], [1], [0, 0, 1, 1], [], []>} : vector<2x32xf32>, vector<32x128xf32>, vector<2x128xf32> -> vector<2x128xf32>
    %1743 = arith.addf %1741, %1742 : vector<2x128xf32>
    %1744 = arith.index_cast %1738 : i32 to index
    %c0_540 = arith.constant 0 : index
    %c0_541 = arith.constant 0 : index
    %1745 = vector.load %arg23[%1744, %c0_540, %c0_541] : memref<16x2x128xf32, #tpu.memory_space<vmem>>, vector<1x2x128xf32>
    %1746 = vector.shape_cast %1745 : vector<1x2x128xf32> to vector<2x128xf32>
    %cst_542 = arith.constant dense<0.000000e+00> : vector<2x128xf32>
    %1747 = tpu.matmul %1729, %919, %cst_542 {dimension_numbers = #tpu.dot_dimension_numbers<[1], [0], [0], [1], [0, 0, 1, 1], [], []>} : vector<2x32xf32>, vector<32x128xf32>, vector<2x128xf32> -> vector<2x128xf32>
    %1748 = arith.addf %1746, %1747 : vector<2x128xf32>
    %1749 = vector.extract_strided_slice %1743 {offsets = [0, 0], sizes = [2, 96], strides = [1, 1]} : vector<2x128xf32> to vector<2x96xf32>
    %1750 = arith.negf %1749 : vector<2x96xf32>
    %1751 = math.exp %1750 : vector<2x96xf32>
    %cst_543 = arith.constant 1.000000e+00 : f32
    %1752 = vector.broadcast %cst_543 : f32 to vector<2x96xf32>
    %1753 = arith.addf %1752, %1751 : vector<2x96xf32>
    %1754 = arith.divf %1752, %1753 : vector<2x96xf32>
    %1755 = vector.extract_strided_slice %1754 {offsets = [0, 0], sizes = [2, 32], strides = [1, 1]} : vector<2x96xf32> to vector<2x32xf32>
    %1756 = vector.extract_strided_slice %1754 {offsets = [0, 32], sizes = [2, 32], strides = [1, 1]} : vector<2x96xf32> to vector<2x32xf32>
    %1757 = vector.extract_strided_slice %1754 {offsets = [0, 64], sizes = [2, 32], strides = [1, 1]} : vector<2x96xf32> to vector<2x32xf32>
    %1758 = vector.extract_strided_slice %1743 {offsets = [0, 96], sizes = [2, 32], strides = [1, 1]} : vector<2x128xf32> to vector<2x32xf32>
    %1759 = math.tanh %1758 : vector<2x32xf32>
    %1760 = arith.mulf %1756, %1711 : vector<2x32xf32>
    %1761 = arith.mulf %1755, %1759 : vector<2x32xf32>
    %1762 = arith.addf %1760, %1761 : vector<2x32xf32>
    %1763 = math.tanh %1762 : vector<2x32xf32>
    %1764 = arith.mulf %1757, %1763 : vector<2x32xf32>
    %1765 = vector.extract_strided_slice %1748 {offsets = [0, 0], sizes = [2, 96], strides = [1, 1]} : vector<2x128xf32> to vector<2x96xf32>
    %1766 = arith.negf %1765 : vector<2x96xf32>
    %1767 = math.exp %1766 : vector<2x96xf32>
    %cst_544 = arith.constant 1.000000e+00 : f32
    %1768 = vector.broadcast %cst_544 : f32 to vector<2x96xf32>
    %1769 = arith.addf %1768, %1767 : vector<2x96xf32>
    %1770 = arith.divf %1768, %1769 : vector<2x96xf32>
    %1771 = vector.extract_strided_slice %1770 {offsets = [0, 0], sizes = [2, 32], strides = [1, 1]} : vector<2x96xf32> to vector<2x32xf32>
    %1772 = vector.extract_strided_slice %1770 {offsets = [0, 32], sizes = [2, 32], strides = [1, 1]} : vector<2x96xf32> to vector<2x32xf32>
    %1773 = vector.extract_strided_slice %1770 {offsets = [0, 64], sizes = [2, 32], strides = [1, 1]} : vector<2x96xf32> to vector<2x32xf32>
    %1774 = vector.extract_strided_slice %1748 {offsets = [0, 96], sizes = [2, 32], strides = [1, 1]} : vector<2x128xf32> to vector<2x32xf32>
    %1775 = math.tanh %1774 : vector<2x32xf32>
    %1776 = arith.mulf %1772, %1727 : vector<2x32xf32>
    %1777 = arith.mulf %1771, %1775 : vector<2x32xf32>
    %1778 = arith.addf %1776, %1777 : vector<2x32xf32>
    %1779 = math.tanh %1778 : vector<2x32xf32>
    %1780 = arith.mulf %1773, %1779 : vector<2x32xf32>
    %1781 = arith.index_cast %c15_i32_535 : i32 to index
    %c0_545 = arith.constant 0 : index
    %c0_546 = arith.constant 0 : index
    %1782 = vector.load %arg24[%1781, %c0_545, %c0_546] : memref<16x2x32xf32, #tpu.memory_space<vmem>>, vector<1x2x32xf32>
    %1783 = vector.shape_cast %1782 : vector<1x2x32xf32> to vector<2x32xf32>
    %1784 = vector.shape_cast %1764 : vector<2x32xf32> to vector<1x2x32xf32>
    tpu.vector_store %arg24[%1781, %c0_545, %c0_546], %1784 {strides = array<i32>} : memref<16x2x32xf32, #tpu.memory_space<vmem>>, vector<1x2x32xf32>,
    %1785 = arith.index_cast %1738 : i32 to index
    %c0_547 = arith.constant 0 : index
    %c0_548 = arith.constant 0 : index
    %1786 = vector.load %arg25[%1785, %c0_547, %c0_548] : memref<16x2x32xf32, #tpu.memory_space<vmem>>, vector<1x2x32xf32>
    %1787 = vector.shape_cast %1786 : vector<1x2x32xf32> to vector<2x32xf32>
    %1788 = vector.shape_cast %1780 : vector<2x32xf32> to vector<1x2x32xf32>
    tpu.vector_store %arg25[%1785, %c0_547, %c0_548], %1788 {strides = array<i32>} : memref<16x2x32xf32, #tpu.memory_space<vmem>>, vector<1x2x32xf32>,
    %c16_i32_549 = arith.constant 16 : i32
    %c15 = arith.constant 15 : index
    %c0_550 = arith.constant 0 : index
    %c0_551 = arith.constant 0 : index
    %1789 = vector.load %arg24[%c15, %c0_550, %c0_551] : memref<16x2x32xf32, #tpu.memory_space<vmem>>, vector<1x2x32xf32>
    %1790 = vector.shape_cast %1789 : vector<1x2x32xf32> to vector<2x32xf32>
    %cst_552 = arith.constant 0.000000e+00 : f32
    %1791 = vector.broadcast %cst_552 : f32 to vector<2x32xf32>
    %1792 = arith.maximumf %1790, %1791 : vector<2x32xf32>
    %c15_553 = arith.constant 15 : index
    %c0_554 = arith.constant 0 : index
    %c0_555 = arith.constant 0 : index
    %1793 = vector.load %arg25[%c15_553, %c0_554, %c0_555] : memref<16x2x32xf32, #tpu.memory_space<vmem>>, vector<1x2x32xf32>
    %1794 = vector.shape_cast %1793 : vector<1x2x32xf32> to vector<2x32xf32>
    %cst_556 = arith.constant 0.000000e+00 : f32
    %1795 = vector.broadcast %cst_556 : f32 to vector<2x32xf32>
    %1796 = arith.maximumf %1794, %1795 : vector<2x32xf32>
    %c0_557 = arith.constant 0 : index
    %c0_558 = arith.constant 0 : index
    %1797 = vector.load %arg15[%c0_557, %c0_558] : memref<64x64xf32, #tpu.memory_space<vmem>>, vector<64x64xf32>
    %1798 = vector.extract_strided_slice %1797 {offsets = [0, 0], sizes = [32, 64], strides = [1, 1]} : vector<64x64xf32> to vector<32x64xf32>
    %cst_559 = arith.constant dense<0.000000e+00> : vector<2x64xf32>
    %1799 = tpu.matmul %1792, %1798, %cst_559 {dimension_numbers = #tpu.dot_dimension_numbers<[1], [0], [0], [1], [0, 0, 1, 1], [], []>} : vector<2x32xf32>, vector<32x64xf32>, vector<2x64xf32> -> vector<2x64xf32>
    %1800 = vector.extract_strided_slice %1797 {offsets = [32, 0], sizes = [32, 64], strides = [1, 1]} : vector<64x64xf32> to vector<32x64xf32>
    %cst_560 = arith.constant dense<0.000000e+00> : vector<2x64xf32>
    %1801 = tpu.matmul %1796, %1800, %cst_560 {dimension_numbers = #tpu.dot_dimension_numbers<[1], [0], [0], [1], [0, 0, 1, 1], [], []>} : vector<2x32xf32>, vector<32x64xf32>, vector<2x64xf32> -> vector<2x64xf32>
    %1802 = arith.addf %1799, %1801 : vector<2x64xf32>
    %c0_561 = arith.constant 0 : index
    %c0_562 = arith.constant 0 : index
    %1803 = vector.load %arg16[%c0_561, %c0_562] : memref<1x64xf32, #tpu.memory_space<vmem>>, vector<1x64xf32>
    %1804 = vector.broadcast %1803 : vector<1x64xf32> to vector<2x64xf32>
    %1805 = arith.addf %1802, %1804 : vector<2x64xf32>
    %cst_563 = arith.constant 0.000000e+00 : f32
    %1806 = vector.broadcast %cst_563 : f32 to vector<2x64xf32>
    %1807 = arith.maximumf %1805, %1806 : vector<2x64xf32>
    %c0_564 = arith.constant 0 : index
    %c0_565 = arith.constant 0 : index
    %1808 = vector.load %arg17[%c0_564, %c0_565] : memref<64x16xf32, #tpu.memory_space<vmem>>, vector<64x16xf32>
    %cst_566 = arith.constant dense<0.000000e+00> : vector<2x16xf32>
    %1809 = tpu.matmul %1807, %1808, %cst_566 {dimension_numbers = #tpu.dot_dimension_numbers<[1], [0], [0], [1], [0, 0, 1, 1], [], []>} : vector<2x64xf32>, vector<64x16xf32>, vector<2x16xf32> -> vector<2x16xf32>
    %c0_567 = arith.constant 0 : index
    %c0_568 = arith.constant 0 : index
    %1810 = vector.load %arg18[%c0_567, %c0_568] : memref<1x16xf32, #tpu.memory_space<vmem>>, vector<1x16xf32>
    %1811 = vector.broadcast %1810 : vector<1x16xf32> to vector<2x16xf32>
    %1812 = arith.addf %1809, %1811 : vector<2x16xf32>
    %cst_569 = arith.constant 0.000000e+00 : f32
    %1813 = vector.broadcast %cst_569 : f32 to vector<2x16xf32>
    %1814 = arith.maximumf %1812, %1813 : vector<2x16xf32>
    %c0_570 = arith.constant 0 : index
    %c0_571 = arith.constant 0 : index
    %1815 = vector.load %arg19[%c0_570, %c0_571] : memref<16x1xf32, #tpu.memory_space<vmem>>, vector<16x1xf32>
    %cst_572 = arith.constant dense<0.000000e+00> : vector<2x1xf32>
    %1816 = tpu.matmul %1814, %1815, %cst_572 {dimension_numbers = #tpu.dot_dimension_numbers<[1], [0], [0], [1], [0, 0, 1, 1], [], []>} : vector<2x16xf32>, vector<16x1xf32>, vector<2x1xf32> -> vector<2x1xf32>
    %c0_573 = arith.constant 0 : index
    %c0_574 = arith.constant 0 : index
    %1817 = vector.load %arg20[%c0_573, %c0_574] : memref<1x1xf32, #tpu.memory_space<vmem>>, vector<1x1xf32>
    %1818 = vector.broadcast %1817 : vector<1x1xf32> to vector<2x1xf32>
    %1819 = arith.addf %1816, %1818 : vector<2x1xf32>
    %c0_575 = arith.constant 0 : index
    %c0_576 = arith.constant 0 : index
    %1820 = vector.load %arg21[%c0_575, %c0_576] : memref<2x1xf32, #tpu.memory_space<vmem>>, vector<2x1xf32>
    tpu.vector_store %arg21[%c0_575, %c0_576], %1819 {strides = array<i32>} : memref<2x1xf32, #tpu.memory_space<vmem>>, vector<2x1xf32>,
    return
  }
}

</mosaic_0001>

<bundles_post_ra>
// kernel: tpu_custom_call.1
= control target key start
LH: loop header
LB: loop body
LE: loop exit
PB: predicated region body
PF: predicated region fallthrough
CT: control target
= control target key end

     0   :  { %s14756_s0 = inlined_call_operand.vmem [shape: f32[2,18,2], index: 0, kind: input, shape index: {}]   ;;  %s14757_s1 = inlined_call_operand.vmem [shape: f32[3,2,2], index: 1, kind: input, shape index: {}]   ;;  %s14758_s2 = inlined_call_operand.hbm [shape: f32[1,2], index: 2, kind: input, shape index: {}]   ;;  %s14759_s3 = inlined_call_operand.hbm [shape: f32[2,128], index: 3, kind: input, shape index: {}]   ;;  %s14760_s4 = inlined_call_operand.hbm [shape: f32[32,128], index: 4, kind: input, shape index: {}]   ;;  %s14761_s5 = inlined_call_operand.hbm [shape: f32[1,128], index: 5, kind: input, shape index: {}]   ;;  %s14762_s6 = inlined_call_operand.hbm [shape: f32[2,128], index: 6, kind: input, shape index: {}]   ;;  %s14763_s7 = inlined_call_operand.hbm [shape: f32[32,128], index: 7, kind: input, shape index: {}]   ;;  %s14764_s8 = inlined_call_operand.hbm [shape: f32[1,128], index: 8, kind: input, shape index: {}]   ;;  %s14765_s9 = inlined_call_operand.vmem [shape: f32[64,128], index: 9, kind: input, shape index: {}]   ;;  %s14766_s10 = inlined_call_operand.hbm [shape: f32[32,128], index: 10, kind: input, shape index: {}]   ;;  %s14767_s11 = inlined_call_operand.hbm [shape: f32[1,128], index: 11, kind: input, shape index: {}]   ;;  %s14768_s12 = inlined_call_operand.vmem [shape: f32[64,128], index: 12, kind: input, shape index: {}]   ;;  %s14769_s13 = inlined_call_operand.hbm [shape: f32[32,128], index: 13, kind: input, shape index: {}]   ;;  %s14770_s14 = inlined_call_operand.vmem [shape: f32[1,128], index: 14, kind: input, shape index: {}]   ;;  %s14771_s15 = inlined_call_operand.vmem [shape: f32[64,64], index: 15, kind: input, shape index: {}]   ;;  %s14772_s16 = inlined_call_operand.vmem [shape: f32[1,64], index: 16, kind: input, shape index: {}]   ;;  %s14773_s17 = inlined_call_operand.vmem [shape: f32[64,16], index: 17, kind: input, shape index: {}]   ;;  %s14774_s18 = inlined_call_operand.vmem [shape: f32[1,16], index: 18, kind: input, shape index: {}]   ;;  %s14775_s19 = inlined_call_operand.vmem [shape: f32[16,1], index: 19, kind: input, shape index: {}]   ;;  %s14776_s20 = inlined_call_operand.<no memory space> [shape: f32[1,1], index: 20, kind: input, shape index: {}]   ;;  %s14777_s21 = inlined_call_operand.vmem [shape: f32[2,1], index: 21, kind: output, shape index: {}]  }
   0x1   :  { %14784 = sst [smem:[#allocation29_spill]] %s14756_s0  ;;  %v26_v0 = vstv %s14776_s20 }
   0x2   :  { %14785 = sst [smem:[#allocation30_spill]] %s14757_s1  ;;  %27 = vst [vmem:[#allocation6] sm:$0x1] %v26_v0 }
   0x3   :  { %14786 = sst [smem:[#allocation31_spill]] %s14758_s2 }
   0x4   :  { %14787 = sst [smem:[#allocation32_spill]] %s14759_s3 }
   0x5   :  { %14788 = sst [smem:[#allocation33_spill]] %s14760_s4 }
   0x6   :  { %14789 = sst [smem:[#allocation34_spill]] %s14761_s5 }
   0x7   :  { %28 = vsyncpa [#allocation8], 0 }
   0x8   :  { %29 = vsyncpa [#allocation10], 0 }
   0x9   :  { %30 = vsyncpa [#allocation13], 0 }
   0xa   :  { %31 = vsyncpa [#allocation16], 0 }
   0xb   :  { %32 = vsyncpa [#allocation19], 0 }
   0xc   :  { %33 = vsyncpa [#allocation22], 0  ;;  %s12918_s26 = smov [#allocation9]   ;;  %s12919_s3 = smov [#allocation12]  }
   0xd   :  { %s54_s27 = sshll.u32 %s12918_s26, 4  ;;  %s76_s28 = sshll.u32 %s12919_s3, 4  ;;  %s55_s27 = int_to_ptr.vmem [resolvable:$true] %s54_s27  ;;  %s77_s28 = int_to_ptr.vmem [resolvable:$true] %s76_s28 }
   0xe   :  { %s14790_s4 = sld [smem:[#allocation32_spill]] }
  0x14   :  { %s12686_s30 = scalar_lea.hbm %s14790_s4, 32 }
  0x15   :  { %p12687_p0 = scmp.ne.s32.totalorder %s14790_s4, %s12686_s30  ;;  %p12690_p1 = scmp.lt.u32.totalorder %s12686_s30, %s14790_s4 }
  0x17   :  { %p12692_p2 = pnand %p12690_p1, %p12687_p0 }
  0x19   :  { %12695 = shalt.err (!%p12692_p2)
}
  0x1a   :  { %s12696_s1 = scalar_lea.vmem %s55_s27, 32  ;;  %p12701_p4 = scmp.lt.s32.totalorder %s55_s27, %s55_s27 }
  0x1b   :  { %p12697_p3 = scmp.ne.s32.totalorder %s55_s27, %s12696_s1  ;;  %p12702_p5 = scmp.lt.s32.totalorder %s12696_s1, %s12696_s1 }
  0x1d   :  { %p12703_p6 = por %p12702_p5, %p12701_p4 }
  0x1f   :  { %p12704_p7 = pnand %p12703_p6, %p12697_p3 }
  0x21   :  { %12707 = shalt.err (!%p12704_p7)
}
  0x22   :  { %57 = dma.hbm_to_vmem [thread:$0]  %s14790_s4, 32, %s55_s27, [#allocation10]  }
  0x23   :  { %s14791_s3 = sld [smem:[#allocation34_spill]] }
  0x29   :  { %s12708_s29 = scalar_lea.hbm %s14791_s3, 16 }
  0x2a   :  { %p12709_p8 = scmp.ne.s32.totalorder %s14791_s3, %s12708_s29  ;;  %p12712_p9 = scmp.lt.u32.totalorder %s12708_s29, %s14791_s3 }
  0x2c   :  { %p12714_p10 = pnand %p12712_p9, %p12709_p8 }
  0x2e   :  { %12717 = shalt.err (!%p12714_p10)
}
  0x2f   :  { %s12718_s20 = scalar_lea.vmem %s77_s28, 16  ;;  %s12722_s23 = scalar_lea.vmem %s77_s28, 32 }
  0x30   :  { %p12719_p11 = scmp.ne.s32.totalorder %s77_s28, %s12718_s20  ;;  %p12723_p12 = scmp.lt.s32.totalorder %s77_s28, %s77_s28 }
  0x31   :  { %p12724_p13 = scmp.lt.s32.totalorder %s12722_s23, %s12718_s20 }
  0x33   :  { %p12725_p0 = por %p12724_p13, %p12723_p12 }
  0x35   :  { %p12726_p1 = pnand %p12725_p0, %p12719_p11 }
  0x37   :  { %12729 = shalt.err (!%p12726_p1)
}
  0x38   :  { %79 = dma.hbm_to_vmem [thread:$0]  %s14791_s3, 16, %s77_s28, [#allocation13]  }
  0x39   :  { %s12920_s1 = smov [#allocation15]   ;;  %s12921_s2 = smov [#allocation18]  }
  0x3a   :  { %s95_s24 = sshll.u32 %s12920_s1, 4  ;;  %s119_s25 = sshll.u32 %s12921_s2, 4  ;;  %s96_s24 = int_to_ptr.vmem [resolvable:$true] %s95_s24  ;;  %s13073_s25 = int_to_ptr.vmem [resolvable:$true] %s119_s25 }
  0x3b   :  { %s12730_s0 = scalar_lea.hbm %s14763_s7, 512 }
  0x3c   :  { %p12731_p2 = scmp.ne.s32.totalorder %s14763_s7, %s12730_s0  ;;  %p12734_p3 = scmp.lt.u32.totalorder %s12730_s0, %s14763_s7 }
  0x3e   :  { %p12736_p4 = pnand %p12734_p3, %p12731_p2 }
  0x40   :  { %12739 = shalt.err (!%p12736_p4)
}
  0x41   :  { %s12740_s28 = scalar_lea.vmem %s96_s24, 512  ;;  %p12745_p6 = scmp.lt.s32.totalorder %s96_s24, %s96_s24 }
  0x42   :  { %p12741_p5 = scmp.ne.s32.totalorder %s96_s24, %s12740_s28  ;;  %p12746_p7 = scmp.lt.s32.totalorder %s12740_s28, %s12740_s28 }
  0x44   :  { %p12747_p8 = por %p12746_p7, %p12745_p6 }
  0x46   :  { %p12748_p9 = pnand %p12747_p8, %p12741_p5 }
  0x48   :  { %12751 = shalt.err (!%p12748_p9)
}
  0x49   :  { %s12922_s3 = smov 128   ;;  %s12923_s23 = smov 8  }
  0x4a   :  { %101 = dma.hbm_to_vmem [thread:$0]  %s14763_s7, 512, %s96_s24, [#allocation16], %s12922_s3, %s12922_s3, %s12923_s23  }
  0x4b   :  { %s12752_s26 = scalar_lea.hbm %s14766_s10, 512 }
  0x4c   :  { %p12753_p10 = scmp.ne.s32.totalorder %s14766_s10, %s12752_s26  ;;  %p12756_p11 = scmp.lt.u32.totalorder %s12752_s26, %s14766_s10 }
  0x4e   :  { %p12758_p12 = pnand %p12756_p11, %p12753_p10 }
  0x50   :  { %12761 = shalt.err (!%p12758_p12)
}
  0x51   :  { %s12762_s22 = scalar_lea.vmem %s13073_s25, 512  ;;  %p12767_p0 = scmp.lt.s32.totalorder %s13073_s25, %s13073_s25 }
  0x52   :  { %p12763_p13 = scmp.ne.s32.totalorder %s13073_s25, %s12762_s22  ;;  %p12768_p1 = scmp.lt.s32.totalorder %s12762_s22, %s12762_s22 }
  0x54   :  { %p12769_p2 = por %p12768_p1, %p12767_p0 }
  0x56   :  { %p12770_p3 = pnand %p12769_p2, %p12763_p13 }
  0x58   :  { %12773 = shalt.err (!%p12770_p3)
}
  0x59   :  { %125 = dma.hbm_to_vmem [thread:$0]  %s14766_s10, 512, %s13073_s25, [#allocation19], %s12922_s3, %s12922_s3, %s12923_s23  }
  0x5a   :  { %s12924_s20 = smov [#allocation7]   ;;  %s12925_s27 = smov [#allocation11]  }
  0x5b   :  { %s44_s28 = sshll.u32 %s12924_s20, 4  ;;  %s63_s4 = sshll.u32 %s12925_s27, 4  ;;  %s45_s28 = int_to_ptr.vmem [resolvable:$true] %s44_s28  ;;  %s13110_s4 = int_to_ptr.vmem [resolvable:$true] %s63_s4 }
  0x5c   :  { %s14792_s26 = sld [smem:[#allocation31_spill]] }
  0x62   :  { %s12774_s29 = scalar_lea.hbm %s14792_s26, 16 }
  0x63   :  { %p12775_p4 = scmp.ne.s32.totalorder %s14792_s26, %s12774_s29  ;;  %p12778_p5 = scmp.lt.u32.totalorder %s12774_s29, %s14792_s26 }
  0x65   :  { %p12780_p6 = pnand %p12778_p5, %p12775_p4 }
  0x67   :  { %12783 = shalt.err (!%p12780_p6)
}
  0x68   :  { %s12784_s10 = scalar_lea.vmem %s45_s28, 16  ;;  %s12788_s25 = scalar_lea.vmem %s45_s28, 32 }
  0x69   :  { %p12785_p7 = scmp.ne.s32.totalorder %s45_s28, %s12784_s10  ;;  %p12789_p8 = scmp.lt.s32.totalorder %s45_s28, %s45_s28 }
  0x6a   :  { %p12790_p9 = scmp.lt.s32.totalorder %s12788_s25, %s12784_s10 }
  0x6c   :  { %p12791_p10 = por %p12790_p9, %p12789_p8 }
  0x6e   :  { %p12792_p11 = pnand %p12791_p10, %p12785_p7 }
  0x70   :  { %12795 = shalt.err (!%p12792_p11)
}
  0x71   :  { %47 = dma.hbm_to_vmem [thread:$0]  %s14792_s26, 16, %s45_s28, [#allocation8]  }
  0x72   :  { %s14793_s1 = sld [smem:[#allocation33_spill]] }
  0x78   :  { %s12796_s2 = scalar_lea.hbm %s14793_s1, 512 }
  0x79   :  { %p12797_p12 = scmp.ne.s32.totalorder %s14793_s1, %s12796_s2  ;;  %p12800_p13 = scmp.lt.u32.totalorder %s12796_s2, %s14793_s1 }
  0x7b   :  { %p12802_p0 = pnand %p12800_p13, %p12797_p12 }
  0x7d   :  { %12805 = shalt.err (!%p12802_p0)
}
  0x7e   :  { %s12806_s22 = scalar_lea.vmem %s13110_s4, 512  ;;  %p12811_p2 = scmp.lt.s32.totalorder %s13110_s4, %s13110_s4 }
  0x7f   :  { %p12807_p1 = scmp.ne.s32.totalorder %s13110_s4, %s12806_s22  ;;  %p12812_p3 = scmp.lt.s32.totalorder %s12806_s22, %s12806_s22 }
  0x81   :  { %p12813_p4 = por %p12812_p3, %p12811_p2 }
  0x83   :  { %p12814_p5 = pnand %p12813_p4, %p12807_p1 }
  0x85   :  { %12817 = shalt.err (!%p12814_p5)
}
  0x86   :  { %69 = dma.hbm_to_vmem [thread:$0]  %s14793_s1, 512, %s13110_s4, [#allocation10], %s12922_s3, %s12922_s3, %s12923_s23  }
  0x87   :  { %s12926_s10 = smov [#allocation14]   ;;  %s12927_s7 = smov [#allocation17]  }
  0x88   :  { %s86_s25 = sshll.u32 %s12926_s10, 4  ;;  %s108_s24 = sshll.u32 %s12927_s7, 4  ;;  %s87_s25 = int_to_ptr.vmem [resolvable:$true] %s86_s25  ;;  %s109_s24 = int_to_ptr.vmem [resolvable:$true] %s108_s24 }
  0x89   :  { %s12818_s2 = scalar_lea.hbm %s14762_s6, 32 }
  0x8a   :  { %p12819_p6 = scmp.ne.s32.totalorder %s14762_s6, %s12818_s2  ;;  %p12822_p7 = scmp.lt.u32.totalorder %s12818_s2, %s14762_s6 }
  0x8c   :  { %p12824_p8 = pnand %p12822_p7, %p12819_p6 }
  0x8e   :  { %12827 = shalt.err (!%p12824_p8)
}
  0x8f   :  { %s12828_s4 = scalar_lea.vmem %s87_s25, 32  ;;  %p12833_p10 = scmp.lt.s32.totalorder %s87_s25, %s87_s25 }
  0x90   :  { %p12829_p9 = scmp.ne.s32.totalorder %s87_s25, %s12828_s4  ;;  %p12834_p11 = scmp.lt.s32.totalorder %s12828_s4, %s12828_s4 }
  0x92   :  { %p12835_p12 = por %p12834_p11, %p12833_p10 }
  0x94   :  { %p12836_p13 = pnand %p12835_p12, %p12829_p9 }
  0x96   :  { %12839 = shalt.err (!%p12836_p13)
}
  0x97   :  { %89 = dma.hbm_to_vmem [thread:$0]  %s14762_s6, 32, %s87_s25, [#allocation13]  }
  0x98   :  { %s12840_s10 = scalar_lea.hbm %s14764_s8, 16 }
  0x99   :  { %p12841_p0 = scmp.ne.s32.totalorder %s14764_s8, %s12840_s10  ;;  %p12844_p1 = scmp.lt.u32.totalorder %s12840_s10, %s14764_s8 }
  0x9b   :  { %p12846_p2 = pnand %p12844_p1, %p12841_p0 }
  0x9d   :  { %12849 = shalt.err (!%p12846_p2)
}
  0x9e   :  { %s12850_s0 = scalar_lea.vmem %s109_s24, 16  ;;  %s12854_s29 = scalar_lea.vmem %s109_s24, 32 }
  0x9f   :  { %p12851_p3 = scmp.ne.s32.totalorder %s109_s24, %s12850_s0  ;;  %p12855_p4 = scmp.lt.s32.totalorder %s109_s24, %s109_s24 }
  0xa0   :  { %p12856_p5 = scmp.lt.s32.totalorder %s12854_s29, %s12850_s0 }
  0xa2   :  { %p12857_p6 = por %p12856_p5, %p12855_p4 }
  0xa4   :  { %p12858_p7 = pnand %p12857_p6, %p12851_p3 }
  0xa6   :  { %12861 = shalt.err (!%p12858_p7)
}
  0xa7   :  { %111 = dma.hbm_to_vmem [thread:$0]  %s14764_s8, 16, %s109_s24, [#allocation16]  }
  0xa8   :  { %s12928_s5 = smov [#allocation20]   ;;  %s12929_s4 = smov [#allocation21]  }
  0xa9   :  { %s132_s30 = sshll.u32 %s12928_s5, 4  ;;  %s143_s1 = sshll.u32 %s12929_s4, 4  ;;  %s133_s30 = int_to_ptr.vmem [resolvable:$true] %s132_s30  ;;  %s13168_s1 = int_to_ptr.vmem [resolvable:$true] %s143_s1 }
  0xaa   :  { %s12862_s26 = scalar_lea.hbm %s14767_s11, 16 }
  0xab   :  { %p12863_p8 = scmp.ne.s32.totalorder %s14767_s11, %s12862_s26  ;;  %p12866_p9 = scmp.lt.u32.totalorder %s12862_s26, %s14767_s11 }
  0xad   :  { %p12868_p10 = pnand %p12866_p9, %p12863_p8 }
  0xaf   :  { %12871 = shalt.err (!%p12868_p10)
}
  0xb0   :  { %s12872_s8 = scalar_lea.vmem %s133_s30, 16  ;;  %s12876_s24 = scalar_lea.vmem %s133_s30, 32 }
  0xb1   :  { %p12873_p11 = scmp.ne.s32.totalorder %s133_s30, %s12872_s8  ;;  %p12877_p12 = scmp.lt.s32.totalorder %s133_s30, %s133_s30 }
  0xb2   :  { %p12878_p13 = scmp.lt.s32.totalorder %s12876_s24, %s12872_s8 }
  0xb4   :  { %p12879_p0 = por %p12878_p13, %p12877_p12 }
  0xb6   :  { %p12880_p1 = pnand %p12879_p0, %p12873_p11 }
  0xb8   :  { %12883 = shalt.err (!%p12880_p1)
}
  0xb9   :  { %135 = dma.hbm_to_vmem [thread:$0]  %s14767_s11, 16, %s133_s30, [#allocation19]  }
  0xba   :  { %s12884_s25 = scalar_lea.hbm %s14769_s13, 512 }
  0xbb   :  { %p12885_p2 = scmp.ne.s32.totalorder %s14769_s13, %s12884_s25  ;;  %p12888_p3 = scmp.lt.u32.totalorder %s12884_s25, %s14769_s13 }
  0xbd   :  { %p12890_p4 = pnand %p12888_p3, %p12885_p2 }
  0xbf   :  { %12893 = shalt.err (!%p12890_p4)
}
  0xc0   :  { %s12894_s26 = scalar_lea.vmem %s13168_s1, 512  ;;  %p12899_p6 = scmp.lt.s32.totalorder %s13168_s1, %s13168_s1 }
  0xc1   :  { %p12895_p5 = scmp.ne.s32.totalorder %s13168_s1, %s12894_s26  ;;  %p12900_p7 = scmp.lt.s32.totalorder %s12894_s26, %s12894_s26 }
  0xc3   :  { %p12901_p8 = por %p12900_p7, %p12899_p6 }
  0xc5   :  { %p12902_p9 = pnand %p12901_p8, %p12895_p5 }
  0xc7   :  { %12905 = shalt.err (!%p12902_p9)
}
  0xc8   :  { %149 = dma.hbm_to_vmem [thread:$0]  %s14769_s13, 512, %s13168_s1, [#allocation22], %s12922_s3, %s12922_s3, %s12923_s23  }
  0xc9   :  { %12906 = dma.done.wait [#allocation8], 16  }
  0xca   :  { %12907 = vsyncadd [#allocation8], 4294967280 }
  0xcb   :  { %12908 = dma.done.wait [#allocation10], 544  }
  0xcc   :  { %12909 = vsyncadd [#allocation10], 4294966752 }
  0xcd   :  { %12910 = dma.done.wait [#allocation13], 48  }
  0xce   :  { %12911 = vsyncadd [#allocation13], 4294967248 }
  0xcf   :  { %12912 = dma.done.wait [#allocation16], 528  }
  0xd0   :  { %12913 = vsyncadd [#allocation16], 4294966768 }
  0xd1   :  { %12914 = dma.done.wait [#allocation19], 528  }
  0xd2   :  { %12915 = vsyncadd [#allocation19], 4294966768 }
  0xd3   :  { %12916 = dma.done.wait [#allocation22], 512  }
  0xd4   :  { %12917 = vsyncadd [#allocation22], 4294966784  ;;  %vm217_vm0 = vcmask 1041408   ;;  %vm210_vm1 = vcmask 15360   ;;  %s14794_s20 = sld [smem:[#allocation30_spill]]  ;;  %s14795_s23 = sld [smem:[#allocation29_spill]] }
  0xd5   :  { %v200_v10 = vld [vmem:[#allocation9] sm:$0x3]  ;;  %v13257_v11 = vld [vmem:[#allocation14] sm:$0x3]  ;;  %v13263_v14 = vld [vmem:[#allocation7] ss:$0 sm:$0xff] }
  0xd6   :  { %v12930_v59 = vmov 0.0|0.0   ;;  %vm12931_vm2 = vmmov 0   ;;  %v12932_v60 = vmov 0.0   ;;  %v1655_v61 = vld [vmem:[#allocation15] sm:$0xff]  ;;  %v1656_v62 = vld [vmem:[#allocation15 + $0x8] sm:$0xff]  ;;  %v1657_v63 = vld [vmem:[#allocation15 + $0x10] sm:$0xff] }
  0xd7   :  { %v13322_v0 = vpack.c.bf16 %v1656_v62, %v1655_v61  ;;  %s12935_s0 = smov 64   ;;  %vm1860_vm3 = vcmask 254976   ;;  %vm1660_vm4 = vcmask 261120   ;;  %vm5091_vm5 = vcmask 1041409  }
  0xd8   :  { %vm5094_vm6 = vcmask 1042434   ;;  %vm5097_vm7 = vcmask 1043459   ;;  %vm5100_vm8 = vcmask 1044484   ;;  %vm5103_vm9 = vcmask 1045509  }
  0xd9   :  { %vm5106_vm10 = vcmask 1046534   ;;  %vm5109_vm11 = vcmask 1047559   ;;  %vm9927_vm12 = vcmask 523264   ;;  %vm10011_vm13 = vcmask 130048  }
  0xda   :  { %v13205_v1 = vld [vmem:[%s14794_s20] sm:$0x3]  ;;  %v205_v3 = vld [vmem:[%s14795_s23 + $0x8] sm:$0xff]  ;;  %v13219_v4 = vld [vmem:[%s14794_s20 + $0x4] sm:$0x3]  ;;  %vm10085_vm14 = vcmask 1024  }
  0xdb   :  { %v204_v2 = vld [vmem:[%s14795_s23] sm:$0xff]  ;;  %10776 = vmatprep.subr.msk.mxu0 %vm217_vm0, %v13205_v1  ;;  %v207_v8 = vld [vmem:[%s14795_s23 + $0x9] sm:$0xff]  ;;  %v10133_v55 = vld [vmem:[%s14795_s23 + $0x18] sm:$0xff] }
  0xdc   :  { %10778 = vmatprep.mubr.msk.f32.mxu0 %vm210_vm1, %v204_v2  ;;  %v13224_v5 = vld [vmem:[%s14794_s20 + $0x2] sm:$0x3]  ;;  %10777 = vmatpush3.msk.msra.mxu0 %vm217_vm0, %v13205_v1  ;;  %v209_v9 = vld [vmem:[%s14795_s23 + $0xa] sm:$0xff]  ;;  %v13281_v53 = vld [vmem:[%s14795_s23 + $0x19] sm:$0xff] }
  0xdd   :  { %10771 = vmatprep.subr.msk.mxu1 %vm217_vm0, %v13224_v5  ;;  %v206_v6 = vld [vmem:[%s14795_s23 + $0x1] sm:$0xff]  ;;  %10779 = vmatmul.mubr.msk.f32.vlgmr.msra.gmra.mrb[0].mxu0 %vm210_vm1, %v205_v3  ;;  %v12933_v3 = vmov 1966171168  }
  0xde   :  { %v208_v7 = vld [vmem:[%s14795_s23 + $0x2] sm:$0xff]  ;;  %10781 = vmatprep.subr.msk.mxu0 %vm217_vm0, %v13219_v4  ;;  %10772 = vmatpush3.msk.msra.mxu1 %vm217_vm0, %v13224_v5  ;;  %v10137_v57 = vld [vmem:[%s14795_s23 + $0x1a] sm:$0xff] }
  0xdf   :  { %10782 = vmatpush3.msk.msra.mxu0 %vm217_vm0, %v13219_v4  ;;  %10773 = vmatprep.mubr.msk.f32.mxu1 %vm210_vm1, %v206_v6  ;;  %v13291_v54 = vld [vmem:[%s14795_s23 + $0x21] sm:$0xff] }
  0xe0   :  { %10783 = vmatprep.mubr.msk.f32.mxu0 %vm210_vm1, %v208_v7  ;;  %10774 = vmatmul.mubr.msk.f32.vlgmr.msra.gmra.mrb[0].mxu1 %vm210_vm1, %v207_v8  ;;  %v10134_v56 = vld [vmem:[%s14795_s23 + $0x20] sm:$0xff] }
  0xe1   :  { %10786 = vmatprep.subr.msk.mxu1 %vm217_vm0, %v200_v10  ;;  %10811 = vmatprep.subr.msk.mxu0 %vm217_vm0, %v200_v10  ;;  %v10138_v58 = vld [vmem:[%s14795_s23 + $0x22] sm:$0xff]  ;;  %s12934_s23 = smov 32  }
  0xe2   :  { %10787 = vmatpush3.msk.msra.mxu1 %vm217_vm0, %v200_v10 }
  0xe3   :  { %10791 = vmatprep.subr.msk.mxu1 %vm217_vm0, %v13257_v11 }
  0xe5   :  { %10784 = vmatmul.mubr.msk.f32.vlgmr.msra.gmra.mrb[0].mxu0 %vm210_vm1, %v209_v9 }
  0xe6   :  { %10812 = vmatpush3.msk.msra.mxu0 %vm217_vm0, %v200_v10 }
  0xe7   :  { %10816 = vmatprep.subr.msk.mxu0 %vm217_vm0, %v13257_v11 }
 0x1b3   :  { %v10775_v12 = vpop.f32.mrb[0].mxu1 }
 0x1b4   :  { %v287_v13 = vpop.f32.mrb[1].mxu1 }
 0x1b8   :  { %v10785_v15 = vpop.f32.mrb[0].mxu0 }
 0x1b9   :  { %v12136_v16 = vadd.f32 %v10785_v15, %v10775_v12  ;;  %v455_v17 = vpop.f32.mrb[1].mxu0 }
 0x1ba   :  { %v12137_v18 = vadd.f32 %v455_v17, %v287_v13 }
 0x1bb   :  { %v473_v19 = vadd.f32 %v12136_v16, %v13263_v14  ;;  %v13343_v16 = vld [vmem:[#allocation17] ss:$0 sm:$0xff] }
 0x1bc   :  { %v472_v20 = vadd.f32 %v12137_v18, %v13263_v14 }
 0x1bd   :  { %v475_v21 = vsel %vm210_vm1, %v473_v19, 0.0 }
 0x1be   :  { %v474_v22 = vsel %vm210_vm1, %v472_v20, 0.0 }
 0x1bf   :  { %v476_v23 = vadd.f32 %v475_v21, %v474_v22 }
 0x1c1   :  { %v477_v24 = vrot.slane %v476_v23, 4 }
 0x1c3   :  { %v478_v25 = vadd.f32 %v477_v24, %v476_v23 }
 0x1c5   :  { %v479_v26 = vrot.slane %v478_v25, 2 }
 0x1c7   :  { %v480_v27 = vadd.f32 %v479_v26, %v478_v25 }
 0x1c9   :  { %v481_v28 = vrot.slane %v480_v27, 1 }
 0x1cb   :  { %v482_v29 = vadd.f32 %v481_v28, %v480_v27 }
 0x1cd   :  { %v484_v30 = vmul.f32 0.0625, %v482_v29 }
 0x1cf   :  { %v485_v31 = vsub.f32 %v472_v20, %v484_v30  ;;  %v486_v32 = vsub.f32 %v473_v19, %v484_v30 }
 0x1d1   :  { %v487_v33 = vmul.f32 %v485_v31, %v485_v31  ;;  %v488_v34 = vmul.f32 %v486_v32, %v486_v32 }
 0x1d3   :  { %v489_v35 = vsel %vm210_vm1, %v487_v33, 0.0  ;;  %v490_v36 = vsel %vm210_vm1, %v488_v34, 0.0 }
 0x1d4   :  { %v491_v37 = vadd.f32 %v490_v36, %v489_v35 }
 0x1d6   :  { %v492_v38 = vrot.slane %v491_v37, 4 }
 0x1d8   :  { %v493_v39 = vadd.f32 %v492_v38, %v491_v37 }
 0x1da   :  { %v494_v40 = vrot.slane %v493_v39, 2 }
 0x1dc   :  { %v495_v41 = vadd.f32 %v494_v40, %v493_v39 }
 0x1de   :  { %v496_v42 = vrot.slane %v495_v41, 1 }
 0x1e0   :  { %v497_v43 = vadd.f32 %v496_v42, %v495_v41 }
 0x1e2   :  { %v498_v44 = vmul.f32 0.0625, %v497_v43 }
 0x1e4   :  { %v499_v45 = vadd.f32 1e-05, %v498_v44 }
 0x1e6   :  { %12170 = vrsqrt.f32 %v499_v45 }
 0x1f0   :  { %v12171_v46 = vpop.eup %12170 }
 0x1f1   :  { %v501_v47 = vmul.f32 %v12171_v46, %v485_v31  ;;  %v502_v48 = vmul.f32 %v12171_v46, %v486_v32 }
 0x1f3   :  { %v503_v49 = vadd.f32 %v501_v47, %v206_v6  ;;  %v504_v50 = vadd.f32 %v502_v48, %v207_v8  ;;  %v13337_v8 = vld [vmem:[#allocation12] ss:$0 sm:$0xff] }
 0x1f5   :  { %v505_v51 = vmax.f32 %v503_v49, 0.0  ;;  %v506_v52 = vmax.f32 %v504_v50, 0.0 }
 0x1f7   :  { %10788 = vmatprep.mubr.msk.f32.mxu1 %vm210_vm1, %v505_v51 }
 0x1f8   :  { %10789 = vmatmul.mubr.msk.f32.vlgmr.msra.gmra.mrb[2].mxu1 %vm210_vm1, %v506_v52 }
 0x1f9   :  { %10792 = vmatpush3.msk.msra.mxu1 %vm217_vm0, %v13257_v11  ;;  %10793 = vmatprep.mubr.msk.f32.mxu1 %vm210_vm1, %v505_v51 }
 0x1fa   :  { %10796 = vmatprep.subr.msk.mxu1 %vm217_vm0, %v13224_v5 }
 0x1fc   :  { %10794 = vmatmul.mubr.msk.f32.vlgmr.msra.gmra.mrb[4].mxu1 %vm210_vm1, %v506_v52 }
 0x1fd   :  { %10797 = vmatpush3.msk.msra.mxu1 %vm217_vm0, %v13224_v5  ;;  %10798 = vmatprep.mubr.msk.f32.mxu1 %vm210_vm1, %v13281_v53  ;;  %v603_v5 = vlaneseq }
 0x1fe   :  { %10801 = vmatprep.subr.msk.mxu1 %vm217_vm0, %v13205_v1 }
 0x1ff   :  { %v604_v7 = vshrl.u32 %v603_v5, 7 }
 0x200   :  { %10799 = vmatmul.mubr.msk.f32.vlgmr.msra.gmra.mrb[6].mxu1 %vm210_vm1, %v13291_v54 }
 0x201   :  { %10802 = vmatpush3.msk.msra.mxu1 %vm217_vm0, %v13205_v1  ;;  %10803 = vmatprep.mubr.msk.f32.mxu1 %vm210_vm1, %v10133_v55  ;;  %v1658_v1 = vld [vmem:[#allocation15 + $0x18] sm:$0xff] }
 0x202   :  { %10806 = vmatprep.subr.msk.mxu1 %vm217_vm0, %v13219_v4  ;;  %v13325_v2 = vpack.c.bf16 %v1658_v1, %v1657_v63 }
 0x208   :  { %10804 = vmatmul.mubr.msk.f32.vlgmr.msra.gmra.mrb[6].mxu1 %vm210_vm1, %v10134_v56 }
 0x209   :  { %10807 = vmatpush3.msk.msra.mxu1 %vm217_vm0, %v13219_v4  ;;  %10808 = vmatprep.mubr.msk.f32.mxu1 %vm210_vm1, %v10137_v57  ;;  %v601_v4 = vunpack.c.l.s4 %v12933_v3 }
 0x20a   :  { %11667 = vmatprep.subr.bf16.mxu1 %v12930_v59 }
 0x20b   :  { %v602_v6 = vunpack.c.0.s8 %v601_v4 }
 0x20d   :  { %v13339_v9 = vsub.s32 %v602_v6, %v604_v7 }
 0x210   :  { %10809 = vmatmul.mubr.msk.f32.vlgmr.msra.gmra.mrb[6].mxu1 %vm210_vm1, %v10138_v58 }
 0x211   :  { %10840 = vmatprep.mubr.msk.f32.mxu1 %vm12931_vm2, %v12932_v60  ;;  %11669 = vmatpush3.bf16.msra.mxu1 %v13322_v0 }
 0x212   :  { %11670 = vmatprep.subr.bf16.mxu1 %v12930_v59 }
 0x215   :  { %11672 = vmatpush3.bf16.msra.mxu1 %v13325_v2 }
 0x216   :  { %11679 = vmatprep.subr.bf16.mxu1 %v12930_v59 }
 0x218   :  { %10841 = vmatmul.mubr.f32.vlgmr.msra.gmra.mrb[8].mxu1 %v12932_v60 }
 0x219   :  { %11681 = vmatpush3.bf16.msra.mxu1 %v13322_v0  ;;  %10862 = vmatprep.mubr.msk.f32.mxu1 %vm12931_vm2, %v12932_v60 }
 0x21a   :  { %11682 = vmatprep.subr.bf16.mxu1 %v12930_v59 }
 0x21d   :  { %11684 = vmatpush3.bf16.msra.mxu1 %v13325_v2 }
 0x21e   :  { %11691 = vmatprep.subr.bf16.mxu1 %v12930_v59 }
 0x2cb   :  { %v10790_v10 = vpop.f32.mrb[2].mxu1 }
 0x2cc   :  { %v594_v12 = vadd.f32 %v10790_v10, %v13337_v8  ;;  %v588_v13 = vpop.f32.mrb[3].mxu1 }
 0x2cd   :  { %v589_v15 = vadd.f32 %v13337_v8, %v588_v13 }
 0x2ce   :  { %v648_v17 = vcombine.high %v594_v12, %v594_v12  ;;  %v655_v18 = vrot.slane %v594_v12, %v13339_v9 }
 0x2cf   :  { %v599_v19 = vcombine.high %v589_v15, %v589_v15  ;;  %v606_v20 = vrot.slane %v589_v15, %v13339_v9  ;;  %v10795_v21 = vpop.f32.mrb[4].mxu1 }
 0x2d0   :  { %v662_v22 = vrot.slane %v648_v17, %v13339_v9  ;;  %v663_v23 = vcombine.high %v655_v18, %v655_v18  ;;  %v671_v24 = vrot.slane %v655_v18, %v13339_v9  ;;  %10117 = vst.sshfl [vmem:[#allocation2 + $0x10] sm:$0x1 pattern:$0x73625140] %v655_v18  ;;  %v810_v25 = vadd.f32 %v10795_v21, %v13343_v16  ;;  %v804_v26 = vpop.f32.mrb[5].mxu1 }
 0x2d1   :  { %v613_v27 = vrot.slane %v599_v19, %v13339_v9  ;;  %v614_v28 = vcombine.high %v606_v20, %v606_v20  ;;  %v622_v29 = vrot.slane %v606_v20, %v13339_v9  ;;  %10113 = vst.sshfl [vmem:[#allocation2] sm:$0x1 pattern:$0x73625140] %v606_v20  ;;  %v805_v30 = vadd.f32 %v13343_v16, %v804_v26 }
 0x2d2   :  { %v664_v31 = vcombine.high %v662_v22, %v662_v22  ;;  %v678_v32 = vrot.slane %v662_v22, %v13339_v9  ;;  %v685_v33 = vrot.slane %v663_v23, %v13339_v9  ;;  %v693_v34 = vcombine.high %v671_v24, %v671_v24  ;;  %10118 = vst.sshfl [vmem:[#allocation2 + $0x12] sm:$0x1 pattern:$0x73625140] %v663_v23 }
 0x2d3   :  { %10119 = vst.sshfl [vmem:[#allocation2 + $0x18] sm:$0x1 pattern:$0x73625140] %v662_v22  ;;  %v615_v35 = vcombine.high %v613_v27, %v613_v27  ;;  %v629_v36 = vrot.slane %v613_v27, %v13339_v9  ;;  %v636_v37 = vrot.slane %v614_v28, %v13339_v9  ;;  %v644_v38 = vcombine.high %v622_v29, %v622_v29 }
 0x2d4   :  { %10114 = vst.sshfl [vmem:[#allocation2 + $0x2] sm:$0x1 pattern:$0x73625140] %v614_v28  ;;  %v692_v39 = vrot.slane %v664_v31, %v13339_v9  ;;  %v694_v40 = vcombine.high %v678_v32, %v678_v32  ;;  %v695_v41 = vcombine.high %v685_v33, %v685_v33  ;;  %723 = vst [vmem:[#allocation2 + $0x14] sm:$0x1] %v693_v34 }
 0x2d5   :  { %10115 = vst.sshfl [vmem:[#allocation2 + $0x8] sm:$0x1 pattern:$0x73625140] %v613_v27  ;;  %v864_v42 = vcombine.high %v810_v25, %v810_v25  ;;  %v643_v43 = vrot.slane %v615_v35, %v13339_v9  ;;  %v645_v44 = vcombine.high %v629_v36, %v629_v36  ;;  %v646_v45 = vcombine.high %v636_v37, %v636_v37 }
 0x2d6   :  { %10120 = vst.sshfl [vmem:[#allocation2 + $0x1a] sm:$0x1 pattern:$0x73625140] %v664_v31  ;;  %715 = vst [vmem:[#allocation2 + $0x4] sm:$0x1] %v644_v38  ;;  %v871_v46 = vrot.slane %v810_v25, %v13339_v9  ;;  %v696_v47 = vcombine.high %v692_v39, %v692_v39  ;;  %v815_v49 = vcombine.high %v805_v30, %v805_v30 }
 0x2d7   :  { %10116 = vst.sshfl [vmem:[#allocation2 + $0xa] sm:$0x1 pattern:$0x73625140] %v615_v35  ;;  %724 = vst [vmem:[#allocation2 + $0x16] sm:$0x1] %v695_v41  ;;  %v878_v48 = vrot.slane %v864_v42, %v13339_v9  ;;  %v822_v50 = vrot.slane %v805_v30, %v13339_v9  ;;  %v647_v51 = vcombine.high %v643_v43, %v643_v43 }
 0x2d8   :  { %727 = vst [vmem:[#allocation2 + $0x1c] sm:$0x1] %v694_v40  ;;  %716 = vst [vmem:[#allocation2 + $0x6] sm:$0x1] %v646_v45  ;;  %v879_v52 = vcombine.high %v871_v46, %v871_v46  ;;  %v887_v55 = vrot.slane %v871_v46, %v13339_v9  ;;  %v829_v58 = vrot.slane %v815_v49, %v13339_v9 }
 0x2d9   :  { %719 = vst [vmem:[#allocation2 + $0xc] sm:$0x1] %v645_v44  ;;  %10129 = vst.sshfl [vmem:[#allocation3 + $0x10] sm:$0x1 pattern:$0x73625140] %v871_v46  ;;  %v880_v56 = vcombine.high %v878_v48, %v878_v48  ;;  %v894_v57 = vrot.slane %v878_v48, %v13339_v9  ;;  %v830_v61 = vcombine.high %v822_v50, %v822_v50 }
 0x2da   :  { %728 = vst [vmem:[#allocation2 + $0x1e] sm:$0x1] %v696_v47  ;;  %10131 = vst.sshfl [vmem:[#allocation3 + $0x18] sm:$0x1 pattern:$0x73625140] %v878_v48  ;;  %v901_v62 = vrot.slane %v879_v52, %v13339_v9  ;;  %v909_v63 = vcombine.high %v887_v55, %v887_v55  ;;  %v838_v1 = vrot.slane %v822_v50, %v13339_v9 }
 0x2db   :  { %10125 = vst.sshfl [vmem:[#allocation3] sm:$0x1 pattern:$0x73625140] %v822_v50  ;;  %720 = vst [vmem:[#allocation2 + $0xe] sm:$0x1] %v647_v51  ;;  %v908_v3 = vrot.slane %v880_v56, %v13339_v9  ;;  %v910_v4 = vcombine.high %v894_v57, %v894_v57  ;;  %v831_v5 = vcombine.high %v829_v58, %v829_v58 }
 0x2dc   :  { %10130 = vst.sshfl [vmem:[#allocation3 + $0x12] sm:$0x1 pattern:$0x73625140] %v879_v52  ;;  %v845_v6 = vrot.slane %v829_v58, %v13339_v9  ;;  %v911_v7 = vcombine.high %v901_v62, %v901_v62  ;;  %939 = vst [vmem:[#allocation3 + $0x14] sm:$0x1] %v909_v63  ;;  %v852_v10 = vrot.slane %v830_v61, %v13339_v9 }
 0x2dd   :  { %10132 = vst.sshfl [vmem:[#allocation3 + $0x1a] sm:$0x1 pattern:$0x73625140] %v880_v56  ;;  %v860_v12 = vcombine.high %v838_v1, %v838_v1  ;;  %v912_v13 = vcombine.high %v908_v3, %v908_v3  ;;  %943 = vst [vmem:[#allocation3 + $0x1c] sm:$0x1] %v910_v4  ;;  %v859_v15 = vrot.slane %v831_v5, %v13339_v9 }
 0x2de   :  { %10126 = vst.sshfl [vmem:[#allocation3 + $0x2] sm:$0x1 pattern:$0x73625140] %v830_v61  ;;  %v861_v17 = vcombine.high %v845_v6, %v845_v6  ;;  %940 = vst [vmem:[#allocation3 + $0x16] sm:$0x1] %v911_v7  ;;  %v862_v18 = vcombine.high %v852_v10, %v852_v10 }
 0x2df   :  { %10127 = vst.sshfl [vmem:[#allocation3 + $0x8] sm:$0x1 pattern:$0x73625140] %v829_v58  ;;  %931 = vst [vmem:[#allocation3 + $0x4] sm:$0x1] %v860_v12  ;;  %v863_v19 = vcombine.high %v859_v15, %v859_v15 }
 0x2e0   :  { %10128 = vst.sshfl [vmem:[#allocation3 + $0xa] sm:$0x1 pattern:$0x73625140] %v831_v5  ;;  %944 = vst [vmem:[#allocation3 + $0x1e] sm:$0x1] %v912_v13 }
 0x2e1   :  { %935 = vst [vmem:[#allocation3 + $0xc] sm:$0x1] %v861_v17  ;;  %932 = vst [vmem:[#allocation3 + $0x6] sm:$0x1] %v862_v18  ;;  %v1651_v57 = vld [vmem:[#allocation11] sm:$0xff]  ;;  %v1652_v58 = vld [vmem:[#allocation11 + $0x8] sm:$0xff] }
 0x2e2   :  { %936 = vst [vmem:[#allocation3 + $0xe] sm:$0x1] %v863_v19  ;;  %v13384_v61 = vpack.c.bf16 %v1652_v58, %v1651_v57  ;;  %v1654_v62 = vld [vmem:[#allocation11 + $0x18] sm:$0xff] }
 0x2e3   :  { %v10810_v20 = vpop.f32.mrb[6].mxu1 }
 0x2e4   :  { %v1198_v21 = vadd.f32 %v10810_v20, %v13263_v14  ;;  %v1186_v22 = vpop.f32.mrb[7].mxu1 }
 0x2e5   :  { %v1197_v23 = vadd.f32 %v13263_v14, %v1186_v22 }
 0x2e6   :  { %v1200_v24 = vsel %vm210_vm1, %v1198_v21, 0.0 }
 0x2e7   :  { %v1199_v25 = vsel %vm210_vm1, %v1197_v23, 0.0 }
 0x2e8   :  { %v1201_v26 = vadd.f32 %v1200_v24, %v1199_v25 }
 0x2ea   :  { %v1202_v27 = vrot.slane %v1201_v26, 4 }
 0x2ec   :  { %v1203_v28 = vadd.f32 %v1202_v27, %v1201_v26 }
 0x2ee   :  { %v1204_v29 = vrot.slane %v1203_v28, 2 }
 0x2f0   :  { %v1205_v30 = vadd.f32 %v1204_v29, %v1203_v28 }
 0x2f2   :  { %v1206_v31 = vrot.slane %v1205_v30, 1 }
 0x2f4   :  { %v1207_v32 = vadd.f32 %v1206_v31, %v1205_v30 }
 0x2f6   :  { %v1208_v33 = vmul.f32 0.0625, %v1207_v32 }
 0x2f8   :  { %v1209_v34 = vsub.f32 %v1197_v23, %v1208_v33  ;;  %v1210_v35 = vsub.f32 %v1198_v21, %v1208_v33 }
 0x2fa   :  { %v1211_v36 = vmul.f32 %v1209_v34, %v1209_v34  ;;  %v1212_v37 = vmul.f32 %v1210_v35, %v1210_v35 }
 0x2fc   :  { %v1213_v38 = vsel %vm210_vm1, %v1211_v36, 0.0  ;;  %v1214_v14 = vsel %vm210_vm1, %v1212_v37, 0.0 }
 0x2fd   :  { %v1215_v39 = vadd.f32 %v1214_v14, %v1213_v38 }
 0x2ff   :  { %v1216_v40 = vrot.slane %v1215_v39, 4 }
 0x301   :  { %v1217_v41 = vadd.f32 %v1216_v40, %v1215_v39 }
 0x303   :  { %v1218_v42 = vrot.slane %v1217_v41, 2 }
 0x305   :  { %v1219_v43 = vadd.f32 %v1218_v42, %v1217_v41 }
 0x307   :  { %v1220_v44 = vrot.slane %v1219_v43, 1 }
 0x309   :  { %v1221_v45 = vadd.f32 %v1220_v44, %v1219_v43 }
 0x30b   :  { %v1222_v46 = vmul.f32 0.0625, %v1221_v45 }
 0x30d   :  { %v1223_v47 = vadd.f32 1e-05, %v1222_v46 }
 0x30f   :  { %12172 = vrsqrt.f32 %v1223_v47 }
 0x319   :  { %v12173_v48 = vpop.eup %12172 }
 0x31a   :  { %v1225_v49 = vmul.f32 %v12173_v48, %v1209_v34  ;;  %v1226_v50 = vmul.f32 %v12173_v48, %v1210_v35 }
 0x31c   :  { %v1227_v51 = vadd.f32 %v13281_v53, %v1225_v49  ;;  %v1228_v52 = vadd.f32 %v13291_v54, %v1226_v50  ;;  %v1653_v53 = vld [vmem:[#allocation11 + $0x10] sm:$0xff] }
 0x31d   :  { %v13389_v54 = vpack.c.bf16 %v1654_v62, %v1653_v53 }
 0x31e   :  { %v1229_v55 = vmax.f32 %v1227_v51, 0.0  ;;  %v1230_v56 = vmax.f32 %v1228_v52, 0.0 }
 0x320   :  { %10813 = vmatprep.mubr.msk.f32.mxu0 %vm210_vm1, %v1229_v55 }
 0x321   :  { %10814 = vmatmul.mubr.msk.f32.vlgmr.msra.gmra.mrb[2].mxu0 %vm210_vm1, %v1230_v56 }
 0x322   :  { %10817 = vmatpush3.msk.msra.mxu0 %vm217_vm0, %v13257_v11  ;;  %10818 = vmatprep.mubr.msk.f32.mxu0 %vm210_vm1, %v1229_v55  ;;  %v13403_v11 = vpop.f32.mrb[8].mxu1 }
 0x323   :  { %11661 = vmatprep.subr.bf16.mxu0 %v12930_v59  ;;  %v10842_v63 = vpop.f32.mrb[9].mxu1 }
 0x325   :  { %10819 = vmatmul.mubr.msk.f32.vlgmr.msra.gmra.mrb[4].mxu0 %vm210_vm1, %v1230_v56 }
 0x326   :  { %11663 = vmatpush3.bf16.msra.mxu0 %v13384_v61  ;;  %10829 = vmatprep.mubr.msk.f32.mxu0 %vm12931_vm2, %v12932_v60 }
 0x327   :  { %11664 = vmatprep.subr.bf16.mxu0 %v12930_v59 }
 0x32a   :  { %11666 = vmatpush3.bf16.msra.mxu0 %v13389_v54 }
 0x32b   :  { %11673 = vmatprep.subr.bf16.mxu0 %v12930_v59 }
 0x32d   :  { %10830 = vmatmul.mubr.f32.vlgmr.msra.gmra.mrb[6].mxu0 %v12932_v60 }
 0x32e   :  { %11675 = vmatpush3.bf16.msra.mxu0 %v13384_v61  ;;  %10851 = vmatprep.mubr.msk.f32.mxu0 %vm12931_vm2, %v12932_v60 }
 0x32f   :  { %11676 = vmatprep.subr.bf16.mxu0 %v12930_v59 }
 0x332   :  { %11678 = vmatpush3.bf16.msra.mxu0 %v13389_v54 }
 0x333   :  { %11685 = vmatprep.subr.bf16.mxu0 %v12930_v59 }
 0x3f4   :  { %v10815_v1 = vpop.f32.mrb[2].mxu0 }
 0x3f5   :  { %v1309_v3 = vadd.f32 %v10815_v1, %v13337_v8  ;;  %v1303_v4 = vpop.f32.mrb[3].mxu0 }
 0x3f6   :  { %v1304_v5 = vadd.f32 %v13337_v8, %v1303_v4 }
 0x3f7   :  { %v1363_v6 = vcombine.high %v1309_v3, %v1309_v3  ;;  %v1370_v7 = vrot.slane %v1309_v3, %v13339_v9 }
 0x3f8   :  { %v1314_v10 = vcombine.high %v1304_v5, %v1304_v5  ;;  %v1321_v12 = vrot.slane %v1304_v5, %v13339_v9  ;;  %v10820_v13 = vpop.f32.mrb[4].mxu0 }
 0x3f9   :  { %v1377_v15 = vrot.slane %v1363_v6, %v13339_v9  ;;  %v1378_v17 = vcombine.high %v1370_v7, %v1370_v7  ;;  %v1386_v18 = vrot.slane %v1370_v7, %v13339_v9  ;;  %10155 = vst.sshfl [vmem:[#allocation2 + $0x11] sm:$0x1 pattern:$0x73625140] %v1370_v7  ;;  %v1516_v19 = vadd.f32 %v10820_v13, %v13343_v16  ;;  %v1510_v20 = vpop.f32.mrb[5].mxu0 }
 0x3fa   :  { %v1328_v21 = vrot.slane %v1314_v10, %v13339_v9  ;;  %v1329_v22 = vcombine.high %v1321_v12, %v1321_v12  ;;  %v1337_v8 = vrot.slane %v1321_v12, %v13339_v9  ;;  %10151 = vst.sshfl [vmem:[#allocation2 + $0x1] sm:$0x1 pattern:$0x73625140] %v1321_v12  ;;  %v1511_v23 = vadd.f32 %v13343_v16, %v1510_v20 }
 0x3fb   :  { %v1379_v24 = vcombine.high %v1377_v15, %v1377_v15  ;;  %v1393_v25 = vrot.slane %v1377_v15, %v13339_v9  ;;  %v1400_v26 = vrot.slane %v1378_v17, %v13339_v9  ;;  %v1408_v27 = vcombine.high %v1386_v18, %v1386_v18  ;;  %10156 = vst.sshfl [vmem:[#allocation2 + $0x13] sm:$0x1 pattern:$0x73625140] %v1378_v17 }
 0x3fc   :  { %10157 = vst.sshfl [vmem:[#allocation2 + $0x19] sm:$0x1 pattern:$0x73625140] %v1377_v15  ;;  %v1330_v28 = vcombine.high %v1328_v21, %v1328_v21  ;;  %v1344_v29 = vrot.slane %v1328_v21, %v13339_v9  ;;  %v1351_v30 = vrot.slane %v1329_v22, %v13339_v9  ;;  %v1359_v31 = vcombine.high %v1337_v8, %v1337_v8 }
 0x3fd   :  { %10152 = vst.sshfl [vmem:[#allocation2 + $0x3] sm:$0x1 pattern:$0x73625140] %v1329_v22  ;;  %v1407_v32 = vrot.slane %v1379_v24, %v13339_v9  ;;  %v1409_v33 = vcombine.high %v1393_v25, %v1393_v25  ;;  %v1410_v16 = vcombine.high %v1400_v26, %v1400_v26  ;;  %1438 = vst [vmem:[#allocation2 + $0x15] sm:$0x1] %v1408_v27 }
 0x3fe   :  { %10153 = vst.sshfl [vmem:[#allocation2 + $0x9] sm:$0x1 pattern:$0x73625140] %v1328_v21  ;;  %v1570_v34 = vcombine.high %v1516_v19, %v1516_v19  ;;  %v1358_v35 = vrot.slane %v1330_v28, %v13339_v9  ;;  %v1360_v36 = vcombine.high %v1344_v29, %v1344_v29  ;;  %v1361_v37 = vcombine.high %v1351_v30, %v1351_v30 }
 0x3ff   :  { %10158 = vst.sshfl [vmem:[#allocation2 + $0x1b] sm:$0x1 pattern:$0x73625140] %v1379_v24  ;;  %1430 = vst [vmem:[#allocation2 + $0x5] sm:$0x1] %v1359_v31  ;;  %v1577_v38 = vrot.slane %v1516_v19, %v13339_v9  ;;  %v1411_v14 = vcombine.high %v1407_v32, %v1407_v32  ;;  %v1521_v40 = vcombine.high %v1511_v23, %v1511_v23 }
 0x400   :  { %10154 = vst.sshfl [vmem:[#allocation2 + $0xb] sm:$0x1 pattern:$0x73625140] %v1330_v28  ;;  %1439 = vst [vmem:[#allocation2 + $0x17] sm:$0x1] %v1410_v16  ;;  %v1584_v39 = vrot.slane %v1570_v34, %v13339_v9  ;;  %v1528_v41 = vrot.slane %v1511_v23, %v13339_v9  ;;  %v1362_v42 = vcombine.high %v1358_v35, %v1358_v35 }
 0x401   :  { %1442 = vst [vmem:[#allocation2 + $0x1d] sm:$0x1] %v1409_v33  ;;  %1431 = vst [vmem:[#allocation2 + $0x7] sm:$0x1] %v1361_v37  ;;  %v1585_v43 = vcombine.high %v1577_v38, %v1577_v38  ;;  %v1593_v44 = vrot.slane %v1577_v38, %v13339_v9  ;;  %v1730_v45 = vpop.f32.mrb[6].mxu0  ;;  %v1535_v48 = vrot.slane %v1521_v40, %v13339_v9 }
 0x402   :  { %1434 = vst [vmem:[#allocation2 + $0xd] sm:$0x1] %v1360_v36  ;;  %10166 = vst.sshfl [vmem:[#allocation3 + $0x11] sm:$0x1 pattern:$0x73625140] %v1577_v38  ;;  %v1586_v46 = vcombine.high %v1584_v39, %v1584_v39  ;;  %v1600_v47 = vrot.slane %v1584_v39, %v13339_v9  ;;  %v1536_v49 = vcombine.high %v1528_v41, %v1528_v41 }
 0x403   :  { %1443 = vst [vmem:[#allocation2 + $0x1f] sm:$0x1] %v1411_v14  ;;  %10168 = vst.sshfl [vmem:[#allocation3 + $0x19] sm:$0x1 pattern:$0x73625140] %v1584_v39  ;;  %v1607_v51 = vrot.slane %v1585_v43, %v13339_v9  ;;  %v1615_v52 = vcombine.high %v1593_v44, %v1593_v44  ;;  %v1544_v55 = vrot.slane %v1528_v41, %v13339_v9 }
 0x404   :  { %10162 = vst.sshfl [vmem:[#allocation3 + $0x1] sm:$0x1 pattern:$0x73625140] %v1528_v41  ;;  %v10831_v50 = vpop.f32.mrb[7].mxu0  ;;  %v1614_v56 = vrot.slane %v1586_v46, %v13339_v9  ;;  %v1616_v57 = vcombine.high %v1600_v47, %v1600_v47  ;;  %v1537_v58 = vcombine.high %v1535_v48, %v1535_v48  ;;  %v1551_v53 = vrot.slane %v1535_v48, %v13339_v9 }
 0x405   :  { %1435 = vst [vmem:[#allocation2 + $0xf] sm:$0x1] %v1362_v42  ;;  %10167 = vst.sshfl [vmem:[#allocation3 + $0x13] sm:$0x1 pattern:$0x73625140] %v1585_v43  ;;  %v1617_v62 = vcombine.high %v1607_v51, %v1607_v51  ;;  %v1558_v63 = vrot.slane %v1536_v49, %v13339_v9  ;;  %v1566_v1 = vcombine.high %v1544_v55, %v1544_v55 }
 0x406   :  { %10169 = vst.sshfl [vmem:[#allocation3 + $0x1b] sm:$0x1 pattern:$0x73625140] %v1586_v46  ;;  %1645 = vst [vmem:[#allocation3 + $0x15] sm:$0x1] %v1615_v52  ;;  %v1618_v3 = vcombine.high %v1614_v56, %v1614_v56  ;;  %v1565_v4 = vrot.slane %v1537_v58, %v13339_v9  ;;  %v1567_v5 = vcombine.high %v1551_v53, %v1551_v53 }
 0x407   :  { %10163 = vst.sshfl [vmem:[#allocation3 + $0x3] sm:$0x1 pattern:$0x73625140] %v1536_v49  ;;  %1649 = vst [vmem:[#allocation3 + $0x1d] sm:$0x1] %v1616_v57  ;;  %v1568_v6 = vcombine.high %v1558_v63, %v1558_v63 }
 0x408   :  { %10164 = vst.sshfl [vmem:[#allocation3 + $0x9] sm:$0x1 pattern:$0x73625140] %v1535_v48  ;;  %1646 = vst [vmem:[#allocation3 + $0x17] sm:$0x1] %v1617_v62  ;;  %v1569_v7 = vcombine.high %v1565_v4, %v1565_v4 }
 0x409   :  { %10165 = vst.sshfl [vmem:[#allocation3 + $0xb] sm:$0x1 pattern:$0x73625140] %v1537_v58  ;;  %1637 = vst [vmem:[#allocation3 + $0x5] sm:$0x1] %v1566_v1 }
 0x40a   :  { %1650 = vst [vmem:[#allocation3 + $0x1f] sm:$0x1] %v1618_v3  ;;  %1641 = vst [vmem:[#allocation3 + $0xd] sm:$0x1] %v1567_v5  ;;  %v1659_v10 = vld [vmem:[#allocation2] sm:$0x3] }
 0x40b   :  { %1638 = vst [vmem:[#allocation3 + $0x7] sm:$0x1] %v1568_v6  ;;  %1642 = vst [vmem:[#allocation3 + $0xf] sm:$0x1] %v1569_v7  ;;  %v1734_v15 = vadd.f32 %v1730_v45, %v1659_v10  ;;  %v1869_v45 = vld [vmem:[#allocation2 + $0x2] sm:$0x3] }
 0x40d   :  { %v10170_v20 = vmul.f32 -1.442695, %v1734_v15 }
 0x40e   :  { %v1944_v41 = vld [vmem:[#allocation3 + $0x1c] sm:$0x3] }
 0x411   :  { %v1736_v12 = vld [vmem:[#allocation3 + $0x1e] sm:$0x3] }
 0x412   :  { %v1807_v13 = vadd.f32 %v13403_v11, %v1736_v12 }
 0x414   :  { %12174 = vtanh.f32 %v1807_v13  ;;  %v10171_v19 = vmul.f32 -1.442695, %v1807_v13 }
 0x415   :  { %12176 = vtanh.f32 %v1734_v15 }
 0x416   :  { %12178 = vpow2.f32 %v10171_v19 }
 0x417   :  { %12180 = vpow2.f32 %v10170_v20 }
 0x41e   :  { %v12175_v17 = vpop.eup %12174 }
 0x41f   :  { %1841 = vrot.lane.b32.xlu0 %v12175_v17, %s12934_s23  ;;  %v12177_v18 = vpop.eup %12176 }
 0x420   :  { %v12179_v21 = vpop.eup %12178 }
 0x421   :  { %v1835_v22 = vadd.f32 1.0, %v12179_v21  ;;  %v12181_v8 = vpop.eup %12180 }
 0x422   :  { %v1811_v23 = vadd.f32 1.0, %v12181_v8 }
 0x423   :  { %1817 = vrot.lane.b32.xlu0 %v12177_v18, %s12934_s23  ;;  %12182 = vrcp.f32 %v1835_v22 }
 0x424   :  { %12184 = vrcp.f32 %v1811_v23  ;;  %v2154_v23 = vld [vmem:[#allocation3 + $0x1a] sm:$0x3] }
 0x42d   :  { %v12183_v11 = vpop.eup %12182 }
 0x42e   :  { %v12185_v26 = vpop.eup %12184  ;;  %v1839_v29 = vmul.f32 0.0, %v12183_v11 }
 0x42f   :  { %v1815_v32 = vmul.f32 0.0, %v12185_v26 }
 0x491   :  { %v1842_v24 = vpop.permute.xlu0 %1841 }
 0x492   :  { %v1844_v25 = vmul.f32 %v12183_v11, %v1842_v24 }
 0x494   :  { %1846 = vrot.lane.b32.xlu1 %v1844_v25, %s12934_s23 }
 0x495   :  { %v1818_v27 = vpop.permute.xlu0 %1817 }
 0x496   :  { %v1820_v28 = vmul.f32 %v12185_v26, %v1818_v27 }
 0x498   :  { %1822 = vrot.lane.b32.xlu1 %v1820_v28, %s12934_s23 }
 0x506   :  { %v1847_v30 = vpop.permute.xlu1 %1846 }
 0x507   :  { %v13438_v31 = vadd.f32 %v1847_v30, %v1839_v29 }
 0x509   :  { %12186 = vtanh.f32 %v13438_v31 }
 0x50a   :  { %v1823_v33 = vpop.permute.xlu1 %1822 }
 0x50b   :  { %v13441_v16 = vadd.f32 %v1823_v33, %v1815_v32 }
 0x50d   :  { %12188 = vtanh.f32 %v13441_v16 }
 0x513   :  { %v12187_v34 = vpop.eup %12186 }
 0x514   :  { %1852 = vrot.lane.b32.xlu0 %v12187_v34, %s12934_s23 }
 0x517   :  { %v12189_v35 = vpop.eup %12188 }
 0x518   :  { %1828 = vrot.lane.b32.xlu1 %v12189_v35, %s12934_s23 }
 0x586   :  { %v1853_v36 = vpop.permute.xlu0 %1852 }
 0x587   :  { %v1855_v37 = vmul.f32 %v12183_v11, %v1853_v36 }
 0x589   :  { %1863 = vrot.lane.b32.xlu0 %v1855_v37, %s12935_s0 }
 0x58a   :  { %v1829_v38 = vpop.permute.xlu1 %1828 }
 0x58b   :  { %v1831_v14 = vmul.f32 %v12185_v26, %v1829_v38  ;;  %v2079_v26 = vld [vmem:[#allocation2 + $0x4] sm:$0x3] }
 0x58d   :  { %1857 = vrot.lane.b32.xlu1 %v1831_v14, %s12935_s0 }
 0x5fb   :  { %v1864_v39 = vpop.permute.xlu0 %1863 }
 0x5fc   :  { %1867 = vst.msk [vmem:[#allocation5 + $0x1e] sm:$0x3] %vm1860_vm3, %v1864_v39  ;;  %10863 = vmatmul.mubr.msk.f32.vlgmr.msra.gmra.mrb[10].mxu1 %vm1660_vm4, %v1864_v39 }
 0x5fd   :  { %11693 = vmatpush3.bf16.msra.mxu1 %v13322_v0  ;;  %10884 = vmatprep.mubr.msk.f32.mxu1 %vm12931_vm2, %v12932_v60 }
 0x5fe   :  { %11694 = vmatprep.subr.bf16.mxu1 %v12930_v59 }
 0x5ff   :  { %v1858_v40 = vpop.permute.xlu1 %1857 }
 0x600   :  { %1861 = vst.msk [vmem:[#allocation4] sm:$0x3] %vm1860_vm3, %v1858_v40  ;;  %10852 = vmatmul.mubr.msk.f32.vlgmr.msra.gmra.mrb[8].mxu0 %vm1660_vm4, %v1858_v40 }
 0x601   :  { %11687 = vmatpush3.bf16.msra.mxu0 %v13384_v61  ;;  %11696 = vmatpush3.bf16.msra.mxu1 %v13325_v2 }
 0x602   :  { %11688 = vmatprep.subr.bf16.mxu0 %v12930_v59  ;;  %10873 = vmatprep.mubr.msk.f32.mxu0 %vm12931_vm2, %v12932_v60 }
 0x603   :  { %11703 = vmatprep.subr.bf16.mxu1 %v12930_v59 }
 0x605   :  { %11690 = vmatpush3.bf16.msra.mxu0 %v13389_v54 }
 0x606   :  { %11697 = vmatprep.subr.bf16.mxu0 %v12930_v59 }
 0x6cf   :  { %v2013_v42 = vpop.f32.mrb[10].mxu1 }
 0x6d0   :  { %v2017_v43 = vadd.f32 %v2013_v42, %v1944_v41  ;;  %v10864_v44 = vpop.f32.mrb[11].mxu1 }
 0x6d2   :  { %12190 = vtanh.f32 %v2017_v43  ;;  %v10175_v51 = vmul.f32 -1.442695, %v2017_v43 }
 0x6d3   :  { %v1938_v46 = vpop.f32.mrb[8].mxu0 }
 0x6d4   :  { %v1942_v47 = vadd.f32 %v1938_v46, %v1869_v45  ;;  %v10853_v48 = vpop.f32.mrb[9].mxu0 }
 0x6d6   :  { %12192 = vtanh.f32 %v1942_v47  ;;  %v10174_v52 = vmul.f32 -1.442695, %v1942_v47 }
 0x6d7   :  { %12194 = vpow2.f32 %v10175_v51 }
 0x6d8   :  { %12196 = vpow2.f32 %v10174_v52 }
 0x6dc   :  { %v12191_v49 = vpop.eup %12190 }
 0x6dd   :  { %2051 = vrot.lane.b32.xlu0 %v12191_v49, %s12934_s23 }
 0x6e0   :  { %v12193_v50 = vpop.eup %12192 }
 0x6e1   :  { %2027 = vrot.lane.b32.xlu1 %v12193_v50, %s12934_s23  ;;  %v12195_v55 = vpop.eup %12194 }
 0x6e2   :  { %v2045_v56 = vadd.f32 1.0, %v12195_v55  ;;  %v12197_v57 = vpop.eup %12196 }
 0x6e3   :  { %v2021_v58 = vadd.f32 1.0, %v12197_v57 }
 0x6e4   :  { %12198 = vrcp.f32 %v2045_v56 }
 0x6e5   :  { %12200 = vrcp.f32 %v2021_v58  ;;  %v2364_v58 = vld [vmem:[#allocation3 + $0x18] sm:$0x3] }
 0x6ee   :  { %v12199_v53 = vpop.eup %12198 }
 0x6ef   :  { %v12201_v1 = vpop.eup %12200  ;;  %v2049_v5 = vmul.f32 %v12199_v53, %v13438_v31 }
 0x6f0   :  { %v2025_v10 = vmul.f32 %v12201_v1, %v13441_v16 }
 0x74f   :  { %v2052_v62 = vpop.permute.xlu0 %2051 }
 0x750   :  { %v2054_v63 = vmul.f32 %v12199_v53, %v2052_v62 }
 0x752   :  { %2056 = vrot.lane.b32.xlu0 %v2054_v63, %s12934_s23 }
 0x753   :  { %v2028_v3 = vpop.permute.xlu1 %2027 }
 0x754   :  { %v2030_v4 = vmul.f32 %v12201_v1, %v2028_v3 }
 0x756   :  { %2032 = vrot.lane.b32.xlu1 %v2030_v4, %s12934_s23 }
 0x7c4   :  { %v2057_v6 = vpop.permute.xlu0 %2056 }
 0x7c5   :  { %v13469_v7 = vadd.f32 %v2057_v6, %v2049_v5 }
 0x7c7   :  { %12202 = vtanh.f32 %v13469_v7 }
 0x7c8   :  { %v2033_v12 = vpop.permute.xlu1 %2032 }
 0x7c9   :  { %v13473_v13 = vadd.f32 %v2033_v12, %v2025_v10 }
 0x7cb   :  { %12204 = vtanh.f32 %v13473_v13 }
 0x7d1   :  { %v12203_v15 = vpop.eup %12202 }
 0x7d2   :  { %2062 = vrot.lane.b32.xlu0 %v12203_v15, %s12934_s23 }
 0x7d5   :  { %v12205_v17 = vpop.eup %12204 }
 0x7d6   :  { %2038 = vrot.lane.b32.xlu1 %v12205_v17, %s12934_s23 }
 0x844   :  { %v2063_v18 = vpop.permute.xlu0 %2062 }
 0x845   :  { %v2065_v19 = vmul.f32 %v12199_v53, %v2063_v18 }
 0x847   :  { %2073 = vrot.lane.b32.xlu0 %v2065_v19, %s12935_s0 }
 0x848   :  { %v2039_v20 = vpop.permute.xlu1 %2038 }
 0x849   :  { %v2041_v21 = vmul.f32 %v12201_v1, %v2039_v20  ;;  %v2289_v1 = vld [vmem:[#allocation2 + $0x6] sm:$0x3] }
 0x84b   :  { %2067 = vrot.lane.b32.xlu1 %v2041_v21, %s12935_s0 }
 0x8b9   :  { %v2074_v22 = vpop.permute.xlu0 %2073 }
 0x8ba   :  { %2077 = vst.msk [vmem:[#allocation5 + $0x1c] sm:$0x3] %vm1860_vm3, %v2074_v22  ;;  %10885 = vmatmul.mubr.msk.f32.vlgmr.msra.gmra.mrb[12].mxu1 %vm1660_vm4, %v2074_v22 }
 0x8bb   :  { %11705 = vmatpush3.bf16.msra.mxu1 %v13322_v0  ;;  %10906 = vmatprep.mubr.msk.f32.mxu1 %vm12931_vm2, %v12932_v60 }
 0x8bc   :  { %11706 = vmatprep.subr.bf16.mxu1 %v12930_v59 }
 0x8bd   :  { %v2068_v8 = vpop.permute.xlu1 %2067 }
 0x8be   :  { %2071 = vst.msk [vmem:[#allocation4 + $0x2] sm:$0x3] %vm1860_vm3, %v2068_v8  ;;  %10874 = vmatmul.mubr.msk.f32.vlgmr.msra.gmra.mrb[10].mxu0 %vm1660_vm4, %v2068_v8 }
 0x8bf   :  { %11699 = vmatpush3.bf16.msra.mxu0 %v13384_v61  ;;  %11708 = vmatpush3.bf16.msra.mxu1 %v13325_v2 }
 0x8c0   :  { %11700 = vmatprep.subr.bf16.mxu0 %v12930_v59  ;;  %10895 = vmatprep.mubr.msk.f32.mxu0 %vm12931_vm2, %v12932_v60 }
 0x8c1   :  { %11715 = vmatprep.subr.bf16.mxu1 %v12930_v59 }
 0x8c3   :  { %11702 = vmatpush3.bf16.msra.mxu0 %v13389_v54 }
 0x8c4   :  { %11709 = vmatprep.subr.bf16.mxu0 %v12930_v59 }
 0x98d   :  { %v2223_v11 = vpop.f32.mrb[12].mxu1 }
 0x98e   :  { %v2227_v24 = vadd.f32 %v2223_v11, %v2154_v23  ;;  %v10886_v25 = vpop.f32.mrb[13].mxu1 }
 0x990   :  { %12206 = vtanh.f32 %v2227_v24  ;;  %v10179_v32 = vmul.f32 -1.442695, %v2227_v24 }
 0x991   :  { %v2148_v27 = vpop.f32.mrb[10].mxu0 }
 0x992   :  { %v2152_v28 = vadd.f32 %v2148_v27, %v2079_v26  ;;  %v10875_v29 = vpop.f32.mrb[11].mxu0 }
 0x994   :  { %12208 = vtanh.f32 %v2152_v28  ;;  %v10178_v33 = vmul.f32 -1.442695, %v2152_v28 }
 0x995   :  { %12210 = vpow2.f32 %v10179_v32 }
 0x996   :  { %12212 = vpow2.f32 %v10178_v33 }
 0x99a   :  { %v12207_v30 = vpop.eup %12206 }
 0x99b   :  { %2261 = vrot.lane.b32.xlu0 %v12207_v30, %s12934_s23 }
 0x99e   :  { %v12209_v31 = vpop.eup %12208 }
 0x99f   :  { %2237 = vrot.lane.b32.xlu1 %v12209_v31, %s12934_s23  ;;  %v12211_v16 = vpop.eup %12210 }
 0x9a0   :  { %v2255_v34 = vadd.f32 1.0, %v12211_v16  ;;  %v12213_v35 = vpop.eup %12212 }
 0x9a1   :  { %v2231_v36 = vadd.f32 1.0, %v12213_v35 }
 0x9a2   :  { %12214 = vrcp.f32 %v2255_v34 }
 0x9a3   :  { %12216 = vrcp.f32 %v2231_v36  ;;  %v2574_v36 = vld [vmem:[#allocation3 + $0x16] sm:$0x3] }
 0x9ac   :  { %v12215_v37 = vpop.eup %12214 }
 0x9ad   :  { %v12217_v39 = vpop.eup %12216  ;;  %v2259_v42 = vmul.f32 %v12215_v37, %v13469_v7 }
 0x9ae   :  { %v2235_v45 = vmul.f32 %v12217_v39, %v13473_v13 }
 0xa0d   :  { %v2262_v38 = vpop.permute.xlu0 %2261 }
 0xa0e   :  { %v2264_v14 = vmul.f32 %v12215_v37, %v2262_v38 }
 0xa10   :  { %2266 = vrot.lane.b32.xlu0 %v2264_v14, %s12934_s23 }
 0xa11   :  { %v2238_v40 = vpop.permute.xlu1 %2237 }
 0xa12   :  { %v2240_v41 = vmul.f32 %v12217_v39, %v2238_v40 }
 0xa14   :  { %2242 = vrot.lane.b32.xlu1 %v2240_v41, %s12934_s23 }
 0xa82   :  { %v2267_v43 = vpop.permute.xlu0 %2266 }
 0xa83   :  { %v13501_v44 = vadd.f32 %v2267_v43, %v2259_v42 }
 0xa85   :  { %12218 = vtanh.f32 %v13501_v44 }
 0xa86   :  { %v2243_v46 = vpop.permute.xlu1 %2242 }
 0xa87   :  { %v13505_v47 = vadd.f32 %v2243_v46, %v2235_v45 }
 0xa89   :  { %12220 = vtanh.f32 %v13505_v47 }
 0xa8f   :  { %v12219_v48 = vpop.eup %12218 }
 0xa90   :  { %2272 = vrot.lane.b32.xlu0 %v12219_v48, %s12934_s23 }
 0xa93   :  { %v12221_v49 = vpop.eup %12220 }
 0xa94   :  { %2248 = vrot.lane.b32.xlu1 %v12221_v49, %s12934_s23 }
 0xb02   :  { %v2273_v50 = vpop.permute.xlu0 %2272 }
 0xb03   :  { %v2275_v51 = vmul.f32 %v12215_v37, %v2273_v50 }
 0xb05   :  { %2283 = vrot.lane.b32.xlu0 %v2275_v51, %s12935_s0 }
 0xb06   :  { %v2249_v52 = vpop.permute.xlu1 %2248 }
 0xb07   :  { %v2251_v55 = vmul.f32 %v12217_v39, %v2249_v52  ;;  %v2499_v39 = vld [vmem:[#allocation2 + $0x8] sm:$0x3] }
 0xb09   :  { %2277 = vrot.lane.b32.xlu1 %v2251_v55, %s12935_s0 }
 0xb77   :  { %v2284_v56 = vpop.permute.xlu0 %2283 }
 0xb78   :  { %2287 = vst.msk [vmem:[#allocation5 + $0x1a] sm:$0x3] %vm1860_vm3, %v2284_v56  ;;  %10907 = vmatmul.mubr.msk.f32.vlgmr.msra.gmra.mrb[14].mxu1 %vm1660_vm4, %v2284_v56 }
 0xb79   :  { %11717 = vmatpush3.bf16.msra.mxu1 %v13322_v0  ;;  %10928 = vmatprep.mubr.msk.f32.mxu1 %vm12931_vm2, %v12932_v60 }
 0xb7a   :  { %11718 = vmatprep.subr.bf16.mxu1 %v12930_v59 }
 0xb7b   :  { %v2278_v57 = vpop.permute.xlu1 %2277 }
 0xb7c   :  { %2281 = vst.msk [vmem:[#allocation4 + $0x4] sm:$0x3] %vm1860_vm3, %v2278_v57  ;;  %10896 = vmatmul.mubr.msk.f32.vlgmr.msra.gmra.mrb[12].mxu0 %vm1660_vm4, %v2278_v57 }
 0xb7d   :  { %11711 = vmatpush3.bf16.msra.mxu0 %v13384_v61  ;;  %11720 = vmatpush3.bf16.msra.mxu1 %v13325_v2 }
 0xb7e   :  { %11712 = vmatprep.subr.bf16.mxu0 %v12930_v59  ;;  %10917 = vmatprep.mubr.msk.f32.mxu0 %vm12931_vm2, %v12932_v60 }
 0xb7f   :  { %11727 = vmatprep.subr.bf16.mxu1 %v12930_v59 }
 0xb81   :  { %11714 = vmatpush3.bf16.msra.mxu0 %v13389_v54 }
 0xb82   :  { %11721 = vmatprep.subr.bf16.mxu0 %v12930_v59 }
 0xc4b   :  { %v2433_v53 = vpop.f32.mrb[14].mxu1 }
 0xc4c   :  { %v2437_v62 = vadd.f32 %v2433_v53, %v2364_v58  ;;  %v10908_v63 = vpop.f32.mrb[15].mxu1 }
 0xc4e   :  { %12222 = vtanh.f32 %v2437_v62  ;;  %v10183_v10 = vmul.f32 -1.442695, %v2437_v62 }
 0xc4f   :  { %v2358_v3 = vpop.f32.mrb[12].mxu0 }
 0xc50   :  { %v2362_v4 = vadd.f32 %v2358_v3, %v2289_v1  ;;  %v10897_v5 = vpop.f32.mrb[13].mxu0 }
 0xc52   :  { %12224 = vtanh.f32 %v2362_v4  ;;  %v10182_v12 = vmul.f32 -1.442695, %v2362_v4 }
 0xc53   :  { %12226 = vpow2.f32 %v10183_v10 }
 0xc54   :  { %12228 = vpow2.f32 %v10182_v12 }
 0xc58   :  { %v12223_v6 = vpop.eup %12222 }
 0xc59   :  { %2471 = vrot.lane.b32.xlu0 %v12223_v6, %s12934_s23 }
 0xc5c   :  { %v12225_v7 = vpop.eup %12224 }
 0xc5d   :  { %2447 = vrot.lane.b32.xlu1 %v12225_v7, %s12934_s23  ;;  %v12227_v13 = vpop.eup %12226 }
 0xc5e   :  { %v2465_v15 = vadd.f32 1.0, %v12227_v13  ;;  %v12229_v17 = vpop.eup %12228 }
 0xc5f   :  { %v2441_v18 = vadd.f32 1.0, %v12229_v17 }
 0xc60   :  { %12230 = vrcp.f32 %v2465_v15 }
 0xc61   :  { %12232 = vrcp.f32 %v2441_v18  ;;  %v2784_v18 = vld [vmem:[#allocation3 + $0x14] sm:$0x3] }
 0xc6a   :  { %v12231_v19 = vpop.eup %12230 }
 0xc6b   :  { %v12233_v22 = vpop.eup %12232  ;;  %v2469_v11 = vmul.f32 %v12231_v19, %v13501_v44 }
 0xc6c   :  { %v2445_v26 = vmul.f32 %v12233_v22, %v13505_v47 }
 0xccb   :  { %v2472_v20 = vpop.permute.xlu0 %2471 }
 0xccc   :  { %v2474_v21 = vmul.f32 %v12231_v19, %v2472_v20 }
 0xcce   :  { %2476 = vrot.lane.b32.xlu0 %v2474_v21, %s12934_s23 }
 0xccf   :  { %v2448_v8 = vpop.permute.xlu1 %2447 }
 0xcd0   :  { %v2450_v23 = vmul.f32 %v12233_v22, %v2448_v8 }
 0xcd2   :  { %2452 = vrot.lane.b32.xlu1 %v2450_v23, %s12934_s23 }
 0xd40   :  { %v2477_v24 = vpop.permute.xlu0 %2476 }
 0xd41   :  { %v13533_v25 = vadd.f32 %v2477_v24, %v2469_v11 }
 0xd43   :  { %12234 = vtanh.f32 %v13533_v25 }
 0xd44   :  { %v2453_v27 = vpop.permute.xlu1 %2452 }
 0xd45   :  { %v13537_v28 = vadd.f32 %v2453_v27, %v2445_v26 }
 0xd47   :  { %12236 = vtanh.f32 %v13537_v28 }
 0xd4d   :  { %v12235_v29 = vpop.eup %12234 }
 0xd4e   :  { %2482 = vrot.lane.b32.xlu0 %v12235_v29, %s12934_s23 }
 0xd51   :  { %v12237_v30 = vpop.eup %12236 }
 0xd52   :  { %2458 = vrot.lane.b32.xlu1 %v12237_v30, %s12934_s23 }
 0xdc0   :  { %v2483_v31 = vpop.permute.xlu0 %2482 }
 0xdc1   :  { %v2485_v32 = vmul.f32 %v12231_v19, %v2483_v31 }
 0xdc3   :  { %2493 = vrot.lane.b32.xlu0 %v2485_v32, %s12935_s0 }
 0xdc4   :  { %v2459_v33 = vpop.permute.xlu1 %2458 }
 0xdc5   :  { %v2461_v16 = vmul.f32 %v12233_v22, %v2459_v33  ;;  %v2709_v22 = vld [vmem:[#allocation2 + $0xa] sm:$0x3] }
 0xdc7   :  { %2487 = vrot.lane.b32.xlu1 %v2461_v16, %s12935_s0 }
 0xe35   :  { %v2494_v34 = vpop.permute.xlu0 %2493 }
 0xe36   :  { %2497 = vst.msk [vmem:[#allocation5 + $0x18] sm:$0x3] %vm1860_vm3, %v2494_v34  ;;  %10929 = vmatmul.mubr.msk.f32.vlgmr.msra.gmra.mrb[16].mxu1 %vm1660_vm4, %v2494_v34 }
 0xe37   :  { %11729 = vmatpush3.bf16.msra.mxu1 %v13322_v0  ;;  %10950 = vmatprep.mubr.msk.f32.mxu1 %vm12931_vm2, %v12932_v60 }
 0xe38   :  { %11730 = vmatprep.subr.bf16.mxu1 %v12930_v59 }
 0xe39   :  { %v2488_v35 = vpop.permute.xlu1 %2487 }
 0xe3a   :  { %2491 = vst.msk [vmem:[#allocation4 + $0x6] sm:$0x3] %vm1860_vm3, %v2488_v35  ;;  %10918 = vmatmul.mubr.msk.f32.vlgmr.msra.gmra.mrb[14].mxu0 %vm1660_vm4, %v2488_v35 }
 0xe3b   :  { %11723 = vmatpush3.bf16.msra.mxu0 %v13384_v61  ;;  %11732 = vmatpush3.bf16.msra.mxu1 %v13325_v2 }
 0xe3c   :  { %11724 = vmatprep.subr.bf16.mxu0 %v12930_v59  ;;  %10939 = vmatprep.mubr.msk.f32.mxu0 %vm12931_vm2, %v12932_v60 }
 0xe3d   :  { %11739 = vmatprep.subr.bf16.mxu1 %v12930_v59 }
 0xe3f   :  { %11726 = vmatpush3.bf16.msra.mxu0 %v13389_v54 }
 0xe40   :  { %11733 = vmatprep.subr.bf16.mxu0 %v12930_v59 }
 0xf09   :  { %v2643_v37 = vpop.f32.mrb[16].mxu1 }
 0xf0a   :  { %v2647_v38 = vadd.f32 %v2643_v37, %v2574_v36  ;;  %v10930_v14 = vpop.f32.mrb[17].mxu1 }
 0xf0c   :  { %12238 = vtanh.f32 %v2647_v38  ;;  %v10187_v45 = vmul.f32 -1.442695, %v2647_v38 }
 0xf0d   :  { %v2568_v40 = vpop.f32.mrb[14].mxu0 }
 0xf0e   :  { %v2572_v41 = vadd.f32 %v2568_v40, %v2499_v39  ;;  %v10919_v42 = vpop.f32.mrb[15].mxu0 }
 0xf10   :  { %12240 = vtanh.f32 %v2572_v41  ;;  %v10186_v46 = vmul.f32 -1.442695, %v2572_v41 }
 0xf11   :  { %12242 = vpow2.f32 %v10187_v45 }
 0xf12   :  { %12244 = vpow2.f32 %v10186_v46 }
 0xf16   :  { %v12239_v43 = vpop.eup %12238 }
 0xf17   :  { %2681 = vrot.lane.b32.xlu0 %v12239_v43, %s12934_s23 }
 0xf1a   :  { %v12241_v44 = vpop.eup %12240 }
 0xf1b   :  { %2657 = vrot.lane.b32.xlu1 %v12241_v44, %s12934_s23  ;;  %v12243_v47 = vpop.eup %12242 }
 0xf1c   :  { %v2675_v48 = vadd.f32 1.0, %v12243_v47  ;;  %v12245_v49 = vpop.eup %12244 }
 0xf1d   :  { %v2651_v50 = vadd.f32 1.0, %v12245_v49 }
 0xf1e   :  { %12246 = vrcp.f32 %v2675_v48 }
 0xf1f   :  { %12248 = vrcp.f32 %v2651_v50  ;;  %v2994_v50 = vld [vmem:[#allocation3 + $0x12] sm:$0x3] }
 0xf28   :  { %v12247_v51 = vpop.eup %12246 }
 0xf29   :  { %v12249_v56 = vpop.eup %12248  ;;  %v2679_v53 = vmul.f32 %v12247_v51, %v13533_v25 }
 0xf2a   :  { %v2655_v1 = vmul.f32 %v12249_v56, %v13537_v28 }
 0xf89   :  { %v2682_v52 = vpop.permute.xlu0 %2681 }
 0xf8a   :  { %v2684_v55 = vmul.f32 %v12247_v51, %v2682_v52 }
 0xf8c   :  { %2686 = vrot.lane.b32.xlu0 %v2684_v55, %s12934_s23 }
 0xf8d   :  { %v2658_v57 = vpop.permute.xlu1 %2657 }
 0xf8e   :  { %v2660_v58 = vmul.f32 %v12249_v56, %v2658_v57 }
 0xf90   :  { %2662 = vrot.lane.b32.xlu1 %v2660_v58, %s12934_s23 }
 0xffe   :  { %v2687_v62 = vpop.permute.xlu0 %2686 }
 0xfff   :  { %v13565_v63 = vadd.f32 %v2687_v62, %v2679_v53 }
0x1001   :  { %12250 = vtanh.f32 %v13565_v63 }
0x1002   :  { %v2663_v3 = vpop.permute.xlu1 %2662 }
0x1003   :  { %v13569_v4 = vadd.f32 %v2663_v3, %v2655_v1 }
0x1005   :  { %12252 = vtanh.f32 %v13569_v4 }
0x100b   :  { %v12251_v5 = vpop.eup %12250 }
0x100c   :  { %2692 = vrot.lane.b32.xlu0 %v12251_v5, %s12934_s23 }
0x100f   :  { %v12253_v6 = vpop.eup %12252 }
0x1010   :  { %2668 = vrot.lane.b32.xlu1 %v12253_v6, %s12934_s23 }
0x107e   :  { %v2693_v7 = vpop.permute.xlu0 %2692 }
0x107f   :  { %v2695_v10 = vmul.f32 %v12247_v51, %v2693_v7 }
0x1081   :  { %2703 = vrot.lane.b32.xlu0 %v2695_v10, %s12935_s0 }
0x1082   :  { %v2669_v12 = vpop.permute.xlu1 %2668 }
0x1083   :  { %v2671_v13 = vmul.f32 %v12249_v56, %v2669_v12  ;;  %v2919_v56 = vld [vmem:[#allocation2 + $0xc] sm:$0x3] }
0x1085   :  { %2697 = vrot.lane.b32.xlu1 %v2671_v13, %s12935_s0 }
0x10f3   :  { %v2704_v15 = vpop.permute.xlu0 %2703 }
0x10f4   :  { %2707 = vst.msk [vmem:[#allocation5 + $0x16] sm:$0x3] %vm1860_vm3, %v2704_v15  ;;  %10951 = vmatmul.mubr.msk.f32.vlgmr.msra.gmra.mrb[18].mxu1 %vm1660_vm4, %v2704_v15 }
0x10f5   :  { %11741 = vmatpush3.bf16.msra.mxu1 %v13322_v0  ;;  %10972 = vmatprep.mubr.msk.f32.mxu1 %vm12931_vm2, %v12932_v60 }
0x10f6   :  { %11742 = vmatprep.subr.bf16.mxu1 %v12930_v59 }
0x10f7   :  { %v2698_v17 = vpop.permute.xlu1 %2697 }
0x10f8   :  { %2701 = vst.msk [vmem:[#allocation4 + $0x8] sm:$0x3] %vm1860_vm3, %v2698_v17  ;;  %10940 = vmatmul.mubr.msk.f32.vlgmr.msra.gmra.mrb[16].mxu0 %vm1660_vm4, %v2698_v17 }
0x10f9   :  { %11735 = vmatpush3.bf16.msra.mxu0 %v13384_v61  ;;  %11744 = vmatpush3.bf16.msra.mxu1 %v13325_v2 }
0x10fa   :  { %11736 = vmatprep.subr.bf16.mxu0 %v12930_v59  ;;  %10961 = vmatprep.mubr.msk.f32.mxu0 %vm12931_vm2, %v12932_v60 }
0x10fb   :  { %11751 = vmatprep.subr.bf16.mxu1 %v12930_v59 }
0x10fd   :  { %11738 = vmatpush3.bf16.msra.mxu0 %v13389_v54 }
0x10fe   :  { %11745 = vmatprep.subr.bf16.mxu0 %v12930_v59 }
0x11c7   :  { %v2853_v19 = vpop.f32.mrb[18].mxu1 }
0x11c8   :  { %v2857_v20 = vadd.f32 %v2853_v19, %v2784_v18  ;;  %v10952_v21 = vpop.f32.mrb[19].mxu1 }
0x11ca   :  { %12254 = vtanh.f32 %v2857_v20  ;;  %v10191_v26 = vmul.f32 -1.442695, %v2857_v20 }
0x11cb   :  { %v2778_v8 = vpop.f32.mrb[16].mxu0 }
0x11cc   :  { %v2782_v23 = vadd.f32 %v2778_v8, %v2709_v22  ;;  %v10941_v11 = vpop.f32.mrb[17].mxu0 }
0x11ce   :  { %12256 = vtanh.f32 %v2782_v23  ;;  %v10190_v27 = vmul.f32 -1.442695, %v2782_v23 }
0x11cf   :  { %12258 = vpow2.f32 %v10191_v26 }
0x11d0   :  { %12260 = vpow2.f32 %v10190_v27 }
0x11d4   :  { %v12255_v24 = vpop.eup %12254 }
0x11d5   :  { %2891 = vrot.lane.b32.xlu0 %v12255_v24, %s12934_s23 }
0x11d8   :  { %v12257_v25 = vpop.eup %12256 }
0x11d9   :  { %2867 = vrot.lane.b32.xlu1 %v12257_v25, %s12934_s23  ;;  %v12259_v28 = vpop.eup %12258 }
0x11da   :  { %v2885_v29 = vadd.f32 1.0, %v12259_v28  ;;  %v12261_v30 = vpop.eup %12260 }
0x11db   :  { %v2861_v31 = vadd.f32 1.0, %v12261_v30 }
0x11dc   :  { %12262 = vrcp.f32 %v2885_v29 }
0x11dd   :  { %12264 = vrcp.f32 %v2861_v31  ;;  %v3204_v31 = vld [vmem:[#allocation3 + $0x10] sm:$0x3] }
0x11e6   :  { %v12263_v32 = vpop.eup %12262 }
0x11e7   :  { %v12265_v34 = vpop.eup %12264  ;;  %v2889_v37 = vmul.f32 %v12263_v32, %v13565_v63 }
0x11e8   :  { %v2865_v39 = vmul.f32 %v12265_v34, %v13569_v4 }
0x1247   :  { %v2892_v33 = vpop.permute.xlu0 %2891 }
0x1248   :  { %v2894_v16 = vmul.f32 %v12263_v32, %v2892_v33 }
0x124a   :  { %2896 = vrot.lane.b32.xlu0 %v2894_v16, %s12934_s23 }
0x124b   :  { %v2868_v35 = vpop.permute.xlu1 %2867 }
0x124c   :  { %v2870_v36 = vmul.f32 %v12265_v34, %v2868_v35 }
0x124e   :  { %2872 = vrot.lane.b32.xlu1 %v2870_v36, %s12934_s23 }
0x12bc   :  { %v2897_v38 = vpop.permute.xlu0 %2896 }
0x12bd   :  { %v13597_v14 = vadd.f32 %v2897_v38, %v2889_v37 }
0x12bf   :  { %12266 = vtanh.f32 %v13597_v14 }
0x12c0   :  { %v2873_v40 = vpop.permute.xlu1 %2872 }
0x12c1   :  { %v13601_v41 = vadd.f32 %v2873_v40, %v2865_v39 }
0x12c3   :  { %12268 = vtanh.f32 %v13601_v41 }
0x12c9   :  { %v12267_v42 = vpop.eup %12266 }
0x12ca   :  { %2902 = vrot.lane.b32.xlu0 %v12267_v42, %s12934_s23 }
0x12cd   :  { %v12269_v43 = vpop.eup %12268 }
0x12ce   :  { %2878 = vrot.lane.b32.xlu1 %v12269_v43, %s12934_s23 }
0x133c   :  { %v2903_v44 = vpop.permute.xlu0 %2902 }
0x133d   :  { %v2905_v45 = vmul.f32 %v12263_v32, %v2903_v44 }
0x133f   :  { %2913 = vrot.lane.b32.xlu0 %v2905_v45, %s12935_s0 }
0x1340   :  { %v2879_v46 = vpop.permute.xlu1 %2878 }
0x1341   :  { %v2881_v47 = vmul.f32 %v12265_v34, %v2879_v46  ;;  %v3129_v34 = vld [vmem:[#allocation2 + $0xe] sm:$0x3] }
0x1343   :  { %2907 = vrot.lane.b32.xlu1 %v2881_v47, %s12935_s0 }
0x13b1   :  { %v2914_v48 = vpop.permute.xlu0 %2913 }
0x13b2   :  { %2917 = vst.msk [vmem:[#allocation5 + $0x14] sm:$0x3] %vm1860_vm3, %v2914_v48  ;;  %10973 = vmatmul.mubr.msk.f32.vlgmr.msra.gmra.mrb[20].mxu1 %vm1660_vm4, %v2914_v48 }
0x13b3   :  { %11753 = vmatpush3.bf16.msra.mxu1 %v13322_v0  ;;  %10994 = vmatprep.mubr.msk.f32.mxu1 %vm12931_vm2, %v12932_v60 }
0x13b4   :  { %11754 = vmatprep.subr.bf16.mxu1 %v12930_v59 }
0x13b5   :  { %v2908_v49 = vpop.permute.xlu1 %2907 }
0x13b6   :  { %2911 = vst.msk [vmem:[#allocation4 + $0xa] sm:$0x3] %vm1860_vm3, %v2908_v49  ;;  %10962 = vmatmul.mubr.msk.f32.vlgmr.msra.gmra.mrb[18].mxu0 %vm1660_vm4, %v2908_v49 }
0x13b7   :  { %11747 = vmatpush3.bf16.msra.mxu0 %v13384_v61  ;;  %11756 = vmatpush3.bf16.msra.mxu1 %v13325_v2 }
0x13b8   :  { %11748 = vmatprep.subr.bf16.mxu0 %v12930_v59  ;;  %10983 = vmatprep.mubr.msk.f32.mxu0 %vm12931_vm2, %v12932_v60 }
0x13b9   :  { %11763 = vmatprep.subr.bf16.mxu1 %v12930_v59 }
0x13bb   :  { %11750 = vmatpush3.bf16.msra.mxu0 %v13389_v54 }
0x13bc   :  { %11757 = vmatprep.subr.bf16.mxu0 %v12930_v59 }
0x1485   :  { %v3063_v51 = vpop.f32.mrb[20].mxu1 }
0x1486   :  { %v3067_v52 = vadd.f32 %v3063_v51, %v2994_v50  ;;  %v10974_v55 = vpop.f32.mrb[21].mxu1 }
0x1488   :  { %12270 = vtanh.f32 %v3067_v52  ;;  %v10195_v1 = vmul.f32 -1.442695, %v3067_v52 }
0x1489   :  { %v2988_v57 = vpop.f32.mrb[18].mxu0 }
0x148a   :  { %v2992_v58 = vadd.f32 %v2988_v57, %v2919_v56  ;;  %v10963_v53 = vpop.f32.mrb[19].mxu0 }
0x148c   :  { %12272 = vtanh.f32 %v2992_v58  ;;  %v10194_v3 = vmul.f32 -1.442695, %v2992_v58 }
0x148d   :  { %12274 = vpow2.f32 %v10195_v1 }
0x148e   :  { %12276 = vpow2.f32 %v10194_v3 }
0x1492   :  { %v12271_v62 = vpop.eup %12270 }
0x1493   :  { %3101 = vrot.lane.b32.xlu0 %v12271_v62, %s12934_s23 }
0x1496   :  { %v12273_v63 = vpop.eup %12272 }
0x1497   :  { %3077 = vrot.lane.b32.xlu1 %v12273_v63, %s12934_s23  ;;  %v12275_v4 = vpop.eup %12274 }
0x1498   :  { %v3095_v5 = vadd.f32 1.0, %v12275_v4  ;;  %v12277_v6 = vpop.eup %12276 }
0x1499   :  { %v3071_v7 = vadd.f32 1.0, %v12277_v6 }
0x149a   :  { %12278 = vrcp.f32 %v3095_v5 }
0x149b   :  { %12280 = vrcp.f32 %v3071_v7  ;;  %v3414_v7 = vld [vmem:[#allocation3 + $0xe] sm:$0x3] }
0x14a4   :  { %v12279_v10 = vpop.eup %12278 }
0x14a5   :  { %v12281_v15 = vpop.eup %12280  ;;  %v3099_v19 = vmul.f32 %v12279_v10, %v13597_v14 }
0x14a6   :  { %v3075_v22 = vmul.f32 %v12281_v15, %v13601_v41 }
0x1505   :  { %v3102_v12 = vpop.permute.xlu0 %3101 }
0x1506   :  { %v3104_v13 = vmul.f32 %v12279_v10, %v3102_v12 }
0x1508   :  { %3106 = vrot.lane.b32.xlu0 %v3104_v13, %s12934_s23 }
0x1509   :  { %v3078_v17 = vpop.permute.xlu1 %3077 }
0x150a   :  { %v3080_v18 = vmul.f32 %v12281_v15, %v3078_v17 }
0x150c   :  { %3082 = vrot.lane.b32.xlu1 %v3080_v18, %s12934_s23 }
0x157a   :  { %v3107_v20 = vpop.permute.xlu0 %3106 }
0x157b   :  { %v13629_v21 = vadd.f32 %v3107_v20, %v3099_v19 }
0x157d   :  { %12282 = vtanh.f32 %v13629_v21 }
0x157e   :  { %v3083_v8 = vpop.permute.xlu1 %3082 }
0x157f   :  { %v13633_v23 = vadd.f32 %v3083_v8, %v3075_v22 }
0x1581   :  { %12284 = vtanh.f32 %v13633_v23 }
0x1587   :  { %v12283_v11 = vpop.eup %12282 }
0x1588   :  { %3112 = vrot.lane.b32.xlu0 %v12283_v11, %s12934_s23 }
0x158b   :  { %v12285_v24 = vpop.eup %12284 }
0x158c   :  { %3088 = vrot.lane.b32.xlu1 %v12285_v24, %s12934_s23 }
0x15fa   :  { %v3113_v25 = vpop.permute.xlu0 %3112 }
0x15fb   :  { %v3115_v26 = vmul.f32 %v12279_v10, %v3113_v25 }
0x15fd   :  { %3123 = vrot.lane.b32.xlu0 %v3115_v26, %s12935_s0 }
0x15fe   :  { %v3089_v27 = vpop.permute.xlu1 %3088 }
0x15ff   :  { %v3091_v28 = vmul.f32 %v12281_v15, %v3089_v27  ;;  %v3339_v15 = vld [vmem:[#allocation2 + $0x10] sm:$0x3] }
0x1601   :  { %3117 = vrot.lane.b32.xlu1 %v3091_v28, %s12935_s0 }
0x166f   :  { %v3124_v29 = vpop.permute.xlu0 %3123 }
0x1670   :  { %3127 = vst.msk [vmem:[#allocation5 + $0x12] sm:$0x3] %vm1860_vm3, %v3124_v29  ;;  %10995 = vmatmul.mubr.msk.f32.vlgmr.msra.gmra.mrb[22].mxu1 %vm1660_vm4, %v3124_v29 }
0x1671   :  { %11765 = vmatpush3.bf16.msra.mxu1 %v13322_v0  ;;  %11016 = vmatprep.mubr.msk.f32.mxu1 %vm12931_vm2, %v12932_v60 }
0x1672   :  { %11766 = vmatprep.subr.bf16.mxu1 %v12930_v59 }
0x1673   :  { %v3118_v30 = vpop.permute.xlu1 %3117 }
0x1674   :  { %3121 = vst.msk [vmem:[#allocation4 + $0xc] sm:$0x3] %vm1860_vm3, %v3118_v30  ;;  %10984 = vmatmul.mubr.msk.f32.vlgmr.msra.gmra.mrb[20].mxu0 %vm1660_vm4, %v3118_v30 }
0x1675   :  { %11759 = vmatpush3.bf16.msra.mxu0 %v13384_v61  ;;  %11768 = vmatpush3.bf16.msra.mxu1 %v13325_v2 }
0x1676   :  { %11760 = vmatprep.subr.bf16.mxu0 %v12930_v59  ;;  %11005 = vmatprep.mubr.msk.f32.mxu0 %vm12931_vm2, %v12932_v60 }
0x1677   :  { %11775 = vmatprep.subr.bf16.mxu1 %v12930_v59 }
0x1679   :  { %11762 = vmatpush3.bf16.msra.mxu0 %v13389_v54 }
0x167a   :  { %11769 = vmatprep.subr.bf16.mxu0 %v12930_v59 }
0x1743   :  { %v3273_v32 = vpop.f32.mrb[22].mxu1 }
0x1744   :  { %v3277_v33 = vadd.f32 %v3273_v32, %v3204_v31  ;;  %v10996_v16 = vpop.f32.mrb[23].mxu1 }
0x1746   :  { %12286 = vtanh.f32 %v3277_v33  ;;  %v10199_v39 = vmul.f32 -1.442695, %v3277_v33 }
0x1747   :  { %v3198_v35 = vpop.f32.mrb[20].mxu0 }
0x1748   :  { %v3202_v36 = vadd.f32 %v3198_v35, %v3129_v34  ;;  %v10985_v37 = vpop.f32.mrb[21].mxu0 }
0x174a   :  { %12288 = vtanh.f32 %v3202_v36  ;;  %v10198_v40 = vmul.f32 -1.442695, %v3202_v36 }
0x174b   :  { %12290 = vpow2.f32 %v10199_v39 }
0x174c   :  { %12292 = vpow2.f32 %v10198_v40 }
0x1750   :  { %v12287_v38 = vpop.eup %12286 }
0x1751   :  { %3311 = vrot.lane.b32.xlu0 %v12287_v38, %s12934_s23 }
0x1754   :  { %v12289_v14 = vpop.eup %12288 }
0x1755   :  { %3287 = vrot.lane.b32.xlu1 %v12289_v14, %s12934_s23  ;;  %v12291_v41 = vpop.eup %12290 }
0x1756   :  { %v3305_v42 = vadd.f32 1.0, %v12291_v41  ;;  %v12293_v43 = vpop.eup %12292 }
0x1757   :  { %v3281_v44 = vadd.f32 1.0, %v12293_v43 }
0x1758   :  { %12294 = vrcp.f32 %v3305_v42 }
0x1759   :  { %12296 = vrcp.f32 %v3281_v44  ;;  %v3624_v44 = vld [vmem:[#allocation3 + $0xc] sm:$0x3] }
0x1762   :  { %v12295_v45 = vpop.eup %12294 }
0x1763   :  { %v12297_v48 = vpop.eup %12296  ;;  %v3309_v51 = vmul.f32 %v12295_v45, %v13629_v21 }
0x1764   :  { %v3285_v56 = vmul.f32 %v12297_v48, %v13633_v23 }
0x17c3   :  { %v3312_v46 = vpop.permute.xlu0 %3311 }
0x17c4   :  { %v3314_v47 = vmul.f32 %v12295_v45, %v3312_v46 }
0x17c6   :  { %3316 = vrot.lane.b32.xlu0 %v3314_v47, %s12934_s23 }
0x17c7   :  { %v3288_v49 = vpop.permute.xlu1 %3287 }
0x17c8   :  { %v3290_v50 = vmul.f32 %v12297_v48, %v3288_v49 }
0x17ca   :  { %3292 = vrot.lane.b32.xlu1 %v3290_v50, %s12934_s23 }
0x1838   :  { %v3317_v52 = vpop.permute.xlu0 %3316 }
0x1839   :  { %v13661_v55 = vadd.f32 %v3317_v52, %v3309_v51 }
0x183b   :  { %12298 = vtanh.f32 %v13661_v55 }
0x183c   :  { %v3293_v57 = vpop.permute.xlu1 %3292 }
0x183d   :  { %v13665_v58 = vadd.f32 %v3293_v57, %v3285_v56 }
0x183f   :  { %12300 = vtanh.f32 %v13665_v58 }
0x1845   :  { %v12299_v53 = vpop.eup %12298 }
0x1846   :  { %3322 = vrot.lane.b32.xlu0 %v12299_v53, %s12934_s23 }
0x1849   :  { %v12301_v62 = vpop.eup %12300 }
0x184a   :  { %3298 = vrot.lane.b32.xlu1 %v12301_v62, %s12934_s23 }
0x18b8   :  { %v3323_v63 = vpop.permute.xlu0 %3322 }
0x18b9   :  { %v3325_v1 = vmul.f32 %v12295_v45, %v3323_v63 }
0x18bb   :  { %3333 = vrot.lane.b32.xlu0 %v3325_v1, %s12935_s0 }
0x18bc   :  { %v3299_v3 = vpop.permute.xlu1 %3298 }
0x18bd   :  { %v3301_v4 = vmul.f32 %v12297_v48, %v3299_v3  ;;  %v3549_v48 = vld [vmem:[#allocation2 + $0x12] sm:$0x3] }
0x18bf   :  { %3327 = vrot.lane.b32.xlu1 %v3301_v4, %s12935_s0 }
0x192d   :  { %v3334_v5 = vpop.permute.xlu0 %3333 }
0x192e   :  { %3337 = vst.msk [vmem:[#allocation5 + $0x10] sm:$0x3] %vm1860_vm3, %v3334_v5  ;;  %11017 = vmatmul.mubr.msk.f32.vlgmr.msra.gmra.mrb[24].mxu1 %vm1660_vm4, %v3334_v5 }
0x192f   :  { %11777 = vmatpush3.bf16.msra.mxu1 %v13322_v0  ;;  %11038 = vmatprep.mubr.msk.f32.mxu1 %vm12931_vm2, %v12932_v60 }
0x1930   :  { %11778 = vmatprep.subr.bf16.mxu1 %v12930_v59 }
0x1931   :  { %v3328_v6 = vpop.permute.xlu1 %3327 }
0x1932   :  { %3331 = vst.msk [vmem:[#allocation4 + $0xe] sm:$0x3] %vm1860_vm3, %v3328_v6  ;;  %11006 = vmatmul.mubr.msk.f32.vlgmr.msra.gmra.mrb[22].mxu0 %vm1660_vm4, %v3328_v6 }
0x1933   :  { %11771 = vmatpush3.bf16.msra.mxu0 %v13384_v61  ;;  %11780 = vmatpush3.bf16.msra.mxu1 %v13325_v2 }
0x1934   :  { %11772 = vmatprep.subr.bf16.mxu0 %v12930_v59  ;;  %11027 = vmatprep.mubr.msk.f32.mxu0 %vm12931_vm2, %v12932_v60 }
0x1935   :  { %11787 = vmatprep.subr.bf16.mxu1 %v12930_v59 }
0x1937   :  { %11774 = vmatpush3.bf16.msra.mxu0 %v13389_v54 }
0x1938   :  { %11781 = vmatprep.subr.bf16.mxu0 %v12930_v59 }
0x1a01   :  { %v3483_v10 = vpop.f32.mrb[24].mxu1 }
0x1a02   :  { %v3487_v12 = vadd.f32 %v3483_v10, %v3414_v7  ;;  %v11018_v13 = vpop.f32.mrb[25].mxu1 }
0x1a04   :  { %12302 = vtanh.f32 %v3487_v12  ;;  %v10203_v22 = vmul.f32 -1.442695, %v3487_v12 }
0x1a05   :  { %v3408_v17 = vpop.f32.mrb[22].mxu0 }
0x1a06   :  { %v3412_v18 = vadd.f32 %v3408_v17, %v3339_v15  ;;  %v11007_v19 = vpop.f32.mrb[23].mxu0 }
0x1a08   :  { %12304 = vtanh.f32 %v3412_v18  ;;  %v10202_v8 = vmul.f32 -1.442695, %v3412_v18 }
0x1a09   :  { %12306 = vpow2.f32 %v10203_v22 }
0x1a0a   :  { %12308 = vpow2.f32 %v10202_v8 }
0x1a0e   :  { %v12303_v20 = vpop.eup %12302 }
0x1a0f   :  { %3521 = vrot.lane.b32.xlu0 %v12303_v20, %s12934_s23 }
0x1a12   :  { %v12305_v21 = vpop.eup %12304 }
0x1a13   :  { %3497 = vrot.lane.b32.xlu1 %v12305_v21, %s12934_s23  ;;  %v12307_v23 = vpop.eup %12306 }
0x1a14   :  { %v3515_v11 = vadd.f32 1.0, %v12307_v23  ;;  %v12309_v24 = vpop.eup %12308 }
0x1a15   :  { %v3491_v25 = vadd.f32 1.0, %v12309_v24 }
0x1a16   :  { %12310 = vrcp.f32 %v3515_v11 }
0x1a17   :  { %12312 = vrcp.f32 %v3491_v25  ;;  %v3834_v25 = vld [vmem:[#allocation3 + $0xa] sm:$0x3] }
0x1a20   :  { %v12311_v26 = vpop.eup %12310 }
0x1a21   :  { %v12313_v29 = vpop.eup %12312  ;;  %v3519_v32 = vmul.f32 %v12311_v26, %v13661_v55 }
0x1a22   :  { %v3495_v34 = vmul.f32 %v12313_v29, %v13665_v58 }
0x1a81   :  { %v3522_v27 = vpop.permute.xlu0 %3521 }
0x1a82   :  { %v3524_v28 = vmul.f32 %v12311_v26, %v3522_v27 }
0x1a84   :  { %3526 = vrot.lane.b32.xlu0 %v3524_v28, %s12934_s23 }
0x1a85   :  { %v3498_v30 = vpop.permute.xlu1 %3497 }
0x1a86   :  { %v3500_v31 = vmul.f32 %v12313_v29, %v3498_v30 }
0x1a88   :  { %3502 = vrot.lane.b32.xlu1 %v3500_v31, %s12934_s23 }
0x1af6   :  { %v3527_v33 = vpop.permute.xlu0 %3526 }
0x1af7   :  { %v13693_v16 = vadd.f32 %v3527_v33, %v3519_v32 }
0x1af9   :  { %12314 = vtanh.f32 %v13693_v16 }
0x1afa   :  { %v3503_v35 = vpop.permute.xlu1 %3502 }
0x1afb   :  { %v13697_v36 = vadd.f32 %v3503_v35, %v3495_v34 }
0x1afd   :  { %12316 = vtanh.f32 %v13697_v36 }
0x1b03   :  { %v12315_v37 = vpop.eup %12314 }
0x1b04   :  { %3532 = vrot.lane.b32.xlu0 %v12315_v37, %s12934_s23 }
0x1b07   :  { %v12317_v38 = vpop.eup %12316 }
0x1b08   :  { %3508 = vrot.lane.b32.xlu1 %v12317_v38, %s12934_s23 }
0x1b76   :  { %v3533_v14 = vpop.permute.xlu0 %3532 }
0x1b77   :  { %v3535_v39 = vmul.f32 %v12311_v26, %v3533_v14 }
0x1b79   :  { %3543 = vrot.lane.b32.xlu0 %v3535_v39, %s12935_s0 }
0x1b7a   :  { %v3509_v40 = vpop.permute.xlu1 %3508 }
0x1b7b   :  { %v3511_v41 = vmul.f32 %v12313_v29, %v3509_v40  ;;  %v3759_v29 = vld [vmem:[#allocation2 + $0x14] sm:$0x3] }
0x1b7d   :  { %3537 = vrot.lane.b32.xlu1 %v3511_v41, %s12935_s0 }
0x1beb   :  { %v3544_v42 = vpop.permute.xlu0 %3543 }
0x1bec   :  { %3547 = vst.msk [vmem:[#allocation5 + $0xe] sm:$0x3] %vm1860_vm3, %v3544_v42  ;;  %11039 = vmatmul.mubr.msk.f32.vlgmr.msra.gmra.mrb[26].mxu1 %vm1660_vm4, %v3544_v42 }
0x1bed   :  { %11789 = vmatpush3.bf16.msra.mxu1 %v13322_v0  ;;  %11060 = vmatprep.mubr.msk.f32.mxu1 %vm12931_vm2, %v12932_v60 }
0x1bee   :  { %11790 = vmatprep.subr.bf16.mxu1 %v12930_v59 }
0x1bef   :  { %v3538_v43 = vpop.permute.xlu1 %3537 }
0x1bf0   :  { %3541 = vst.msk [vmem:[#allocation4 + $0x10] sm:$0x3] %vm1860_vm3, %v3538_v43  ;;  %11028 = vmatmul.mubr.msk.f32.vlgmr.msra.gmra.mrb[24].mxu0 %vm1660_vm4, %v3538_v43 }
0x1bf1   :  { %11783 = vmatpush3.bf16.msra.mxu0 %v13384_v61  ;;  %11792 = vmatpush3.bf16.msra.mxu1 %v13325_v2 }
0x1bf2   :  { %11784 = vmatprep.subr.bf16.mxu0 %v12930_v59  ;;  %11049 = vmatprep.mubr.msk.f32.mxu0 %vm12931_vm2, %v12932_v60 }
0x1bf3   :  { %11799 = vmatprep.subr.bf16.mxu1 %v12930_v59 }
0x1bf5   :  { %11786 = vmatpush3.bf16.msra.mxu0 %v13389_v54 }
0x1bf6   :  { %11793 = vmatprep.subr.bf16.mxu0 %v12930_v59 }
0x1cbf   :  { %v3693_v45 = vpop.f32.mrb[26].mxu1 }
0x1cc0   :  { %v3697_v46 = vadd.f32 %v3693_v45, %v3624_v44  ;;  %v11040_v47 = vpop.f32.mrb[27].mxu1 }
0x1cc2   :  { %12318 = vtanh.f32 %v3697_v46  ;;  %v10207_v56 = vmul.f32 -1.442695, %v3697_v46 }
0x1cc3   :  { %v3618_v49 = vpop.f32.mrb[24].mxu0 }
0x1cc4   :  { %v3622_v50 = vadd.f32 %v3618_v49, %v3549_v48  ;;  %v11029_v51 = vpop.f32.mrb[25].mxu0 }
0x1cc6   :  { %12320 = vtanh.f32 %v3622_v50  ;;  %v10206_v57 = vmul.f32 -1.442695, %v3622_v50 }
0x1cc7   :  { %12322 = vpow2.f32 %v10207_v56 }
0x1cc8   :  { %12324 = vpow2.f32 %v10206_v57 }
0x1ccc   :  { %v12319_v52 = vpop.eup %12318 }
0x1ccd   :  { %3731 = vrot.lane.b32.xlu0 %v12319_v52, %s12934_s23 }
0x1cd0   :  { %v12321_v55 = vpop.eup %12320 }
0x1cd1   :  { %3707 = vrot.lane.b32.xlu1 %v12321_v55, %s12934_s23  ;;  %v12323_v58 = vpop.eup %12322 }
0x1cd2   :  { %v3725_v53 = vadd.f32 1.0, %v12323_v58  ;;  %v12325_v62 = vpop.eup %12324 }
0x1cd3   :  { %v3701_v63 = vadd.f32 1.0, %v12325_v62 }
0x1cd4   :  { %12326 = vrcp.f32 %v3725_v53 }
0x1cd5   :  { %12328 = vrcp.f32 %v3701_v63  ;;  %v4044_v63 = vld [vmem:[#allocation3 + $0x8] sm:$0x3] }
0x1cde   :  { %v12327_v1 = vpop.eup %12326 }
0x1cdf   :  { %v12329_v5 = vpop.eup %12328  ;;  %v3729_v10 = vmul.f32 %v12327_v1, %v13693_v16 }
0x1ce0   :  { %v3705_v15 = vmul.f32 %v12329_v5, %v13697_v36 }
0x1d3f   :  { %v3732_v3 = vpop.permute.xlu0 %3731 }
0x1d40   :  { %v3734_v4 = vmul.f32 %v12327_v1, %v3732_v3 }
0x1d42   :  { %3736 = vrot.lane.b32.xlu0 %v3734_v4, %s12934_s23 }
0x1d43   :  { %v3708_v6 = vpop.permute.xlu1 %3707 }
0x1d44   :  { %v3710_v7 = vmul.f32 %v12329_v5, %v3708_v6 }
0x1d46   :  { %3712 = vrot.lane.b32.xlu1 %v3710_v7, %s12934_s23 }
0x1db4   :  { %v3737_v12 = vpop.permute.xlu0 %3736 }
0x1db5   :  { %v13725_v13 = vadd.f32 %v3737_v12, %v3729_v10 }
0x1db7   :  { %12330 = vtanh.f32 %v13725_v13 }
0x1db8   :  { %v3713_v17 = vpop.permute.xlu1 %3712 }
0x1db9   :  { %v13729_v18 = vadd.f32 %v3713_v17, %v3705_v15 }
0x1dbb   :  { %12332 = vtanh.f32 %v13729_v18 }
0x1dc1   :  { %v12331_v19 = vpop.eup %12330 }
0x1dc2   :  { %3742 = vrot.lane.b32.xlu0 %v12331_v19, %s12934_s23 }
0x1dc5   :  { %v12333_v20 = vpop.eup %12332 }
0x1dc6   :  { %3718 = vrot.lane.b32.xlu1 %v12333_v20, %s12934_s23 }
0x1e34   :  { %v3743_v21 = vpop.permute.xlu0 %3742 }
0x1e35   :  { %v3745_v22 = vmul.f32 %v12327_v1, %v3743_v21 }
0x1e37   :  { %3753 = vrot.lane.b32.xlu0 %v3745_v22, %s12935_s0 }
0x1e38   :  { %v3719_v8 = vpop.permute.xlu1 %3718 }
0x1e39   :  { %v3721_v23 = vmul.f32 %v12329_v5, %v3719_v8  ;;  %v3969_v5 = vld [vmem:[#allocation2 + $0x16] sm:$0x3] }
0x1e3b   :  { %3747 = vrot.lane.b32.xlu1 %v3721_v23, %s12935_s0 }
0x1ea9   :  { %v3754_v11 = vpop.permute.xlu0 %3753 }
0x1eaa   :  { %3757 = vst.msk [vmem:[#allocation5 + $0xc] sm:$0x3] %vm1860_vm3, %v3754_v11  ;;  %11061 = vmatmul.mubr.msk.f32.vlgmr.msra.gmra.mrb[28].mxu1 %vm1660_vm4, %v3754_v11 }
0x1eab   :  { %11801 = vmatpush3.bf16.msra.mxu1 %v13322_v0  ;;  %11082 = vmatprep.mubr.msk.f32.mxu1 %vm12931_vm2, %v12932_v60 }
0x1eac   :  { %11802 = vmatprep.subr.bf16.mxu1 %v12930_v59 }
0x1ead   :  { %v3748_v24 = vpop.permute.xlu1 %3747 }
0x1eae   :  { %3751 = vst.msk [vmem:[#allocation4 + $0x12] sm:$0x3] %vm1860_vm3, %v3748_v24  ;;  %11050 = vmatmul.mubr.msk.f32.vlgmr.msra.gmra.mrb[26].mxu0 %vm1660_vm4, %v3748_v24 }
0x1eaf   :  { %11795 = vmatpush3.bf16.msra.mxu0 %v13384_v61  ;;  %11804 = vmatpush3.bf16.msra.mxu1 %v13325_v2 }
0x1eb0   :  { %11796 = vmatprep.subr.bf16.mxu0 %v12930_v59  ;;  %11071 = vmatprep.mubr.msk.f32.mxu0 %vm12931_vm2, %v12932_v60 }
0x1eb1   :  { %11811 = vmatprep.subr.bf16.mxu1 %v12930_v59 }
0x1eb3   :  { %11798 = vmatpush3.bf16.msra.mxu0 %v13389_v54 }
0x1eb4   :  { %11805 = vmatprep.subr.bf16.mxu0 %v12930_v59 }
0x1f7d   :  { %v3903_v26 = vpop.f32.mrb[28].mxu1 }
0x1f7e   :  { %v3907_v27 = vadd.f32 %v3903_v26, %v3834_v25  ;;  %v11062_v28 = vpop.f32.mrb[29].mxu1 }
0x1f80   :  { %12334 = vtanh.f32 %v3907_v27  ;;  %v10211_v34 = vmul.f32 -1.442695, %v3907_v27 }
0x1f81   :  { %v3828_v30 = vpop.f32.mrb[26].mxu0 }
0x1f82   :  { %v3832_v31 = vadd.f32 %v3828_v30, %v3759_v29  ;;  %v11051_v32 = vpop.f32.mrb[27].mxu0 }
0x1f84   :  { %12336 = vtanh.f32 %v3832_v31  ;;  %v10210_v35 = vmul.f32 -1.442695, %v3832_v31 }
0x1f85   :  { %12338 = vpow2.f32 %v10211_v34 }
0x1f86   :  { %12340 = vpow2.f32 %v10210_v35 }
0x1f8a   :  { %v12335_v33 = vpop.eup %12334 }
0x1f8b   :  { %3941 = vrot.lane.b32.xlu0 %v12335_v33, %s12934_s23 }
0x1f8e   :  { %v12337_v16 = vpop.eup %12336 }
0x1f8f   :  { %3917 = vrot.lane.b32.xlu1 %v12337_v16, %s12934_s23  ;;  %v12339_v36 = vpop.eup %12338 }
0x1f90   :  { %v3935_v37 = vadd.f32 1.0, %v12339_v36  ;;  %v12341_v38 = vpop.eup %12340 }
0x1f91   :  { %v3911_v14 = vadd.f32 1.0, %v12341_v38 }
0x1f92   :  { %12342 = vrcp.f32 %v3935_v37 }
0x1f93   :  { %12344 = vrcp.f32 %v3911_v14  ;;  %v4254_v14 = vld [vmem:[#allocation3 + $0x6] sm:$0x3] }
0x1f9c   :  { %v12343_v39 = vpop.eup %12342 }
0x1f9d   :  { %v12345_v42 = vpop.eup %12344  ;;  %v3939_v45 = vmul.f32 %v12343_v39, %v13725_v13 }
0x1f9e   :  { %v3915_v48 = vmul.f32 %v12345_v42, %v13729_v18 }
0x1ffd   :  { %v3942_v40 = vpop.permute.xlu0 %3941 }
0x1ffe   :  { %v3944_v41 = vmul.f32 %v12343_v39, %v3942_v40 }
0x2000   :  { %3946 = vrot.lane.b32.xlu0 %v3944_v41, %s12934_s23 }
0x2001   :  { %v3918_v43 = vpop.permute.xlu1 %3917 }
0x2002   :  { %v3920_v44 = vmul.f32 %v12345_v42, %v3918_v43 }
0x2004   :  { %3922 = vrot.lane.b32.xlu1 %v3920_v44, %s12934_s23 }
0x2072   :  { %v3947_v46 = vpop.permute.xlu0 %3946 }
0x2073   :  { %v13757_v47 = vadd.f32 %v3947_v46, %v3939_v45 }
0x2075   :  { %12346 = vtanh.f32 %v13757_v47 }
0x2076   :  { %v3923_v49 = vpop.permute.xlu1 %3922 }
0x2077   :  { %v13761_v50 = vadd.f32 %v3923_v49, %v3915_v48 }
0x2079   :  { %12348 = vtanh.f32 %v13761_v50 }
0x207f   :  { %v12347_v51 = vpop.eup %12346 }
0x2080   :  { %3952 = vrot.lane.b32.xlu0 %v12347_v51, %s12934_s23 }
0x2083   :  { %v12349_v52 = vpop.eup %12348 }
0x2084   :  { %3928 = vrot.lane.b32.xlu1 %v12349_v52, %s12934_s23 }
0x20f2   :  { %v3953_v55 = vpop.permute.xlu0 %3952 }
0x20f3   :  { %v3955_v56 = vmul.f32 %v12343_v39, %v3953_v55 }
0x20f5   :  { %3963 = vrot.lane.b32.xlu0 %v3955_v56, %s12935_s0 }
0x20f6   :  { %v3929_v57 = vpop.permute.xlu1 %3928 }
0x20f7   :  { %v3931_v58 = vmul.f32 %v12345_v42, %v3929_v57  ;;  %v4179_v42 = vld [vmem:[#allocation2 + $0x18] sm:$0x3] }
0x20f9   :  { %3957 = vrot.lane.b32.xlu1 %v3931_v58, %s12935_s0 }
0x2167   :  { %v3964_v53 = vpop.permute.xlu0 %3963 }
0x2168   :  { %3967 = vst.msk [vmem:[#allocation5 + $0xa] sm:$0x3] %vm1860_vm3, %v3964_v53  ;;  %11083 = vmatmul.mubr.msk.f32.vlgmr.msra.gmra.mrb[30].mxu1 %vm1660_vm4, %v3964_v53 }
0x2169   :  { %11813 = vmatpush3.bf16.msra.mxu1 %v13322_v0  ;;  %11104 = vmatprep.mubr.msk.f32.mxu1 %vm12931_vm2, %v12932_v60 }
0x216a   :  { %11814 = vmatprep.subr.bf16.mxu1 %v12930_v59 }
0x216b   :  { %v3958_v62 = vpop.permute.xlu1 %3957 }
0x216c   :  { %3961 = vst.msk [vmem:[#allocation4 + $0x14] sm:$0x3] %vm1860_vm3, %v3958_v62  ;;  %11072 = vmatmul.mubr.msk.f32.vlgmr.msra.gmra.mrb[28].mxu0 %vm1660_vm4, %v3958_v62 }
0x216d   :  { %11807 = vmatpush3.bf16.msra.mxu0 %v13384_v61  ;;  %11816 = vmatpush3.bf16.msra.mxu1 %v13325_v2 }
0x216e   :  { %11808 = vmatprep.subr.bf16.mxu0 %v12930_v59  ;;  %11093 = vmatprep.mubr.msk.f32.mxu0 %vm12931_vm2, %v12932_v60 }
0x216f   :  { %11823 = vmatprep.subr.bf16.mxu1 %v12930_v59 }
0x2171   :  { %11810 = vmatpush3.bf16.msra.mxu0 %v13389_v54 }
0x2172   :  { %11817 = vmatprep.subr.bf16.mxu0 %v12930_v59 }
0x223b   :  { %v4113_v1 = vpop.f32.mrb[30].mxu1 }
0x223c   :  { %v4117_v3 = vadd.f32 %v4113_v1, %v4044_v63  ;;  %v11084_v4 = vpop.f32.mrb[31].mxu1 }
0x223e   :  { %12350 = vtanh.f32 %v4117_v3  ;;  %v10215_v15 = vmul.f32 -1.442695, %v4117_v3 }
0x223f   :  { %v4038_v6 = vpop.f32.mrb[28].mxu0 }
0x2240   :  { %v4042_v7 = vadd.f32 %v4038_v6, %v3969_v5  ;;  %v11073_v10 = vpop.f32.mrb[29].mxu0 }
0x2242   :  { %12352 = vtanh.f32 %v4042_v7  ;;  %v10214_v17 = vmul.f32 -1.442695, %v4042_v7 }
0x2243   :  { %12354 = vpow2.f32 %v10215_v15 }
0x2244   :  { %12356 = vpow2.f32 %v10214_v17 }
0x2248   :  { %v12351_v12 = vpop.eup %12350 }
0x2249   :  { %4151 = vrot.lane.b32.xlu0 %v12351_v12, %s12934_s23 }
0x224c   :  { %v12353_v13 = vpop.eup %12352 }
0x224d   :  { %4127 = vrot.lane.b32.xlu1 %v12353_v13, %s12934_s23  ;;  %v12355_v18 = vpop.eup %12354 }
0x224e   :  { %v4145_v19 = vadd.f32 1.0, %v12355_v18  ;;  %v12357_v20 = vpop.eup %12356 }
0x224f   :  { %v4121_v21 = vadd.f32 1.0, %v12357_v20 }
0x2250   :  { %12358 = vrcp.f32 %v4145_v19 }
0x2251   :  { %12360 = vrcp.f32 %v4121_v21  ;;  %v4464_v21 = vld [vmem:[#allocation3 + $0x4] sm:$0x3] }
0x225a   :  { %v12359_v22 = vpop.eup %12358 }
0x225b   :  { %v12361_v11 = vpop.eup %12360  ;;  %v4149_v26 = vmul.f32 %v12359_v22, %v13757_v47 }
0x225c   :  { %v4125_v29 = vmul.f32 %v12361_v11, %v13761_v50 }
0x22bb   :  { %v4152_v8 = vpop.permute.xlu0 %4151 }
0x22bc   :  { %v4154_v23 = vmul.f32 %v12359_v22, %v4152_v8 }
0x22be   :  { %4156 = vrot.lane.b32.xlu0 %v4154_v23, %s12934_s23 }
0x22bf   :  { %v4128_v24 = vpop.permute.xlu1 %4127 }
0x22c0   :  { %v4130_v25 = vmul.f32 %v12361_v11, %v4128_v24 }
0x22c2   :  { %4132 = vrot.lane.b32.xlu1 %v4130_v25, %s12934_s23 }
0x2330   :  { %v4157_v27 = vpop.permute.xlu0 %4156 }
0x2331   :  { %v13789_v28 = vadd.f32 %v4157_v27, %v4149_v26 }
0x2333   :  { %12362 = vtanh.f32 %v13789_v28 }
0x2334   :  { %v4133_v30 = vpop.permute.xlu1 %4132 }
0x2335   :  { %v13793_v31 = vadd.f32 %v4133_v30, %v4125_v29 }
0x2337   :  { %12364 = vtanh.f32 %v13793_v31 }
0x233d   :  { %v12363_v32 = vpop.eup %12362 }
0x233e   :  { %4162 = vrot.lane.b32.xlu0 %v12363_v32, %s12934_s23 }
0x2341   :  { %v12365_v33 = vpop.eup %12364 }
0x2342   :  { %4138 = vrot.lane.b32.xlu1 %v12365_v33, %s12934_s23 }
0x23b0   :  { %v4163_v16 = vpop.permute.xlu0 %4162 }
0x23b1   :  { %v4165_v34 = vmul.f32 %v12359_v22, %v4163_v16 }
0x23b3   :  { %4173 = vrot.lane.b32.xlu0 %v4165_v34, %s12935_s0 }
0x23b4   :  { %v4139_v35 = vpop.permute.xlu1 %4138 }
0x23b5   :  { %v4141_v36 = vmul.f32 %v12361_v11, %v4139_v35  ;;  %v4389_v11 = vld [vmem:[#allocation2 + $0x1a] sm:$0x3] }
0x23b7   :  { %4167 = vrot.lane.b32.xlu1 %v4141_v36, %s12935_s0 }
0x2425   :  { %v4174_v37 = vpop.permute.xlu0 %4173 }
0x2426   :  { %4177 = vst.msk [vmem:[#allocation5 + $0x8] sm:$0x3] %vm1860_vm3, %v4174_v37  ;;  %11105 = vmatmul.mubr.msk.f32.vlgmr.msra.gmra.mrb[32].mxu1 %vm1660_vm4, %v4174_v37 }
0x2427   :  { %11825 = vmatpush3.bf16.msra.mxu1 %v13322_v0  ;;  %11126 = vmatprep.mubr.msk.f32.mxu1 %vm12931_vm2, %v12932_v60 }
0x2428   :  { %11826 = vmatprep.subr.bf16.mxu1 %v12930_v59 }
0x2429   :  { %v4168_v38 = vpop.permute.xlu1 %4167 }
0x242a   :  { %4171 = vst.msk [vmem:[#allocation4 + $0x16] sm:$0x3] %vm1860_vm3, %v4168_v38  ;;  %11094 = vmatmul.mubr.msk.f32.vlgmr.msra.gmra.mrb[30].mxu0 %vm1660_vm4, %v4168_v38 }
0x242b   :  { %11819 = vmatpush3.bf16.msra.mxu0 %v13384_v61  ;;  %11828 = vmatpush3.bf16.msra.mxu1 %v13325_v2 }
0x242c   :  { %11820 = vmatprep.subr.bf16.mxu0 %v12930_v59  ;;  %11115 = vmatprep.mubr.msk.f32.mxu0 %vm12931_vm2, %v12932_v60 }
0x242d   :  { %11835 = vmatprep.subr.bf16.mxu1 %v12930_v59 }
0x242f   :  { %11822 = vmatpush3.bf16.msra.mxu0 %v13389_v54 }
0x2430   :  { %11829 = vmatprep.subr.bf16.mxu0 %v12930_v59 }
0x24f9   :  { %v4323_v39 = vpop.f32.mrb[32].mxu1 }
0x24fa   :  { %v4327_v40 = vadd.f32 %v4323_v39, %v4254_v14  ;;  %v11106_v41 = vpop.f32.mrb[33].mxu1 }
0x24fc   :  { %12366 = vtanh.f32 %v4327_v40  ;;  %v10219_v48 = vmul.f32 -1.442695, %v4327_v40 }
0x24fd   :  { %v4248_v43 = vpop.f32.mrb[30].mxu0 }
0x24fe   :  { %v4252_v44 = vadd.f32 %v4248_v43, %v4179_v42  ;;  %v11095_v45 = vpop.f32.mrb[31].mxu0 }
0x2500   :  { %12368 = vtanh.f32 %v4252_v44  ;;  %v10218_v49 = vmul.f32 -1.442695, %v4252_v44 }
0x2501   :  { %12370 = vpow2.f32 %v10219_v48 }
0x2502   :  { %12372 = vpow2.f32 %v10218_v49 }
0x2506   :  { %v12367_v46 = vpop.eup %12366 }
0x2507   :  { %4361 = vrot.lane.b32.xlu0 %v12367_v46, %s12934_s23 }
0x250a   :  { %v12369_v47 = vpop.eup %12368 }
0x250b   :  { %4337 = vrot.lane.b32.xlu1 %v12369_v47, %s12934_s23  ;;  %v12371_v50 = vpop.eup %12370 }
0x250c   :  { %v4355_v51 = vadd.f32 1.0, %v12371_v50  ;;  %v12373_v52 = vpop.eup %12372 }
0x250d   :  { %v4331_v55 = vadd.f32 1.0, %v12373_v52 }
0x250e   :  { %12374 = vrcp.f32 %v4355_v51 }
0x250f   :  { %12376 = vrcp.f32 %v4331_v55 }
0x2518   :  { %v12375_v56 = vpop.eup %12374 }
0x2519   :  { %v12377_v53 = vpop.eup %12376  ;;  %v4359_v1 = vmul.f32 %v12375_v56, %v13789_v28 }
0x251a   :  { %v4335_v5 = vmul.f32 %v12377_v53, %v13793_v31 }
0x2579   :  { %v4362_v57 = vpop.permute.xlu0 %4361 }
0x257a   :  { %v4364_v58 = vmul.f32 %v12375_v56, %v4362_v57 }
0x257c   :  { %4366 = vrot.lane.b32.xlu0 %v4364_v58, %s12934_s23  ;;  %v4599_v58 = vld [vmem:[#allocation2 + $0x1c] sm:$0x3] }
0x257d   :  { %v4338_v62 = vpop.permute.xlu1 %4337 }
0x257e   :  { %v4340_v63 = vmul.f32 %v12377_v53, %v4338_v62 }
0x2580   :  { %4342 = vrot.lane.b32.xlu1 %v4340_v63, %s12934_s23 }
0x25ee   :  { %v4367_v3 = vpop.permute.xlu0 %4366 }
0x25ef   :  { %v13821_v4 = vadd.f32 %v4367_v3, %v4359_v1 }
0x25f1   :  { %12378 = vtanh.f32 %v13821_v4 }
0x25f2   :  { %v4343_v6 = vpop.permute.xlu1 %4342 }
0x25f3   :  { %v13825_v7 = vadd.f32 %v4343_v6, %v4335_v5 }
0x25f5   :  { %12380 = vtanh.f32 %v13825_v7 }
0x25fb   :  { %v12379_v10 = vpop.eup %12378 }
0x25fc   :  { %4372 = vrot.lane.b32.xlu0 %v12379_v10, %s12934_s23 }
0x25ff   :  { %v12381_v12 = vpop.eup %12380 }
0x2600   :  { %4348 = vrot.lane.b32.xlu1 %v12381_v12, %s12934_s23 }
0x266e   :  { %v4373_v13 = vpop.permute.xlu0 %4372 }
0x266f   :  { %v4375_v15 = vmul.f32 %v12375_v56, %v4373_v13 }
0x2671   :  { %4383 = vrot.lane.b32.xlu0 %v4375_v15, %s12935_s0 }
0x2672   :  { %v4349_v17 = vpop.permute.xlu1 %4348 }
0x2673   :  { %v4351_v18 = vmul.f32 %v12377_v53, %v4349_v17 }
0x2675   :  { %4377 = vrot.lane.b32.xlu1 %v4351_v18, %s12935_s0 }
0x26e3   :  { %v4384_v19 = vpop.permute.xlu0 %4383 }
0x26e4   :  { %4387 = vst.msk [vmem:[#allocation5 + $0x6] sm:$0x3] %vm1860_vm3, %v4384_v19  ;;  %11127 = vmatmul.mubr.msk.f32.vlgmr.msra.gmra.mrb[34].mxu1 %vm1660_vm4, %v4384_v19 }
0x26e5   :  { %11837 = vmatpush3.bf16.msra.mxu1 %v13322_v0  ;;  %11148 = vmatprep.mubr.msk.f32.mxu1 %vm12931_vm2, %v12932_v60 }
0x26e6   :  { %11838 = vmatprep.subr.bf16.mxu1 %v12930_v59 }
0x26e7   :  { %v4378_v20 = vpop.permute.xlu1 %4377 }
0x26e8   :  { %4381 = vst.msk [vmem:[#allocation4 + $0x18] sm:$0x3] %vm1860_vm3, %v4378_v20  ;;  %11116 = vmatmul.mubr.msk.f32.vlgmr.msra.gmra.mrb[32].mxu0 %vm1660_vm4, %v4378_v20 }
0x26e9   :  { %11831 = vmatpush3.bf16.msra.mxu0 %v13384_v61  ;;  %11840 = vmatpush3.bf16.msra.mxu1 %v13325_v2 }
0x26ea   :  { %11832 = vmatprep.subr.bf16.mxu0 %v12930_v59  ;;  %11137 = vmatprep.mubr.msk.f32.mxu0 %vm12931_vm2, %v12932_v60 }
0x26eb   :  { %11847 = vmatprep.subr.bf16.mxu1 %v12930_v59 }
0x26ed   :  { %11834 = vmatpush3.bf16.msra.mxu0 %v13389_v54 }
0x26ee   :  { %11841 = vmatprep.subr.bf16.mxu0 %v12930_v59 }
0x27b7   :  { %v4533_v22 = vpop.f32.mrb[34].mxu1 }
0x27b8   :  { %v4537_v8 = vadd.f32 %v4533_v22, %v4464_v21  ;;  %v11128_v23 = vpop.f32.mrb[35].mxu1 }
0x27ba   :  { %12382 = vtanh.f32 %v4537_v8  ;;  %v10223_v29 = vmul.f32 -1.442695, %v4537_v8 }
0x27bb   :  { %v4458_v24 = vpop.f32.mrb[32].mxu0 }
0x27bc   :  { %v4462_v25 = vadd.f32 %v4458_v24, %v4389_v11  ;;  %v11117_v26 = vpop.f32.mrb[33].mxu0 }
0x27be   :  { %12384 = vtanh.f32 %v4462_v25  ;;  %v10222_v30 = vmul.f32 -1.442695, %v4462_v25 }
0x27bf   :  { %12386 = vpow2.f32 %v10223_v29 }
0x27c0   :  { %12388 = vpow2.f32 %v10222_v30  ;;  %v4883_v30 = vld [vmem:[#allocation3] sm:$0x3] }
0x27c4   :  { %v12383_v27 = vpop.eup %12382 }
0x27c5   :  { %4571 = vrot.lane.b32.xlu0 %v12383_v27, %s12934_s23 }
0x27c8   :  { %v12385_v28 = vpop.eup %12384 }
0x27c9   :  { %4547 = vrot.lane.b32.xlu1 %v12385_v28, %s12934_s23  ;;  %v12387_v31 = vpop.eup %12386 }
0x27ca   :  { %v4565_v32 = vadd.f32 1.0, %v12387_v31  ;;  %v12389_v33 = vpop.eup %12388 }
0x27cb   :  { %v4541_v16 = vadd.f32 1.0, %v12389_v33 }
0x27cc   :  { %12390 = vrcp.f32 %v4565_v32 }
0x27cd   :  { %12392 = vrcp.f32 %v4541_v16  ;;  %v4809_v16 = vld [vmem:[#allocation2 + $0x1e] sm:$0x3] }
0x27d6   :  { %v12391_v34 = vpop.eup %12390 }
0x27d7   :  { %v12393_v37 = vpop.eup %12392  ;;  %v4569_v39 = vmul.f32 %v12391_v34, %v13821_v4 }
0x27d8   :  { %v4545_v42 = vmul.f32 %v12393_v37, %v13825_v7 }
0x2837   :  { %v4572_v35 = vpop.permute.xlu0 %4571 }
0x2838   :  { %v4574_v36 = vmul.f32 %v12391_v34, %v4572_v35 }
0x283a   :  { %4576 = vrot.lane.b32.xlu0 %v4574_v36, %s12934_s23 }
0x283b   :  { %v4548_v38 = vpop.permute.xlu1 %4547 }
0x283c   :  { %v4550_v14 = vmul.f32 %v12393_v37, %v4548_v38 }
0x283e   :  { %4552 = vrot.lane.b32.xlu1 %v4550_v14, %s12934_s23 }
0x28ac   :  { %v4577_v40 = vpop.permute.xlu0 %4576 }
0x28ad   :  { %v4579_v41 = vadd.f32 %v4577_v40, %v4569_v39 }
0x28af   :  { %12394 = vtanh.f32 %v4579_v41 }
0x28b0   :  { %v4553_v43 = vpop.permute.xlu1 %4552 }
0x28b1   :  { %v4555_v44 = vadd.f32 %v4553_v43, %v4545_v42 }
0x28b3   :  { %12396 = vtanh.f32 %v4555_v44 }
0x28b9   :  { %v12395_v45 = vpop.eup %12394 }
0x28ba   :  { %4582 = vrot.lane.b32.xlu0 %v12395_v45, %s12934_s23 }
0x28bd   :  { %v12397_v46 = vpop.eup %12396 }
0x28be   :  { %4558 = vrot.lane.b32.xlu1 %v12397_v46, %s12934_s23 }
0x292c   :  { %v4583_v47 = vpop.permute.xlu0 %4582 }
0x292d   :  { %v4585_v48 = vmul.f32 %v12391_v34, %v4583_v47 }
0x292f   :  { %4593 = vrot.lane.b32.xlu0 %v4585_v48, %s12935_s0 }
0x2930   :  { %v4559_v49 = vpop.permute.xlu1 %4558 }
0x2931   :  { %v4561_v50 = vmul.f32 %v12393_v37, %v4559_v49 }
0x2933   :  { %4587 = vrot.lane.b32.xlu1 %v4561_v50, %s12935_s0 }
0x29a1   :  { %v4594_v51 = vpop.permute.xlu0 %4593 }
0x29a2   :  { %4597 = vst.msk [vmem:[#allocation5 + $0x4] sm:$0x3] %vm1860_vm3, %v4594_v51  ;;  %11149 = vmatmul.mubr.msk.f32.vlgmr.msra.gmra.mrb[36].mxu1 %vm1660_vm4, %v4594_v51 }
0x29a3   :  { %11849 = vmatpush3.bf16.msra.mxu1 %v13322_v0  ;;  %11170 = vmatprep.mubr.msk.f32.mxu1 %vm12931_vm2, %v12932_v60  ;;  %v4674_v0 = vld [vmem:[#allocation3 + $0x2] sm:$0x3] }
0x29a4   :  { %11850 = vmatprep.subr.bf16.mxu1 %v12930_v59 }
0x29a5   :  { %v4588_v52 = vpop.permute.xlu1 %4587 }
0x29a6   :  { %4591 = vst.msk [vmem:[#allocation4 + $0x1a] sm:$0x3] %vm1860_vm3, %v4588_v52  ;;  %11138 = vmatmul.mubr.msk.f32.vlgmr.msra.gmra.mrb[34].mxu0 %vm1660_vm4, %v4588_v52 }
0x29a7   :  { %11843 = vmatpush3.bf16.msra.mxu0 %v13384_v61  ;;  %11852 = vmatpush3.bf16.msra.mxu1 %v13325_v2 }
0x29a8   :  { %11844 = vmatprep.subr.bf16.mxu0 %v12930_v59  ;;  %11159 = vmatprep.mubr.msk.f32.mxu0 %vm12931_vm2, %v12932_v60 }
0x29ab   :  { %11846 = vmatpush3.bf16.msra.mxu0 %v13389_v54 }
0x2a75   :  { %v4743_v55 = vpop.f32.mrb[36].mxu1 }
0x2a76   :  { %v4747_v56 = vadd.f32 %v4743_v55, %v4674_v0  ;;  %v11150_v57 = vpop.f32.mrb[37].mxu1 }
0x2a78   :  { %12398 = vtanh.f32 %v4747_v56  ;;  %v10227_v1 = vmul.f32 -1.442695, %v4747_v56 }
0x2a79   :  { %v4668_v53 = vpop.f32.mrb[34].mxu0 }
0x2a7a   :  { %v4672_v62 = vadd.f32 %v4668_v53, %v4599_v58  ;;  %v11139_v63 = vpop.f32.mrb[35].mxu0  ;;  %v5028_v53 = vld [vmem:[%s14765_s9 + $0x20] sm:$0xff] }
0x2a7b   :  { %v5037_v63 = vld [vmem:[%s14768_s12 + $0x20] sm:$0xff] }
0x2a7c   :  { %12400 = vtanh.f32 %v4672_v62  ;;  %v10226_v3 = vmul.f32 -1.442695, %v4672_v62  ;;  %v5029_v62 = vld [vmem:[%s14765_s9 + $0x28] sm:$0xff] }
0x2a7d   :  { %12402 = vpow2.f32 %v10227_v1  ;;  %v5030_v1 = vld [vmem:[%s14765_s9 + $0x30] sm:$0xff] }
0x2a7e   :  { %12404 = vpow2.f32 %v10226_v3  ;;  %v5031_v3 = vld [vmem:[%s14765_s9 + $0x38] sm:$0xff] }
0x2a82   :  { %v12399_v61 = vpop.eup %12398 }
0x2a83   :  { %4781 = vrot.lane.b32.xlu0 %v12399_v61, %s12934_s23  ;;  %v13899_v61 = vpack.c.bf16 %v5029_v62, %v5028_v53  ;;  %v13978_v53 = vld [vmem:[#allocation4 + $0xc] sm:$0x1] }
0x2a85   :  { %11854 = vmatprep.subr.bf16.mxu0 %v13899_v61 }
0x2a86   :  { %v12401_v2 = vpop.eup %12400 }
0x2a87   :  { %4757 = vrot.lane.b32.xlu1 %v12401_v2, %s12934_s23  ;;  %v12403_v54 = vpop.eup %12402  ;;  %v5038_v2 = vld [vmem:[%s14768_s12 + $0x28] sm:$0xff] }
0x2a88   :  { %v4775_v4 = vadd.f32 1.0, %v12403_v54  ;;  %v12405_v5 = vpop.eup %12404  ;;  %v13910_v54 = vpack.c.bf16 %v5038_v2, %v5037_v63  ;;  %v5061_v63 = vld [vmem:[#allocation5 + $0x6] sm:$0x1]  ;;  %v5064_v2 = vld [vmem:[#allocation5 + $0xc] sm:$0x1] }
0x2a89   :  { %v4751_v6 = vadd.f32 1.0, %v12405_v5  ;;  %v5039_v5 = vld [vmem:[%s14768_s12 + $0x30] sm:$0xff] }
0x2a8a   :  { %12406 = vrcp.f32 %v4775_v4  ;;  %v13912_v4 = vpack.c.bf16 %v5031_v3, %v5030_v1  ;;  %11870 = vmatprep.subr.bf16.mxu1 %v13910_v54  ;;  %v5775_v3 = vld [vmem:[#allocation5 + $0x5] sm:$0x1] }
0x2a8b   :  { %12408 = vrcp.f32 %v4751_v6  ;;  %v5040_v6 = vld [vmem:[%s14768_s12 + $0x38] sm:$0xff] }
0x2a94   :  { %v12407_v7 = vpop.eup %12406 }
0x2a95   :  { %v12409_v13 = vpop.eup %12408  ;;  %v4779_v18 = vmul.f32 %v12407_v7, %v4579_v41 }
0x2a96   :  { %v4755_v21 = vmul.f32 %v12409_v13, %v4555_v44 }
0x2af5   :  { %v4782_v10 = vpop.permute.xlu0 %4781 }
0x2af6   :  { %v4784_v12 = vmul.f32 %v12407_v7, %v4782_v10 }
0x2af8   :  { %4786 = vrot.lane.b32.xlu0 %v4784_v12, %s12934_s23 }
0x2af9   :  { %v4758_v15 = vpop.permute.xlu1 %4757 }
0x2afa   :  { %v4760_v17 = vmul.f32 %v12409_v13, %v4758_v15  ;;  %v5024_v15 = vld [vmem:[%s14765_s9] sm:$0xff] }
0x2afc   :  { %4762 = vrot.lane.b32.xlu1 %v4760_v17, %s12934_s23  ;;  %v5025_v17 = vld [vmem:[%s14765_s9 + $0x8] sm:$0xff] }
0x2b6a   :  { %v4787_v19 = vpop.permute.xlu0 %4786 }
0x2b6b   :  { %v4789_v20 = vadd.f32 %v4787_v19, %v4779_v18  ;;  %v5033_v18 = vld [vmem:[%s14768_s12] sm:$0xff] }
0x2b6d   :  { %12410 = vtanh.f32 %v4789_v20 }
0x2b6e   :  { %v4763_v22 = vpop.permute.xlu1 %4762 }
0x2b6f   :  { %v4765_v8 = vadd.f32 %v4763_v22, %v4755_v21  ;;  %v5034_v21 = vld [vmem:[%s14768_s12 + $0x8] sm:$0xff] }
0x2b70   :  { %v13945_v22 = vpack.c.bf16 %v5034_v21, %v5033_v18  ;;  %v5230_v21 = vrot.slane %v13978_v53, 2 }
0x2b71   :  { %12412 = vtanh.f32 %v4765_v8 }
0x2b77   :  { %v12411_v23 = vpop.eup %12410 }
0x2b78   :  { %4792 = vrot.lane.b32.xlu0 %v12411_v23, %s12934_s23  ;;  %v13950_v23 = vld [vmem:[#allocation5 + $0x1e] sm:$0x1] }
0x2b7b   :  { %v12413_v11 = vpop.eup %12412 }
0x2b7c   :  { %4768 = vrot.lane.b32.xlu1 %v12413_v11, %s12934_s23  ;;  %v5066_v11 = vld [vmem:[#allocation5 + $0x10] sm:$0x1] }
0x2bea   :  { %v4793_v24 = vpop.permute.xlu0 %4792 }
0x2beb   :  { %v4795_v25 = vmul.f32 %v12407_v7, %v4793_v24  ;;  %v13921_v7 = vpack.c.bf16 %v5040_v6, %v5039_v5  ;;  %v5068_v24 = vld [vmem:[#allocation5 + $0x14] sm:$0x1]  ;;  %v5062_v5 = vld [vmem:[#allocation5 + $0x8] sm:$0x1]  ;;  %v5063_v6 = vld [vmem:[#allocation5 + $0xa] sm:$0x1] }
0x2bed   :  { %4803 = vrot.lane.b32.xlu0 %v4795_v25, %s12935_s0  ;;  %v13952_v25 = vld [vmem:[#allocation5 + $0x1c] sm:$0x1] }
0x2bee   :  { %v4769_v26 = vpop.permute.xlu1 %4768 }
0x2bef   :  { %v4771_v27 = vmul.f32 %v12409_v13, %v4769_v26 }
0x2bf1   :  { %4797 = vrot.lane.b32.xlu1 %v4771_v27, %s12935_s0  ;;  %v5123_v27 = vrot.slane %v13950_v23, 1 }
0x2c5f   :  { %v4804_v28 = vpop.permute.xlu0 %4803 }
0x2c60   :  { %4807 = vst.msk [vmem:[#allocation5 + $0x2] sm:$0x3] %vm1860_vm3, %v4804_v28  ;;  %11171 = vmatmul.mubr.msk.f32.vlgmr.msra.gmra.mrb[38].mxu1 %vm1660_vm4, %v4804_v28  ;;  %v5043_v28 = vld [vmem:[#allocation4 + $0x2] sm:$0x1] }
0x2c61   :  { %11872 = vmatpush3.bf16.msra.mxu1 %v13910_v54 }
0x2c62   :  { %11874 = vmatprep.subr.bf16.mxu1 %v13921_v7 }
0x2c63   :  { %v4798_v29 = vpop.permute.xlu1 %4797 }
0x2c64   :  { %4801 = vst.msk [vmem:[#allocation4 + $0x1c] sm:$0x3] %vm1860_vm3, %v4798_v29  ;;  %11160 = vmatmul.mubr.msk.f32.vlgmr.msra.gmra.mrb[36].mxu0 %vm1660_vm4, %v4798_v29  ;;  %v5070_v29 = vld [vmem:[#allocation5 + $0x18] sm:$0x1] }
0x2c65   :  { %11856 = vmatpush3.bf16.msra.mxu0 %v13899_v61  ;;  %11876 = vmatpush3.bf16.msra.mxu1 %v13921_v7 }
0x2c66   :  { %11858 = vmatprep.subr.bf16.mxu0 %v13912_v4  ;;  %11878 = vmatprep.subr.bf16.mxu1 %v13945_v22 }
0x2c69   :  { %11860 = vmatpush3.bf16.msra.mxu0 %v13912_v4 }
0x2d33   :  { %v4952_v31 = vpop.f32.mrb[38].mxu1 }
0x2d34   :  { %v4956_v32 = vadd.f32 %v4952_v31, %v4883_v30  ;;  %v11172_v33 = vpop.f32.mrb[39].mxu1  ;;  %v13955_v30 = vld [vmem:[#allocation5 + $0x1a] sm:$0x1] }
0x2d35   :  { %v5069_v33 = vld [vmem:[#allocation5 + $0x16] sm:$0x1] }
0x2d36   :  { %12414 = vtanh.f32 %v4956_v32  ;;  %v10231_v14 = vmul.f32 -1.442695, %v4956_v32  ;;  %v5044_v32 = vld [vmem:[#allocation4 + $0x4] sm:$0x1] }
0x2d37   :  { %v4878_v34 = vpop.f32.mrb[36].mxu0 }
0x2d38   :  { %v4882_v35 = vadd.f32 %v4878_v34, %v4809_v16  ;;  %v11161_v36 = vpop.f32.mrb[37].mxu0  ;;  %v5113_v16 = vrot.slane %v5068_v24, 6  ;;  %v5121_v34 = vrot.slane %v13952_v25, 2  ;;  %v5096_v24 = vrot.slane %v5061_v63, 5  ;;  %v5054_v25 = vld [vmem:[#allocation4 + $0x18] sm:$0x1] }
0x2d3a   :  { %12416 = vtanh.f32 %v4882_v35  ;;  %v10230_v39 = vmul.f32 -1.442695, %v4882_v35  ;;  %v5045_v35 = vld [vmem:[#allocation4 + $0x6] sm:$0x1] }
0x2d3b   :  { %12418 = vpow2.f32 %v10231_v14  ;;  %v13961_v14 = vld [vmem:[#allocation5 + $0x17] sm:$0x1] }
0x2d3c   :  { %12420 = vpow2.f32 %v10230_v39 }
0x2d40   :  { %v12415_v37 = vpop.eup %12414 }
0x2d41   :  { %4990 = vrot.lane.b32.xlu0 %v12415_v37, %s12934_s23  ;;  %v13959_v37 = vld [vmem:[#allocation4 + $0x8] sm:$0x1] }
0x2d44   :  { %v12417_v38 = vpop.eup %12416 }
0x2d45   :  { %4966 = vrot.lane.b32.xlu1 %v12417_v38, %s12934_s23  ;;  %v12419_v40 = vpop.eup %12418  ;;  %v5220_v38 = vrot.slane %v5043_v28, 7 }
0x2d46   :  { %v4984_v41 = vadd.f32 1.0, %v12419_v40  ;;  %v12421_v42 = vpop.eup %12420  ;;  %v5119_v40 = vrot.slane %v13955_v30, 3  ;;  %v5781_v30 = vld [vmem:[#allocation5 + $0x11] sm:$0x1] }
0x2d47   :  { %v4960_v43 = vadd.f32 1.0, %v12421_v42  ;;  %v5222_v42 = vrot.slane %v5044_v32, 6 }
0x2d48   :  { %12422 = vrcp.f32 %v4984_v41  ;;  %v13966_v41 = vld [vmem:[#allocation4 + $0xa] sm:$0x1] }
0x2d49   :  { %12424 = vrcp.f32 %v4960_v43  ;;  %v13968_v43 = vld [vmem:[#allocation5 + $0x15] sm:$0x1] }
0x2d52   :  { %v12423_v44 = vpop.eup %12422 }
0x2d53   :  { %v12425_v47 = vpop.eup %12424  ;;  %v4988_v50 = vmul.f32 %v12423_v44, %v4789_v20  ;;  %v13940_v20 = vpack.c.bf16 %v5025_v17, %v5024_v15 }
0x2d54   :  { %v4964_v0 = vmul.f32 %v12425_v47, %v4765_v8  ;;  %v5067_v8 = vld [vmem:[#allocation5 + $0x12] sm:$0x1] }
0x2d55   :  { %11862 = vmatprep.subr.bf16.mxu0 %v13940_v20  ;;  %v5111_v26 = vrot.slane %v5067_v8, 7 }
0x2d57   :  { %v5112_v31 = vsel %vm5091_vm5, %v5111_v26, %v5066_v11  ;;  %v5776_v26 = vld [vmem:[#allocation5 + $0x7] sm:$0x1] }
0x2d58   :  { %v5114_v39 = vsel %vm5094_vm6, %v5113_v16, %v5112_v31  ;;  %v5065_v31 = vld [vmem:[#allocation5 + $0xe] sm:$0x1] }
0x2db3   :  { %v4991_v45 = vpop.permute.xlu0 %4990 }
0x2db4   :  { %v4993_v46 = vmul.f32 %v12423_v44, %v4991_v45  ;;  %v5117_v45 = vrot.slane %v5070_v29, 4  ;;  %v5807_v29 = vrot.slane %v5775_v3, 6 }
0x2db6   :  { %4995 = vrot.lane.b32.xlu0 %v4993_v46, %s12934_s23  ;;  %v5224_v46 = vrot.slane %v5045_v35, 5  ;;  %v5049_v35 = vld [vmem:[#allocation4 + $0xe] sm:$0x1] }
0x2db7   :  { %v4967_v48 = vpop.permute.xlu1 %4966 }
0x2db8   :  { %v4969_v49 = vmul.f32 %v12425_v47, %v4967_v48  ;;  %v5042_v48 = vld [vmem:[#allocation4] sm:$0x1] }
0x2db9   :  { %v5221_v1 = vsel %vm5091_vm5, %v5220_v38, %v5042_v48  ;;  %v5105_v38 = vrot.slane %v5064_v2, 2  ;;  %v5777_v48 = vld [vmem:[#allocation5 + $0x9] sm:$0x1]  ;;  %v5232_v2 = vrot.slane %v5049_v35, 1  ;;  %v5786_v35 = vld [vmem:[#allocation5 + $0x1b] sm:$0x1] }
0x2dba   :  { %4971 = vrot.lane.b32.xlu1 %v4969_v49, %s12934_s23  ;;  %v5226_v49 = vrot.slane %v13959_v37, 4  ;;  %v5102_v37 = vrot.slane %v5063_v6, 3  ;;  %v5055_v6 = vld [vmem:[#allocation4 + $0x1a] sm:$0x1] }
0x2e28   :  { %v4996_v51 = vpop.permute.xlu0 %4995 }
0x2e29   :  { %v4998_v52 = vadd.f32 %v4996_v51, %v4988_v50  ;;  %v5823_v50 = vrot.slane %v13961_v14, 5 }
0x2e2b   :  { %12426 = vtanh.f32 %v4998_v52  ;;  %v5059_v52 = vld [vmem:[#allocation5 + $0x2] sm:$0x1] }
0x2e2c   :  { %v4972_v55 = vpop.permute.xlu1 %4971 }
0x2e2d   :  { %v4974_v56 = vadd.f32 %v4972_v55, %v4964_v0  ;;  %v5228_v55 = vrot.slane %v13966_v41, 3  ;;  %v5052_v41 = vld [vmem:[#allocation4 + $0x14] sm:$0x1] }
0x2e2f   :  { %12428 = vtanh.f32 %v4974_v56  ;;  %v5774_v56 = vld [vmem:[#allocation5 + $0x3] sm:$0x1] }
0x2e30   :  { %v5805_v15 = vrot.slane %v5774_v56, 7  ;;  %v5027_v56 = vld [vmem:[%s14765_s9 + $0x18] sm:$0xff] }
0x2e35   :  { %v12427_v57 = vpop.eup %12426 }
0x2e36   :  { %5001 = vrot.lane.b32.xlu0 %v12427_v57, %s12934_s23  ;;  %v5821_v57 = vrot.slane %v13968_v43, 6 }
0x2e39   :  { %v12429_v58 = vpop.eup %12428 }
0x2e3a   :  { %4977 = vrot.lane.b32.xlu1 %v12429_v58, %s12934_s23  ;;  %v5060_v58 = vld [vmem:[#allocation5 + $0x4] sm:$0x1] }
0x2e3b   :  { %v5093_v18 = vrot.slane %v5060_v58, 6  ;;  %v5036_v58 = vld [vmem:[%s14768_s12 + $0x18] sm:$0xff] }
0x2ea8   :  { %v5002_v10 = vpop.permute.xlu0 %5001 }
0x2ea9   :  { %v5004_v12 = vmul.f32 %v12423_v44, %v5002_v10  ;;  %v5115_v44 = vrot.slane %v5069_v33, 5  ;;  %v5090_v10 = vrot.slane %v5059_v52, 7  ;;  %v5099_v33 = vrot.slane %v5062_v5, 4 }
0x2eaa   :  { %v5108_v52 = vrot.slane %v5065_v31, 1  ;;  %v5785_v31 = vld [vmem:[#allocation5 + $0x19] sm:$0x1] }
0x2eab   :  { %5012 = vrot.lane.b32.xlu0 %v5004_v12, %s12935_s0  ;;  %v5116_v0 = vsel %vm5097_vm7, %v5115_v44, %v5114_v39  ;;  %v5051_v39 = vld [vmem:[#allocation4 + $0x12] sm:$0x1] }
0x2eac   :  { %v4978_v13 = vpop.permute.xlu1 %4977  ;;  %v5118_v12 = vsel %vm5100_vm8, %v5117_v45, %v5116_v0 }
0x2ead   :  { %v4980_v19 = vmul.f32 %v12425_v47, %v4978_v13  ;;  %v13970_v47 = vld [vmem:[#allocation5 + $0x13] sm:$0x1]  ;;  %v5223_v13 = vsel %vm5094_vm6, %v5222_v42, %v5221_v1  ;;  %v5120_v16 = vsel %vm5103_vm9, %v5119_v40, %v5118_v12  ;;  %v5809_v40 = vrot.slane %v5776_v26, 5  ;;  %v5778_v12 = vld [vmem:[#allocation5 + $0xb] sm:$0x1] }
0x2eae   :  { %v5819_v62 = vrot.slane %v13970_v47, 7  ;;  %v5053_v47 = vld [vmem:[#allocation4 + $0x16] sm:$0x1]  ;;  %v5122_v0 = vsel %vm5106_vm10, %v5121_v34, %v5120_v16  ;;  %v5234_v1 = vrot.slane %v5051_v39, 7  ;;  %v5780_v39 = vld [vmem:[#allocation5 + $0xf] sm:$0x1] }
0x2eaf   :  { %5006 = vrot.lane.b32.xlu1 %v4980_v19, %s12935_s0  ;;  %v5225_v19 = vsel %vm5097_vm7, %v5224_v46, %v5223_v13  ;;  %v5026_v46 = vld [vmem:[%s14765_s9 + $0x10] sm:$0xff]  ;;  %v5811_v13 = vrot.slane %v5777_v48, 4 }
0x2eb0   :  { %v5227_v45 = vsel %vm5100_vm8, %v5226_v49, %v5225_v19  ;;  %v5035_v49 = vld [vmem:[%s14768_s12 + $0x10] sm:$0xff]  ;;  %v5820_v53 = vsel %vm5091_vm5, %v5819_v62, %v5781_v30  ;;  %v5124_v62 = vsel %vm5109_vm11, %v5123_v27, %v5122_v0  ;;  %v5238_v19 = vrot.slane %v5053_v47, 5  ;;  %v5779_v30 = vld [vmem:[#allocation5 + $0xd] sm:$0x1]  ;;  %v5787_v47 = vld [vmem:[#allocation5 + $0x1d] sm:$0x1] }
0x2eb1   :  { %v5229_v5 = vsel %vm5103_vm9, %v5228_v55, %v5227_v45  ;;  %v5822_v23 = vsel %vm5094_vm6, %v5821_v57, %v5820_v53  ;;  %v5817_v0 = vrot.slane %v5780_v39, 1  ;;  %v5763_v53 = vld [vmem:[#allocation4 + $0xd] sm:$0x1] }
0x2eb2   :  { %v5231_v55 = vsel %vm5106_vm10, %v5230_v21, %v5229_v5  ;;  %v5813_v21 = vrot.slane %v5778_v12, 3  ;;  %v5788_v5 = vld [vmem:[#allocation5 + $0x1f] sm:$0x1] }
0x2eb3   :  { %v5233_v27 = vsel %vm5109_vm11, %v5232_v2, %v5231_v55 }
0x2f1d   :  { %v5013_v36 = vpop.permute.xlu0 %5012 }
0x2f1e   :  { %5015 = vst.msk [vmem:[#allocation5] sm:$0x3] %vm1860_vm3, %v5013_v36 }
0x2f21   :  { %v5007_v51 = vpop.permute.xlu1 %5006 }
0x2f22   :  { %5010 = vst.msk [vmem:[#allocation4 + $0x1e] sm:$0x3] %vm1860_vm3, %v5007_v51 }
0x2f25   :  { %v5058_v17 = vld [vmem:[#allocation5] sm:$0x1]  ;;  %v5773_v8 = vld [vmem:[#allocation5 + $0x1] sm:$0x1] }
0x2f26   :  { %v5092_v11 = vsel %vm5091_vm5, %v5090_v10, %v5058_v17  ;;  %v5806_v28 = vsel %vm5091_vm5, %v5805_v15, %v5773_v8  ;;  %v5236_v10 = vrot.slane %v5052_v41, 6  ;;  %v14020_v15 = vpack.c.bf16 %v5027_v56, %v5026_v46  ;;  %v5050_v8 = vld [vmem:[#allocation4 + $0x10] sm:$0x1]  ;;  %v5760_v46 = vld [vmem:[#allocation4 + $0x7] sm:$0x1] }
0x2f27   :  { %v5095_v32 = vsel %vm5094_vm6, %v5093_v18, %v5092_v11  ;;  %v5808_v42 = vsel %vm5094_vm6, %v5807_v29, %v5806_v28  ;;  %v14022_v17 = vpack.c.bf16 %v5036_v58, %v5035_v49  ;;  %v5056_v18 = vld [vmem:[#allocation4 + $0x1c] sm:$0x1]  ;;  %v5235_v28 = vsel %vm5091_vm5, %v5234_v1, %v5050_v8  ;;  %v5762_v49 = vld [vmem:[#allocation4 + $0xb] sm:$0x1]  ;;  %v5757_v1 = vld [vmem:[#allocation4 + $0x1] sm:$0x1] }
0x2f28   :  { %v5098_v36 = vsel %vm5097_vm7, %v5096_v24, %v5095_v32  ;;  %v5810_v34 = vsel %vm5097_vm7, %v5809_v40, %v5808_v42  ;;  %v5240_v24 = vrot.slane %v5054_v25, 4  ;;  %v5242_v29 = vrot.slane %v5055_v6, 3  ;;  %v5761_v40 = vld [vmem:[#allocation4 + $0x9] sm:$0x1]  ;;  %v5768_v8 = vld [vmem:[#allocation4 + $0x17] sm:$0x1] }
0x2f29   :  { %v5101_v44 = vsel %vm5100_vm8, %v5099_v33, %v5098_v36  ;;  %v5057_v11 = vld [vmem:[#allocation4 + $0x1e] sm:$0x1]  ;;  %v5812_v26 = vsel %vm5100_vm8, %v5811_v13, %v5810_v34  ;;  %v5237_v43 = vsel %vm5094_vm6, %v5236_v10, %v5235_v28  ;;  %v5244_v32 = vrot.slane %v5056_v18, 2  ;;  %v5764_v34 = vld [vmem:[#allocation4 + $0xf] sm:$0x1] }
0x2f2a   :  { %v5104_v51 = vsel %vm5103_vm9, %v5102_v37, %v5101_v44  ;;  %v5239_v57 = vsel %vm5097_vm7, %v5238_v19, %v5237_v43  ;;  %v5246_v33 = vrot.slane %v5057_v11, 1  ;;  %v5814_v16 = vsel %vm5103_vm9, %v5813_v21, %v5812_v26  ;;  %v5758_v37 = vld [vmem:[#allocation4 + $0x3] sm:$0x1]  ;;  %v5759_v44 = vld [vmem:[#allocation4 + $0x5] sm:$0x1] }
0x2f2b   :  { %v5107_v63 = vsel %vm5106_vm10, %v5105_v38, %v5104_v51  ;;  %v5824_v36 = vsel %vm5097_vm7, %v5823_v50, %v5822_v23  ;;  %v5241_v38 = vsel %vm5100_vm8, %v5240_v24, %v5239_v57  ;;  %v5815_v41 = vrot.slane %v5779_v30, 2  ;;  %v5766_v13 = vld [vmem:[#allocation4 + $0x13] sm:$0x1]  ;;  %v5769_v26 = vld [vmem:[#allocation4 + $0x19] sm:$0x1] }
0x2f2c   :  { %v5110_v3 = vsel %vm5109_vm11, %v5108_v52, %v5107_v63  ;;  %v5825_v42 = vrot.slane %v5785_v31, 4  ;;  %v5243_v45 = vsel %vm5103_vm9, %v5242_v29, %v5241_v38  ;;  %v5928_v51 = vrot.slane %v5758_v37, 7  ;;  %v5770_v28 = vld [vmem:[#allocation4 + $0x1b] sm:$0x1]  ;;  %v5765_v43 = vld [vmem:[#allocation4 + $0x11] sm:$0x1] }
0x2f2d   :  { %11181 = vmatprep.mubr.msk.f32.mxu0 %vm1660_vm4, %v5110_v3  ;;  %11203 = vmatprep.mubr.msk.f32.mxu1 %vm1660_vm4, %v5110_v3  ;;  %v5245_v14 = vsel %vm5106_vm10, %v5244_v32, %v5243_v45  ;;  %v5816_v50 = vsel %vm5106_vm10, %v5815_v41, %v5814_v16  ;;  %v5827_v56 = vrot.slane %v5786_v35, 3  ;;  %v5930_v58 = vrot.slane %v5759_v44, 6  ;;  %v5772_v32 = vld [vmem:[#allocation4 + $0x1f] sm:$0x1]  ;;  %v5016_v37 = vld [vmem:[#allocation18] sm:$0xff]  ;;  %v5017_v38 = vld [vmem:[#allocation18 + $0x8] sm:$0xff] }
0x2f2e   :  { %11182 = vmatmul.mubr.msk.f32.vlgmr.msra.gmra.mrb[38].mxu0 %vm1660_vm4, %v5124_v62  ;;  %11204 = vmatmul.mubr.msk.f32.vlgmr.msra.gmra.mrb[40].mxu1 %vm1660_vm4, %v5124_v62  ;;  %v5826_v48 = vsel %vm5100_vm8, %v5825_v42, %v5824_v36  ;;  %v5247_v52 = vsel %vm5109_vm11, %v5246_v33, %v5245_v14  ;;  %v5932_v63 = vrot.slane %v5760_v46, 5  ;;  %v5818_v2 = vsel %vm5109_vm11, %v5817_v0, %v5816_v50  ;;  %v5767_v62 = vld [vmem:[#allocation4 + $0x15] sm:$0x1]  ;;  %v5020_v42 = vld [vmem:[#allocation21] sm:$0xff]  ;;  %v5018_v14 = vld [vmem:[#allocation18 + $0x10] sm:$0xff] }
0x2f2f   :  { %11864 = vmatpush3.bf16.msra.mxu0 %v13940_v20  ;;  %11880 = vmatpush3.bf16.msra.mxu1 %v13945_v22  ;;  %v5828_v25 = vsel %vm5103_vm9, %v5827_v56, %v5826_v48  ;;  %v5934_v3 = vrot.slane %v5761_v40, 4  ;;  %v5829_v6 = vrot.slane %v5787_v47, 2  ;;  %v5929_v10 = vsel %vm5091_vm5, %v5928_v51, %v5757_v1  ;;  %v5021_v44 = vld [vmem:[#allocation21 + $0x8] sm:$0xff]  ;;  %v5019_v50 = vld [vmem:[#allocation18 + $0x18] sm:$0xff]  ;;  %v14138_v0 = vld [vmem:[%s14770_s14] ss:$0 sm:$0xff] }
0x2f30   :  { %11192 = vmatprep.mubr.msk.f32.mxu0 %vm1660_vm4, %v5233_v27  ;;  %11214 = vmatprep.mubr.msk.f32.mxu1 %vm1660_vm4, %v5233_v27  ;;  %v5936_v12 = vrot.slane %v5762_v49, 3  ;;  %v5940_v55 = vrot.slane %v5764_v34, 1  ;;  %v5831_v11 = vrot.slane %v5788_v5, 1  ;;  %v5942_v23 = vrot.slane %v5766_v13, 7  ;;  %v5023_v40 = vld [vmem:[#allocation21 + $0x18] sm:$0xff] }
0x2f31   :  { %11866 = vmatprep.subr.bf16.mxu0 %v14020_v15  ;;  %11882 = vmatprep.subr.bf16.mxu1 %v14022_v17  ;;  %v5830_v18 = vsel %vm5106_vm10, %v5829_v6, %v5828_v25  ;;  %v5944_v29 = vrot.slane %v5767_v62, 6  ;;  %v5946_v31 = vrot.slane %v5768_v8, 5  ;;  %v5948_v57 = vrot.slane %v5769_v26, 4 }
0x2f32   :  { %v5832_v30 = vsel %vm5109_vm11, %v5831_v11, %v5830_v18  ;;  %v5943_v33 = vsel %vm5091_vm5, %v5942_v23, %v5765_v43  ;;  %v5950_v16 = vrot.slane %v5770_v28, 3  ;;  %v5954_v39 = vrot.slane %v5772_v32, 1 }
0x2f33   :  { %11868 = vmatpush3.bf16.msra.mxu0 %v14020_v15  ;;  %11884 = vmatpush3.bf16.msra.mxu1 %v14022_v17  ;;  %v5945_v35 = vsel %vm5094_vm6, %v5944_v29, %v5943_v33  ;;  %v14092_v45 = vpack.c.bf16 %v5017_v38, %v5016_v37  ;;  %v14099_v48 = vpack.c.bf16 %v5021_v44, %v5020_v42 }
0x2f34   :  { %11886 = vmatprep.subr.bf16.mxu0 %v13899_v61  ;;  %11902 = vmatprep.subr.bf16.mxu1 %v13910_v54 }
0x2f36   :  { %11193 = vmatmul.mubr.msk.f32.vlgmr.msra.gmra.mrb[38].mxu0 %vm1660_vm4, %v5247_v52  ;;  %11215 = vmatmul.mubr.msk.f32.vlgmr.msra.gmra.mrb[40].mxu1 %vm1660_vm4, %v5247_v52  ;;  %v14133_v52 = vld [vmem:[#allocation20] ss:$0 sm:$0xff] }
0x2f37   :  { %11888 = vmatpush3.bf16.msra.mxu0 %v13899_v61  ;;  %11904 = vmatpush3.bf16.msra.mxu1 %v13910_v54  ;;  %v5931_v61 = vsel %vm5094_vm6, %v5930_v58, %v5929_v10  ;;  %v5938_v54 = vrot.slane %v5763_v53, 2 }
0x2f38   :  { %11225 = vmatprep.mubr.msk.f32.mxu0 %vm1660_vm4, %v5818_v2  ;;  %11247 = vmatprep.mubr.msk.f32.mxu1 %vm1660_vm4, %v5818_v2  ;;  %v5933_v19 = vsel %vm5097_vm7, %v5932_v63, %v5931_v61 }
0x2f39   :  { %11890 = vmatprep.subr.bf16.mxu0 %v13912_v4  ;;  %11906 = vmatprep.subr.bf16.mxu1 %v13921_v7  ;;  %v5935_v24 = vsel %vm5100_vm8, %v5934_v3, %v5933_v19 }
0x2f3a   :  { %v5937_v27 = vsel %vm5103_vm9, %v5936_v12, %v5935_v24 }
0x2f3b   :  { %11892 = vmatpush3.bf16.msra.mxu0 %v13912_v4  ;;  %11908 = vmatpush3.bf16.msra.mxu1 %v13921_v7  ;;  %v5939_v21 = vsel %vm5106_vm10, %v5938_v54, %v5937_v27  ;;  %v5771_v4 = vld [vmem:[#allocation4 + $0x1d] sm:$0x1] }
0x2f3c   :  { %11894 = vmatprep.subr.bf16.mxu0 %v13940_v20  ;;  %11910 = vmatprep.subr.bf16.mxu1 %v13945_v22  ;;  %v5941_v7 = vsel %vm5109_vm11, %v5940_v55, %v5939_v21  ;;  %v5952_v36 = vrot.slane %v5771_v4, 2 }
0x2f3e   :  { %11226 = vmatmul.mubr.msk.f32.vlgmr.msra.gmra.mrb[40].mxu0 %vm1660_vm4, %v5832_v30  ;;  %11248 = vmatmul.mubr.msk.f32.vlgmr.msra.gmra.mrb[42].mxu1 %vm1660_vm4, %v5832_v30 }
0x2f3f   :  { %11896 = vmatpush3.bf16.msra.mxu0 %v13940_v20  ;;  %11236 = vmatprep.mubr.msk.f32.mxu0 %vm1660_vm4, %v5941_v7  ;;  %v5947_v20 = vsel %vm5097_vm7, %v5946_v31, %v5945_v35 }
0x2f40   :  { %11912 = vmatpush3.bf16.msra.mxu1 %v13945_v22  ;;  %11258 = vmatprep.mubr.msk.f32.mxu1 %vm1660_vm4, %v5941_v7  ;;  %v5949_v41 = vsel %vm5100_vm8, %v5948_v57, %v5947_v20 }
0x2f41   :  { %11898 = vmatprep.subr.bf16.mxu0 %v14020_v15  ;;  %11914 = vmatprep.subr.bf16.mxu1 %v14022_v17  ;;  %v5951_v22 = vsel %vm5103_vm9, %v5950_v16, %v5949_v41 }
0x2f42   :  { %v5953_v46 = vsel %vm5106_vm10, %v5952_v36, %v5951_v22 }
0x2f43   :  { %11900 = vmatpush3.bf16.msra.mxu0 %v14020_v15  ;;  %v5955_v47 = vsel %vm5109_vm11, %v5954_v39, %v5953_v46  ;;  %v5022_v15 = vld [vmem:[#allocation21 + $0x10] sm:$0xff] }
0x2f44   :  { %11916 = vmatpush3.bf16.msra.mxu1 %v14022_v17  ;;  %11917 = vmatprep.subr.bf16.mxu0 %v12930_v59  ;;  %v14104_v17 = vpack.c.bf16 %v5019_v50, %v5018_v14  ;;  %v14110_v51 = vpack.c.bf16 %v5023_v40, %v5022_v15 }
0x2f45   :  { %11923 = vmatprep.subr.bf16.mxu1 %v12930_v59 }
0x2f46   :  { %11237 = vmatmul.mubr.msk.f32.vlgmr.msra.gmra.mrb[40].mxu0 %vm1660_vm4, %v5955_v47 }
0x2f47   :  { %11259 = vmatmul.mubr.msk.f32.vlgmr.msra.gmra.mrb[42].mxu1 %vm1660_vm4, %v5955_v47  ;;  %11919 = vmatpush3.bf16.msra.mxu0 %v14092_v45 }
0x2f48   :  { %11920 = vmatprep.subr.bf16.mxu0 %v12930_v59  ;;  %11269 = vmatprep.mubr.msk.f32.mxu0 %vm12931_vm2, %v12932_v60 }
0x2f49   :  { %11925 = vmatpush3.bf16.msra.mxu1 %v14099_v48  ;;  %11280 = vmatprep.mubr.msk.f32.mxu1 %vm12931_vm2, %v12932_v60 }
0x2f4a   :  { %11926 = vmatprep.subr.bf16.mxu1 %v12930_v59 }
0x2f4b   :  { %11922 = vmatpush3.bf16.msra.mxu0 %v14104_v17 }
0x2f4c   :  { %11929 = vmatprep.subr.bf16.mxu0 %v12930_v59 }
0x2f4d   :  { %11928 = vmatpush3.bf16.msra.mxu1 %v14110_v51 }
0x2f4e   :  { %11270 = vmatmul.mubr.f32.vlgmr.msra.gmra.mrb[42].mxu0 %v12932_v60  ;;  %11935 = vmatprep.subr.bf16.mxu1 %v12930_v59 }
0x2f4f   :  { %11931 = vmatpush3.bf16.msra.mxu0 %v14092_v45  ;;  %11291 = vmatprep.mubr.msk.f32.mxu0 %vm12931_vm2, %v12932_v60 }
0x2f50   :  { %11281 = vmatmul.mubr.f32.vlgmr.msra.gmra.mrb[44].mxu1 %v12932_v60  ;;  %11932 = vmatprep.subr.bf16.mxu0 %v12930_v59 }
0x2f51   :  { %11937 = vmatpush3.bf16.msra.mxu1 %v14099_v48  ;;  %11302 = vmatprep.mubr.msk.f32.mxu1 %vm12931_vm2, %v12932_v60 }
0x2f52   :  { %11938 = vmatprep.subr.bf16.mxu1 %v12930_v59 }
0x2f53   :  { %11934 = vmatpush3.bf16.msra.mxu0 %v14104_v17 }
0x2f54   :  { %11941 = vmatprep.subr.bf16.mxu0 %v12930_v59 }
0x2f55   :  { %11940 = vmatpush3.bf16.msra.mxu1 %v14110_v51 }
0x2f56   :  { %11947 = vmatprep.subr.bf16.mxu1 %v12930_v59 }
0x3009   :  { %v11194_v56 = vpop.f32.mrb[38].mxu0  ;;  %v11216_v49 = vpop.f32.mrb[40].mxu1 }
0x300a   :  { %v5334_v58 = vadd.f32 %v11194_v56, %v14133_v52  ;;  %v5624_v53 = vadd.f32 %v11216_v49, %v14138_v0  ;;  %v5318_v63 = vpop.f32.mrb[39].mxu0  ;;  %v5608_v2 = vpop.f32.mrb[41].mxu1 }
0x300b   :  { %v5333_v25 = vadd.f32 %v14133_v52, %v5318_v63  ;;  %v5623_v1 = vadd.f32 %v14138_v0, %v5608_v2 }
0x300c   :  { %v5386_v34 = vcombine.high %v5334_v58, %v5334_v58  ;;  %v5393_v3 = vrot.slane %v5334_v58, %v13339_v9  ;;  %v5676_v5 = vcombine.high %v5624_v53, %v5624_v53  ;;  %v5683_v6 = vrot.slane %v5624_v53, %v13339_v9 }
0x300d   :  { %v5337_v10 = vcombine.high %v5333_v25, %v5333_v25  ;;  %v5344_v12 = vrot.slane %v5333_v25, %v13339_v9  ;;  %v5627_v13 = vcombine.high %v5623_v1, %v5623_v1  ;;  %v5634_v61 = vrot.slane %v5623_v1, %v13339_v9 }
0x300e   :  { %v5400_v54 = vrot.slane %v5386_v34, %v13339_v9  ;;  %v5401_v62 = vcombine.high %v5393_v3, %v5393_v3  ;;  %v5409_v18 = vrot.slane %v5393_v3, %v13339_v9  ;;  %10241 = vst.sshfl [vmem:[#allocation2 + $0x10] sm:$0x1 pattern:$0x73625140] %v5393_v3  ;;  %v5690_v19 = vrot.slane %v5676_v5, %v13339_v9 }
0x300f   :  { %10254 = vst.sshfl [vmem:[#allocation3 + $0x10] sm:$0x1 pattern:$0x73625140] %v5683_v6  ;;  %v5691_v55 = vcombine.high %v5683_v6, %v5683_v6  ;;  %v5699_v8 = vrot.slane %v5683_v6, %v13339_v9  ;;  %v5351_v11 = vrot.slane %v5337_v10, %v13339_v9  ;;  %v5352_v24 = vcombine.high %v5344_v12, %v5344_v12 }
0x3010   :  { %10237 = vst.sshfl [vmem:[#allocation2] sm:$0x1 pattern:$0x73625140] %v5344_v12  ;;  %v5402_v26 = vcombine.high %v5400_v54, %v5400_v54  ;;  %v5416_v23 = vrot.slane %v5400_v54, %v13339_v9  ;;  %v5423_v27 = vrot.slane %v5401_v62, %v13339_v9  ;;  %v5431_v28 = vcombine.high %v5409_v18, %v5409_v18 }
0x3011   :  { %10250 = vst.sshfl [vmem:[#allocation3] sm:$0x1 pattern:$0x73625140] %v5634_v61  ;;  %v5692_v29 = vcombine.high %v5690_v19, %v5690_v19  ;;  %v5706_v30 = vrot.slane %v5690_v19, %v13339_v9  ;;  %v5713_v21 = vrot.slane %v5691_v55, %v13339_v9  ;;  %v5721_v4 = vcombine.high %v5699_v8, %v5699_v8 }
0x3012   :  { %10242 = vst.sshfl [vmem:[#allocation2 + $0x12] sm:$0x1 pattern:$0x73625140] %v5401_v62  ;;  %v5430_v31 = vrot.slane %v5402_v26, %v13339_v9  ;;  %v5432_v7 = vcombine.high %v5416_v23, %v5416_v23  ;;  %v5433_v43 = vcombine.high %v5423_v27, %v5423_v27  ;;  %5461 = vst [vmem:[#allocation2 + $0x14] sm:$0x1] %v5431_v28 }
0x3013   :  { %10243 = vst.sshfl [vmem:[#allocation2 + $0x18] sm:$0x1 pattern:$0x73625140] %v5400_v54  ;;  %v5353_v32 = vcombine.high %v5351_v11, %v5351_v11  ;;  %v5720_v57 = vrot.slane %v5692_v29, %v13339_v9  ;;  %v5722_v33 = vcombine.high %v5706_v30, %v5706_v30  ;;  %v5723_v16 = vcombine.high %v5713_v21, %v5713_v21 }
0x3014   :  { %10256 = vst.sshfl [vmem:[#allocation3 + $0x18] sm:$0x1 pattern:$0x73625140] %v5690_v19  ;;  %5751 = vst [vmem:[#allocation3 + $0x14] sm:$0x1] %v5721_v4  ;;  %v5360_v35 = vrot.slane %v5344_v12, %v13339_v9  ;;  %v5434_v36 = vcombine.high %v5430_v31, %v5430_v31  ;;  %v5367_v37 = vrot.slane %v5351_v11, %v13339_v9 }
0x3015   :  { %10255 = vst.sshfl [vmem:[#allocation3 + $0x12] sm:$0x1 pattern:$0x73625140] %v5691_v55  ;;  %5462 = vst [vmem:[#allocation2 + $0x16] sm:$0x1] %v5433_v43  ;;  %v5374_v38 = vrot.slane %v5352_v24, %v13339_v9  ;;  %v5381_v20 = vrot.slane %v5353_v32, %v13339_v9  ;;  %v5724_v39 = vcombine.high %v5720_v57, %v5720_v57 }
0x3016   :  { %10238 = vst.sshfl [vmem:[#allocation2 + $0x2] sm:$0x1 pattern:$0x73625140] %v5352_v24  ;;  %5465 = vst [vmem:[#allocation2 + $0x1c] sm:$0x1] %v5432_v7  ;;  %v5382_v41 = vcombine.high %v5360_v35, %v5360_v35  ;;  %v5641_v42 = vrot.slane %v5627_v13, %v13339_v9  ;;  %v5642_v44 = vcombine.high %v5634_v61, %v5634_v61 }
0x3017   :  { %10239 = vst.sshfl [vmem:[#allocation2 + $0x8] sm:$0x1 pattern:$0x73625140] %v5351_v11  ;;  %5752 = vst [vmem:[#allocation3 + $0x16] sm:$0x1] %v5723_v16  ;;  %v5383_v22 = vcombine.high %v5367_v37, %v5367_v37  ;;  %v5384_v46 = vcombine.high %v5374_v38, %v5374_v38  ;;  %v5385_v14 = vcombine.high %v5381_v20, %v5381_v20 }
0x3018   :  { %10244 = vst.sshfl [vmem:[#allocation2 + $0x1a] sm:$0x1 pattern:$0x73625140] %v5402_v26  ;;  %5755 = vst [vmem:[#allocation3 + $0x1c] sm:$0x1] %v5722_v33  ;;  %v5650_v50 = vrot.slane %v5634_v61, %v13339_v9  ;;  %v5643_v47 = vcombine.high %v5641_v42, %v5641_v42  ;;  %v5657_v15 = vrot.slane %v5641_v42, %v13339_v9 }
0x3019   :  { %10257 = vst.sshfl [vmem:[#allocation3 + $0x1a] sm:$0x1 pattern:$0x73625140] %v5692_v29  ;;  %5466 = vst [vmem:[#allocation2 + $0x1e] sm:$0x1] %v5434_v36  ;;  %v5664_v40 = vrot.slane %v5642_v44, %v13339_v9 }
0x301a   :  { %10240 = vst.sshfl [vmem:[#allocation2 + $0xa] sm:$0x1 pattern:$0x73625140] %v5353_v32  ;;  %5756 = vst [vmem:[#allocation3 + $0x1e] sm:$0x1] %v5724_v39  ;;  %v5672_v56 = vcombine.high %v5650_v50, %v5650_v50  ;;  %v5671_v49 = vrot.slane %v5643_v47, %v13339_v9  ;;  %v5673_v58 = vcombine.high %v5657_v15, %v5657_v15 }
0x301b   :  { %5453 = vst [vmem:[#allocation2 + $0x4] sm:$0x1] %v5382_v41  ;;  %10251 = vst.sshfl [vmem:[#allocation3 + $0x2] sm:$0x1 pattern:$0x73625140] %v5642_v44  ;;  %v5674_v53 = vcombine.high %v5664_v40, %v5664_v40 }
0x301c   :  { %10252 = vst.sshfl [vmem:[#allocation3 + $0x8] sm:$0x1 pattern:$0x73625140] %v5641_v42  ;;  %5454 = vst [vmem:[#allocation2 + $0x6] sm:$0x1] %v5384_v46  ;;  %v5675_v34 = vcombine.high %v5671_v49, %v5671_v49 }
0x301d   :  { %5457 = vst [vmem:[#allocation2 + $0xc] sm:$0x1] %v5383_v22  ;;  %5458 = vst [vmem:[#allocation2 + $0xe] sm:$0x1] %v5385_v14  ;;  %v11238_v63 = vpop.f32.mrb[40].mxu0  ;;  %v11260_v25 = vpop.f32.mrb[42].mxu1 }
0x301e   :  { %10253 = vst.sshfl [vmem:[#allocation3 + $0xa] sm:$0x1 pattern:$0x73625140] %v5643_v47  ;;  %5743 = vst [vmem:[#allocation3 + $0x4] sm:$0x1] %v5672_v56  ;;  %v6036_v2 = vadd.f32 %v11238_v63, %v14133_v52  ;;  %v6320_v3 = vadd.f32 %v11260_v25, %v14138_v0 }
0x301f   :  { %v6026_v1 = vpop.f32.mrb[41].mxu0  ;;  %5744 = vst [vmem:[#allocation3 + $0x6] sm:$0x1] %v5674_v53  ;;  %5747 = vst [vmem:[#allocation3 + $0xc] sm:$0x1] %v5673_v58  ;;  %v6310_v6 = vpop.f32.mrb[43].mxu1 }
0x3020   :  { %v6035_v5 = vadd.f32 %v14133_v52, %v6026_v1  ;;  %v6088_v10 = vcombine.high %v6036_v2, %v6036_v2  ;;  %v6095_v12 = vrot.slane %v6036_v2, %v13339_v9  ;;  %v6319_v13 = vadd.f32 %v14138_v0, %v6310_v6  ;;  %5748 = vst [vmem:[#allocation3 + $0xe] sm:$0x1] %v5675_v34 }
0x3021   :  { %v6372_v61 = vcombine.high %v6320_v3, %v6320_v3  ;;  %v6379_v54 = vrot.slane %v6320_v3, %v13339_v9  ;;  %v6520_v7 = vpop.f32.mrb[42].mxu0 }
0x3022   :  { %v6039_v62 = vcombine.high %v6035_v5, %v6035_v5  ;;  %v6046_v18 = vrot.slane %v6035_v5, %v13339_v9  ;;  %v6102_v19 = vrot.slane %v6088_v10, %v13339_v9  ;;  %v6103_v55 = vcombine.high %v6095_v12, %v6095_v12  ;;  %10266 = vst.sshfl [vmem:[#allocation2 + $0x11] sm:$0x1 pattern:$0x73625140] %v6095_v12  ;;  %v11271_v16 = vpop.f32.mrb[43].mxu0 }
0x3023   :  { %v6111_v8 = vrot.slane %v6095_v12, %v13339_v9  ;;  %v6323_v52 = vcombine.high %v6319_v13, %v6319_v13  ;;  %v6386_v11 = vrot.slane %v6372_v61, %v13339_v9  ;;  %v6387_v24 = vcombine.high %v6379_v54, %v6379_v54  ;;  %10278 = vst.sshfl [vmem:[#allocation3 + $0x11] sm:$0x1 pattern:$0x73625140] %v6379_v54  ;;  %v14186_v20 = vpop.f32.mrb[44].mxu1 }
0x3024   :  { %v6395_v26 = vrot.slane %v6379_v54, %v13339_v9  ;;  %v6053_v0 = vrot.slane %v6039_v62, %v13339_v9  ;;  %10262 = vst.sshfl [vmem:[#allocation2 + $0x1] sm:$0x1 pattern:$0x73625140] %v6046_v18  ;;  %v6104_v23 = vcombine.high %v6102_v19, %v6102_v19  ;;  %v6118_v27 = vrot.slane %v6102_v19, %v13339_v9  ;;  %v11282_v22 = vpop.f32.mrb[45].mxu1 }
0x3025   :  { %v6125_v28 = vrot.slane %v6103_v55, %v13339_v9  ;;  %v6133_v29 = vcombine.high %v6111_v8, %v6111_v8  ;;  %10267 = vst.sshfl [vmem:[#allocation2 + $0x13] sm:$0x1 pattern:$0x73625140] %v6103_v55  ;;  %v6388_v30 = vcombine.high %v6386_v11, %v6386_v11  ;;  %v6402_v21 = vrot.slane %v6386_v11, %v13339_v9 }
0x3026   :  { %10268 = vst.sshfl [vmem:[#allocation2 + $0x19] sm:$0x1 pattern:$0x73625140] %v6102_v19  ;;  %v6409_v4 = vrot.slane %v6387_v24, %v13339_v9  ;;  %v6417_v31 = vcombine.high %v6395_v26, %v6395_v26  ;;  %v6132_v43 = vrot.slane %v6104_v23, %v13339_v9  ;;  %v6134_v32 = vcombine.high %v6118_v27, %v6118_v27 }
0x3027   :  { %10279 = vst.sshfl [vmem:[#allocation3 + $0x13] sm:$0x1 pattern:$0x73625140] %v6387_v24  ;;  %v6135_v57 = vcombine.high %v6125_v28, %v6125_v28  ;;  %6163 = vst [vmem:[#allocation2 + $0x15] sm:$0x1] %v6133_v29  ;;  %v6054_v33 = vcombine.high %v6046_v18, %v6046_v18  ;;  %v6416_v35 = vrot.slane %v6388_v30, %v13339_v9 }
0x3028   :  { %10280 = vst.sshfl [vmem:[#allocation3 + $0x19] sm:$0x1 pattern:$0x73625140] %v6386_v11  ;;  %v6418_v36 = vcombine.high %v6402_v21, %v6402_v21  ;;  %v6419_v37 = vcombine.high %v6409_v4, %v6409_v4  ;;  %6447 = vst [vmem:[#allocation3 + $0x15] sm:$0x1] %v6417_v31  ;;  %v6055_v38 = vcombine.high %v6053_v0, %v6053_v0 }
0x3029   :  { %10264 = vst.sshfl [vmem:[#allocation2 + $0x9] sm:$0x1 pattern:$0x73625140] %v6053_v0  ;;  %v6136_v39 = vcombine.high %v6132_v43, %v6132_v43  ;;  %6164 = vst [vmem:[#allocation2 + $0x17] sm:$0x1] %v6135_v57  ;;  %v6062_v41 = vrot.slane %v6046_v18, %v13339_v9  ;;  %v6069_v42 = vrot.slane %v6053_v0, %v13339_v9 }
0x302a   :  { %10269 = vst.sshfl [vmem:[#allocation2 + $0x1b] sm:$0x1 pattern:$0x73625140] %v6104_v23  ;;  %6167 = vst [vmem:[#allocation2 + $0x1d] sm:$0x1] %v6134_v32  ;;  %v6076_v44 = vrot.slane %v6054_v33, %v13339_v9  ;;  %v6420_v46 = vcombine.high %v6416_v35, %v6416_v35  ;;  %v6083_v14 = vrot.slane %v6055_v38, %v13339_v9 }
0x302b   :  { %10281 = vst.sshfl [vmem:[#allocation3 + $0x1b] sm:$0x1 pattern:$0x73625140] %v6388_v30  ;;  %6448 = vst [vmem:[#allocation3 + $0x17] sm:$0x1] %v6419_v37  ;;  %v6330_v50 = vrot.slane %v6319_v13, %v13339_v9  ;;  %v6337_v47 = vrot.slane %v6323_v52, %v13339_v9  ;;  %v6084_v15 = vcombine.high %v6062_v41, %v6062_v41 }
0x302c   :  { %10263 = vst.sshfl [vmem:[#allocation2 + $0x3] sm:$0x1 pattern:$0x73625140] %v6054_v33  ;;  %6451 = vst [vmem:[#allocation3 + $0x1d] sm:$0x1] %v6418_v36  ;;  %v6085_v40 = vcombine.high %v6069_v42, %v6069_v42  ;;  %v6086_v56 = vcombine.high %v6076_v44, %v6076_v44  ;;  %v6087_v58 = vcombine.high %v6083_v14, %v6083_v14 }
0x302d   :  { %10265 = vst.sshfl [vmem:[#allocation2 + $0xb] sm:$0x1 pattern:$0x73625140] %v6055_v38  ;;  %6168 = vst [vmem:[#allocation2 + $0x1f] sm:$0x1] %v6136_v39  ;;  %v6338_v53 = vcombine.high %v6330_v50, %v6330_v50  ;;  %v6339_v63 = vcombine.high %v6337_v47, %v6337_v47  ;;  %v6346_v2 = vrot.slane %v6330_v50, %v13339_v9 }
0x302e   :  { %v6453_v49 = vld [vmem:[#allocation2] sm:$0x3]  ;;  %6452 = vst [vmem:[#allocation3 + $0x1f] sm:$0x1] %v6420_v46  ;;  %6155 = vst [vmem:[#allocation2 + $0x5] sm:$0x1] %v6084_v15  ;;  %v6353_v25 = vrot.slane %v6337_v47, %v13339_v9 }
0x302f   :  { %10274 = vst.sshfl [vmem:[#allocation3 + $0x1] sm:$0x1 pattern:$0x73625140] %v6330_v50  ;;  %6156 = vst [vmem:[#allocation2 + $0x7] sm:$0x1] %v6086_v56  ;;  %v6524_v1 = vadd.f32 %v6520_v7, %v6453_v49  ;;  %v6360_v34 = vrot.slane %v6338_v53, %v13339_v9  ;;  %v6367_v3 = vrot.slane %v6339_v63, %v13339_v9 }
0x3030   :  { %10276 = vst.sshfl [vmem:[#allocation3 + $0x9] sm:$0x1 pattern:$0x73625140] %v6337_v47  ;;  %6159 = vst [vmem:[#allocation2 + $0xd] sm:$0x1] %v6085_v40  ;;  %v6368_v5 = vcombine.high %v6346_v2, %v6346_v2  ;;  %v6369_v6 = vcombine.high %v6353_v25, %v6353_v25 }
0x3031   :  { %6160 = vst [vmem:[#allocation2 + $0xf] sm:$0x1] %v6087_v58  ;;  %10275 = vst.sshfl [vmem:[#allocation3 + $0x3] sm:$0x1 pattern:$0x73625140] %v6338_v53  ;;  %12430 = vtanh.f32 %v6524_v1  ;;  %v6370_v10 = vcombine.high %v6360_v34, %v6360_v34  ;;  %v6371_v12 = vcombine.high %v6367_v3, %v6367_v3 }
0x3032   :  { %10277 = vst.sshfl [vmem:[#allocation3 + $0xb] sm:$0x1 pattern:$0x73625140] %v6339_v63  ;;  %6439 = vst [vmem:[#allocation3 + $0x5] sm:$0x1] %v6368_v5 }
0x3033   :  { %6443 = vst [vmem:[#allocation3 + $0xd] sm:$0x1] %v6369_v6  ;;  %6440 = vst [vmem:[#allocation3 + $0x7] sm:$0x1] %v6370_v10  ;;  %v10282_v61 = vmul.f32 -1.442695, %v6524_v1 }
0x3034   :  { %6444 = vst [vmem:[#allocation3 + $0xf] sm:$0x1] %v6371_v12  ;;  %v6655_v16 = vld [vmem:[#allocation2 + $0x2] sm:$0x3]  ;;  %v6729_v49 = vld [vmem:[#allocation3 + $0x1c] sm:$0x3] }
0x3035   :  { %12432 = vpow2.f32 %v10282_v61  ;;  %v6525_v24 = vld [vmem:[#allocation3 + $0x1e] sm:$0x3] }
0x3036   :  { %v6596_v26 = vadd.f32 %v14186_v20, %v6525_v24 }
0x3038   :  { %v10283_v28 = vmul.f32 -1.442695, %v6596_v26 }
0x303b   :  { %v12431_v13 = vpop.eup %12430 }
0x303c   :  { %6606 = vrot.lane.b32.xlu0 %v12431_v13, %s12934_s23 }
0x303f   :  { %v12433_v54 = vpop.eup %12432 }
0x3040   :  { %v6600_v62 = vadd.f32 1.0, %v12433_v54 }
0x3042   :  { %12434 = vrcp.f32 %v6600_v62 }
0x304c   :  { %v12435_v9 = vpop.eup %12434 }
0x304d   :  { %v6604_v55 = vmul.f32 0.0, %v12435_v9 }
0x30ae   :  { %v6607_v18 = vpop.permute.xlu0 %6606 }
0x30af   :  { %v6609_v19 = vmul.f32 %v12435_v9, %v6607_v18  ;;  %v6861_v18 = vld [vmem:[#allocation2 + $0x4] sm:$0x3] }
0x30b1   :  { %6611 = vrot.lane.b32.xlu1 %v6609_v19, %s12934_s23 }
0x3123   :  { %v6612_v8 = vpop.permute.xlu1 %6611 }
0x3124   :  { %v6614_v52 = vadd.f32 %v6612_v8, %v6604_v55 }
0x3126   :  { %12436 = vtanh.f32 %v6614_v52 }
0x3127   :  { %12438 = vtanh.f32 %v6596_v26 }
0x3128   :  { %12440 = vpow2.f32 %v10283_v28 }
0x3130   :  { %v12437_v11 = vpop.eup %12436 }
0x3131   :  { %6617 = vrot.lane.b32.xlu0 %v12437_v11, %s12934_s23  ;;  %v12439_v27 = vpop.eup %12438 }
0x3132   :  { %v12441_v29 = vpop.eup %12440 }
0x3133   :  { %v6624_v30 = vadd.f32 1.0, %v12441_v29 }
0x3135   :  { %12442 = vrcp.f32 %v6624_v30 }
0x313f   :  { %v12443_v4 = vpop.eup %12442 }
0x3140   :  { %v6628_v43 = vmul.f32 0.0, %v12443_v4 }
0x31a3   :  { %v6618_v0 = vpop.permute.xlu0 %6617 }
0x31a4   :  { %v6620_v23 = vmul.f32 %v12435_v9, %v6618_v0 }
0x31a6   :  { %6646 = vrot.lane.b32.xlu1 %v6620_v23, %s12935_s0 }
0x31aa   :  { %6630 = vrot.lane.b32.xlu1 %v12439_v27, %s12934_s23 }
0x3218   :  { %v6647_v21 = vpop.permute.xlu1 %6646 }
0x3219   :  { %6649 = vst.msk [vmem:[#allocation4] sm:$0x3] %vm1860_vm3, %v6647_v21  ;;  %11292 = vmatmul.mubr.msk.f32.vlgmr.msra.gmra.mrb[44].mxu0 %vm1660_vm4, %v6647_v21 }
0x321a   :  { %11943 = vmatpush3.bf16.msra.mxu0 %v14092_v45  ;;  %11313 = vmatprep.mubr.msk.f32.mxu0 %vm12931_vm2, %v12932_v60 }
0x321b   :  { %11944 = vmatprep.subr.bf16.mxu0 %v12930_v59 }
0x321c   :  { %v6631_v31 = vpop.permute.xlu1 %6630 }
0x321d   :  { %v6633_v7 = vmul.f32 %v12443_v4, %v6631_v31 }
0x321e   :  { %11946 = vmatpush3.bf16.msra.mxu0 %v14104_v17 }
0x321f   :  { %6635 = vrot.lane.b32.xlu1 %v6633_v7, %s12934_s23  ;;  %11953 = vmatprep.subr.bf16.mxu0 %v12930_v59 }
0x3291   :  { %v6636_v32 = vpop.permute.xlu1 %6635 }
0x3292   :  { %v14213_v57 = vadd.f32 %v6636_v32, %v6628_v43  ;;  %v6935_v43 = vld [vmem:[#allocation3 + $0x1a] sm:$0x3] }
0x3294   :  { %12444 = vtanh.f32 %v14213_v57 }
0x329e   :  { %v12445_v33 = vpop.eup %12444 }
0x329f   :  { %6641 = vrot.lane.b32.xlu1 %v12445_v33, %s12934_s23 }
0x32ec   :  { %v6724_v35 = vpop.f32.mrb[44].mxu0 }
0x32ed   :  { %v6728_v36 = vadd.f32 %v6724_v35, %v6655_v16  ;;  %v11293_v37 = vpop.f32.mrb[45].mxu0 }
0x32ef   :  { %12446 = vtanh.f32 %v6728_v36  ;;  %v10286_v41 = vmul.f32 -1.442695, %v6728_v36 }
0x32f1   :  { %12448 = vpow2.f32 %v10286_v41 }
0x32f9   :  { %v12447_v38 = vpop.eup %12446 }
0x32fa   :  { %6812 = vrot.lane.b32.xlu0 %v12447_v38, %s12934_s23 }
0x32fb   :  { %v12449_v42 = vpop.eup %12448 }
0x32fc   :  { %v6806_v44 = vadd.f32 1.0, %v12449_v42 }
0x32fe   :  { %12450 = vrcp.f32 %v6806_v44 }
0x3308   :  { %v12451_v22 = vpop.eup %12450 }
0x3309   :  { %v6810_v47 = vmul.f32 %v12451_v22, %v6614_v52 }
0x3311   :  { %v6642_v20 = vpop.permute.xlu1 %6641 }
0x3312   :  { %v6644_v39 = vmul.f32 %v12443_v4, %v6642_v20 }
0x3314   :  { %6651 = vrot.lane.b32.xlu1 %v6644_v39, %s12935_s0 }
0x336c   :  { %v6813_v46 = vpop.permute.xlu0 %6812 }
0x336d   :  { %v6815_v14 = vmul.f32 %v12451_v22, %v6813_v46 }
0x336f   :  { %6817 = vrot.lane.b32.xlu0 %v6815_v14, %s12934_s23 }
0x3386   :  { %v6652_v50 = vpop.permute.xlu1 %6651 }
0x3387   :  { %6654 = vst.msk [vmem:[#allocation5 + $0x1e] sm:$0x3] %vm1860_vm3, %v6652_v50  ;;  %11303 = vmatmul.mubr.msk.f32.vlgmr.msra.gmra.mrb[46].mxu1 %vm1660_vm4, %v6652_v50 }
0x3388   :  { %11949 = vmatpush3.bf16.msra.mxu1 %v14099_v48  ;;  %11324 = vmatprep.mubr.msk.f32.mxu1 %vm12931_vm2, %v12932_v60 }
0x3389   :  { %11950 = vmatprep.subr.bf16.mxu1 %v12930_v59 }
0x338c   :  { %11952 = vmatpush3.bf16.msra.mxu1 %v14110_v51 }
0x338d   :  { %11959 = vmatprep.subr.bf16.mxu1 %v12930_v59 }
0x33e1   :  { %v6818_v15 = vpop.permute.xlu0 %6817 }
0x33e2   :  { %v14228_v40 = vadd.f32 %v6818_v15, %v6810_v47  ;;  %v7067_v47 = vld [vmem:[#allocation2 + $0x6] sm:$0x3] }
0x33e4   :  { %12452 = vtanh.f32 %v14228_v40 }
0x33ee   :  { %v12453_v56 = vpop.eup %12452 }
0x33ef   :  { %6823 = vrot.lane.b32.xlu0 %v12453_v56, %s12934_s23 }
0x345a   :  { %v6798_v58 = vpop.f32.mrb[46].mxu1 }
0x345b   :  { %v6802_v53 = vadd.f32 %v6798_v58, %v6729_v49  ;;  %v11304_v63 = vpop.f32.mrb[47].mxu1 }
0x345d   :  { %12454 = vtanh.f32 %v6802_v53  ;;  %v10287_v34 = vmul.f32 -1.442695, %v6802_v53 }
0x345f   :  { %12456 = vpow2.f32 %v10287_v34 }
0x3461   :  { %v6824_v2 = vpop.permute.xlu0 %6823 }
0x3462   :  { %v6826_v25 = vmul.f32 %v12451_v22, %v6824_v2 }
0x3464   :  { %6852 = vrot.lane.b32.xlu0 %v6826_v25, %s12935_s0 }
0x3467   :  { %v12455_v1 = vpop.eup %12454 }
0x3468   :  { %6836 = vrot.lane.b32.xlu1 %v12455_v1, %s12934_s23 }
0x3469   :  { %v12457_v3 = vpop.eup %12456 }
0x346a   :  { %v6830_v5 = vadd.f32 1.0, %v12457_v3 }
0x346c   :  { %12458 = vrcp.f32 %v6830_v5 }
0x3476   :  { %v12459_v10 = vpop.eup %12458 }
0x3477   :  { %v6834_v61 = vmul.f32 %v12459_v10, %v14213_v57 }
0x34d6   :  { %v6853_v6 = vpop.permute.xlu0 %6852 }
0x34d7   :  { %6855 = vst.msk [vmem:[#allocation4 + $0x2] sm:$0x3] %vm1860_vm3, %v6853_v6  ;;  %11314 = vmatmul.mubr.msk.f32.vlgmr.msra.gmra.mrb[46].mxu0 %vm1660_vm4, %v6853_v6 }
0x34d8   :  { %11955 = vmatpush3.bf16.msra.mxu0 %v14092_v45  ;;  %11335 = vmatprep.mubr.msk.f32.mxu0 %vm12931_vm2, %v12932_v60 }
0x34d9   :  { %11956 = vmatprep.subr.bf16.mxu0 %v12930_v59 }
0x34da   :  { %v6837_v12 = vpop.permute.xlu1 %6836 }
0x34db   :  { %v6839_v13 = vmul.f32 %v12459_v10, %v6837_v12 }
0x34dc   :  { %11958 = vmatpush3.bf16.msra.mxu0 %v14104_v17 }
0x34dd   :  { %6841 = vrot.lane.b32.xlu1 %v6839_v13, %s12934_s23  ;;  %11965 = vmatprep.subr.bf16.mxu0 %v12930_v59 }
0x354f   :  { %v6842_v54 = vpop.permute.xlu1 %6841 }
0x3550   :  { %v14244_v62 = vadd.f32 %v6842_v54, %v6834_v61  ;;  %v7141_v61 = vld [vmem:[#allocation3 + $0x18] sm:$0x3] }
0x3552   :  { %12460 = vtanh.f32 %v14244_v62 }
0x355c   :  { %v12461_v9 = vpop.eup %12460 }
0x355d   :  { %6847 = vrot.lane.b32.xlu1 %v12461_v9, %s12934_s23 }
0x35aa   :  { %v6930_v19 = vpop.f32.mrb[46].mxu0 }
0x35ab   :  { %v6934_v55 = vadd.f32 %v6930_v19, %v6861_v18  ;;  %v11315_v8 = vpop.f32.mrb[47].mxu0 }
0x35ad   :  { %12462 = vtanh.f32 %v6934_v55  ;;  %v10290_v26 = vmul.f32 -1.442695, %v6934_v55 }
0x35af   :  { %12464 = vpow2.f32 %v10290_v26 }
0x35b7   :  { %v12463_v52 = vpop.eup %12462 }
0x35b8   :  { %7018 = vrot.lane.b32.xlu0 %v12463_v52, %s12934_s23 }
0x35b9   :  { %v12465_v0 = vpop.eup %12464 }
0x35ba   :  { %v7012_v23 = vadd.f32 1.0, %v12465_v0 }
0x35bc   :  { %12466 = vrcp.f32 %v7012_v23 }
0x35c6   :  { %v12467_v27 = vpop.eup %12466 }
0x35c7   :  { %v7016_v21 = vmul.f32 %v12467_v27, %v14228_v40 }
0x35cf   :  { %v6848_v11 = vpop.permute.xlu1 %6847 }
0x35d0   :  { %v6850_v24 = vmul.f32 %v12459_v10, %v6848_v11 }
0x35d2   :  { %6857 = vrot.lane.b32.xlu1 %v6850_v24, %s12935_s0 }
0x362a   :  { %v7019_v28 = vpop.permute.xlu0 %7018 }
0x362b   :  { %v7021_v29 = vmul.f32 %v12467_v27, %v7019_v28 }
0x362d   :  { %7023 = vrot.lane.b32.xlu0 %v7021_v29, %s12934_s23 }
0x3644   :  { %v6858_v30 = vpop.permute.xlu1 %6857 }
0x3645   :  { %6860 = vst.msk [vmem:[#allocation5 + $0x1c] sm:$0x3] %vm1860_vm3, %v6858_v30  ;;  %11325 = vmatmul.mubr.msk.f32.vlgmr.msra.gmra.mrb[48].mxu1 %vm1660_vm4, %v6858_v30 }
0x3646   :  { %11961 = vmatpush3.bf16.msra.mxu1 %v14099_v48  ;;  %11346 = vmatprep.mubr.msk.f32.mxu1 %vm12931_vm2, %v12932_v60 }
0x3647   :  { %11962 = vmatprep.subr.bf16.mxu1 %v12930_v59 }
0x364a   :  { %11964 = vmatpush3.bf16.msra.mxu1 %v14110_v51 }
0x364b   :  { %11971 = vmatprep.subr.bf16.mxu1 %v12930_v59 }
0x369f   :  { %v7024_v4 = vpop.permute.xlu0 %7023 }
0x36a0   :  { %v14260_v31 = vadd.f32 %v7024_v4, %v7016_v21  ;;  %v7273_v21 = vld [vmem:[#allocation2 + $0x8] sm:$0x3] }
0x36a2   :  { %12468 = vtanh.f32 %v14260_v31 }
0x36ac   :  { %v12469_v7 = vpop.eup %12468 }
0x36ad   :  { %7029 = vrot.lane.b32.xlu0 %v12469_v7, %s12934_s23 }
0x3718   :  { %v7004_v32 = vpop.f32.mrb[48].mxu1 }
0x3719   :  { %v7008_v57 = vadd.f32 %v7004_v32, %v6935_v43  ;;  %v11326_v33 = vpop.f32.mrb[49].mxu1 }
0x371b   :  { %12470 = vtanh.f32 %v7008_v57  ;;  %v10291_v37 = vmul.f32 -1.442695, %v7008_v57 }
0x371d   :  { %12472 = vpow2.f32 %v10291_v37 }
0x371f   :  { %v7030_v16 = vpop.permute.xlu0 %7029 }
0x3720   :  { %v7032_v35 = vmul.f32 %v12467_v27, %v7030_v16 }
0x3722   :  { %7058 = vrot.lane.b32.xlu0 %v7032_v35, %s12935_s0 }
0x3725   :  { %v12471_v36 = vpop.eup %12470 }
0x3726   :  { %7042 = vrot.lane.b32.xlu1 %v12471_v36, %s12934_s23 }
0x3727   :  { %v12473_v38 = vpop.eup %12472 }
0x3728   :  { %v7036_v20 = vadd.f32 1.0, %v12473_v38 }
0x372a   :  { %12474 = vrcp.f32 %v7036_v20 }
0x3734   :  { %v12475_v41 = vpop.eup %12474 }
0x3735   :  { %v7040_v22 = vmul.f32 %v12475_v41, %v14244_v62 }
0x3794   :  { %v7059_v39 = vpop.permute.xlu0 %7058 }
0x3795   :  { %7061 = vst.msk [vmem:[#allocation4 + $0x4] sm:$0x3] %vm1860_vm3, %v7059_v39  ;;  %11336 = vmatmul.mubr.msk.f32.vlgmr.msra.gmra.mrb[48].mxu0 %vm1660_vm4, %v7059_v39 }
0x3796   :  { %11967 = vmatpush3.bf16.msra.mxu0 %v14092_v45  ;;  %11357 = vmatprep.mubr.msk.f32.mxu0 %vm12931_vm2, %v12932_v60 }
0x3797   :  { %11968 = vmatprep.subr.bf16.mxu0 %v12930_v59 }
0x3798   :  { %v7043_v42 = vpop.permute.xlu1 %7042 }
0x3799   :  { %v7045_v44 = vmul.f32 %v12475_v41, %v7043_v42 }
0x379a   :  { %11970 = vmatpush3.bf16.msra.mxu0 %v14104_v17 }
0x379b   :  { %7047 = vrot.lane.b32.xlu1 %v7045_v44, %s12934_s23  ;;  %11977 = vmatprep.subr.bf16.mxu0 %v12930_v59 }
0x380d   :  { %v7048_v46 = vpop.permute.xlu1 %7047 }
0x380e   :  { %v14276_v14 = vadd.f32 %v7048_v46, %v7040_v22  ;;  %v7347_v22 = vld [vmem:[#allocation3 + $0x16] sm:$0x3] }
0x3810   :  { %12476 = vtanh.f32 %v14276_v14 }
0x381a   :  { %v12477_v50 = vpop.eup %12476 }
0x381b   :  { %7053 = vrot.lane.b32.xlu1 %v12477_v50, %s12934_s23 }
0x3868   :  { %v7136_v15 = vpop.f32.mrb[48].mxu0 }
0x3869   :  { %v7140_v40 = vadd.f32 %v7136_v15, %v7067_v47  ;;  %v11337_v56 = vpop.f32.mrb[49].mxu0 }
0x386b   :  { %12478 = vtanh.f32 %v7140_v40  ;;  %v10294_v63 = vmul.f32 -1.442695, %v7140_v40 }
0x386d   :  { %12480 = vpow2.f32 %v10294_v63 }
0x3875   :  { %v12479_v49 = vpop.eup %12478 }
0x3876   :  { %7224 = vrot.lane.b32.xlu0 %v12479_v49, %s12934_s23 }
0x3877   :  { %v12481_v2 = vpop.eup %12480 }
0x3878   :  { %v7218_v25 = vadd.f32 1.0, %v12481_v2 }
0x387a   :  { %12482 = vrcp.f32 %v7218_v25 }
0x3884   :  { %v12483_v1 = vpop.eup %12482 }
0x3885   :  { %v7222_v6 = vmul.f32 %v12483_v1, %v14260_v31 }
0x388d   :  { %v7054_v58 = vpop.permute.xlu1 %7053 }
0x388e   :  { %v7056_v53 = vmul.f32 %v12475_v41, %v7054_v58 }
0x3890   :  { %7063 = vrot.lane.b32.xlu1 %v7056_v53, %s12935_s0 }
0x38e8   :  { %v7225_v34 = vpop.permute.xlu0 %7224 }
0x38e9   :  { %v7227_v3 = vmul.f32 %v12483_v1, %v7225_v34 }
0x38eb   :  { %7229 = vrot.lane.b32.xlu0 %v7227_v3, %s12934_s23 }
0x3902   :  { %v7064_v5 = vpop.permute.xlu1 %7063 }
0x3903   :  { %7066 = vst.msk [vmem:[#allocation5 + $0x1a] sm:$0x3] %vm1860_vm3, %v7064_v5  ;;  %11347 = vmatmul.mubr.msk.f32.vlgmr.msra.gmra.mrb[50].mxu1 %vm1660_vm4, %v7064_v5 }
0x3904   :  { %11973 = vmatpush3.bf16.msra.mxu1 %v14099_v48  ;;  %11368 = vmatprep.mubr.msk.f32.mxu1 %vm12931_vm2, %v12932_v60 }
0x3905   :  { %11974 = vmatprep.subr.bf16.mxu1 %v12930_v59 }
0x3908   :  { %11976 = vmatpush3.bf16.msra.mxu1 %v14110_v51 }
0x3909   :  { %11983 = vmatprep.subr.bf16.mxu1 %v12930_v59 }
0x395d   :  { %v7230_v10 = vpop.permute.xlu0 %7229 }
0x395e   :  { %v14292_v12 = vadd.f32 %v7230_v10, %v7222_v6  ;;  %v7479_v6 = vld [vmem:[#allocation2 + $0xa] sm:$0x3] }
0x3960   :  { %12484 = vtanh.f32 %v14292_v12 }
0x396a   :  { %v12485_v13 = vpop.eup %12484 }
0x396b   :  { %7235 = vrot.lane.b32.xlu0 %v12485_v13, %s12934_s23 }
0x39d6   :  { %v7210_v54 = vpop.f32.mrb[50].mxu1 }
0x39d7   :  { %v7214_v62 = vadd.f32 %v7210_v54, %v7141_v61  ;;  %v11348_v9 = vpop.f32.mrb[51].mxu1 }
0x39d9   :  { %12486 = vtanh.f32 %v7214_v62  ;;  %v10295_v8 = vmul.f32 -1.442695, %v7214_v62 }
0x39db   :  { %12488 = vpow2.f32 %v10295_v8 }
0x39dd   :  { %v7236_v18 = vpop.permute.xlu0 %7235 }
0x39de   :  { %v7238_v19 = vmul.f32 %v12483_v1, %v7236_v18 }
0x39e0   :  { %7264 = vrot.lane.b32.xlu0 %v7238_v19, %s12935_s0 }
0x39e3   :  { %v12487_v55 = vpop.eup %12486 }
0x39e4   :  { %7248 = vrot.lane.b32.xlu1 %v12487_v55, %s12934_s23 }
0x39e5   :  { %v12489_v52 = vpop.eup %12488 }
0x39e6   :  { %v7242_v11 = vadd.f32 1.0, %v12489_v52 }
0x39e8   :  { %12490 = vrcp.f32 %v7242_v11 }
0x39f2   :  { %v12491_v26 = vpop.eup %12490 }
0x39f3   :  { %v7246_v27 = vmul.f32 %v12491_v26, %v14276_v14 }
0x3a52   :  { %v7265_v24 = vpop.permute.xlu0 %7264 }
0x3a53   :  { %7267 = vst.msk [vmem:[#allocation4 + $0x6] sm:$0x3] %vm1860_vm3, %v7265_v24  ;;  %11358 = vmatmul.mubr.msk.f32.vlgmr.msra.gmra.mrb[50].mxu0 %vm1660_vm4, %v7265_v24 }
0x3a54   :  { %11979 = vmatpush3.bf16.msra.mxu0 %v14092_v45  ;;  %11379 = vmatprep.mubr.msk.f32.mxu0 %vm12931_vm2, %v12932_v60 }
0x3a55   :  { %11980 = vmatprep.subr.bf16.mxu0 %v12930_v59 }
0x3a56   :  { %v7249_v0 = vpop.permute.xlu1 %7248 }
0x3a57   :  { %v7251_v23 = vmul.f32 %v12491_v26, %v7249_v0 }
0x3a58   :  { %11982 = vmatpush3.bf16.msra.mxu0 %v14104_v17 }
0x3a59   :  { %7253 = vrot.lane.b32.xlu1 %v7251_v23, %s12934_s23  ;;  %11989 = vmatprep.subr.bf16.mxu0 %v12930_v59 }
0x3acb   :  { %v7254_v28 = vpop.permute.xlu1 %7253 }
0x3acc   :  { %v14308_v29 = vadd.f32 %v7254_v28, %v7246_v27  ;;  %v7553_v27 = vld [vmem:[#allocation3 + $0x14] sm:$0x3] }
0x3ace   :  { %12492 = vtanh.f32 %v14308_v29 }
0x3ad8   :  { %v12493_v30 = vpop.eup %12492 }
0x3ad9   :  { %7259 = vrot.lane.b32.xlu1 %v12493_v30, %s12934_s23 }
0x3b26   :  { %v7342_v4 = vpop.f32.mrb[50].mxu0 }
0x3b27   :  { %v7346_v31 = vadd.f32 %v7342_v4, %v7273_v21  ;;  %v11359_v7 = vpop.f32.mrb[51].mxu0 }
0x3b29   :  { %12494 = vtanh.f32 %v7346_v31  ;;  %v10298_v33 = vmul.f32 -1.442695, %v7346_v31 }
0x3b2b   :  { %12496 = vpow2.f32 %v10298_v33 }
0x3b33   :  { %v12495_v43 = vpop.eup %12494 }
0x3b34   :  { %7430 = vrot.lane.b32.xlu0 %v12495_v43, %s12934_s23 }
0x3b35   :  { %v12497_v16 = vpop.eup %12496 }
0x3b36   :  { %v7424_v35 = vadd.f32 1.0, %v12497_v16 }
0x3b38   :  { %12498 = vrcp.f32 %v7424_v35 }
0x3b42   :  { %v12499_v36 = vpop.eup %12498 }
0x3b43   :  { %v7428_v39 = vmul.f32 %v12499_v36, %v14292_v12 }
0x3b4b   :  { %v7260_v32 = vpop.permute.xlu1 %7259 }
0x3b4c   :  { %v7262_v57 = vmul.f32 %v12491_v26, %v7260_v32 }
0x3b4e   :  { %7269 = vrot.lane.b32.xlu1 %v7262_v57, %s12935_s0 }
0x3ba6   :  { %v7431_v37 = vpop.permute.xlu0 %7430 }
0x3ba7   :  { %v7433_v38 = vmul.f32 %v12499_v36, %v7431_v37 }
0x3ba9   :  { %7435 = vrot.lane.b32.xlu0 %v7433_v38, %s12934_s23 }
0x3bc0   :  { %v7270_v20 = vpop.permute.xlu1 %7269 }
0x3bc1   :  { %7272 = vst.msk [vmem:[#allocation5 + $0x18] sm:$0x3] %vm1860_vm3, %v7270_v20  ;;  %11369 = vmatmul.mubr.msk.f32.vlgmr.msra.gmra.mrb[52].mxu1 %vm1660_vm4, %v7270_v20 }
0x3bc2   :  { %11985 = vmatpush3.bf16.msra.mxu1 %v14099_v48  ;;  %11390 = vmatprep.mubr.msk.f32.mxu1 %vm12931_vm2, %v12932_v60 }
0x3bc3   :  { %11986 = vmatprep.subr.bf16.mxu1 %v12930_v59 }
0x3bc6   :  { %11988 = vmatpush3.bf16.msra.mxu1 %v14110_v51 }
0x3bc7   :  { %11995 = vmatprep.subr.bf16.mxu1 %v12930_v59 }
0x3c1b   :  { %v7436_v41 = vpop.permute.xlu0 %7435 }
0x3c1c   :  { %v14324_v42 = vadd.f32 %v7436_v41, %v7428_v39  ;;  %v7685_v39 = vld [vmem:[#allocation2 + $0xc] sm:$0x3] }
0x3c1e   :  { %12500 = vtanh.f32 %v14324_v42 }
0x3c28   :  { %v12501_v44 = vpop.eup %12500 }
0x3c29   :  { %7441 = vrot.lane.b32.xlu0 %v12501_v44, %s12934_s23 }
0x3c94   :  { %v7416_v46 = vpop.f32.mrb[52].mxu1 }
0x3c95   :  { %v7420_v14 = vadd.f32 %v7416_v46, %v7347_v22  ;;  %v11370_v50 = vpop.f32.mrb[53].mxu1 }
0x3c97   :  { %12502 = vtanh.f32 %v7420_v14  ;;  %v10299_v56 = vmul.f32 -1.442695, %v7420_v14 }
0x3c99   :  { %12504 = vpow2.f32 %v10299_v56 }
0x3c9b   :  { %v7442_v47 = vpop.permute.xlu0 %7441 }
0x3c9c   :  { %v7444_v15 = vmul.f32 %v12499_v36, %v7442_v47 }
0x3c9e   :  { %7470 = vrot.lane.b32.xlu0 %v7444_v15, %s12935_s0 }
0x3ca1   :  { %v12503_v40 = vpop.eup %12502 }
0x3ca2   :  { %7454 = vrot.lane.b32.xlu1 %v12503_v40, %s12934_s23 }
0x3ca3   :  { %v12505_v49 = vpop.eup %12504 }
0x3ca4   :  { %v7448_v58 = vadd.f32 1.0, %v12505_v49 }
0x3ca6   :  { %12506 = vrcp.f32 %v7448_v58 }
0x3cb0   :  { %v12507_v63 = vpop.eup %12506 }
0x3cb1   :  { %v7452_v1 = vmul.f32 %v12507_v63, %v14308_v29 }
0x3d10   :  { %v7471_v53 = vpop.permute.xlu0 %7470 }
0x3d11   :  { %7473 = vst.msk [vmem:[#allocation4 + $0x8] sm:$0x3] %vm1860_vm3, %v7471_v53  ;;  %11380 = vmatmul.mubr.msk.f32.vlgmr.msra.gmra.mrb[52].mxu0 %vm1660_vm4, %v7471_v53 }
0x3d12   :  { %11991 = vmatpush3.bf16.msra.mxu0 %v14092_v45  ;;  %11401 = vmatprep.mubr.msk.f32.mxu0 %vm12931_vm2, %v12932_v60 }
0x3d13   :  { %11992 = vmatprep.subr.bf16.mxu0 %v12930_v59 }
0x3d14   :  { %v7455_v2 = vpop.permute.xlu1 %7454 }
0x3d15   :  { %v7457_v25 = vmul.f32 %v12507_v63, %v7455_v2 }
0x3d16   :  { %11994 = vmatpush3.bf16.msra.mxu0 %v14104_v17 }
0x3d17   :  { %7459 = vrot.lane.b32.xlu1 %v7457_v25, %s12934_s23  ;;  %12001 = vmatprep.subr.bf16.mxu0 %v12930_v59 }
0x3d89   :  { %v7460_v34 = vpop.permute.xlu1 %7459 }
0x3d8a   :  { %v14340_v3 = vadd.f32 %v7460_v34, %v7452_v1  ;;  %v7759_v1 = vld [vmem:[#allocation3 + $0x12] sm:$0x3] }
0x3d8c   :  { %12508 = vtanh.f32 %v14340_v3 }
0x3d96   :  { %v12509_v5 = vpop.eup %12508 }
0x3d97   :  { %7465 = vrot.lane.b32.xlu1 %v12509_v5, %s12934_s23 }
0x3de4   :  { %v7548_v10 = vpop.f32.mrb[52].mxu0 }
0x3de5   :  { %v7552_v12 = vadd.f32 %v7548_v10, %v7479_v6  ;;  %v11381_v13 = vpop.f32.mrb[53].mxu0 }
0x3de7   :  { %12510 = vtanh.f32 %v7552_v12  ;;  %v10302_v9 = vmul.f32 -1.442695, %v7552_v12 }
0x3de9   :  { %12512 = vpow2.f32 %v10302_v9 }
0x3df1   :  { %v12511_v61 = vpop.eup %12510 }
0x3df2   :  { %7636 = vrot.lane.b32.xlu0 %v12511_v61, %s12934_s23 }
0x3df3   :  { %v12513_v18 = vpop.eup %12512 }
0x3df4   :  { %v7630_v19 = vadd.f32 1.0, %v12513_v18 }
0x3df6   :  { %12514 = vrcp.f32 %v7630_v19 }
0x3e00   :  { %v12515_v55 = vpop.eup %12514 }
0x3e01   :  { %v7634_v24 = vmul.f32 %v12515_v55, %v14324_v42 }
0x3e09   :  { %v7466_v54 = vpop.permute.xlu1 %7465 }
0x3e0a   :  { %v7468_v62 = vmul.f32 %v12507_v63, %v7466_v54 }
0x3e0c   :  { %7475 = vrot.lane.b32.xlu1 %v7468_v62, %s12935_s0 }
0x3e64   :  { %v7637_v8 = vpop.permute.xlu0 %7636 }
0x3e65   :  { %v7639_v52 = vmul.f32 %v12515_v55, %v7637_v8 }
0x3e67   :  { %7641 = vrot.lane.b32.xlu0 %v7639_v52, %s12934_s23 }
0x3e7e   :  { %v7476_v11 = vpop.permute.xlu1 %7475 }
0x3e7f   :  { %7478 = vst.msk [vmem:[#allocation5 + $0x16] sm:$0x3] %vm1860_vm3, %v7476_v11  ;;  %11391 = vmatmul.mubr.msk.f32.vlgmr.msra.gmra.mrb[54].mxu1 %vm1660_vm4, %v7476_v11 }
0x3e80   :  { %11997 = vmatpush3.bf16.msra.mxu1 %v14099_v48  ;;  %11412 = vmatprep.mubr.msk.f32.mxu1 %vm12931_vm2, %v12932_v60 }
0x3e81   :  { %11998 = vmatprep.subr.bf16.mxu1 %v12930_v59 }
0x3e84   :  { %12000 = vmatpush3.bf16.msra.mxu1 %v14110_v51 }
0x3e85   :  { %12007 = vmatprep.subr.bf16.mxu1 %v12930_v59 }
0x3ed9   :  { %v7642_v26 = vpop.permute.xlu0 %7641 }
0x3eda   :  { %v14356_v0 = vadd.f32 %v7642_v26, %v7634_v24  ;;  %v7891_v24 = vld [vmem:[#allocation2 + $0xe] sm:$0x3] }
0x3edc   :  { %12516 = vtanh.f32 %v14356_v0 }
0x3ee6   :  { %v12517_v23 = vpop.eup %12516 }
0x3ee7   :  { %7647 = vrot.lane.b32.xlu0 %v12517_v23, %s12934_s23 }
0x3f52   :  { %v7622_v28 = vpop.f32.mrb[54].mxu1 }
0x3f53   :  { %v7626_v29 = vadd.f32 %v7622_v28, %v7553_v27  ;;  %v11392_v30 = vpop.f32.mrb[55].mxu1 }
0x3f55   :  { %12518 = vtanh.f32 %v7626_v29  ;;  %v10303_v7 = vmul.f32 -1.442695, %v7626_v29 }
0x3f57   :  { %12520 = vpow2.f32 %v10303_v7 }
0x3f59   :  { %v7648_v21 = vpop.permute.xlu0 %7647 }
0x3f5a   :  { %v7650_v4 = vmul.f32 %v12515_v55, %v7648_v21 }
0x3f5c   :  { %7676 = vrot.lane.b32.xlu0 %v7650_v4, %s12935_s0 }
0x3f5f   :  { %v12519_v31 = vpop.eup %12518 }
0x3f60   :  { %7660 = vrot.lane.b32.xlu1 %v12519_v31, %s12934_s23 }
0x3f61   :  { %v12521_v43 = vpop.eup %12520 }
0x3f62   :  { %v7654_v32 = vadd.f32 1.0, %v12521_v43 }
0x3f64   :  { %12522 = vrcp.f32 %v7654_v32 }
0x3f6e   :  { %v12523_v33 = vpop.eup %12522 }
0x3f6f   :  { %v7658_v36 = vmul.f32 %v12523_v33, %v14340_v3 }
0x3fce   :  { %v7677_v57 = vpop.permute.xlu0 %7676 }
0x3fcf   :  { %7679 = vst.msk [vmem:[#allocation4 + $0xa] sm:$0x3] %vm1860_vm3, %v7677_v57  ;;  %11402 = vmatmul.mubr.msk.f32.vlgmr.msra.gmra.mrb[54].mxu0 %vm1660_vm4, %v7677_v57 }
0x3fd0   :  { %12003 = vmatpush3.bf16.msra.mxu0 %v14092_v45  ;;  %11423 = vmatprep.mubr.msk.f32.mxu0 %vm12931_vm2, %v12932_v60 }
0x3fd1   :  { %12004 = vmatprep.subr.bf16.mxu0 %v12930_v59 }
0x3fd2   :  { %v7661_v16 = vpop.permute.xlu1 %7660 }
0x3fd3   :  { %v7663_v35 = vmul.f32 %v12523_v33, %v7661_v16 }
0x3fd4   :  { %12006 = vmatpush3.bf16.msra.mxu0 %v14104_v17 }
0x3fd5   :  { %7665 = vrot.lane.b32.xlu1 %v7663_v35, %s12934_s23  ;;  %12013 = vmatprep.subr.bf16.mxu0 %v12930_v59 }
0x4047   :  { %v7666_v37 = vpop.permute.xlu1 %7665 }
0x4048   :  { %v14372_v38 = vadd.f32 %v7666_v37, %v7658_v36  ;;  %v7965_v36 = vld [vmem:[#allocation3 + $0x10] sm:$0x3] }
0x404a   :  { %12524 = vtanh.f32 %v14372_v38 }
0x4054   :  { %v12525_v20 = vpop.eup %12524 }
0x4055   :  { %7671 = vrot.lane.b32.xlu1 %v12525_v20, %s12934_s23 }
0x40a2   :  { %v7754_v41 = vpop.f32.mrb[54].mxu0 }
0x40a3   :  { %v7758_v42 = vadd.f32 %v7754_v41, %v7685_v39  ;;  %v11403_v44 = vpop.f32.mrb[55].mxu0 }
0x40a5   :  { %12526 = vtanh.f32 %v7758_v42  ;;  %v10306_v50 = vmul.f32 -1.442695, %v7758_v42 }
0x40a7   :  { %12528 = vpow2.f32 %v10306_v50 }
0x40af   :  { %v12527_v22 = vpop.eup %12526 }
0x40b0   :  { %7842 = vrot.lane.b32.xlu0 %v12527_v22, %s12934_s23 }
0x40b1   :  { %v12529_v47 = vpop.eup %12528 }
0x40b2   :  { %v7836_v15 = vadd.f32 1.0, %v12529_v47 }
0x40b4   :  { %12530 = vrcp.f32 %v7836_v15 }
0x40be   :  { %v12531_v40 = vpop.eup %12530 }
0x40bf   :  { %v7840_v53 = vmul.f32 %v12531_v40, %v14356_v0 }
0x40c7   :  { %v7672_v46 = vpop.permute.xlu1 %7671 }
0x40c8   :  { %v7674_v14 = vmul.f32 %v12523_v33, %v7672_v46 }
0x40ca   :  { %7681 = vrot.lane.b32.xlu1 %v7674_v14, %s12935_s0 }
0x4122   :  { %v7843_v56 = vpop.permute.xlu0 %7842 }
0x4123   :  { %v7845_v49 = vmul.f32 %v12531_v40, %v7843_v56 }
0x4125   :  { %7847 = vrot.lane.b32.xlu0 %v7845_v49, %s12934_s23 }
0x413c   :  { %v7682_v58 = vpop.permute.xlu1 %7681 }
0x413d   :  { %7684 = vst.msk [vmem:[#allocation5 + $0x14] sm:$0x3] %vm1860_vm3, %v7682_v58  ;;  %11413 = vmatmul.mubr.msk.f32.vlgmr.msra.gmra.mrb[56].mxu1 %vm1660_vm4, %v7682_v58 }
0x413e   :  { %12009 = vmatpush3.bf16.msra.mxu1 %v14099_v48  ;;  %11434 = vmatprep.mubr.msk.f32.mxu1 %vm12931_vm2, %v12932_v60 }
0x413f   :  { %12010 = vmatprep.subr.bf16.mxu1 %v12930_v59 }
0x4142   :  { %12012 = vmatpush3.bf16.msra.mxu1 %v14110_v51 }
0x4143   :  { %12019 = vmatprep.subr.bf16.mxu1 %v12930_v59 }
0x4197   :  { %v7848_v63 = vpop.permute.xlu0 %7847 }
0x4198   :  { %v14388_v2 = vadd.f32 %v7848_v63, %v7840_v53  ;;  %v8097_v53 = vld [vmem:[#allocation2 + $0x10] sm:$0x3] }
0x419a   :  { %12532 = vtanh.f32 %v14388_v2 }
0x41a4   :  { %v12533_v25 = vpop.eup %12532 }
0x41a5   :  { %7853 = vrot.lane.b32.xlu0 %v12533_v25, %s12934_s23 }
0x4210   :  { %v7828_v34 = vpop.f32.mrb[56].mxu1 }
0x4211   :  { %v7832_v3 = vadd.f32 %v7828_v34, %v7759_v1  ;;  %v11414_v5 = vpop.f32.mrb[57].mxu1 }
0x4213   :  { %12534 = vtanh.f32 %v7832_v3  ;;  %v10307_v13 = vmul.f32 -1.442695, %v7832_v3 }
0x4215   :  { %12536 = vpow2.f32 %v10307_v13 }
0x4217   :  { %v7854_v6 = vpop.permute.xlu0 %7853 }
0x4218   :  { %v7856_v10 = vmul.f32 %v12531_v40, %v7854_v6 }
0x421a   :  { %7882 = vrot.lane.b32.xlu0 %v7856_v10, %s12935_s0 }
0x421d   :  { %v12535_v12 = vpop.eup %12534 }
0x421e   :  { %7866 = vrot.lane.b32.xlu1 %v12535_v12, %s12934_s23 }
0x421f   :  { %v12537_v61 = vpop.eup %12536 }
0x4220   :  { %v7860_v54 = vadd.f32 1.0, %v12537_v61 }
0x4222   :  { %12538 = vrcp.f32 %v7860_v54 }
0x422c   :  { %v12539_v9 = vpop.eup %12538 }
0x422d   :  { %v7864_v55 = vmul.f32 %v12539_v9, %v14372_v38 }
0x428c   :  { %v7883_v62 = vpop.permute.xlu0 %7882 }
0x428d   :  { %7885 = vst.msk [vmem:[#allocation4 + $0xc] sm:$0x3] %vm1860_vm3, %v7883_v62  ;;  %11424 = vmatmul.mubr.msk.f32.vlgmr.msra.gmra.mrb[56].mxu0 %vm1660_vm4, %v7883_v62 }
0x428e   :  { %12015 = vmatpush3.bf16.msra.mxu0 %v14092_v45  ;;  %11445 = vmatprep.mubr.msk.f32.mxu0 %vm12931_vm2, %v12932_v60 }
0x428f   :  { %12016 = vmatprep.subr.bf16.mxu0 %v12930_v59 }
0x4290   :  { %v7867_v18 = vpop.permute.xlu1 %7866 }
0x4291   :  { %v7869_v19 = vmul.f32 %v12539_v9, %v7867_v18 }
0x4292   :  { %12018 = vmatpush3.bf16.msra.mxu0 %v14104_v17 }
0x4293   :  { %7871 = vrot.lane.b32.xlu1 %v7869_v19, %s12934_s23  ;;  %12025 = vmatprep.subr.bf16.mxu0 %v12930_v59 }
0x4305   :  { %v7872_v8 = vpop.permute.xlu1 %7871 }
0x4306   :  { %v14404_v52 = vadd.f32 %v7872_v8, %v7864_v55  ;;  %v8171_v55 = vld [vmem:[#allocation3 + $0xe] sm:$0x3] }
0x4308   :  { %12540 = vtanh.f32 %v14404_v52 }
0x4312   :  { %v12541_v11 = vpop.eup %12540 }
0x4313   :  { %7877 = vrot.lane.b32.xlu1 %v12541_v11, %s12934_s23 }
0x4360   :  { %v7960_v26 = vpop.f32.mrb[56].mxu0 }
0x4361   :  { %v7964_v0 = vadd.f32 %v7960_v26, %v7891_v24  ;;  %v11425_v23 = vpop.f32.mrb[57].mxu0 }
0x4363   :  { %12542 = vtanh.f32 %v7964_v0  ;;  %v10310_v30 = vmul.f32 -1.442695, %v7964_v0 }
0x4365   :  { %12544 = vpow2.f32 %v10310_v30 }
0x436d   :  { %v12543_v27 = vpop.eup %12542 }
0x436e   :  { %8048 = vrot.lane.b32.xlu0 %v12543_v27, %s12934_s23 }
0x436f   :  { %v12545_v21 = vpop.eup %12544 }
0x4370   :  { %v8042_v4 = vadd.f32 1.0, %v12545_v21 }
0x4372   :  { %12546 = vrcp.f32 %v8042_v4 }
0x437c   :  { %v12547_v31 = vpop.eup %12546 }
0x437d   :  { %v8046_v57 = vmul.f32 %v12547_v31, %v14388_v2 }
0x4385   :  { %v7878_v28 = vpop.permute.xlu1 %7877 }
0x4386   :  { %v7880_v29 = vmul.f32 %v12539_v9, %v7878_v28 }
0x4388   :  { %7887 = vrot.lane.b32.xlu1 %v7880_v29, %s12935_s0 }
0x43e0   :  { %v8049_v7 = vpop.permute.xlu0 %8048 }
0x43e1   :  { %v8051_v43 = vmul.f32 %v12547_v31, %v8049_v7 }
0x43e3   :  { %8053 = vrot.lane.b32.xlu0 %v8051_v43, %s12934_s23 }
0x43fa   :  { %v7888_v32 = vpop.permute.xlu1 %7887 }
0x43fb   :  { %7890 = vst.msk [vmem:[#allocation5 + $0x12] sm:$0x3] %vm1860_vm3, %v7888_v32  ;;  %11435 = vmatmul.mubr.msk.f32.vlgmr.msra.gmra.mrb[58].mxu1 %vm1660_vm4, %v7888_v32 }
0x43fc   :  { %12021 = vmatpush3.bf16.msra.mxu1 %v14099_v48  ;;  %11456 = vmatprep.mubr.msk.f32.mxu1 %vm12931_vm2, %v12932_v60 }
0x43fd   :  { %12022 = vmatprep.subr.bf16.mxu1 %v12930_v59 }
0x4400   :  { %12024 = vmatpush3.bf16.msra.mxu1 %v14110_v51 }
0x4401   :  { %12031 = vmatprep.subr.bf16.mxu1 %v12930_v59 }
0x4455   :  { %v8054_v33 = vpop.permute.xlu0 %8053 }
0x4456   :  { %v14420_v16 = vadd.f32 %v8054_v33, %v8046_v57  ;;  %v8303_v57 = vld [vmem:[#allocation2 + $0x12] sm:$0x3] }
0x4458   :  { %12548 = vtanh.f32 %v14420_v16 }
0x4462   :  { %v12549_v35 = vpop.eup %12548 }
0x4463   :  { %8059 = vrot.lane.b32.xlu0 %v12549_v35, %s12934_s23 }
0x44ce   :  { %v8034_v37 = vpop.f32.mrb[58].mxu1 }
0x44cf   :  { %v8038_v38 = vadd.f32 %v8034_v37, %v7965_v36  ;;  %v11436_v20 = vpop.f32.mrb[59].mxu1 }
0x44d1   :  { %12550 = vtanh.f32 %v8038_v38  ;;  %v10311_v44 = vmul.f32 -1.442695, %v8038_v38 }
0x44d3   :  { %12552 = vpow2.f32 %v10311_v44 }
0x44d5   :  { %v8060_v39 = vpop.permute.xlu0 %8059 }
0x44d6   :  { %v8062_v41 = vmul.f32 %v12547_v31, %v8060_v39 }
0x44d8   :  { %8088 = vrot.lane.b32.xlu0 %v8062_v41, %s12935_s0 }
0x44db   :  { %v12551_v42 = vpop.eup %12550 }
0x44dc   :  { %8072 = vrot.lane.b32.xlu1 %v12551_v42, %s12934_s23 }
0x44dd   :  { %v12553_v22 = vpop.eup %12552 }
0x44de   :  { %v8066_v46 = vadd.f32 1.0, %v12553_v22 }
0x44e0   :  { %12554 = vrcp.f32 %v8066_v46 }
0x44ea   :  { %v12555_v50 = vpop.eup %12554 }
0x44eb   :  { %v8070_v40 = vmul.f32 %v12555_v50, %v14404_v52 }
0x454a   :  { %v8089_v14 = vpop.permute.xlu0 %8088 }
0x454b   :  { %8091 = vst.msk [vmem:[#allocation4 + $0xe] sm:$0x3] %vm1860_vm3, %v8089_v14  ;;  %11446 = vmatmul.mubr.msk.f32.vlgmr.msra.gmra.mrb[58].mxu0 %vm1660_vm4, %v8089_v14 }
0x454c   :  { %12027 = vmatpush3.bf16.msra.mxu0 %v14092_v45  ;;  %11467 = vmatprep.mubr.msk.f32.mxu0 %vm12931_vm2, %v12932_v60 }
0x454d   :  { %12028 = vmatprep.subr.bf16.mxu0 %v12930_v59 }
0x454e   :  { %v8073_v47 = vpop.permute.xlu1 %8072 }
0x454f   :  { %v8075_v15 = vmul.f32 %v12555_v50, %v8073_v47 }
0x4550   :  { %12030 = vmatpush3.bf16.msra.mxu0 %v14104_v17 }
0x4551   :  { %8077 = vrot.lane.b32.xlu1 %v8075_v15, %s12934_s23  ;;  %12037 = vmatprep.subr.bf16.mxu0 %v12930_v59 }
0x45c3   :  { %v8078_v56 = vpop.permute.xlu1 %8077 }
0x45c4   :  { %v14436_v49 = vadd.f32 %v8078_v56, %v8070_v40  ;;  %v8377_v40 = vld [vmem:[#allocation3 + $0xc] sm:$0x3] }
0x45c6   :  { %12556 = vtanh.f32 %v14436_v49 }
0x45d0   :  { %v12557_v58 = vpop.eup %12556 }
0x45d1   :  { %8083 = vrot.lane.b32.xlu1 %v12557_v58, %s12934_s23 }
0x461e   :  { %v8166_v63 = vpop.f32.mrb[58].mxu0 }
0x461f   :  { %v8170_v2 = vadd.f32 %v8166_v63, %v8097_v53  ;;  %v11447_v25 = vpop.f32.mrb[59].mxu0 }
0x4621   :  { %12558 = vtanh.f32 %v8170_v2  ;;  %v10314_v5 = vmul.f32 -1.442695, %v8170_v2 }
0x4623   :  { %12560 = vpow2.f32 %v10314_v5 }
0x462b   :  { %v12559_v1 = vpop.eup %12558 }
0x462c   :  { %8254 = vrot.lane.b32.xlu0 %v12559_v1, %s12934_s23 }
0x462d   :  { %v12561_v6 = vpop.eup %12560 }
0x462e   :  { %v8248_v10 = vadd.f32 1.0, %v12561_v6 }
0x4630   :  { %12562 = vrcp.f32 %v8248_v10 }
0x463a   :  { %v12563_v12 = vpop.eup %12562 }
0x463b   :  { %v8252_v62 = vmul.f32 %v12563_v12, %v14420_v16 }
0x4643   :  { %v8084_v34 = vpop.permute.xlu1 %8083 }
0x4644   :  { %v8086_v3 = vmul.f32 %v12555_v50, %v8084_v34 }
0x4646   :  { %8093 = vrot.lane.b32.xlu1 %v8086_v3, %s12935_s0 }
0x469e   :  { %v8255_v13 = vpop.permute.xlu0 %8254 }
0x469f   :  { %v8257_v61 = vmul.f32 %v12563_v12, %v8255_v13 }
0x46a1   :  { %8259 = vrot.lane.b32.xlu0 %v8257_v61, %s12934_s23 }
0x46b8   :  { %v8094_v54 = vpop.permute.xlu1 %8093 }
0x46b9   :  { %8096 = vst.msk [vmem:[#allocation5 + $0x10] sm:$0x3] %vm1860_vm3, %v8094_v54  ;;  %11457 = vmatmul.mubr.msk.f32.vlgmr.msra.gmra.mrb[60].mxu1 %vm1660_vm4, %v8094_v54 }
0x46ba   :  { %12033 = vmatpush3.bf16.msra.mxu1 %v14099_v48  ;;  %11478 = vmatprep.mubr.msk.f32.mxu1 %vm12931_vm2, %v12932_v60 }
0x46bb   :  { %12034 = vmatprep.subr.bf16.mxu1 %v12930_v59 }
0x46be   :  { %12036 = vmatpush3.bf16.msra.mxu1 %v14110_v51 }
0x46bf   :  { %12043 = vmatprep.subr.bf16.mxu1 %v12930_v59 }
0x4713   :  { %v8260_v9 = vpop.permute.xlu0 %8259 }
0x4714   :  { %v14452_v18 = vadd.f32 %v8260_v9, %v8252_v62  ;;  %v8509_v62 = vld [vmem:[#allocation2 + $0x14] sm:$0x3] }
0x4716   :  { %12564 = vtanh.f32 %v14452_v18 }
0x4720   :  { %v12565_v19 = vpop.eup %12564 }
0x4721   :  { %8265 = vrot.lane.b32.xlu0 %v12565_v19, %s12934_s23 }
0x478c   :  { %v8240_v8 = vpop.f32.mrb[60].mxu1 }
0x478d   :  { %v8244_v52 = vadd.f32 %v8240_v8, %v8171_v55  ;;  %v11458_v11 = vpop.f32.mrb[61].mxu1 }
0x478f   :  { %12566 = vtanh.f32 %v8244_v52  ;;  %v10315_v23 = vmul.f32 -1.442695, %v8244_v52 }
0x4791   :  { %12568 = vpow2.f32 %v10315_v23 }
0x4793   :  { %v8266_v24 = vpop.permute.xlu0 %8265 }
0x4794   :  { %v8268_v26 = vmul.f32 %v12563_v12, %v8266_v24 }
0x4796   :  { %8294 = vrot.lane.b32.xlu0 %v8268_v26, %s12935_s0 }
0x4799   :  { %v12567_v0 = vpop.eup %12566 }
0x479a   :  { %8278 = vrot.lane.b32.xlu1 %v12567_v0, %s12934_s23 }
0x479b   :  { %v12569_v27 = vpop.eup %12568 }
0x479c   :  { %v8272_v28 = vadd.f32 1.0, %v12569_v27 }
0x479e   :  { %12570 = vrcp.f32 %v8272_v28 }
0x47a8   :  { %v12571_v30 = vpop.eup %12570 }
0x47a9   :  { %v8276_v31 = vmul.f32 %v12571_v30, %v14436_v49 }
0x4808   :  { %v8295_v29 = vpop.permute.xlu0 %8294 }
0x4809   :  { %8297 = vst.msk [vmem:[#allocation4 + $0x10] sm:$0x3] %vm1860_vm3, %v8295_v29  ;;  %11468 = vmatmul.mubr.msk.f32.vlgmr.msra.gmra.mrb[60].mxu0 %vm1660_vm4, %v8295_v29 }
0x480a   :  { %12039 = vmatpush3.bf16.msra.mxu0 %v14092_v45  ;;  %11489 = vmatprep.mubr.msk.f32.mxu0 %vm12931_vm2, %v12932_v60 }
0x480b   :  { %12040 = vmatprep.subr.bf16.mxu0 %v12930_v59 }
0x480c   :  { %v8279_v21 = vpop.permute.xlu1 %8278 }
0x480d   :  { %v8281_v4 = vmul.f32 %v12571_v30, %v8279_v21 }
0x480e   :  { %12042 = vmatpush3.bf16.msra.mxu0 %v14104_v17 }
0x480f   :  { %8283 = vrot.lane.b32.xlu1 %v8281_v4, %s12934_s23  ;;  %12049 = vmatprep.subr.bf16.mxu0 %v12930_v59 }
0x4881   :  { %v8284_v7 = vpop.permute.xlu1 %8283 }
0x4882   :  { %v14468_v43 = vadd.f32 %v8284_v7, %v8276_v31  ;;  %v8583_v31 = vld [vmem:[#allocation3 + $0xa] sm:$0x3] }
0x4884   :  { %12572 = vtanh.f32 %v14468_v43 }
0x488e   :  { %v12573_v32 = vpop.eup %12572 }
0x488f   :  { %8289 = vrot.lane.b32.xlu1 %v12573_v32, %s12934_s23 }
0x48dc   :  { %v8372_v33 = vpop.f32.mrb[60].mxu0 }
0x48dd   :  { %v8376_v16 = vadd.f32 %v8372_v33, %v8303_v57  ;;  %v11469_v35 = vpop.f32.mrb[61].mxu0 }
0x48df   :  { %12574 = vtanh.f32 %v8376_v16  ;;  %v10318_v20 = vmul.f32 -1.442695, %v8376_v16 }
0x48e1   :  { %12576 = vpow2.f32 %v10318_v20 }
0x48e9   :  { %v12575_v36 = vpop.eup %12574 }
0x48ea   :  { %8460 = vrot.lane.b32.xlu0 %v12575_v36, %s12934_s23 }
0x48eb   :  { %v12577_v39 = vpop.eup %12576 }
0x48ec   :  { %v8454_v41 = vadd.f32 1.0, %v12577_v39 }
0x48ee   :  { %12578 = vrcp.f32 %v8454_v41 }
0x48f8   :  { %v12579_v42 = vpop.eup %12578 }
0x48f9   :  { %v8458_v14 = vmul.f32 %v12579_v42, %v14452_v18 }
0x4901   :  { %v8290_v37 = vpop.permute.xlu1 %8289 }
0x4902   :  { %v8292_v38 = vmul.f32 %v12571_v30, %v8290_v37 }
0x4904   :  { %8299 = vrot.lane.b32.xlu1 %v8292_v38, %s12935_s0 }
0x495c   :  { %v8461_v44 = vpop.permute.xlu0 %8460 }
0x495d   :  { %v8463_v22 = vmul.f32 %v12579_v42, %v8461_v44 }
0x495f   :  { %8465 = vrot.lane.b32.xlu0 %v8463_v22, %s12934_s23 }
0x4976   :  { %v8300_v46 = vpop.permute.xlu1 %8299 }
0x4977   :  { %8302 = vst.msk [vmem:[#allocation5 + $0xe] sm:$0x3] %vm1860_vm3, %v8300_v46  ;;  %11479 = vmatmul.mubr.msk.f32.vlgmr.msra.gmra.mrb[62].mxu1 %vm1660_vm4, %v8300_v46 }
0x4978   :  { %12045 = vmatpush3.bf16.msra.mxu1 %v14099_v48  ;;  %11500 = vmatprep.mubr.msk.f32.mxu1 %vm12931_vm2, %v12932_v60 }
0x4979   :  { %12046 = vmatprep.subr.bf16.mxu1 %v12930_v59 }
0x497c   :  { %12048 = vmatpush3.bf16.msra.mxu1 %v14110_v51 }
0x497d   :  { %12055 = vmatprep.subr.bf16.mxu1 %v12930_v59 }
0x49d1   :  { %v8466_v50 = vpop.permute.xlu0 %8465 }
0x49d2   :  { %v14484_v47 = vadd.f32 %v8466_v50, %v8458_v14  ;;  %v8715_v14 = vld [vmem:[#allocation2 + $0x16] sm:$0x3] }
0x49d4   :  { %12580 = vtanh.f32 %v14484_v47 }
0x49de   :  { %v12581_v15 = vpop.eup %12580 }
0x49df   :  { %8471 = vrot.lane.b32.xlu0 %v12581_v15, %s12934_s23 }
0x4a4a   :  { %v8446_v56 = vpop.f32.mrb[62].mxu1 }
0x4a4b   :  { %v8450_v49 = vadd.f32 %v8446_v56, %v8377_v40  ;;  %v11480_v58 = vpop.f32.mrb[63].mxu1 }
0x4a4d   :  { %12582 = vtanh.f32 %v8450_v49  ;;  %v10319_v25 = vmul.f32 -1.442695, %v8450_v49 }
0x4a4f   :  { %12584 = vpow2.f32 %v10319_v25 }
0x4a51   :  { %v8472_v53 = vpop.permute.xlu0 %8471 }
0x4a52   :  { %v8474_v63 = vmul.f32 %v12579_v42, %v8472_v53 }
0x4a54   :  { %8500 = vrot.lane.b32.xlu0 %v8474_v63, %s12935_s0 }
0x4a57   :  { %v12583_v2 = vpop.eup %12582 }
0x4a58   :  { %8484 = vrot.lane.b32.xlu1 %v12583_v2, %s12934_s23 }
0x4a59   :  { %v12585_v1 = vpop.eup %12584 }
0x4a5a   :  { %v8478_v34 = vadd.f32 1.0, %v12585_v1 }
0x4a5c   :  { %12586 = vrcp.f32 %v8478_v34 }
0x4a66   :  { %v12587_v5 = vpop.eup %12586 }
0x4a67   :  { %v8482_v12 = vmul.f32 %v12587_v5, %v14468_v43 }
0x4ac6   :  { %v8501_v3 = vpop.permute.xlu0 %8500 }
0x4ac7   :  { %8503 = vst.msk [vmem:[#allocation4 + $0x12] sm:$0x3] %vm1860_vm3, %v8501_v3  ;;  %11490 = vmatmul.mubr.msk.f32.vlgmr.msra.gmra.mrb[62].mxu0 %vm1660_vm4, %v8501_v3 }
0x4ac8   :  { %12051 = vmatpush3.bf16.msra.mxu0 %v14092_v45  ;;  %11511 = vmatprep.mubr.msk.f32.mxu0 %vm12931_vm2, %v12932_v60 }
0x4ac9   :  { %12052 = vmatprep.subr.bf16.mxu0 %v12930_v59 }
0x4aca   :  { %v8485_v6 = vpop.permute.xlu1 %8484 }
0x4acb   :  { %v8487_v10 = vmul.f32 %v12587_v5, %v8485_v6 }
0x4acc   :  { %12054 = vmatpush3.bf16.msra.mxu0 %v14104_v17 }
0x4acd   :  { %8489 = vrot.lane.b32.xlu1 %v8487_v10, %s12934_s23  ;;  %12061 = vmatprep.subr.bf16.mxu0 %v12930_v59 }
0x4b3f   :  { %v8490_v13 = vpop.permute.xlu1 %8489 }
0x4b40   :  { %v14500_v61 = vadd.f32 %v8490_v13, %v8482_v12  ;;  %v8789_v12 = vld [vmem:[#allocation3 + $0x8] sm:$0x3] }
0x4b42   :  { %12588 = vtanh.f32 %v14500_v61 }
0x4b4c   :  { %v12589_v54 = vpop.eup %12588 }
0x4b4d   :  { %8495 = vrot.lane.b32.xlu1 %v12589_v54, %s12934_s23 }
0x4b9a   :  { %v8578_v9 = vpop.f32.mrb[62].mxu0 }
0x4b9b   :  { %v8582_v18 = vadd.f32 %v8578_v9, %v8509_v62  ;;  %v11491_v19 = vpop.f32.mrb[63].mxu0 }
0x4b9d   :  { %12590 = vtanh.f32 %v8582_v18  ;;  %v10322_v11 = vmul.f32 -1.442695, %v8582_v18 }
0x4b9f   :  { %12592 = vpow2.f32 %v10322_v11 }
0x4ba7   :  { %v12591_v55 = vpop.eup %12590 }
0x4ba8   :  { %8666 = vrot.lane.b32.xlu0 %v12591_v55, %s12934_s23 }
0x4ba9   :  { %v12593_v24 = vpop.eup %12592 }
0x4baa   :  { %v8660_v26 = vadd.f32 1.0, %v12593_v24 }
0x4bac   :  { %12594 = vrcp.f32 %v8660_v26 }
0x4bb6   :  { %v12595_v0 = vpop.eup %12594 }
0x4bb7   :  { %v8664_v29 = vmul.f32 %v12595_v0, %v14484_v47 }
0x4bbf   :  { %v8496_v8 = vpop.permute.xlu1 %8495 }
0x4bc0   :  { %v8498_v52 = vmul.f32 %v12587_v5, %v8496_v8 }
0x4bc2   :  { %8505 = vrot.lane.b32.xlu1 %v8498_v52, %s12935_s0 }
0x4c1a   :  { %v8667_v23 = vpop.permute.xlu0 %8666 }
0x4c1b   :  { %v8669_v27 = vmul.f32 %v12595_v0, %v8667_v23 }
0x4c1d   :  { %8671 = vrot.lane.b32.xlu0 %v8669_v27, %s12934_s23 }
0x4c34   :  { %v8506_v28 = vpop.permute.xlu1 %8505 }
0x4c35   :  { %8508 = vst.msk [vmem:[#allocation5 + $0xc] sm:$0x3] %vm1860_vm3, %v8506_v28  ;;  %11501 = vmatmul.mubr.msk.f32.vlgmr.msra.gmra.mrb[64].mxu1 %vm1660_vm4, %v8506_v28 }
0x4c36   :  { %12057 = vmatpush3.bf16.msra.mxu1 %v14099_v48  ;;  %11522 = vmatprep.mubr.msk.f32.mxu1 %vm12931_vm2, %v12932_v60 }
0x4c37   :  { %12058 = vmatprep.subr.bf16.mxu1 %v12930_v59 }
0x4c3a   :  { %12060 = vmatpush3.bf16.msra.mxu1 %v14110_v51 }
0x4c3b   :  { %12067 = vmatprep.subr.bf16.mxu1 %v12930_v59 }
0x4c8f   :  { %v8672_v30 = vpop.permute.xlu0 %8671 }
0x4c90   :  { %v14516_v21 = vadd.f32 %v8672_v30, %v8664_v29  ;;  %v8921_v29 = vld [vmem:[#allocation2 + $0x18] sm:$0x3] }
0x4c92   :  { %12596 = vtanh.f32 %v14516_v21 }
0x4c9c   :  { %v12597_v4 = vpop.eup %12596 }
0x4c9d   :  { %8677 = vrot.lane.b32.xlu0 %v12597_v4, %s12934_s23 }
0x4d08   :  { %v8652_v7 = vpop.f32.mrb[64].mxu1 }
0x4d09   :  { %v8656_v43 = vadd.f32 %v8652_v7, %v8583_v31  ;;  %v11502_v32 = vpop.f32.mrb[65].mxu1 }
0x4d0b   :  { %12598 = vtanh.f32 %v8656_v43  ;;  %v10323_v35 = vmul.f32 -1.442695, %v8656_v43 }
0x4d0d   :  { %12600 = vpow2.f32 %v10323_v35 }
0x4d0f   :  { %v8678_v57 = vpop.permute.xlu0 %8677 }
0x4d10   :  { %v8680_v33 = vmul.f32 %v12595_v0, %v8678_v57 }
0x4d12   :  { %8706 = vrot.lane.b32.xlu0 %v8680_v33, %s12935_s0 }
0x4d15   :  { %v12599_v16 = vpop.eup %12598 }
0x4d16   :  { %8690 = vrot.lane.b32.xlu1 %v12599_v16, %s12934_s23 }
0x4d17   :  { %v12601_v36 = vpop.eup %12600 }
0x4d18   :  { %v8684_v37 = vadd.f32 1.0, %v12601_v36 }
0x4d1a   :  { %12602 = vrcp.f32 %v8684_v37 }
0x4d24   :  { %v12603_v20 = vpop.eup %12602 }
0x4d25   :  { %v8688_v42 = vmul.f32 %v12603_v20, %v14500_v61 }
0x4d84   :  { %v8707_v38 = vpop.permute.xlu0 %8706 }
0x4d85   :  { %8709 = vst.msk [vmem:[#allocation4 + $0x14] sm:$0x3] %vm1860_vm3, %v8707_v38  ;;  %11512 = vmatmul.mubr.msk.f32.vlgmr.msra.gmra.mrb[64].mxu0 %vm1660_vm4, %v8707_v38 }
0x4d86   :  { %12063 = vmatpush3.bf16.msra.mxu0 %v14092_v45  ;;  %11533 = vmatprep.mubr.msk.f32.mxu0 %vm12931_vm2, %v12932_v60 }
0x4d87   :  { %12064 = vmatprep.subr.bf16.mxu0 %v12930_v59 }
0x4d88   :  { %v8691_v39 = vpop.permute.xlu1 %8690 }
0x4d89   :  { %v8693_v41 = vmul.f32 %v12603_v20, %v8691_v39 }
0x4d8a   :  { %12066 = vmatpush3.bf16.msra.mxu0 %v14104_v17 }
0x4d8b   :  { %8695 = vrot.lane.b32.xlu1 %v8693_v41, %s12934_s23  ;;  %12073 = vmatprep.subr.bf16.mxu0 %v12930_v59 }
0x4dfd   :  { %v8696_v44 = vpop.permute.xlu1 %8695 }
0x4dfe   :  { %v14532_v22 = vadd.f32 %v8696_v44, %v8688_v42  ;;  %v8995_v42 = vld [vmem:[#allocation3 + $0x6] sm:$0x3] }
0x4e00   :  { %12604 = vtanh.f32 %v14532_v22 }
0x4e0a   :  { %v12605_v46 = vpop.eup %12604 }
0x4e0b   :  { %8701 = vrot.lane.b32.xlu1 %v12605_v46, %s12934_s23 }
0x4e58   :  { %v8784_v50 = vpop.f32.mrb[64].mxu0 }
0x4e59   :  { %v8788_v47 = vadd.f32 %v8784_v50, %v8715_v14  ;;  %v11513_v15 = vpop.f32.mrb[65].mxu0 }
0x4e5b   :  { %12606 = vtanh.f32 %v8788_v47  ;;  %v10326_v58 = vmul.f32 -1.442695, %v8788_v47 }
0x4e5d   :  { %12608 = vpow2.f32 %v10326_v58 }
0x4e65   :  { %v12607_v40 = vpop.eup %12606 }
0x4e66   :  { %8872 = vrot.lane.b32.xlu0 %v12607_v40, %s12934_s23 }
0x4e67   :  { %v12609_v53 = vpop.eup %12608 }
0x4e68   :  { %v8866_v63 = vadd.f32 1.0, %v12609_v53 }
0x4e6a   :  { %12610 = vrcp.f32 %v8866_v63 }
0x4e74   :  { %v12611_v2 = vpop.eup %12610 }
0x4e75   :  { %v8870_v3 = vmul.f32 %v12611_v2, %v14516_v21 }
0x4e7d   :  { %v8702_v56 = vpop.permute.xlu1 %8701 }
0x4e7e   :  { %v8704_v49 = vmul.f32 %v12603_v20, %v8702_v56 }
0x4e80   :  { %8711 = vrot.lane.b32.xlu1 %v8704_v49, %s12935_s0 }
0x4ed8   :  { %v8873_v25 = vpop.permute.xlu0 %8872 }
0x4ed9   :  { %v8875_v1 = vmul.f32 %v12611_v2, %v8873_v25 }
0x4edb   :  { %8877 = vrot.lane.b32.xlu0 %v8875_v1, %s12934_s23 }
0x4ef2   :  { %v8712_v34 = vpop.permute.xlu1 %8711 }
0x4ef3   :  { %8714 = vst.msk [vmem:[#allocation5 + $0xa] sm:$0x3] %vm1860_vm3, %v8712_v34  ;;  %11523 = vmatmul.mubr.msk.f32.vlgmr.msra.gmra.mrb[66].mxu1 %vm1660_vm4, %v8712_v34 }
0x4ef4   :  { %12069 = vmatpush3.bf16.msra.mxu1 %v14099_v48  ;;  %11544 = vmatprep.mubr.msk.f32.mxu1 %vm12931_vm2, %v12932_v60 }
0x4ef5   :  { %12070 = vmatprep.subr.bf16.mxu1 %v12930_v59 }
0x4ef8   :  { %12072 = vmatpush3.bf16.msra.mxu1 %v14110_v51 }
0x4ef9   :  { %12079 = vmatprep.subr.bf16.mxu1 %v12930_v59 }
0x4f4d   :  { %v8878_v5 = vpop.permute.xlu0 %8877 }
0x4f4e   :  { %v14548_v6 = vadd.f32 %v8878_v5, %v8870_v3  ;;  %v9127_v3 = vld [vmem:[#allocation2 + $0x1a] sm:$0x3] }
0x4f50   :  { %12612 = vtanh.f32 %v14548_v6 }
0x4f5a   :  { %v12613_v10 = vpop.eup %12612 }
0x4f5b   :  { %8883 = vrot.lane.b32.xlu0 %v12613_v10, %s12934_s23 }
0x4fc6   :  { %v8858_v13 = vpop.f32.mrb[66].mxu1 }
0x4fc7   :  { %v8862_v61 = vadd.f32 %v8858_v13, %v8789_v12  ;;  %v11524_v54 = vpop.f32.mrb[67].mxu1 }
0x4fc9   :  { %12614 = vtanh.f32 %v8862_v61  ;;  %v10327_v19 = vmul.f32 -1.442695, %v8862_v61 }
0x4fcb   :  { %12616 = vpow2.f32 %v10327_v19 }
0x4fcd   :  { %v8884_v62 = vpop.permute.xlu0 %8883 }
0x4fce   :  { %v8886_v9 = vmul.f32 %v12611_v2, %v8884_v62 }
0x4fd0   :  { %8912 = vrot.lane.b32.xlu0 %v8886_v9, %s12935_s0 }
0x4fd3   :  { %v12615_v18 = vpop.eup %12614 }
0x4fd4   :  { %8896 = vrot.lane.b32.xlu1 %v12615_v18, %s12934_s23 }
0x4fd5   :  { %v12617_v55 = vpop.eup %12616 }
0x4fd6   :  { %v8890_v8 = vadd.f32 1.0, %v12617_v55 }
0x4fd8   :  { %12618 = vrcp.f32 %v8890_v8 }
0x4fe2   :  { %v12619_v11 = vpop.eup %12618 }
0x4fe3   :  { %v8894_v0 = vmul.f32 %v12619_v11, %v14532_v22 }
0x5042   :  { %v8913_v52 = vpop.permute.xlu0 %8912 }
0x5043   :  { %8915 = vst.msk [vmem:[#allocation4 + $0x16] sm:$0x3] %vm1860_vm3, %v8913_v52  ;;  %11534 = vmatmul.mubr.msk.f32.vlgmr.msra.gmra.mrb[66].mxu0 %vm1660_vm4, %v8913_v52 }
0x5044   :  { %12075 = vmatpush3.bf16.msra.mxu0 %v14092_v45  ;;  %11555 = vmatprep.mubr.msk.f32.mxu0 %vm12931_vm2, %v12932_v60 }
0x5045   :  { %12076 = vmatprep.subr.bf16.mxu0 %v12930_v59 }
0x5046   :  { %v8897_v24 = vpop.permute.xlu1 %8896 }
0x5047   :  { %v8899_v26 = vmul.f32 %v12619_v11, %v8897_v24 }
0x5048   :  { %12078 = vmatpush3.bf16.msra.mxu0 %v14104_v17 }
0x5049   :  { %8901 = vrot.lane.b32.xlu1 %v8899_v26, %s12934_s23  ;;  %12085 = vmatprep.subr.bf16.mxu0 %v12930_v59 }
0x50bb   :  { %v8902_v23 = vpop.permute.xlu1 %8901 }
0x50bc   :  { %v14564_v27 = vadd.f32 %v8902_v23, %v8894_v0  ;;  %v9201_v0 = vld [vmem:[#allocation3 + $0x4] sm:$0x3] }
0x50be   :  { %12620 = vtanh.f32 %v14564_v27 }
0x50c8   :  { %v12621_v28 = vpop.eup %12620 }
0x50c9   :  { %8907 = vrot.lane.b32.xlu1 %v12621_v28, %s12934_s23 }
0x5116   :  { %v8990_v30 = vpop.f32.mrb[66].mxu0 }
0x5117   :  { %v8994_v21 = vadd.f32 %v8990_v30, %v8921_v29  ;;  %v11535_v4 = vpop.f32.mrb[67].mxu0 }
0x5119   :  { %12622 = vtanh.f32 %v8994_v21  ;;  %v10330_v32 = vmul.f32 -1.442695, %v8994_v21 }
0x511b   :  { %12624 = vpow2.f32 %v10330_v32 }
0x5123   :  { %v12623_v31 = vpop.eup %12622 }
0x5124   :  { %9078 = vrot.lane.b32.xlu0 %v12623_v31, %s12934_s23 }
0x5125   :  { %v12625_v57 = vpop.eup %12624 }
0x5126   :  { %v9072_v33 = vadd.f32 1.0, %v12625_v57 }
0x5128   :  { %12626 = vrcp.f32 %v9072_v33 }
0x5132   :  { %v12627_v16 = vpop.eup %12626 }
0x5133   :  { %v9076_v38 = vmul.f32 %v12627_v16, %v14548_v6 }
0x513b   :  { %v8908_v7 = vpop.permute.xlu1 %8907 }
0x513c   :  { %v8910_v43 = vmul.f32 %v12619_v11, %v8908_v7 }
0x513e   :  { %8917 = vrot.lane.b32.xlu1 %v8910_v43, %s12935_s0 }
0x5196   :  { %v9079_v35 = vpop.permute.xlu0 %9078 }
0x5197   :  { %v9081_v36 = vmul.f32 %v12627_v16, %v9079_v35 }
0x5199   :  { %9083 = vrot.lane.b32.xlu0 %v9081_v36, %s12934_s23 }
0x51b0   :  { %v8918_v37 = vpop.permute.xlu1 %8917 }
0x51b1   :  { %8920 = vst.msk [vmem:[#allocation5 + $0x8] sm:$0x3] %vm1860_vm3, %v8918_v37  ;;  %11545 = vmatmul.mubr.msk.f32.vlgmr.msra.gmra.mrb[68].mxu1 %vm1660_vm4, %v8918_v37  ;;  %v9333_v37 = vld [vmem:[#allocation2 + $0x1c] sm:$0x3] }
0x51b2   :  { %12081 = vmatpush3.bf16.msra.mxu1 %v14099_v48  ;;  %11566 = vmatprep.mubr.msk.f32.mxu1 %vm12931_vm2, %v12932_v60 }
0x51b3   :  { %12082 = vmatprep.subr.bf16.mxu1 %v12930_v59 }
0x51b6   :  { %12084 = vmatpush3.bf16.msra.mxu1 %v14110_v51 }
0x51b7   :  { %12091 = vmatprep.subr.bf16.mxu1 %v12930_v59 }
0x520b   :  { %v9084_v20 = vpop.permute.xlu0 %9083 }
0x520c   :  { %v14580_v39 = vadd.f32 %v9084_v20, %v9076_v38 }
0x520e   :  { %12628 = vtanh.f32 %v14580_v39 }
0x5218   :  { %v12629_v41 = vpop.eup %12628 }
0x5219   :  { %9089 = vrot.lane.b32.xlu0 %v12629_v41, %s12934_s23 }
0x5284   :  { %v9064_v44 = vpop.f32.mrb[68].mxu1 }
0x5285   :  { %v9068_v22 = vadd.f32 %v9064_v44, %v8995_v42  ;;  %v11546_v46 = vpop.f32.mrb[69].mxu1 }
0x5287   :  { %12630 = vtanh.f32 %v9068_v22  ;;  %v10331_v15 = vmul.f32 -1.442695, %v9068_v22 }
0x5289   :  { %12632 = vpow2.f32 %v10331_v15 }
0x528b   :  { %v9090_v14 = vpop.permute.xlu0 %9089 }
0x528c   :  { %v9092_v50 = vmul.f32 %v12627_v16, %v9090_v14 }
0x528e   :  { %9118 = vrot.lane.b32.xlu0 %v9092_v50, %s12935_s0 }
0x5291   :  { %v12631_v47 = vpop.eup %12630 }
0x5292   :  { %9102 = vrot.lane.b32.xlu1 %v12631_v47, %s12934_s23 }
0x5293   :  { %v12633_v40 = vpop.eup %12632 }
0x5294   :  { %v9096_v56 = vadd.f32 1.0, %v12633_v40 }
0x5296   :  { %12634 = vrcp.f32 %v9096_v56 }
0x52a0   :  { %v12635_v58 = vpop.eup %12634 }
0x52a1   :  { %v9100_v2 = vmul.f32 %v12635_v58, %v14564_v27 }
0x5300   :  { %v9119_v49 = vpop.permute.xlu0 %9118 }
0x5301   :  { %9121 = vst.msk [vmem:[#allocation4 + $0x18] sm:$0x3] %vm1860_vm3, %v9119_v49  ;;  %11556 = vmatmul.mubr.msk.f32.vlgmr.msra.gmra.mrb[68].mxu0 %vm1660_vm4, %v9119_v49 }
0x5302   :  { %12087 = vmatpush3.bf16.msra.mxu0 %v14092_v45  ;;  %11577 = vmatprep.mubr.msk.f32.mxu0 %vm12931_vm2, %v12932_v60 }
0x5303   :  { %12088 = vmatprep.subr.bf16.mxu0 %v12930_v59 }
0x5304   :  { %v9103_v53 = vpop.permute.xlu1 %9102 }
0x5305   :  { %v9105_v63 = vmul.f32 %v12635_v58, %v9103_v53 }
0x5306   :  { %12090 = vmatpush3.bf16.msra.mxu0 %v14104_v17 }
0x5307   :  { %9107 = vrot.lane.b32.xlu1 %v9105_v63, %s12934_s23  ;;  %12097 = vmatprep.subr.bf16.mxu0 %v12930_v59 }
0x5379   :  { %v9108_v25 = vpop.permute.xlu1 %9107 }
0x537a   :  { %v14596_v1 = vadd.f32 %v9108_v25, %v9100_v2 }
0x537c   :  { %12636 = vtanh.f32 %v14596_v1 }
0x5386   :  { %v12637_v34 = vpop.eup %12636 }
0x5387   :  { %9113 = vrot.lane.b32.xlu1 %v12637_v34, %s12934_s23 }
0x53d4   :  { %v9196_v5 = vpop.f32.mrb[68].mxu0 }
0x53d5   :  { %v9200_v6 = vadd.f32 %v9196_v5, %v9127_v3  ;;  %v11557_v10 = vpop.f32.mrb[69].mxu0 }
0x53d6   :  { %v9754_v10 = vld [vmem:[%s14771_s15 + $0x28] sm:$0xff] }
0x53d7   :  { %12638 = vtanh.f32 %v9200_v6  ;;  %v10334_v54 = vmul.f32 -1.442695, %v9200_v6  ;;  %v9753_v6 = vld [vmem:[%s14771_s15 + $0x20] sm:$0xff] }
0x53d9   :  { %12640 = vpow2.f32 %v10334_v54 }
0x53e1   :  { %v12639_v12 = vpop.eup %12638 }
0x53e2   :  { %9284 = vrot.lane.b32.xlu0 %v12639_v12, %s12934_s23  ;;  %v12110_v12 = vpack.c.bf16 %v9754_v10, %v9753_v6 }
0x53e3   :  { %v12641_v62 = vpop.eup %12640 }
0x53e4   :  { %v9278_v9 = vadd.f32 1.0, %v12641_v62 }
0x53e6   :  { %12642 = vrcp.f32 %v9278_v9 }
0x53f0   :  { %v12643_v18 = vpop.eup %12642 }
0x53f1   :  { %v9282_v52 = vmul.f32 %v12643_v18, %v14580_v39 }
0x53f9   :  { %v9114_v13 = vpop.permute.xlu1 %9113 }
0x53fa   :  { %v9116_v61 = vmul.f32 %v12635_v58, %v9114_v13  ;;  %v9755_v13 = vld [vmem:[%s14771_s15 + $0x30] sm:$0xff] }
0x53fc   :  { %9123 = vrot.lane.b32.xlu1 %v9116_v61, %s12935_s0  ;;  %v9756_v61 = vld [vmem:[%s14771_s15 + $0x38] sm:$0xff] }
0x53fd   :  { %v12113_v62 = vpack.c.bf16 %v9756_v61, %v9755_v13  ;;  %v9917_v13 = vld [vmem:[%s14773_s17 + $0x28] sm:$0xff] }
0x5454   :  { %v9285_v19 = vpop.permute.xlu0 %9284 }
0x5455   :  { %v9287_v55 = vmul.f32 %v12643_v18, %v9285_v19  ;;  %v9747_v19 = vld [vmem:[#allocation5 + $0x1e] sm:$0x3] }
0x5457   :  { %9289 = vrot.lane.b32.xlu0 %v9287_v55, %s12934_s23 }
0x546e   :  { %v9124_v8 = vpop.permute.xlu1 %9123 }
0x546f   :  { %9126 = vst.msk [vmem:[#allocation5 + $0x6] sm:$0x3] %vm1860_vm3, %v9124_v8  ;;  %11567 = vmatmul.mubr.msk.f32.vlgmr.msra.gmra.mrb[70].mxu1 %vm1660_vm4, %v9124_v8  ;;  %v9748_v8 = vmax.f32 %v9747_v19, 0.0 }
0x5470   :  { %12093 = vmatpush3.bf16.msra.mxu1 %v14099_v48  ;;  %11588 = vmatprep.mubr.msk.f32.mxu1 %vm12931_vm2, %v12932_v60 }
0x5471   :  { %12094 = vmatprep.subr.bf16.mxu1 %v12930_v59 }
0x5474   :  { %12096 = vmatpush3.bf16.msra.mxu1 %v14110_v51 }
0x5475   :  { %12103 = vmatprep.subr.bf16.mxu1 %v12930_v59 }
0x54c9   :  { %v9290_v11 = vpop.permute.xlu0 %9289 }
0x54ca   :  { %v14612_v24 = vadd.f32 %v9290_v11, %v9282_v52 }
0x54cc   :  { %12644 = vtanh.f32 %v14612_v24 }
0x54d6   :  { %v12645_v26 = vpop.eup %12644 }
0x54d7   :  { %9295 = vrot.lane.b32.xlu0 %v12645_v26, %s12934_s23 }
0x5542   :  { %v9270_v23 = vpop.f32.mrb[70].mxu1 }
0x5543   :  { %v9274_v27 = vadd.f32 %v9270_v23, %v9201_v0  ;;  %v11568_v28 = vpop.f32.mrb[71].mxu1  ;;  %v9539_v0 = vld [vmem:[#allocation2 + $0x1e] sm:$0x3] }
0x5545   :  { %12646 = vtanh.f32 %v9274_v27  ;;  %v10335_v4 = vmul.f32 -1.442695, %v9274_v27 }
0x5547   :  { %12648 = vpow2.f32 %v10335_v4 }
0x5549   :  { %v9296_v29 = vpop.permute.xlu0 %9295 }
0x554a   :  { %v9298_v30 = vmul.f32 %v12643_v18, %v9296_v29 }
0x554c   :  { %9324 = vrot.lane.b32.xlu0 %v9298_v30, %s12935_s0 }
0x554f   :  { %v12647_v21 = vpop.eup %12646 }
0x5550   :  { %9308 = vrot.lane.b32.xlu1 %v12647_v21, %s12934_s23 }
0x5551   :  { %v12649_v31 = vpop.eup %12648 }
0x5552   :  { %v9302_v7 = vadd.f32 1.0, %v12649_v31 }
0x5554   :  { %12650 = vrcp.f32 %v9302_v7 }
0x555e   :  { %v12651_v32 = vpop.eup %12650 }
0x555f   :  { %v9306_v16 = vmul.f32 %v12651_v32, %v14596_v1 }
0x55be   :  { %v9325_v43 = vpop.permute.xlu0 %9324 }
0x55bf   :  { %9327 = vst.msk [vmem:[#allocation4 + $0x1a] sm:$0x3] %vm1860_vm3, %v9325_v43  ;;  %11578 = vmatmul.mubr.msk.f32.vlgmr.msra.gmra.mrb[70].mxu0 %vm1660_vm4, %v9325_v43 }
0x55c0   :  { %12099 = vmatpush3.bf16.msra.mxu0 %v14092_v45  ;;  %11599 = vmatprep.mubr.msk.f32.mxu0 %vm12931_vm2, %v12932_v60 }
0x55c1   :  { %12100 = vmatprep.subr.bf16.mxu0 %v12930_v59 }
0x55c2   :  { %v9309_v57 = vpop.permute.xlu1 %9308 }
0x55c3   :  { %v9311_v33 = vmul.f32 %v12651_v32, %v9309_v57 }
0x55c4   :  { %12102 = vmatpush3.bf16.msra.mxu0 %v14104_v17 }
0x55c5   :  { %9313 = vrot.lane.b32.xlu1 %v9311_v33, %s12934_s23  ;;  %12109 = vmatprep.subr.bf16.mxu0 %v12930_v59 }
0x5637   :  { %v9314_v35 = vpop.permute.xlu1 %9313 }
0x5638   :  { %v14628_v36 = vadd.f32 %v9314_v35, %v9306_v16 }
0x563a   :  { %12652 = vtanh.f32 %v14628_v36 }
0x5644   :  { %v12653_v45 = vpop.eup %12652 }
0x5645   :  { %9319 = vrot.lane.b32.xlu1 %v12653_v45, %s12934_s23 }
0x5692   :  { %v9402_v38 = vpop.f32.mrb[70].mxu0 }
0x5693   :  { %v9406_v20 = vadd.f32 %v9402_v38, %v9333_v37  ;;  %v11579_v39 = vpop.f32.mrb[71].mxu0 }
0x5694   :  { %v9750_v39 = vld [vmem:[%s14771_s15 + $0x8] sm:$0xff] }
0x5695   :  { %12654 = vtanh.f32 %v9406_v20  ;;  %v10338_v44 = vmul.f32 -1.442695, %v9406_v20  ;;  %v9749_v20 = vld [vmem:[%s14771_s15] sm:$0xff] }
0x5697   :  { %12656 = vpow2.f32 %v10338_v44 }
0x569f   :  { %v12655_v17 = vpop.eup %12654 }
0x56a0   :  { %9490 = vrot.lane.b32.xlu0 %v12655_v17, %s12934_s23  ;;  %v12116_v17 = vpack.c.bf16 %v9750_v39, %v9749_v20 }
0x56a1   :  { %v12657_v22 = vpop.eup %12656 }
0x56a2   :  { %v9484_v46 = vadd.f32 1.0, %v12657_v22 }
0x56a4   :  { %12658 = vrcp.f32 %v9484_v46  ;;  %v9751_v46 = vld [vmem:[%s14771_s15 + $0x10] sm:$0xff] }
0x56ae   :  { %v12659_v14 = vpop.eup %12658 }
0x56af   :  { %v9488_v40 = vmul.f32 %v12659_v14, %v14612_v24 }
0x56b7   :  { %v9320_v41 = vpop.permute.xlu1 %9319 }
0x56b8   :  { %v9322_v42 = vmul.f32 %v12651_v32, %v9320_v41  ;;  %v9613_v41 = vld [vmem:[#allocation3] sm:$0x3] }
0x56ba   :  { %9329 = vrot.lane.b32.xlu1 %v9322_v42, %s12935_s0 }
0x5712   :  { %v9491_v50 = vpop.permute.xlu0 %9490 }
0x5713   :  { %v9493_v47 = vmul.f32 %v12659_v14, %v9491_v50 }
0x5715   :  { %9495 = vrot.lane.b32.xlu0 %v9493_v47, %s12934_s23 }
0x572c   :  { %v9330_v15 = vpop.permute.xlu1 %9329 }
0x572d   :  { %9332 = vst.msk [vmem:[#allocation5 + $0x4] sm:$0x3] %vm1860_vm3, %v9330_v15  ;;  %11589 = vmatmul.mubr.msk.f32.vlgmr.msra.gmra.mrb[72].mxu1 %vm1660_vm4, %v9330_v15 }
0x572e   :  { %12105 = vmatpush3.bf16.msra.mxu1 %v14099_v48  ;;  %11610 = vmatprep.mubr.msk.f32.mxu1 %vm12931_vm2, %v12932_v60  ;;  %v9407_v48 = vld [vmem:[#allocation3 + $0x2] sm:$0x3] }
0x572f   :  { %12106 = vmatprep.subr.bf16.mxu1 %v12930_v59 }
0x5732   :  { %12108 = vmatpush3.bf16.msra.mxu1 %v14110_v51 }
0x5733   :  { %12115 = vmatprep.subr.bf16.mxu1 %v12930_v59 }
0x5787   :  { %v9496_v56 = vpop.permute.xlu0 %9495 }
0x5788   :  { %v14644_v49 = vadd.f32 %v9496_v56, %v9488_v40 }
0x578a   :  { %12660 = vtanh.f32 %v14644_v49 }
0x5794   :  { %v12661_v58 = vpop.eup %12660 }
0x5795   :  { %9501 = vrot.lane.b32.xlu0 %v12661_v58, %s12934_s23 }
0x5800   :  { %v9476_v53 = vpop.f32.mrb[72].mxu1 }
0x5801   :  { %v9480_v63 = vadd.f32 %v9476_v53, %v9407_v48  ;;  %v11590_v2 = vpop.f32.mrb[73].mxu1 }
0x5803   :  { %12662 = vtanh.f32 %v9480_v63  ;;  %v10339_v34 = vmul.f32 -1.442695, %v9480_v63 }
0x5805   :  { %12664 = vpow2.f32 %v10339_v34 }
0x5807   :  { %v9502_v25 = vpop.permute.xlu0 %9501 }
0x5808   :  { %v9504_v1 = vmul.f32 %v12659_v14, %v9502_v25  ;;  %v9752_v14 = vld [vmem:[%s14771_s15 + $0x18] sm:$0xff]  ;;  %v9912_v25 = vld [vmem:[%s14773_s17] sm:$0xff] }
0x5809   :  { %v12119_v50 = vpack.c.bf16 %v9752_v14, %v9751_v46 }
0x580a   :  { %9530 = vrot.lane.b32.xlu0 %v9504_v1, %s12935_s0  ;;  %v9913_v1 = vld [vmem:[%s14773_s17 + $0x8] sm:$0xff] }
0x580d   :  { %v12663_v51 = vpop.eup %12662 }
0x580e   :  { %9514 = vrot.lane.b32.xlu1 %v12663_v51, %s12934_s23  ;;  %v9914_v51 = vld [vmem:[%s14773_s17 + $0x10] sm:$0xff] }
0x580f   :  { %v12665_v3 = vpop.eup %12664 }
0x5810   :  { %v9508_v5 = vadd.f32 1.0, %v12665_v3  ;;  %v12122_v3 = vpack.c.bf16 %v9913_v1, %v9912_v25 }
0x5812   :  { %12666 = vrcp.f32 %v9508_v5  ;;  %v9915_v5 = vld [vmem:[%s14773_s17 + $0x18] sm:$0xff] }
0x5813   :  { %v12125_v10 = vpack.c.bf16 %v9915_v5, %v9914_v51 }
0x581c   :  { %v12667_v9 = vpop.eup %12666 }
0x581d   :  { %v9512_v52 = vmul.f32 %v12667_v9, %v14628_v36 }
0x587c   :  { %v9531_v54 = vpop.permute.xlu0 %9530 }
0x587d   :  { %9533 = vst.msk [vmem:[#allocation4 + $0x1c] sm:$0x3] %vm1860_vm3, %v9531_v54  ;;  %11600 = vmatmul.mubr.msk.f32.vlgmr.msra.gmra.mrb[72].mxu0 %vm1660_vm4, %v9531_v54  ;;  %v9918_v54 = vld [vmem:[%s14773_s17 + $0x30] sm:$0xff] }
0x587e   :  { %12111 = vmatpush3.bf16.msra.mxu0 %v12110_v12  ;;  %11621 = vmatprep.mubr.msk.f32.mxu0 %vm12931_vm2, %v12932_v60  ;;  %v9916_v12 = vld [vmem:[%s14773_s17 + $0x20] sm:$0xff] }
0x587f   :  { %12112 = vmatprep.subr.bf16.mxu0 %v12930_v59  ;;  %v12128_v61 = vpack.c.bf16 %v9917_v13, %v9916_v12 }
0x5880   :  { %v9515_v18 = vpop.permute.xlu1 %9514 }
0x5881   :  { %v9517_v55 = vmul.f32 %v12667_v9, %v9515_v18 }
0x5882   :  { %12114 = vmatpush3.bf16.msra.mxu0 %v12113_v62 }
0x5883   :  { %9519 = vrot.lane.b32.xlu1 %v9517_v55, %s12934_s23  ;;  %12121 = vmatprep.subr.bf16.mxu0 %v12930_v59 }
0x5885   :  { %11622 = vmatmul.mubr.msk.f32.vlgmr.msra.gmra.mrb[74].mxu0 %vm1660_vm4, %v9748_v8 }
0x5886   :  { %11651 = vmatprep.mubr.msk.f32.mxu0 %vm12931_vm2, %v12932_v60  ;;  %12123 = vmatpush3.bf16.msra.mxu0 %v12122_v3 }
0x5887   :  { %12124 = vmatprep.subr.bf16.mxu0 %v12930_v59 }
0x588a   :  { %12126 = vmatpush3.bf16.msra.mxu0 %v12125_v10 }
0x588b   :  { %12127 = vmatprep.subr.bf16.mxu0 %v12930_v59 }
0x588e   :  { %12129 = vmatpush3.bf16.msra.mxu0 %v12128_v61 }
0x588f   :  { %12130 = vmatprep.subr.bf16.mxu0 %v12930_v59 }
0x58f5   :  { %v9520_v11 = vpop.permute.xlu1 %9519 }
0x58f6   :  { %v14673_v24 = vadd.f32 %v9520_v11, %v9512_v52  ;;  %v10346_v52 = vld [vmem:[%s14772_s16] ss:$0 sm:$0xff] }
0x58f8   :  { %12668 = vtanh.f32 %v14673_v24 }
0x5902   :  { %v12669_v26 = vpop.eup %12668 }
0x5903   :  { %9525 = vrot.lane.b32.xlu1 %v12669_v26, %s12934_s23 }
0x5950   :  { %v9608_v23 = vpop.f32.mrb[72].mxu0 }
0x5951   :  { %v9612_v27 = vadd.f32 %v9608_v23, %v9539_v0  ;;  %v11601_v28 = vpop.f32.mrb[73].mxu0 }
0x5952   :  { %v10003_v28 = vld [vmem:[%s14775_s19 + $0x8] sm:$0xff] }
0x5953   :  { %12670 = vtanh.f32 %v9612_v27  ;;  %v10342_v7 = vmul.f32 -1.442695, %v9612_v27  ;;  %v10002_v27 = vld [vmem:[%s14775_s19] sm:$0xff] }
0x5955   :  { %12672 = vpow2.f32 %v10342_v7 }
0x5958   :  { %v14677_v29 = vpop.f32.mrb[74].mxu0 }
0x5959   :  { %v11623_v30 = vpop.f32.mrb[75].mxu0 }
0x595a   :  { %v12134_v30 = vpack.c.bf16 %v10003_v28, %v10002_v27 }
0x595d   :  { %v12671_v21 = vpop.eup %12670 }
0x595e   :  { %9696 = vrot.lane.b32.xlu0 %v12671_v21, %s12934_s23  ;;  %v10347_v21 = vld [vmem:[%s14774_s18] ss:$0 sm:$0xff] }
0x595f   :  { %v12673_v43 = vpop.eup %12672 }
0x5960   :  { %v9690_v32 = vadd.f32 1.0, %v12673_v43 }
0x5962   :  { %12674 = vrcp.f32 %v9690_v32  ;;  %v10349_v32 = vld [vmem:[#allocation6] ss:$0 sm:$0xff] }
0x596c   :  { %v12675_v57 = vpop.eup %12674 }
0x596d   :  { %v9694_v36 = vmul.f32 %v12675_v57, %v14644_v49 }
0x5975   :  { %v9526_v4 = vpop.permute.xlu1 %9525 }
0x5976   :  { %v9528_v31 = vmul.f32 %v12667_v9, %v9526_v4 }
0x5978   :  { %9535 = vrot.lane.b32.xlu1 %v9528_v31, %s12935_s0 }
0x59d0   :  { %v9697_v33 = vpop.permute.xlu0 %9696 }
0x59d1   :  { %v9699_v16 = vmul.f32 %v12675_v57, %v9697_v33 }
0x59d3   :  { %9701 = vrot.lane.b32.xlu0 %v9699_v16, %s12934_s23 }
0x59ea   :  { %v9536_v35 = vpop.permute.xlu1 %9535 }
0x59eb   :  { %9538 = vst.msk [vmem:[#allocation5 + $0x2] sm:$0x3] %vm1860_vm3, %v9536_v35  ;;  %11611 = vmatmul.mubr.msk.f32.vlgmr.msra.gmra.mrb[74].mxu1 %vm1660_vm4, %v9536_v35 }
0x59ec   :  { %11632 = vmatprep.mubr.msk.f32.mxu1 %vm12931_vm2, %v12932_v60  ;;  %12117 = vmatpush3.bf16.msra.mxu1 %v12116_v17 }
0x59ed   :  { %12118 = vmatprep.subr.bf16.mxu1 %v12930_v59 }
0x59f0   :  { %12120 = vmatpush3.bf16.msra.mxu1 %v12119_v50 }
0x59f1   :  { %12133 = vmatprep.subr.bf16.mxu1 %v12930_v59 }
0x5a45   :  { %v9702_v45 = vpop.permute.xlu0 %9701 }
0x5a46   :  { %v9704_v37 = vadd.f32 %v9702_v45, %v9694_v36 }
0x5a48   :  { %12676 = vtanh.f32 %v9704_v37 }
0x5a52   :  { %v12677_v38 = vpop.eup %12676 }
0x5a53   :  { %9707 = vrot.lane.b32.xlu0 %v12677_v38, %s12934_s23 }
0x5abe   :  { %v9682_v42 = vpop.f32.mrb[74].mxu1 }
0x5abf   :  { %v9686_v44 = vadd.f32 %v9682_v42, %v9613_v41  ;;  %v11612_v22 = vpop.f32.mrb[75].mxu1 }
0x5ac1   :  { %12678 = vtanh.f32 %v9686_v44  ;;  %v10343_v56 = vmul.f32 -1.442695, %v9686_v44 }
0x5ac3   :  { %12680 = vpow2.f32 %v10343_v56 }
0x5ac5   :  { %v9708_v47 = vpop.permute.xlu0 %9707 }
0x5ac6   :  { %v9710_v15 = vmul.f32 %v12675_v57, %v9708_v47 }
0x5ac8   :  { %9736 = vrot.lane.b32.xlu0 %v9710_v15, %s12935_s0 }
0x5acb   :  { %v12679_v40 = vpop.eup %12678 }
0x5acc   :  { %9720 = vrot.lane.b32.xlu0 %v12679_v40, %s12934_s23 }
0x5acd   :  { %v12681_v49 = vpop.eup %12680 }
0x5ace   :  { %v9714_v58 = vadd.f32 1.0, %v12681_v49 }
0x5ad0   :  { %12682 = vrcp.f32 %v9714_v58 }
0x5ada   :  { %v12683_v53 = vpop.eup %12682 }
0x5adb   :  { %v9718_v9 = vmul.f32 %v12683_v53, %v14673_v24 }
0x5b3a   :  { %v9737_v48 = vpop.permute.xlu0 %9736 }
0x5b3b   :  { %9739 = vst.msk [vmem:[#allocation4 + $0x1e] sm:$0x3] %vm1860_vm3, %v9737_v48 }
0x5b3e   :  { %v9721_v63 = vpop.permute.xlu0 %9720 }
0x5b3f   :  { %v9723_v2 = vmul.f32 %v12683_v53, %v9721_v63 }
0x5b41   :  { %9725 = vrot.lane.b32.xlu1 %v9723_v2, %s12934_s23 }
0x5b42   :  { %v9745_v34 = vld [vmem:[#allocation4 + $0x1e] sm:$0x3] }
0x5b43   :  { %v9746_v6 = vmax.f32 %v9745_v34, 0.0 }
0x5b45   :  { %11633 = vmatmul.mubr.msk.f32.vlgmr.msra.gmra.mrb[76].mxu1 %vm1660_vm4, %v9746_v6 }
0x5b46   :  { %11658 = vmatprep.mubr.msk.f32.mxu1 %vm12931_vm2, %v12932_v60  ;;  %v9919_v60 = vld [vmem:[%s14773_s17 + $0x38] sm:$0xff]  ;;  %12135 = vmatpush3.bf16.msra.mxu1 %v12134_v30 }
0x5b47   :  { %v12131_v62 = vpack.c.bf16 %v9919_v60, %v9918_v54 }
0x5b49   :  { %12132 = vmatpush3.bf16.msra.mxu0 %v12131_v62 }
0x5bb3   :  { %v9726_v18 = vpop.permute.xlu1 %9725 }
0x5bb4   :  { %v9728_v19 = vadd.f32 %v9726_v18, %v9718_v9 }
0x5bb6   :  { %12684 = vtanh.f32 %v9728_v19 }
0x5bc0   :  { %v12685_v55 = vpop.eup %12684 }
0x5bc1   :  { %9731 = vrot.lane.b32.xlu0 %v12685_v55, %s12934_s23 }
0x5c18   :  { %v9899_v8 = vpop.f32.mrb[76].mxu1 }
0x5c19   :  { %v9900_v11 = vadd.f32 %v9899_v8, %v14677_v29  ;;  %v11634_v26 = vpop.f32.mrb[77].mxu1 }
0x5c1b   :  { %v9910_v0 = vadd.f32 %v10346_v52, %v9900_v11 }
0x5c1d   :  { %v9911_v59 = vmax.f32 %v9910_v0, 0.0 }
0x5c1f   :  { %11652 = vmatmul.mubr.msk.f32.vlgmr.msra.gmra.mrb[76].mxu0 %vm9927_vm12, %v9911_v59 }
0x5c33   :  { %v9732_v23 = vpop.permute.xlu0 %9731 }
0x5c34   :  { %v9734_v24 = vmul.f32 %v12683_v53, %v9732_v23 }
0x5c36   :  { %9741 = vrot.lane.b32.xlu1 %v9734_v24, %s12935_s0 }
0x5ca8   :  { %v9742_v29 = vpop.permute.xlu1 %9741 }
0x5ca9   :  { %9744 = vst.msk [vmem:[#allocation5] sm:$0x3] %vm1860_vm3, %v9742_v29 }
0x5cf2   :  { %v9997_v4 = vpop.f32.mrb[76].mxu0 }
0x5cf3   :  { %v9998_v31 = vadd.f32 %v10347_v21, %v9997_v4  ;;  %v11653_v7 = vpop.f32.mrb[77].mxu0 }
0x5cf5   :  { %v10001_v43 = vmax.f32 %v9998_v31, 0.0 }
0x5cf7   :  { %11659 = vmatmul.mubr.msk.f32.vlgmr.msra.gmra.mrb[78].mxu1 %vm10011_vm13, %v10001_v43 }
0x5dca   :  { %v10081_v57 = vpop.f32.mrb[78].mxu1 }
0x5dcb   :  { %v10082_v33 = vadd.f32 %v10349_v32, %v10081_v57  ;;  %v11660_v16 = vpop.f32.mrb[79].mxu1 }
0x5dcd   :  { %10086 = vst.msk [vmem:[%s14777_s21] sm:$0x3] %vm10085_vm14, %v10082_v33 }
0x5dce   :  { %10091 = vsyncpa [#allocation8], 1 }
0x5dcf   :  { %10092 = vsyncpa [#allocation10], 1 }
0x5dd0   :  { %10093 = vsyncpa [#allocation13], 1 }
0x5dd1   :  { %10094 = vsyncpa [#allocation16], 1 }
0x5dd2   :  { %10095 = vsyncpa [#allocation19], 1 }
0x5dd3   :  { %10096 = vsyncpa [#allocation22], 1 }

</bundles_post_ra>
